<compile_context>
chip_gen: v5e
topology: v5e:2x2
jax: 0.10.0
libtpu: 0.0.40
codegen_flags: <defaults>
</compile_context>

<pallas_src>
import functools

import jax
import jax.numpy as jnp
from jax import lax
from jax.experimental import pallas as pl
from jax.experimental.pallas import tpu as pltpu

FEAT_D = 8          # opt.feat_D (synthetic, small)
LRELU_SLOPE = 0.2
IN_EPS = 1e-5       # PyTorch InstanceNorm2d default eps
C_PAD = 128         # lane-dense padded output-channel count


# ---------------------------------------------------------------------------
# Fused conv GEMM kernel: per-image (HW, K) @ (K, 128) + bias, with fused
# prologue / epilogue activations.
# ---------------------------------------------------------------------------
def _conv_kernel(a_ref, w_ref, b_ref, o_ref, *, prologue, epilogue):
    # a: (1, HW, K) bf16, w: (K, 128) bf16, b: (1, 128) f32, o: (1, HW, 128) f32
    a = a_ref[0]
    if prologue == "tanh":
        # nn.Tanh() on the input, fused: identical values, just gathered by im2col.
        a = jnp.tanh(a.astype(jnp.float32)).astype(jnp.bfloat16)
    acc = jnp.dot(a, w_ref[...], preferred_element_type=jnp.float32)
    acc = acc + b_ref[...]                                   # (HW, 128) f32
    if epilogue == "in_lrelu":
        # InstanceNorm2d (no affine, biased variance) over H*W, per channel,
        # then LeakyReLU(0.2).  Zero-padded channels stay exactly zero.
        mean = jnp.mean(acc, axis=0, keepdims=True)
        xc = acc - mean
        var = jnp.mean(xc * xc, axis=0, keepdims=True)
        acc = xc * lax.rsqrt(var + IN_EPS)
        acc = jnp.where(acc >= 0, acc, LRELU_SLOPE * acc)
    elif epilogue == "lrelu":
        acc = jnp.where(acc >= 0, acc, LRELU_SLOPE * acc)
    elif epilogue == "sigmoid":
        acc = jax.nn.sigmoid(acc)
    o_ref[...] = acc[None].astype(o_ref.dtype)


def conv_layer(x, w, b, *, stride, prologue="none", epilogue="none"):
    """Conv2d(k=4, pad=1, stride) + fused activation / InstanceNorm.

    x: (N, H, W, Cin) f32 NHWC; w: (4, 4, Cin, Cout) f32; b: (Cout,) f32.
    Returns (N, Ho, Wo, Cout) f32.
    """
    N, H, W, Cin = x.shape
    kh, kw, _, Cout = w.shape
    pad = 1
    Ho = (H + 2 * pad - kh) // stride + 1
    Wo = (W + 2 * pad - kw) // stride + 1
    HWo = Ho * Wo
    K = kh * kw * Cin

    # im2col in bf16 (halves the patch blow-up / GEMM DMA bytes).
    xp = jnp.pad(x.astype(jnp.bfloat16), ((0, 0), (pad, pad), (pad, pad), (0, 0)))
    cols = []
    for i in range(kh):
        for j in range(kw):
            cols.append(xp[:, i:i + stride * Ho:stride,
                            j:j + stride * Wo:stride, :])
    # rows ordered (kh, kw, Cin), matching w.reshape(K, Cout)
    A = jnp.stack(cols, axis=3).reshape(N, HWo, K)

    # Zero-pad output channels (and bias) to a lane-dense 128.
    Wm = jnp.zeros((K, C_PAD), jnp.bfloat16)
    Wm = Wm.at[:, :Cout].set(w.reshape(K, Cout).astype(jnp.bfloat16))
    bm = jnp.zeros((1, C_PAD), jnp.float32).at[0, :Cout].set(b)

    out = pl.pallas_call(
        functools.partial(_conv_kernel, prologue=prologue, epilogue=epilogue),
        out_shape=jax.ShapeDtypeStruct((N, HWo, C_PAD), jnp.float32),
        grid_spec=pltpu.PrefetchScalarGridSpec(
            num_scalar_prefetch=0,
            grid=(N,),
            in_specs=[
                pl.BlockSpec((1, HWo, K), lambda n: (n, 0, 0)),
                pl.BlockSpec((K, C_PAD), lambda n: (0, 0)),
                pl.BlockSpec((1, C_PAD), lambda n: (0, 0)),
            ],
            out_specs=pl.BlockSpec((1, HWo, C_PAD), lambda n: (n, 0, 0)),
        ),
        compiler_params=pltpu.CompilerParams(
            dimension_semantics=("parallel",)),
    )(A, Wm, bm)
    return out[:, :, :Cout].reshape(N, Ho, Wo, Cout)


# ---------------------------------------------------------------------------
# Parameters (deterministic, synthetic)
# ---------------------------------------------------------------------------
def init_conv(key, cin, cout):
    k1, k2 = jax.random.split(key)
    scale = 1.0 / jnp.sqrt(4.0 * 4.0 * cin)
    w = jax.random.normal(k1, (4, 4, cin, cout), jnp.float32) * scale
    b = jax.random.normal(k2, (cout,), jnp.float32) * scale
    return w, b


def make_params(key):
    f = FEAT_D
    # channel plan: 3 -> f -> 2f -> 4f -> 8f -> 8f  (backbone, stride 2)
    #               8f -> 8f -> 1                   (image_D, stride 1)
    plan = [(3, f), (f, 2 * f), (2 * f, 4 * f), (4 * f, 8 * f), (8 * f, 8 * f),
            (8 * f, 8 * f), (8 * f, 1)]
    keys = jax.random.split(key, len(plan))
    return {f"c{i}": init_conv(k, cin, cout)
            for i, (k, (cin, cout)) in enumerate(zip(keys, plan))}


# ---------------------------------------------------------------------------
# Forward pass (backbone + image_D, exactly what Discriminator.forward returns)
# ---------------------------------------------------------------------------
def discriminator_forward(x_nchw, params):
    x = jnp.transpose(x_nchw, (0, 2, 3, 1)).astype(jnp.float32)   # NCHW -> NHWC
    # backbone: Tanh -> Conv(3,f,4,2,1) -> LReLU, then 4x (Conv s2 -> IN -> LReLU)
    x = conv_layer(x, *params["c0"], stride=2, prologue="tanh", epilogue="lrelu")
    x = conv_layer(x, *params["c1"], stride=2, epilogue="in_lrelu")
    x = conv_layer(x, *params["c2"], stride=2, epilogue="in_lrelu")
    x = conv_layer(x, *params["c3"], stride=2, epilogue="in_lrelu")
    x = conv_layer(x, *params["c4"], stride=2, epilogue="in_lrelu")
    # image_D: Conv(8f,8f,4,1,1) -> IN -> LReLU -> Conv(8f,1,4,1,1) -> Sigmoid
    x = conv_layer(x, *params["c5"], stride=1, epilogue="in_lrelu")
    x = conv_layer(x, *params["c6"], stride=1, epilogue="sigmoid")
    return jnp.transpose(x, (0, 3, 1, 2))                         # back to NCHW
    # TODO(synk): label_D1/label_D2/*_cloth/avgp heads exist in __init__ but are
    # unused by forward(), so they are intentionally not implemented.


if __name__ == "__main__":
    key = jax.random.PRNGKey(0)
    pkey, xkey = jax.random.split(key)
    params = make_params(pkey)
    # 5 stride-2 convs (/32) then two k=4,s=1,p=1 convs (-1, -1): 96 -> 3 -> 2 -> 1
    x = jax.random.normal(xkey, (2, 3, 96, 96), jnp.float32)   # NCHW like PyTorch
    fwd = jax.jit(discriminator_forward)
    out = jax.block_until_ready(fwd(x, params))
    assert out.shape == (2, 1, 1, 1), out.shape
    assert bool(jnp.all(jnp.isfinite(out)))
    assert bool(jnp.all((out >= 0.0) & (out <= 1.0)))   # sigmoid range
    print("KERNEL_OK")
</pallas_src>

<mosaic_0001>
module attributes {stable_mosaic.version = 11 : i64} {
  func.func @_conv_kernel(%arg0: i32, %arg1: memref<1x2304x48xbf16, #tpu.memory_space<vmem>>, %arg2: memref<48x128xbf16, #tpu.memory_space<vmem>>, %arg3: memref<1x128xf32, #tpu.memory_space<vmem>>, %arg4: memref<1x2304x128xf32, #tpu.memory_space<vmem>>) attributes {dimension_semantics = [#tpu.dimension_semantics<parallel>], iteration_bounds = array<i64: 2>, scalar_prefetch = 0 : i64, scratch_operands = 0 : i64, tpu.core_type = #tpu.core_type<tc>, window_params = [{transform_indices = @transform_0, window_bounds = array<i64: 1, 2304, 48>}, {pipeline_mode = #tpu.pipeline_mode<synchronous>, transform_indices = @transform_1, window_bounds = array<i64: 48, 128>}, {pipeline_mode = #tpu.pipeline_mode<synchronous>, transform_indices = @transform_2, window_bounds = array<i64: 1, 128>}, {transform_indices = @transform_3, window_bounds = array<i64: 1, 2304, 128>}]} {
    %c0 = arith.constant 0 : index
    %c0_0 = arith.constant 0 : index
    %c0_1 = arith.constant 0 : index
    %0 = vector.load %arg1[%c0, %c0_0, %c0_1] : memref<1x2304x48xbf16, #tpu.memory_space<vmem>>, vector<1x2304x48xbf16>
    %1 = vector.shape_cast %0 : vector<1x2304x48xbf16> to vector<2304x48xbf16>
    %2 = arith.extf %1 : vector<2304x48xbf16> to vector<2304x48xf32>
    %3 = math.tanh %2 : vector<2304x48xf32>
    %4 = arith.truncf %3 : vector<2304x48xf32> to vector<2304x48xbf16>
    %c0_2 = arith.constant 0 : index
    %c0_3 = arith.constant 0 : index
    %5 = vector.load %arg2[%c0_2, %c0_3] : memref<48x128xbf16, #tpu.memory_space<vmem>>, vector<48x128xbf16>
    %cst = arith.constant dense<0.000000e+00> : vector<2304x128xf32>
    %6 = tpu.matmul %4, %5, %cst {dimension_numbers = #tpu.dot_dimension_numbers<[1], [0], [0], [1], [0, 0, 1, 1], [], []>} : vector<2304x48xbf16>, vector<48x128xbf16>, vector<2304x128xf32> -> vector<2304x128xf32>
    %c0_4 = arith.constant 0 : index
    %c0_5 = arith.constant 0 : index
    %7 = vector.load %arg3[%c0_4, %c0_5] : memref<1x128xf32, #tpu.memory_space<vmem>>, vector<1x128xf32>
    %8 = vector.broadcast %7 : vector<1x128xf32> to vector<2304x128xf32>
    %9 = arith.addf %6, %8 : vector<2304x128xf32>
    %cst_6 = arith.constant 0.000000e+00 : f32
    %10 = vector.broadcast %cst_6 : f32 to vector<2304x128xf32>
    %11 = arith.cmpf oge, %9, %10 : vector<2304x128xf32>
    %cst_7 = arith.constant 2.000000e-01 : f32
    %12 = vector.broadcast %cst_7 : f32 to vector<2304x128xf32>
    %13 = arith.mulf %12, %9 : vector<2304x128xf32>
    %14 = arith.select %11, %9, %13 : vector<2304x128xi1>, vector<2304x128xf32>
    %15 = vector.shape_cast %14 : vector<2304x128xf32> to vector<1x2304x128xf32>
    %c0_8 = arith.constant 0 : index
    %c0_9 = arith.constant 0 : index
    %c0_10 = arith.constant 0 : index
    %16 = vector.load %arg4[%c0_8, %c0_9, %c0_10] : memref<1x2304x128xf32, #tpu.memory_space<vmem>>, vector<1x2304x128xf32>
    tpu.vector_store %arg4[%c0_8, %c0_9, %c0_10], %15 {strides = array<i32>} : memref<1x2304x128xf32, #tpu.memory_space<vmem>>, vector<1x2304x128xf32>,
    return
  }
  func.func @transform_0(%arg0: i32) -> (i32, i32, i32) {
    %c0_i32 = arith.constant 0 : i32
    %c0_i32_0 = arith.constant 0 : i32
    %c0_i32_1 = arith.constant 0 : i32
    return %arg0, %c0_i32, %c0_i32_0 : i32, i32, i32
  }
  func.func @transform_1(%arg0: i32) -> (i32, i32) {
    %c0_i32 = arith.constant 0 : i32
    %c0_i32_0 = arith.constant 0 : i32
    %c0_i32_1 = arith.constant 0 : i32
    return %c0_i32, %c0_i32_0 : i32, i32
  }
  func.func @transform_2(%arg0: i32) -> (i32, i32) {
    %c0_i32 = arith.constant 0 : i32
    %c0_i32_0 = arith.constant 0 : i32
    %c0_i32_1 = arith.constant 0 : i32
    return %c0_i32, %c0_i32_0 : i32, i32
  }
  func.func @transform_3(%arg0: i32) -> (i32, i32, i32) {
    %c0_i32 = arith.constant 0 : i32
    %c0_i32_0 = arith.constant 0 : i32
    %c0_i32_1 = arith.constant 0 : i32
    return %arg0, %c0_i32, %c0_i32_0 : i32, i32, i32
  }
}

module attributes {stable_mosaic.version = 11 : i64} {
  func.func @_conv_kernel(%arg0: i32, %arg1: memref<1x576x128xbf16, #tpu.memory_space<vmem>>, %arg2: memref<128x128xbf16, #tpu.memory_space<vmem>>, %arg3: memref<1x128xf32, #tpu.memory_space<vmem>>, %arg4: memref<1x576x128xf32, #tpu.memory_space<vmem>>) attributes {dimension_semantics = [#tpu.dimension_semantics<parallel>], iteration_bounds = array<i64: 2>, scalar_prefetch = 0 : i64, scratch_operands = 0 : i64, tpu.core_type = #tpu.core_type<tc>, window_params = [{transform_indices = @transform_0, window_bounds = array<i64: 1, 576, 128>}, {pipeline_mode = #tpu.pipeline_mode<synchronous>, transform_indices = @transform_1, window_bounds = array<i64: 128, 128>}, {pipeline_mode = #tpu.pipeline_mode<synchronous>, transform_indices = @transform_2, window_bounds = array<i64: 1, 128>}, {transform_indices = @transform_3, window_bounds = array<i64: 1, 576, 128>}]} {
    %c0 = arith.constant 0 : index
    %c0_0 = arith.constant 0 : index
    %c0_1 = arith.constant 0 : index
    %0 = vector.load %arg1[%c0, %c0_0, %c0_1] : memref<1x576x128xbf16, #tpu.memory_space<vmem>>, vector<1x576x128xbf16>
    %1 = vector.shape_cast %0 : vector<1x576x128xbf16> to vector<576x128xbf16>
    %c0_2 = arith.constant 0 : index
    %c0_3 = arith.constant 0 : index
    %2 = vector.load %arg2[%c0_2, %c0_3] : memref<128x128xbf16, #tpu.memory_space<vmem>>, vector<128x128xbf16>
    %cst = arith.constant dense<0.000000e+00> : vector<576x128xf32>
    %3 = tpu.matmul %1, %2, %cst {dimension_numbers = #tpu.dot_dimension_numbers<[1], [0], [0], [1], [0, 0, 1, 1], [], []>} : vector<576x128xbf16>, vector<128x128xbf16>, vector<576x128xf32> -> vector<576x128xf32>
    %c0_4 = arith.constant 0 : index
    %c0_5 = arith.constant 0 : index
    %4 = vector.load %arg3[%c0_4, %c0_5] : memref<1x128xf32, #tpu.memory_space<vmem>>, vector<1x128xf32>
    %5 = vector.broadcast %4 : vector<1x128xf32> to vector<576x128xf32>
    %6 = arith.addf %3, %5 : vector<576x128xf32>
    %cst_6 = arith.constant dense<0.000000e+00> : vector<128xf32>
    %7 = vector.multi_reduction <add>, %6, %cst_6 [0] : vector<576x128xf32> to vector<128xf32>
    %8 = vector.shape_cast %7 : vector<128xf32> to vector<1x128xf32>
    %cst_7 = arith.constant 5.760000e+02 : f32
    %9 = vector.broadcast %cst_7 : f32 to vector<1x128xf32>
    %10 = arith.divf %8, %9 : vector<1x128xf32>
    %11 = vector.broadcast %10 : vector<1x128xf32> to vector<576x128xf32>
    %12 = arith.subf %6, %11 : vector<576x128xf32>
    %13 = arith.mulf %12, %12 : vector<576x128xf32>
    %cst_8 = arith.constant dense<0.000000e+00> : vector<128xf32>
    %14 = vector.multi_reduction <add>, %13, %cst_8 [0] : vector<576x128xf32> to vector<128xf32>
    %15 = vector.shape_cast %14 : vector<128xf32> to vector<1x128xf32>
    %cst_9 = arith.constant 5.760000e+02 : f32
    %16 = vector.broadcast %cst_9 : f32 to vector<1x128xf32>
    %17 = arith.divf %15, %16 : vector<1x128xf32>
    %cst_10 = arith.constant 9.99999974E-6 : f32
    %18 = vector.broadcast %cst_10 : f32 to vector<1x128xf32>
    %19 = arith.addf %17, %18 : vector<1x128xf32>
    %20 = math.rsqrt %19 : vector<1x128xf32>
    %21 = vector.broadcast %20 : vector<1x128xf32> to vector<576x128xf32>
    %22 = arith.mulf %12, %21 : vector<576x128xf32>
    %cst_11 = arith.constant 0.000000e+00 : f32
    %23 = vector.broadcast %cst_11 : f32 to vector<576x128xf32>
    %24 = arith.cmpf oge, %22, %23 : vector<576x128xf32>
    %cst_12 = arith.constant 2.000000e-01 : f32
    %25 = vector.broadcast %cst_12 : f32 to vector<576x128xf32>
    %26 = arith.mulf %25, %22 : vector<576x128xf32>
    %27 = arith.select %24, %22, %26 : vector<576x128xi1>, vector<576x128xf32>
    %28 = vector.shape_cast %27 : vector<576x128xf32> to vector<1x576x128xf32>
    %c0_13 = arith.constant 0 : index
    %c0_14 = arith.constant 0 : index
    %c0_15 = arith.constant 0 : index
    %29 = vector.load %arg4[%c0_13, %c0_14, %c0_15] : memref<1x576x128xf32, #tpu.memory_space<vmem>>, vector<1x576x128xf32>
    tpu.vector_store %arg4[%c0_13, %c0_14, %c0_15], %28 {strides = array<i32>} : memref<1x576x128xf32, #tpu.memory_space<vmem>>, vector<1x576x128xf32>,
    return
  }
  func.func @transform_0(%arg0: i32) -> (i32, i32, i32) {
    %c0_i32 = arith.constant 0 : i32
    %c0_i32_0 = arith.constant 0 : i32
    %c0_i32_1 = arith.constant 0 : i32
    return %arg0, %c0_i32, %c0_i32_0 : i32, i32, i32
  }
  func.func @transform_1(%arg0: i32) -> (i32, i32) {
    %c0_i32 = arith.constant 0 : i32
    %c0_i32_0 = arith.constant 0 : i32
    %c0_i32_1 = arith.constant 0 : i32
    return %c0_i32, %c0_i32_0 : i32, i32
  }
  func.func @transform_2(%arg0: i32) -> (i32, i32) {
    %c0_i32 = arith.constant 0 : i32
    %c0_i32_0 = arith.constant 0 : i32
    %c0_i32_1 = arith.constant 0 : i32
    return %c0_i32, %c0_i32_0 : i32, i32
  }
  func.func @transform_3(%arg0: i32) -> (i32, i32, i32) {
    %c0_i32 = arith.constant 0 : i32
    %c0_i32_0 = arith.constant 0 : i32
    %c0_i32_1 = arith.constant 0 : i32
    return %arg0, %c0_i32, %c0_i32_0 : i32, i32, i32
  }
}

module attributes {stable_mosaic.version = 11 : i64} {
  func.func @_conv_kernel(%arg0: i32, %arg1: memref<1x144x256xbf16, #tpu.memory_space<vmem>>, %arg2: memref<256x128xbf16, #tpu.memory_space<vmem>>, %arg3: memref<1x128xf32, #tpu.memory_space<vmem>>, %arg4: memref<1x144x128xf32, #tpu.memory_space<vmem>>) attributes {dimension_semantics = [#tpu.dimension_semantics<parallel>], iteration_bounds = array<i64: 2>, scalar_prefetch = 0 : i64, scratch_operands = 0 : i64, tpu.core_type = #tpu.core_type<tc>, window_params = [{transform_indices = @transform_0, window_bounds = array<i64: 1, 144, 256>}, {pipeline_mode = #tpu.pipeline_mode<synchronous>, transform_indices = @transform_1, window_bounds = array<i64: 256, 128>}, {pipeline_mode = #tpu.pipeline_mode<synchronous>, transform_indices = @transform_2, window_bounds = array<i64: 1, 128>}, {transform_indices = @transform_3, window_bounds = array<i64: 1, 144, 128>}]} {
    %c0 = arith.constant 0 : index
    %c0_0 = arith.constant 0 : index
    %c0_1 = arith.constant 0 : index
    %0 = vector.load %arg1[%c0, %c0_0, %c0_1] : memref<1x144x256xbf16, #tpu.memory_space<vmem>>, vector<1x144x256xbf16>
    %1 = vector.shape_cast %0 : vector<1x144x256xbf16> to vector<144x256xbf16>
    %c0_2 = arith.constant 0 : index
    %c0_3 = arith.constant 0 : index
    %2 = vector.load %arg2[%c0_2, %c0_3] : memref<256x128xbf16, #tpu.memory_space<vmem>>, vector<256x128xbf16>
    %cst = arith.constant dense<0.000000e+00> : vector<144x128xf32>
    %3 = tpu.matmul %1, %2, %cst {dimension_numbers = #tpu.dot_dimension_numbers<[1], [0], [0], [1], [0, 0, 1, 1], [], []>} : vector<144x256xbf16>, vector<256x128xbf16>, vector<144x128xf32> -> vector<144x128xf32>
    %c0_4 = arith.constant 0 : index
    %c0_5 = arith.constant 0 : index
    %4 = vector.load %arg3[%c0_4, %c0_5] : memref<1x128xf32, #tpu.memory_space<vmem>>, vector<1x128xf32>
    %5 = vector.broadcast %4 : vector<1x128xf32> to vector<144x128xf32>
    %6 = arith.addf %3, %5 : vector<144x128xf32>
    %cst_6 = arith.constant dense<0.000000e+00> : vector<128xf32>
    %7 = vector.multi_reduction <add>, %6, %cst_6 [0] : vector<144x128xf32> to vector<128xf32>
    %8 = vector.shape_cast %7 : vector<128xf32> to vector<1x128xf32>
    %cst_7 = arith.constant 1.440000e+02 : f32
    %9 = vector.broadcast %cst_7 : f32 to vector<1x128xf32>
    %10 = arith.divf %8, %9 : vector<1x128xf32>
    %11 = vector.broadcast %10 : vector<1x128xf32> to vector<144x128xf32>
    %12 = arith.subf %6, %11 : vector<144x128xf32>
    %13 = arith.mulf %12, %12 : vector<144x128xf32>
    %cst_8 = arith.constant dense<0.000000e+00> : vector<128xf32>
    %14 = vector.multi_reduction <add>, %13, %cst_8 [0] : vector<144x128xf32> to vector<128xf32>
    %15 = vector.shape_cast %14 : vector<128xf32> to vector<1x128xf32>
    %cst_9 = arith.constant 1.440000e+02 : f32
    %16 = vector.broadcast %cst_9 : f32 to vector<1x128xf32>
    %17 = arith.divf %15, %16 : vector<1x128xf32>
    %cst_10 = arith.constant 9.99999974E-6 : f32
    %18 = vector.broadcast %cst_10 : f32 to vector<1x128xf32>
    %19 = arith.addf %17, %18 : vector<1x128xf32>
    %20 = math.rsqrt %19 : vector<1x128xf32>
    %21 = vector.broadcast %20 : vector<1x128xf32> to vector<144x128xf32>
    %22 = arith.mulf %12, %21 : vector<144x128xf32>
    %cst_11 = arith.constant 0.000000e+00 : f32
    %23 = vector.broadcast %cst_11 : f32 to vector<144x128xf32>
    %24 = arith.cmpf oge, %22, %23 : vector<144x128xf32>
    %cst_12 = arith.constant 2.000000e-01 : f32
    %25 = vector.broadcast %cst_12 : f32 to vector<144x128xf32>
    %26 = arith.mulf %25, %22 : vector<144x128xf32>
    %27 = arith.select %24, %22, %26 : vector<144x128xi1>, vector<144x128xf32>
    %28 = vector.shape_cast %27 : vector<144x128xf32> to vector<1x144x128xf32>
    %c0_13 = arith.constant 0 : index
    %c0_14 = arith.constant 0 : index
    %c0_15 = arith.constant 0 : index
    %29 = vector.load %arg4[%c0_13, %c0_14, %c0_15] : memref<1x144x128xf32, #tpu.memory_space<vmem>>, vector<1x144x128xf32>
    tpu.vector_store %arg4[%c0_13, %c0_14, %c0_15], %28 {strides = array<i32>} : memref<1x144x128xf32, #tpu.memory_space<vmem>>, vector<1x144x128xf32>,
    return
  }
  func.func @transform_0(%arg0: i32) -> (i32, i32, i32) {
    %c0_i32 = arith.constant 0 : i32
    %c0_i32_0 = arith.constant 0 : i32
    %c0_i32_1 = arith.constant 0 : i32
    return %arg0, %c0_i32, %c0_i32_0 : i32, i32, i32
  }
  func.func @transform_1(%arg0: i32) -> (i32, i32) {
    %c0_i32 = arith.constant 0 : i32
    %c0_i32_0 = arith.constant 0 : i32
    %c0_i32_1 = arith.constant 0 : i32
    return %c0_i32, %c0_i32_0 : i32, i32
  }
  func.func @transform_2(%arg0: i32) -> (i32, i32) {
    %c0_i32 = arith.constant 0 : i32
    %c0_i32_0 = arith.constant 0 : i32
    %c0_i32_1 = arith.constant 0 : i32
    return %c0_i32, %c0_i32_0 : i32, i32
  }
  func.func @transform_3(%arg0: i32) -> (i32, i32, i32) {
    %c0_i32 = arith.constant 0 : i32
    %c0_i32_0 = arith.constant 0 : i32
    %c0_i32_1 = arith.constant 0 : i32
    return %arg0, %c0_i32, %c0_i32_0 : i32, i32, i32
  }
}

module attributes {stable_mosaic.version = 11 : i64} {
  func.func @_conv_kernel(%arg0: i32, %arg1: memref<1x36x512xbf16, #tpu.memory_space<vmem>>, %arg2: memref<512x128xbf16, #tpu.memory_space<vmem>>, %arg3: memref<1x128xf32, #tpu.memory_space<vmem>>, %arg4: memref<1x36x128xf32, #tpu.memory_space<vmem>>) attributes {dimension_semantics = [#tpu.dimension_semantics<parallel>], iteration_bounds = array<i64: 2>, scalar_prefetch = 0 : i64, scratch_operands = 0 : i64, tpu.core_type = #tpu.core_type<tc>, window_params = [{transform_indices = @transform_0, window_bounds = array<i64: 1, 36, 512>}, {pipeline_mode = #tpu.pipeline_mode<synchronous>, transform_indices = @transform_1, window_bounds = array<i64: 512, 128>}, {pipeline_mode = #tpu.pipeline_mode<synchronous>, transform_indices = @transform_2, window_bounds = array<i64: 1, 128>}, {transform_indices = @transform_3, window_bounds = array<i64: 1, 36, 128>}]} {
    %c0 = arith.constant 0 : index
    %c0_0 = arith.constant 0 : index
    %c0_1 = arith.constant 0 : index
    %0 = vector.load %arg1[%c0, %c0_0, %c0_1] : memref<1x36x512xbf16, #tpu.memory_space<vmem>>, vector<1x36x512xbf16>
    %1 = vector.shape_cast %0 : vector<1x36x512xbf16> to vector<36x512xbf16>
    %c0_2 = arith.constant 0 : index
    %c0_3 = arith.constant 0 : index
    %2 = vector.load %arg2[%c0_2, %c0_3] : memref<512x128xbf16, #tpu.memory_space<vmem>>, vector<512x128xbf16>
    %cst = arith.constant dense<0.000000e+00> : vector<36x128xf32>
    %3 = tpu.matmul %1, %2, %cst {dimension_numbers = #tpu.dot_dimension_numbers<[1], [0], [0], [1], [0, 0, 1, 1], [], []>} : vector<36x512xbf16>, vector<512x128xbf16>, vector<36x128xf32> -> vector<36x128xf32>
    %c0_4 = arith.constant 0 : index
    %c0_5 = arith.constant 0 : index
    %4 = vector.load %arg3[%c0_4, %c0_5] : memref<1x128xf32, #tpu.memory_space<vmem>>, vector<1x128xf32>
    %5 = vector.broadcast %4 : vector<1x128xf32> to vector<36x128xf32>
    %6 = arith.addf %3, %5 : vector<36x128xf32>
    %cst_6 = arith.constant dense<0.000000e+00> : vector<128xf32>
    %7 = vector.multi_reduction <add>, %6, %cst_6 [0] : vector<36x128xf32> to vector<128xf32>
    %8 = vector.shape_cast %7 : vector<128xf32> to vector<1x128xf32>
    %cst_7 = arith.constant 3.600000e+01 : f32
    %9 = vector.broadcast %cst_7 : f32 to vector<1x128xf32>
    %10 = arith.divf %8, %9 : vector<1x128xf32>
    %11 = vector.broadcast %10 : vector<1x128xf32> to vector<36x128xf32>
    %12 = arith.subf %6, %11 : vector<36x128xf32>
    %13 = arith.mulf %12, %12 : vector<36x128xf32>
    %cst_8 = arith.constant dense<0.000000e+00> : vector<128xf32>
    %14 = vector.multi_reduction <add>, %13, %cst_8 [0] : vector<36x128xf32> to vector<128xf32>
    %15 = vector.shape_cast %14 : vector<128xf32> to vector<1x128xf32>
    %cst_9 = arith.constant 3.600000e+01 : f32
    %16 = vector.broadcast %cst_9 : f32 to vector<1x128xf32>
    %17 = arith.divf %15, %16 : vector<1x128xf32>
    %cst_10 = arith.constant 9.99999974E-6 : f32
    %18 = vector.broadcast %cst_10 : f32 to vector<1x128xf32>
    %19 = arith.addf %17, %18 : vector<1x128xf32>
    %20 = math.rsqrt %19 : vector<1x128xf32>
    %21 = vector.broadcast %20 : vector<1x128xf32> to vector<36x128xf32>
    %22 = arith.mulf %12, %21 : vector<36x128xf32>
    %cst_11 = arith.constant 0.000000e+00 : f32
    %23 = vector.broadcast %cst_11 : f32 to vector<36x128xf32>
    %24 = arith.cmpf oge, %22, %23 : vector<36x128xf32>
    %cst_12 = arith.constant 2.000000e-01 : f32
    %25 = vector.broadcast %cst_12 : f32 to vector<36x128xf32>
    %26 = arith.mulf %25, %22 : vector<36x128xf32>
    %27 = arith.select %24, %22, %26 : vector<36x128xi1>, vector<36x128xf32>
    %28 = vector.shape_cast %27 : vector<36x128xf32> to vector<1x36x128xf32>
    %c0_13 = arith.constant 0 : index
    %c0_14 = arith.constant 0 : index
    %c0_15 = arith.constant 0 : index
    %29 = vector.load %arg4[%c0_13, %c0_14, %c0_15] : memref<1x36x128xf32, #tpu.memory_space<vmem>>, vector<1x36x128xf32>
    tpu.vector_store %arg4[%c0_13, %c0_14, %c0_15], %28 {strides = array<i32>} : memref<1x36x128xf32, #tpu.memory_space<vmem>>, vector<1x36x128xf32>,
    return
  }
  func.func @transform_0(%arg0: i32) -> (i32, i32, i32) {
    %c0_i32 = arith.constant 0 : i32
    %c0_i32_0 = arith.constant 0 : i32
    %c0_i32_1 = arith.constant 0 : i32
    return %arg0, %c0_i32, %c0_i32_0 : i32, i32, i32
  }
  func.func @transform_1(%arg0: i32) -> (i32, i32) {
    %c0_i32 = arith.constant 0 : i32
    %c0_i32_0 = arith.constant 0 : i32
    %c0_i32_1 = arith.constant 0 : i32
    return %c0_i32, %c0_i32_0 : i32, i32
  }
  func.func @transform_2(%arg0: i32) -> (i32, i32) {
    %c0_i32 = arith.constant 0 : i32
    %c0_i32_0 = arith.constant 0 : i32
    %c0_i32_1 = arith.constant 0 : i32
    return %c0_i32, %c0_i32_0 : i32, i32
  }
  func.func @transform_3(%arg0: i32) -> (i32, i32, i32) {
    %c0_i32 = arith.constant 0 : i32
    %c0_i32_0 = arith.constant 0 : i32
    %c0_i32_1 = arith.constant 0 : i32
    return %arg0, %c0_i32, %c0_i32_0 : i32, i32, i32
  }
}

module attributes {stable_mosaic.version = 11 : i64} {
  func.func @_conv_kernel(%arg0: i32, %arg1: memref<1x9x1024xbf16, #tpu.memory_space<vmem>>, %arg2: memref<1024x128xbf16, #tpu.memory_space<vmem>>, %arg3: memref<1x128xf32, #tpu.memory_space<vmem>>, %arg4: memref<1x9x128xf32, #tpu.memory_space<vmem>>) attributes {dimension_semantics = [#tpu.dimension_semantics<parallel>], iteration_bounds = array<i64: 2>, scalar_prefetch = 0 : i64, scratch_operands = 0 : i64, tpu.core_type = #tpu.core_type<tc>, window_params = [{transform_indices = @transform_0, window_bounds = array<i64: 1, 9, 1024>}, {pipeline_mode = #tpu.pipeline_mode<synchronous>, transform_indices = @transform_1, window_bounds = array<i64: 1024, 128>}, {pipeline_mode = #tpu.pipeline_mode<synchronous>, transform_indices = @transform_2, window_bounds = array<i64: 1, 128>}, {transform_indices = @transform_3, window_bounds = array<i64: 1, 9, 128>}]} {
    %c0 = arith.constant 0 : index
    %c0_0 = arith.constant 0 : index
    %c0_1 = arith.constant 0 : index
    %0 = vector.load %arg1[%c0, %c0_0, %c0_1] : memref<1x9x1024xbf16, #tpu.memory_space<vmem>>, vector<1x9x1024xbf16>
    %1 = vector.shape_cast %0 : vector<1x9x1024xbf16> to vector<9x1024xbf16>
    %c0_2 = arith.constant 0 : index
    %c0_3 = arith.constant 0 : index
    %2 = vector.load %arg2[%c0_2, %c0_3] : memref<1024x128xbf16, #tpu.memory_space<vmem>>, vector<1024x128xbf16>
    %cst = arith.constant dense<0.000000e+00> : vector<9x128xf32>
    %3 = tpu.matmul %1, %2, %cst {dimension_numbers = #tpu.dot_dimension_numbers<[1], [0], [0], [1], [0, 0, 1, 1], [], []>} : vector<9x1024xbf16>, vector<1024x128xbf16>, vector<9x128xf32> -> vector<9x128xf32>
    %c0_4 = arith.constant 0 : index
    %c0_5 = arith.constant 0 : index
    %4 = vector.load %arg3[%c0_4, %c0_5] : memref<1x128xf32, #tpu.memory_space<vmem>>, vector<1x128xf32>
    %5 = vector.broadcast %4 : vector<1x128xf32> to vector<9x128xf32>
    %6 = arith.addf %3, %5 : vector<9x128xf32>
    %cst_6 = arith.constant dense<0.000000e+00> : vector<128xf32>
    %7 = vector.multi_reduction <add>, %6, %cst_6 [0] : vector<9x128xf32> to vector<128xf32>
    %8 = vector.shape_cast %7 : vector<128xf32> to vector<1x128xf32>
    %cst_7 = arith.constant 9.000000e+00 : f32
    %9 = vector.broadcast %cst_7 : f32 to vector<1x128xf32>
    %10 = arith.divf %8, %9 : vector<1x128xf32>
    %11 = vector.broadcast %10 : vector<1x128xf32> to vector<9x128xf32>
    %12 = arith.subf %6, %11 : vector<9x128xf32>
    %13 = arith.mulf %12, %12 : vector<9x128xf32>
    %cst_8 = arith.constant dense<0.000000e+00> : vector<128xf32>
    %14 = vector.multi_reduction <add>, %13, %cst_8 [0] : vector<9x128xf32> to vector<128xf32>
    %15 = vector.shape_cast %14 : vector<128xf32> to vector<1x128xf32>
    %cst_9 = arith.constant 9.000000e+00 : f32
    %16 = vector.broadcast %cst_9 : f32 to vector<1x128xf32>
    %17 = arith.divf %15, %16 : vector<1x128xf32>
    %cst_10 = arith.constant 9.99999974E-6 : f32
    %18 = vector.broadcast %cst_10 : f32 to vector<1x128xf32>
    %19 = arith.addf %17, %18 : vector<1x128xf32>
    %20 = math.rsqrt %19 : vector<1x128xf32>
    %21 = vector.broadcast %20 : vector<1x128xf32> to vector<9x128xf32>
    %22 = arith.mulf %12, %21 : vector<9x128xf32>
    %cst_11 = arith.constant 0.000000e+00 : f32
    %23 = vector.broadcast %cst_11 : f32 to vector<9x128xf32>
    %24 = arith.cmpf oge, %22, %23 : vector<9x128xf32>
    %cst_12 = arith.constant 2.000000e-01 : f32
    %25 = vector.broadcast %cst_12 : f32 to vector<9x128xf32>
    %26 = arith.mulf %25, %22 : vector<9x128xf32>
    %27 = arith.select %24, %22, %26 : vector<9x128xi1>, vector<9x128xf32>
    %28 = vector.shape_cast %27 : vector<9x128xf32> to vector<1x9x128xf32>
    %c0_13 = arith.constant 0 : index
    %c0_14 = arith.constant 0 : index
    %c0_15 = arith.constant 0 : index
    %29 = vector.load %arg4[%c0_13, %c0_14, %c0_15] : memref<1x9x128xf32, #tpu.memory_space<vmem>>, vector<1x9x128xf32>
    tpu.vector_store %arg4[%c0_13, %c0_14, %c0_15], %28 {strides = array<i32>} : memref<1x9x128xf32, #tpu.memory_space<vmem>>, vector<1x9x128xf32>,
    return
  }
  func.func @transform_0(%arg0: i32) -> (i32, i32, i32) {
    %c0_i32 = arith.constant 0 : i32
    %c0_i32_0 = arith.constant 0 : i32
    %c0_i32_1 = arith.constant 0 : i32
    return %arg0, %c0_i32, %c0_i32_0 : i32, i32, i32
  }
  func.func @transform_1(%arg0: i32) -> (i32, i32) {
    %c0_i32 = arith.constant 0 : i32
    %c0_i32_0 = arith.constant 0 : i32
    %c0_i32_1 = arith.constant 0 : i32
    return %c0_i32, %c0_i32_0 : i32, i32
  }
  func.func @transform_2(%arg0: i32) -> (i32, i32) {
    %c0_i32 = arith.constant 0 : i32
    %c0_i32_0 = arith.constant 0 : i32
    %c0_i32_1 = arith.constant 0 : i32
    return %c0_i32, %c0_i32_0 : i32, i32
  }
  func.func @transform_3(%arg0: i32) -> (i32, i32, i32) {
    %c0_i32 = arith.constant 0 : i32
    %c0_i32_0 = arith.constant 0 : i32
    %c0_i32_1 = arith.constant 0 : i32
    return %arg0, %c0_i32, %c0_i32_0 : i32, i32, i32
  }
}

module attributes {stable_mosaic.version = 11 : i64} {
  func.func @_conv_kernel(%arg0: i32, %arg1: memref<1x4x1024xbf16, #tpu.memory_space<vmem>>, %arg2: memref<1024x128xbf16, #tpu.memory_space<vmem>>, %arg3: memref<1x128xf32, #tpu.memory_space<vmem>>, %arg4: memref<1x4x128xf32, #tpu.memory_space<vmem>>) attributes {dimension_semantics = [#tpu.dimension_semantics<parallel>], iteration_bounds = array<i64: 2>, scalar_prefetch = 0 : i64, scratch_operands = 0 : i64, tpu.core_type = #tpu.core_type<tc>, window_params = [{transform_indices = @transform_0, window_bounds = array<i64: 1, 4, 1024>}, {pipeline_mode = #tpu.pipeline_mode<synchronous>, transform_indices = @transform_1, window_bounds = array<i64: 1024, 128>}, {pipeline_mode = #tpu.pipeline_mode<synchronous>, transform_indices = @transform_2, window_bounds = array<i64: 1, 128>}, {transform_indices = @transform_3, window_bounds = array<i64: 1, 4, 128>}]} {
    %c0 = arith.constant 0 : index
    %c0_0 = arith.constant 0 : index
    %c0_1 = arith.constant 0 : index
    %0 = vector.load %arg1[%c0, %c0_0, %c0_1] : memref<1x4x1024xbf16, #tpu.memory_space<vmem>>, vector<1x4x1024xbf16>
    %1 = vector.shape_cast %0 : vector<1x4x1024xbf16> to vector<4x1024xbf16>
    %c0_2 = arith.constant 0 : index
    %c0_3 = arith.constant 0 : index
    %2 = vector.load %arg2[%c0_2, %c0_3] : memref<1024x128xbf16, #tpu.memory_space<vmem>>, vector<1024x128xbf16>
    %cst = arith.constant dense<0.000000e+00> : vector<4x128xf32>
    %3 = tpu.matmul %1, %2, %cst {dimension_numbers = #tpu.dot_dimension_numbers<[1], [0], [0], [1], [0, 0, 1, 1], [], []>} : vector<4x1024xbf16>, vector<1024x128xbf16>, vector<4x128xf32> -> vector<4x128xf32>
    %c0_4 = arith.constant 0 : index
    %c0_5 = arith.constant 0 : index
    %4 = vector.load %arg3[%c0_4, %c0_5] : memref<1x128xf32, #tpu.memory_space<vmem>>, vector<1x128xf32>
    %5 = vector.broadcast %4 : vector<1x128xf32> to vector<4x128xf32>
    %6 = arith.addf %3, %5 : vector<4x128xf32>
    %cst_6 = arith.constant dense<0.000000e+00> : vector<128xf32>
    %7 = vector.multi_reduction <add>, %6, %cst_6 [0] : vector<4x128xf32> to vector<128xf32>
    %8 = vector.shape_cast %7 : vector<128xf32> to vector<1x128xf32>
    %cst_7 = arith.constant 4.000000e+00 : f32
    %9 = vector.broadcast %cst_7 : f32 to vector<1x128xf32>
    %10 = arith.divf %8, %9 : vector<1x128xf32>
    %11 = vector.broadcast %10 : vector<1x128xf32> to vector<4x128xf32>
    %12 = arith.subf %6, %11 : vector<4x128xf32>
    %13 = arith.mulf %12, %12 : vector<4x128xf32>
    %cst_8 = arith.constant dense<0.000000e+00> : vector<128xf32>
    %14 = vector.multi_reduction <add>, %13, %cst_8 [0] : vector<4x128xf32> to vector<128xf32>
    %15 = vector.shape_cast %14 : vector<128xf32> to vector<1x128xf32>
    %cst_9 = arith.constant 4.000000e+00 : f32
    %16 = vector.broadcast %cst_9 : f32 to vector<1x128xf32>
    %17 = arith.divf %15, %16 : vector<1x128xf32>
    %cst_10 = arith.constant 9.99999974E-6 : f32
    %18 = vector.broadcast %cst_10 : f32 to vector<1x128xf32>
    %19 = arith.addf %17, %18 : vector<1x128xf32>
    %20 = math.rsqrt %19 : vector<1x128xf32>
    %21 = vector.broadcast %20 : vector<1x128xf32> to vector<4x128xf32>
    %22 = arith.mulf %12, %21 : vector<4x128xf32>
    %cst_11 = arith.constant 0.000000e+00 : f32
    %23 = vector.broadcast %cst_11 : f32 to vector<4x128xf32>
    %24 = arith.cmpf oge, %22, %23 : vector<4x128xf32>
    %cst_12 = arith.constant 2.000000e-01 : f32
    %25 = vector.broadcast %cst_12 : f32 to vector<4x128xf32>
    %26 = arith.mulf %25, %22 : vector<4x128xf32>
    %27 = arith.select %24, %22, %26 : vector<4x128xi1>, vector<4x128xf32>
    %28 = vector.shape_cast %27 : vector<4x128xf32> to vector<1x4x128xf32>
    %c0_13 = arith.constant 0 : index
    %c0_14 = arith.constant 0 : index
    %c0_15 = arith.constant 0 : index
    %29 = vector.load %arg4[%c0_13, %c0_14, %c0_15] : memref<1x4x128xf32, #tpu.memory_space<vmem>>, vector<1x4x128xf32>
    tpu.vector_store %arg4[%c0_13, %c0_14, %c0_15], %28 {strides = array<i32>} : memref<1x4x128xf32, #tpu.memory_space<vmem>>, vector<1x4x128xf32>,
    return
  }
  func.func @transform_0(%arg0: i32) -> (i32, i32, i32) {
    %c0_i32 = arith.constant 0 : i32
    %c0_i32_0 = arith.constant 0 : i32
    %c0_i32_1 = arith.constant 0 : i32
    return %arg0, %c0_i32, %c0_i32_0 : i32, i32, i32
  }
  func.func @transform_1(%arg0: i32) -> (i32, i32) {
    %c0_i32 = arith.constant 0 : i32
    %c0_i32_0 = arith.constant 0 : i32
    %c0_i32_1 = arith.constant 0 : i32
    return %c0_i32, %c0_i32_0 : i32, i32
  }
  func.func @transform_2(%arg0: i32) -> (i32, i32) {
    %c0_i32 = arith.constant 0 : i32
    %c0_i32_0 = arith.constant 0 : i32
    %c0_i32_1 = arith.constant 0 : i32
    return %c0_i32, %c0_i32_0 : i32, i32
  }
  func.func @transform_3(%arg0: i32) -> (i32, i32, i32) {
    %c0_i32 = arith.constant 0 : i32
    %c0_i32_0 = arith.constant 0 : i32
    %c0_i32_1 = arith.constant 0 : i32
    return %arg0, %c0_i32, %c0_i32_0 : i32, i32, i32
  }
}

module attributes {stable_mosaic.version = 11 : i64} {
  func.func @_conv_kernel(%arg0: i32, %arg1: memref<1x1x1024xbf16, #tpu.memory_space<vmem>>, %arg2: memref<1024x128xbf16, #tpu.memory_space<vmem>>, %arg3: memref<1x128xf32, #tpu.memory_space<vmem>>, %arg4: memref<1x1x128xf32, #tpu.memory_space<vmem>>) attributes {dimension_semantics = [#tpu.dimension_semantics<parallel>], iteration_bounds = array<i64: 2>, scalar_prefetch = 0 : i64, scratch_operands = 0 : i64, tpu.core_type = #tpu.core_type<tc>, window_params = [{transform_indices = @transform_0, window_bounds = array<i64: 1, 1, 1024>}, {pipeline_mode = #tpu.pipeline_mode<synchronous>, transform_indices = @transform_1, window_bounds = array<i64: 1024, 128>}, {pipeline_mode = #tpu.pipeline_mode<synchronous>, transform_indices = @transform_2, window_bounds = array<i64: 1, 128>}, {transform_indices = @transform_3, window_bounds = array<i64: 1, 1, 128>}]} {
    %c0 = arith.constant 0 : index
    %c0_0 = arith.constant 0 : index
    %c0_1 = arith.constant 0 : index
    %0 = vector.load %arg1[%c0, %c0_0, %c0_1] : memref<1x1x1024xbf16, #tpu.memory_space<vmem>>, vector<1x1x1024xbf16>
    %1 = vector.shape_cast %0 : vector<1x1x1024xbf16> to vector<1x1024xbf16>
    %c0_2 = arith.constant 0 : index
    %c0_3 = arith.constant 0 : index
    %2 = vector.load %arg2[%c0_2, %c0_3] : memref<1024x128xbf16, #tpu.memory_space<vmem>>, vector<1024x128xbf16>
    %cst = arith.constant dense<0.000000e+00> : vector<1x128xf32>
    %3 = tpu.matmul %1, %2, %cst {dimension_numbers = #tpu.dot_dimension_numbers<[1], [0], [0], [1], [0, 0, 1, 1], [], []>} : vector<1x1024xbf16>, vector<1024x128xbf16>, vector<1x128xf32> -> vector<1x128xf32>
    %c0_4 = arith.constant 0 : index
    %c0_5 = arith.constant 0 : index
    %4 = vector.load %arg3[%c0_4, %c0_5] : memref<1x128xf32, #tpu.memory_space<vmem>>, vector<1x128xf32>
    %5 = arith.addf %3, %4 : vector<1x128xf32>
    %6 = arith.negf %5 : vector<1x128xf32>
    %7 = math.exp %6 : vector<1x128xf32>
    %cst_6 = arith.constant 1.000000e+00 : f32
    %8 = vector.broadcast %cst_6 : f32 to vector<1x128xf32>
    %9 = arith.addf %8, %7 : vector<1x128xf32>
    %10 = arith.divf %8, %9 : vector<1x128xf32>
    %11 = vector.shape_cast %10 : vector<1x128xf32> to vector<1x1x128xf32>
    %c0_7 = arith.constant 0 : index
    %c0_8 = arith.constant 0 : index
    %c0_9 = arith.constant 0 : index
    %12 = vector.load %arg4[%c0_7, %c0_8, %c0_9] : memref<1x1x128xf32, #tpu.memory_space<vmem>>, vector<1x1x128xf32>
    tpu.vector_store %arg4[%c0_7, %c0_8, %c0_9], %11 {strides = array<i32>} : memref<1x1x128xf32, #tpu.memory_space<vmem>>, vector<1x1x128xf32>,
    return
  }
  func.func @transform_0(%arg0: i32) -> (i32, i32, i32) {
    %c0_i32 = arith.constant 0 : i32
    %c0_i32_0 = arith.constant 0 : i32
    %c0_i32_1 = arith.constant 0 : i32
    return %arg0, %c0_i32, %c0_i32_0 : i32, i32, i32
  }
  func.func @transform_1(%arg0: i32) -> (i32, i32) {
    %c0_i32 = arith.constant 0 : i32
    %c0_i32_0 = arith.constant 0 : i32
    %c0_i32_1 = arith.constant 0 : i32
    return %c0_i32, %c0_i32_0 : i32, i32
  }
  func.func @transform_2(%arg0: i32) -> (i32, i32) {
    %c0_i32 = arith.constant 0 : i32
    %c0_i32_0 = arith.constant 0 : i32
    %c0_i32_1 = arith.constant 0 : i32
    return %c0_i32, %c0_i32_0 : i32, i32
  }
  func.func @transform_3(%arg0: i32) -> (i32, i32, i32) {
    %c0_i32 = arith.constant 0 : i32
    %c0_i32_0 = arith.constant 0 : i32
    %c0_i32_1 = arith.constant 0 : i32
    return %arg0, %c0_i32, %c0_i32_0 : i32, i32, i32
  }
}

</mosaic_0001>

<bundles_post_ra>
// kernel: discriminator_forward.7
= control target key start
LH: loop header
LB: loop body
LE: loop exit
PB: predicated region body
PF: predicated region fallthrough
CT: control target
= control target key end

     0   :  { %s5093_s12 = smov 0   ;;  %s6180_s0 = inlined_call_operand.vmem [shape: bf16[2,2304,48], index: 0, kind: input, shape index: {}]   ;;  %s6181_s1 = inlined_call_operand.vmem [shape: bf16[48,128], index: 1, kind: input, shape index: {}]   ;;  %s6182_s2 = inlined_call_operand.vmem [shape: f32[1,128], index: 2, kind: input, shape index: {}]   ;;  %s6183_s3 = inlined_call_operand.vmem [shape: f32[2,2304,128], index: 3, kind: output, shape index: {}]  }
   0x1 LB: > { %s3577_s13 = sadd.s32 4294967295, %s5071_s12   ;;  %p3581_p0 = scmp.ge.s32.totalorder %s5071_s12, 1  ;;  %s5071_s12 = sphi %s5093_s12, %s13_s12  }
   0x2   : > { %p137_p1 = scmp.lt.s32.totalorder %s5071_s12, 3 }
   0x4   : > { %p138_p2 = pnand %p3581_p0, %p137_p1 }
   0x5   : > { %p161_p3 = scmp.lt.s32.totalorder (!%p138_p2), %s3577_s13, 1 }
   0x6   : > { %141 = sbr.rel (%p138_p2) target bundleno = 740 (0x2e4), region = 32 }
   0xb   : > { %v3744_v0 = vld [vmem:[%s6181_s1 + $0x10] sm:$0xff]  ;;  %v3743_v1 = vld [vmem:[%s6181_s1 + $0x8] sm:$0xff]  ;;  %s6185_s13 = smov (!%p161_p3, %s3577_s13), 1  ;;  %v3742_v2 = vld [vmem:[%s6181_s1] sm:$0xff]  ;;  %vm1208_vm0 = vcmask 392192  }
   0xc   : > { %1646 = vmatpush.bf16.msra.mxu0 %v3744_v0  ;;  %4464 = vmatpush.bf16.msra.mxu1 %v3744_v0  ;;  %s4473_s18 = smul.u32 1152, %s6185_s13 }
   0xd   : > { %4465 = vmatpush.bf16.msra.mxu2 %v3744_v0  ;;  %4466 = vmatpush.bf16.msra.mxu3 %v3744_v0  ;;  %s4474_s26 = smul.u32 2304, %s6185_s13 }
   0xe   : > { %s5116_s23 = scalar_lea.vmem %s6180_s0, %s4473_s18 }
   0xf   : > { %v3746_v3 = vld [vmem:[%s5116_s23] sm:$0xff]   ;;  %v4321_v15 = vld [vmem:[%s5116_s23 + $0x8] sm:$0xff]   ;;  %v4322_v43 = vld [vmem:[%s5116_s23 + $0x10] sm:$0xff]   ;;  %s5200_s29 = scalar_lea.vmem %s6183_s3, %s4474_s26 }
  0x10   : > { %1647 = vmatpush.bf16.msra.mxu0 %v3743_v1  ;;  %4467 = vmatpush.bf16.msra.mxu1 %v3743_v1  ;;  %v4356_v4 = vld [vmem:[%s5116_s23 + $0x120] sm:$0xff]   ;;  %v3747_v6 = vunpack.c.l.bf16 %v3746_v3  ;;  %v3748_v7 = vunpack.c.h.bf16 %v3746_v3  ;;  %v4357_v18 = vld [vmem:[%s5116_s23 + $0x128] sm:$0xff]   ;;  %v3751_v21 = vunpack.c.l.bf16 %v4321_v15  ;;  %v3752_v23 = vunpack.c.h.bf16 %v4321_v15  ;;  %v4358_v47 = vld [vmem:[%s5116_s23 + $0x130] sm:$0xff]  }
  0x11   : > { %4468 = vmatpush.bf16.msra.mxu2 %v3743_v1  ;;  %4469 = vmatpush.bf16.msra.mxu3 %v3743_v1  ;;  %v4392_v5 = vld [vmem:[%s5116_s23 + $0x240] sm:$0xff]   ;;  %v3891_v8 = vunpack.c.l.bf16 %v4356_v4  ;;  %v3892_v9 = vunpack.c.h.bf16 %v4356_v4  ;;  %v4393_v24 = vld [vmem:[%s5116_s23 + $0x248] sm:$0xff]   ;;  %v3895_v27 = vunpack.c.l.bf16 %v4357_v18  ;;  %v3896_v29 = vunpack.c.h.bf16 %v4357_v18  ;;  %v4394_v53 = vld [vmem:[%s5116_s23 + $0x250] sm:$0xff]  }
  0x12   : > { %v4428_v10 = vld [vmem:[%s5116_s23 + $0x360] sm:$0xff]   ;;  %4484 = vtanh.f32 %v3747_v6  ;;  %v4035_v11 = vunpack.c.l.bf16 %v4392_v5  ;;  %v4036_v12 = vunpack.c.h.bf16 %v4392_v5  ;;  %v4429_v30 = vld [vmem:[%s5116_s23 + $0x368] sm:$0xff]   ;;  %v4039_v33 = vunpack.c.l.bf16 %v4393_v24  ;;  %v4430_v57 = vld [vmem:[%s5116_s23 + $0x370] sm:$0xff]  }
  0x13   : > { %4486 = vtanh.f32 %v3748_v7  ;;  %v4179_v13 = vunpack.c.l.bf16 %v4428_v10  ;;  %v4180_v14 = vunpack.c.h.bf16 %v4428_v10  ;;  %v4040_v35 = vunpack.c.h.bf16 %v4393_v24  ;;  %v4323_v3 = vld [vmem:[%s5116_s23 + $0x18] sm:$0xff]  }
  0x14   : > { %1648 = vmatpush.bf16.msra.mxu0 %v3742_v2  ;;  %4470 = vmatpush.bf16.msra.mxu1 %v3742_v2  ;;  %4488 = vtanh.f32 %v3891_v8  ;;  %v4183_v37 = vunpack.c.l.bf16 %v4429_v30  ;;  %v4184_v38 = vunpack.c.h.bf16 %v4429_v30  ;;  %v3755_v50 = vunpack.c.l.bf16 %v4322_v43  ;;  %v4359_v7 = vld [vmem:[%s5116_s23 + $0x138] sm:$0xff]  }
  0x15   : > { %4471 = vmatpush.bf16.msra.mxu2 %v3742_v2  ;;  %4472 = vmatpush.bf16.msra.mxu3 %v3742_v2  ;;  %4490 = vtanh.f32 %v3892_v9  ;;  %v3756_v52 = vunpack.c.h.bf16 %v4322_v43  ;;  %v3899_v55 = vunpack.c.l.bf16 %v4358_v47  ;;  %v3900_v56 = vunpack.c.h.bf16 %v4358_v47 }
  0x16   : > { %4492 = vtanh.f32 %v4035_v11  ;;  %v4043_v59 = vunpack.c.l.bf16 %v4394_v53  ;;  %v4044_v60 = vunpack.c.h.bf16 %v4394_v53  ;;  %v4187_v61 = vunpack.c.l.bf16 %v4430_v57 }
  0x17   : > { %4494 = vtanh.f32 %v4036_v12  ;;  %v4188_v62 = vunpack.c.h.bf16 %v4430_v57  ;;  %v3759_v10 = vunpack.c.l.bf16 %v4323_v3  ;;  %v3760_v12 = vunpack.c.h.bf16 %v4323_v3 }
  0x18   : > { %v4485_v16 = vpop.eup %4484  ;;  %4496 = vtanh.f32 %v4179_v13  ;;  %v4395_v13 = vld [vmem:[%s5116_s23 + $0x258] sm:$0xff]   ;;  %v3903_v15 = vunpack.c.l.bf16 %v4359_v7 }
  0x19   : > { %v4487_v17 = vpop.eup %4486  ;;  %4498 = vtanh.f32 %v4180_v14 }
  0x1a   : > { %v4489_v19 = vpop.eup %4488  ;;  %v1036_v20 = vpack.c.bf16 %v4487_v17, %v4485_v16  ;;  %4500 = vtanh.f32 %v3751_v21  ;;  %v3904_v16 = vunpack.c.h.bf16 %v4359_v7  ;;  %v4431_v17 = vld [vmem:[%s5116_s23 + $0x378] sm:$0xff]  }
  0x1b   : > { %v4491_v22 = vpop.eup %4490  ;;  %4502 = vtanh.f32 %v3752_v23  ;;  %v4191_v21 = vunpack.c.l.bf16 %v4431_v17 }
  0x1c   : > { %v4493_v25 = vpop.eup %4492  ;;  %3596 = vmatmul.msk.bf16.vlgmr.msra.gmra.mxu0 %vm1208_vm0, %v1036_v20  ;;  %v1072_v26 = vpack.c.bf16 %v4491_v22, %v4489_v19  ;;  %4504 = vtanh.f32 %v3895_v27  ;;  %v4047_v19 = vunpack.c.l.bf16 %v4395_v13  ;;  %v4048_v20 = vunpack.c.h.bf16 %v4395_v13  ;;  %v4324_v27 = vld [vmem:[%s5116_s23 + $0x20] sm:$0xff]  }
  0x1d   : > { %v4495_v28 = vpop.eup %4494  ;;  %4506 = vtanh.f32 %v3896_v29  ;;  %v4192_v22 = vunpack.c.h.bf16 %v4431_v17 }
  0x1e   : > { %v4497_v31 = vpop.eup %4496  ;;  %3632 = vmatmul.msk.bf16.vlgmr.msra.gmra.mxu1 %vm1208_vm0, %v1072_v26  ;;  %v1108_v32 = vpack.c.bf16 %v4495_v28, %v4493_v25  ;;  %4508 = vtanh.f32 %v4039_v33 }
  0x1f   : > { %v4499_v34 = vpop.eup %4498  ;;  %4510 = vtanh.f32 %v4040_v35 }
  0x20   : > { %3668 = vmatmul.msk.bf16.vlgmr.msra.gmra.mxu2 %vm1208_vm0, %v1108_v32  ;;  %v1144_v36 = vpack.c.bf16 %v4499_v34, %v4497_v31  ;;  %v4501_v39 = vpop.eup %4500  ;;  %4512 = vtanh.f32 %v4183_v37  ;;  %v4360_v31 = vld [vmem:[%s5116_s23 + $0x140] sm:$0xff]   ;;  %v3763_v34 = vunpack.c.l.bf16 %v4324_v27 }
  0x21   : > { %v4503_v40 = vpop.eup %4502  ;;  %4514 = vtanh.f32 %v4184_v38  ;;  %v4396_v37 = vld [vmem:[%s5116_s23 + $0x260] sm:$0xff]  }
  0x22   : > { %3704 = vmatmul.msk.bf16.vlgmr.msra.gmra.mxu3 %vm1208_vm0, %v1144_v36  ;;  %v4505_v41 = vpop.eup %4504  ;;  %v1037_v45 = vpack.c.bf16 %v4503_v40, %v4501_v39  ;;  %4516 = vtanh.f32 %v3755_v50  ;;  %v3764_v36 = vunpack.c.h.bf16 %v4324_v27  ;;  %v3907_v39 = vunpack.c.l.bf16 %v4360_v31 }
  0x23   : > { %v4507_v42 = vpop.eup %4506  ;;  %4518 = vtanh.f32 %v3756_v52  ;;  %v3908_v40 = vunpack.c.h.bf16 %v4360_v31  ;;  %v4051_v43 = vunpack.c.l.bf16 %v4396_v37 }
  0x24   : > { %v4509_v44 = vpop.eup %4508  ;;  %v1073_v49 = vpack.c.bf16 %v4507_v42, %v4505_v41  ;;  %4520 = vtanh.f32 %v3899_v55  ;;  %v4432_v41 = vld [vmem:[%s5116_s23 + $0x380] sm:$0xff]   ;;  %v4361_v55 = vld [vmem:[%s5116_s23 + $0x148] sm:$0xff]  }
  0x25   : > { %v4511_v46 = vpop.eup %4510  ;;  %4522 = vtanh.f32 %v3900_v56 }
  0x26   : > { %v4513_v48 = vpop.eup %4512  ;;  %v1109_v54 = vpack.c.bf16 %v4511_v46, %v4509_v44  ;;  %4524 = vtanh.f32 %v4043_v59  ;;  %v4052_v44 = vunpack.c.h.bf16 %v4396_v37  ;;  %v4196_v46 = vunpack.c.h.bf16 %v4432_v41 }
  0x27   : > { %v4515_v51 = vpop.eup %4514  ;;  %4526 = vtanh.f32 %v4044_v60 }
  0x28   : > { %v1145_v58 = vpack.c.bf16 %v4515_v51, %v4513_v48  ;;  %v4517_v63 = vpop.eup %4516  ;;  %4528 = vtanh.f32 %v4187_v61  ;;  %v4325_v51 = vld [vmem:[%s5116_s23 + $0x28] sm:$0xff]  }
  0x29   : > { %v4519_v0 = vpop.eup %4518  ;;  %4530 = vtanh.f32 %v4188_v62  ;;  %v3768_v60 = vunpack.c.h.bf16 %v4325_v51  ;;  %v4397_v61 = vld [vmem:[%s5116_s23 + $0x268] sm:$0xff]  }
  0x2a   : > { %v4521_v1 = vpop.eup %4520  ;;  %v1038_v5 = vpack.c.bf16 %v4519_v0, %v4517_v63  ;;  %4532 = vtanh.f32 %v3759_v10  ;;  %v3911_v63 = vunpack.c.l.bf16 %v4361_v55  ;;  %v3912_v0 = vunpack.c.h.bf16 %v4361_v55 }
  0x2b   : > { %v4523_v2 = vpop.eup %4522  ;;  %4534 = vtanh.f32 %v3760_v12  ;;  %v4055_v3 = vunpack.c.l.bf16 %v4397_v61 }
  0x2c   : > { %3597 = vmatmul.msk.bf16.gmra.mxu0 %vm1208_vm0, %v1037_v45  ;;  %v4525_v4 = vpop.eup %4524  ;;  %v1074_v9 = vpack.c.bf16 %v4523_v2, %v4521_v1  ;;  %4536 = vtanh.f32 %v3903_v15  ;;  %v4195_v45 = vunpack.c.l.bf16 %v4432_v41  ;;  %v4433_v1 = vld [vmem:[%s5116_s23 + $0x388] sm:$0xff]   ;;  %v4362_v15 = vld [vmem:[%s5116_s23 + $0x150] sm:$0xff]  }
  0x2d   : > { %v4527_v6 = vpop.eup %4526  ;;  %4538 = vtanh.f32 %v3904_v16 }
  0x2e   : > { %3633 = vmatmul.msk.bf16.gmra.mxu1 %vm1208_vm0, %v1073_v49  ;;  %v4529_v8 = vpop.eup %4528  ;;  %v1110_v14 = vpack.c.bf16 %v4527_v6, %v4525_v4  ;;  %4540 = vtanh.f32 %v4047_v19  ;;  %v4056_v4 = vunpack.c.h.bf16 %v4397_v61  ;;  %v4200_v6 = vunpack.c.h.bf16 %v4433_v1 }
  0x2f   : > { %v4531_v11 = vpop.eup %4530  ;;  %4542 = vtanh.f32 %v4048_v20 }
  0x30   : > { %3669 = vmatmul.msk.bf16.gmra.mxu2 %vm1208_vm0, %v1109_v54  ;;  %v1146_v18 = vpack.c.bf16 %v4531_v11, %v4529_v8  ;;  %v4533_v23 = vpop.eup %4532  ;;  %4544 = vtanh.f32 %v4191_v21  ;;  %v4326_v11 = vld [vmem:[%s5116_s23 + $0x30] sm:$0xff]  }
  0x31   : > { %v4535_v24 = vpop.eup %4534  ;;  %4546 = vtanh.f32 %v4192_v22  ;;  %v3772_v20 = vunpack.c.h.bf16 %v4326_v11  ;;  %v4398_v21 = vld [vmem:[%s5116_s23 + $0x270] sm:$0xff]  }
  0x32   : > { %3705 = vmatmul.msk.bf16.gmra.mxu3 %vm1208_vm0, %v1145_v58  ;;  %v4537_v25 = vpop.eup %4536  ;;  %v1039_v29 = vpack.c.bf16 %v4535_v24, %v4533_v23  ;;  %4548 = vtanh.f32 %v3763_v34  ;;  %v3767_v58 = vunpack.c.l.bf16 %v4325_v51  ;;  %v3915_v23 = vunpack.c.l.bf16 %v4362_v15 }
  0x33   : > { %v4539_v26 = vpop.eup %4538  ;;  %4550 = vtanh.f32 %v3764_v36  ;;  %v3916_v24 = vunpack.c.h.bf16 %v4362_v15  ;;  %v4059_v27 = vunpack.c.l.bf16 %v4398_v21 }
  0x34   : > { %v4541_v28 = vpop.eup %4540  ;;  %v1075_v33 = vpack.c.bf16 %v4539_v26, %v4537_v25  ;;  %4552 = vtanh.f32 %v3907_v39  ;;  %v4434_v25 = vld [vmem:[%s5116_s23 + $0x390] sm:$0xff]   ;;  %v4363_v39 = vld [vmem:[%s5116_s23 + $0x158] sm:$0xff]  }
  0x35   : > { %v4543_v30 = vpop.eup %4542  ;;  %4554 = vtanh.f32 %v3908_v40 }
  0x36   : > { %v4545_v32 = vpop.eup %4544  ;;  %v1111_v38 = vpack.c.bf16 %v4543_v30, %v4541_v28  ;;  %4556 = vtanh.f32 %v4051_v43  ;;  %v4060_v28 = vunpack.c.h.bf16 %v4398_v21  ;;  %v4204_v30 = vunpack.c.h.bf16 %v4434_v25 }
  0x37   : > { %v4547_v35 = vpop.eup %4546  ;;  %4558 = vtanh.f32 %v4052_v44 }
  0x38   : > { %v1147_v42 = vpack.c.bf16 %v4547_v35, %v4545_v32  ;;  %v4549_v47 = vpop.eup %4548  ;;  %4560 = vtanh.f32 %v4195_v45  ;;  %v4327_v35 = vld [vmem:[%s5116_s23 + $0x38] sm:$0xff]  }
  0x39   : > { %v4551_v48 = vpop.eup %4550  ;;  %4562 = vtanh.f32 %v4196_v46  ;;  %v3776_v44 = vunpack.c.h.bf16 %v4327_v35  ;;  %v4399_v45 = vld [vmem:[%s5116_s23 + $0x278] sm:$0xff]  }
  0x3a   : > { %v4553_v49 = vpop.eup %4552  ;;  %v1040_v53 = vpack.c.bf16 %v4551_v48, %v4549_v47  ;;  %4564 = vtanh.f32 %v3767_v58  ;;  %v3919_v47 = vunpack.c.l.bf16 %v4363_v39  ;;  %v3920_v48 = vunpack.c.h.bf16 %v4363_v39  ;;  %v4328_v58 = vld [vmem:[%s5116_s23 + $0x40] sm:$0xff]  }
  0x3b   : > { %v4555_v50 = vpop.eup %4554  ;;  %4566 = vtanh.f32 %v3768_v60  ;;  %v4063_v51 = vunpack.c.l.bf16 %v4399_v45 }
  0x3c   : > { %3598 = vmatmul.msk.bf16.gmra.mxu0 %vm1208_vm0, %v1038_v5  ;;  %v4557_v52 = vpop.eup %4556  ;;  %v1076_v57 = vpack.c.bf16 %v4555_v50, %v4553_v49  ;;  %4568 = vtanh.f32 %v3911_v63  ;;  %v4199_v5 = vunpack.c.l.bf16 %v4433_v1  ;;  %v4435_v49 = vld [vmem:[%s5116_s23 + $0x398] sm:$0xff]  }
  0x3d   : > { %v4559_v54 = vpop.eup %4558  ;;  %4570 = vtanh.f32 %v3912_v0  ;;  %v3779_v0 = vunpack.c.l.bf16 %v4328_v58 }
  0x3e   : > { %3634 = vmatmul.msk.bf16.gmra.mxu1 %vm1208_vm0, %v1074_v9  ;;  %v4561_v56 = vpop.eup %4560  ;;  %v1112_v62 = vpack.c.bf16 %v4559_v54, %v4557_v52  ;;  %4572 = vtanh.f32 %v4055_v3  ;;  %v4064_v52 = vunpack.c.h.bf16 %v4399_v45  ;;  %v4208_v54 = vunpack.c.h.bf16 %v4435_v49 }
  0x3f   : > { %v4563_v59 = vpop.eup %4562  ;;  %4574 = vtanh.f32 %v4056_v4  ;;  %v3780_v3 = vunpack.c.h.bf16 %v4328_v58  ;;  %v4400_v4 = vld [vmem:[%s5116_s23 + $0x280] sm:$0xff]  }
  0x40   : > { %3670 = vmatmul.msk.bf16.gmra.mxu2 %vm1208_vm0, %v1110_v14  ;;  %v1148_v2 = vpack.c.bf16 %v4563_v59, %v4561_v56  ;;  %v4565_v7 = vpop.eup %4564  ;;  %4576 = vtanh.f32 %v4199_v5 }
  0x41   : > { %v4567_v8 = vpop.eup %4566  ;;  %4578 = vtanh.f32 %v4200_v6 }
  0x42   : > { %3706 = vmatmul.msk.bf16.gmra.mxu3 %vm1208_vm0, %v1146_v18  ;;  %v4569_v9 = vpop.eup %4568  ;;  %v1041_v13 = vpack.c.bf16 %v4567_v8, %v4565_v7  ;;  %v3771_v18 = vunpack.c.l.bf16 %v4326_v11 }
  0x43   : > { %v4571_v10 = vpop.eup %4570 }
  0x44   : > { %v4573_v12 = vpop.eup %4572  ;;  %v1077_v17 = vpack.c.bf16 %v4571_v10, %v4569_v9  ;;  %4580 = vtanh.f32 %v3771_v18  ;;  %v4436_v9 = vld [vmem:[%s5116_s23 + $0x3a0] sm:$0xff]   ;;  %v4067_v10 = vunpack.c.l.bf16 %v4400_v4  ;;  %v4329_v18 = vld [vmem:[%s5116_s23 + $0x48] sm:$0xff]  }
  0x45   : > { %v4575_v14 = vpop.eup %4574  ;;  %4582 = vtanh.f32 %v3772_v20  ;;  %v5190_v20 = vld [vmem:[%s6182_s2] ss:$0 sm:$0xff] }
  0x46   : > { %v4577_v16 = vpop.eup %4576  ;;  %v1113_v22 = vpack.c.bf16 %v4575_v14, %v4573_v12  ;;  %4584 = vtanh.f32 %v3915_v23  ;;  %v4068_v12 = vunpack.c.h.bf16 %v4400_v4  ;;  %v4212_v14 = vunpack.c.h.bf16 %v4436_v9 }
  0x47   : > { %v4579_v19 = vpop.eup %4578  ;;  %4586 = vtanh.f32 %v3916_v24 }
  0x48   : > { %v1149_v26 = vpack.c.bf16 %v4579_v19, %v4577_v16  ;;  %4588 = vtanh.f32 %v4059_v27 }
  0x49   : > { %4590 = vtanh.f32 %v4060_v28 }
  0x4a   : > { %v4581_v31 = vpop.eup %4580 }
  0x4b   : > { %v4583_v32 = vpop.eup %4582 }
  0x4c   : > { %3599 = vmatmul.msk.bf16.gmra.mxu0 %vm1208_vm0, %v1039_v29  ;;  %v4203_v29 = vunpack.c.l.bf16 %v4434_v25  ;;  %v1042_v37 = vpack.c.bf16 %v4583_v32, %v4581_v31  ;;  %v3783_v25 = vunpack.c.l.bf16 %v4329_v18 }
  0x4e   : > { %3635 = vmatmul.msk.bf16.gmra.mxu1 %vm1208_vm0, %v1075_v33  ;;  %4592 = vtanh.f32 %v4203_v29  ;;  %v4585_v33 = vpop.eup %4584  ;;  %v3784_v29 = vunpack.c.h.bf16 %v4329_v18  ;;  %v4438_v18 = vld [vmem:[%s5116_s23 + $0x3b0] sm:$0xff]  }
  0x4f   : > { %4594 = vtanh.f32 %v4204_v30  ;;  %v4587_v34 = vpop.eup %4586 }
  0x50   : > { %3671 = vmatmul.msk.bf16.gmra.mxu2 %vm1208_vm0, %v1111_v38  ;;  %v4589_v36 = vpop.eup %4588  ;;  %v1078_v41 = vpack.c.bf16 %v4587_v34, %v4585_v33  ;;  %v4437_v34 = vld [vmem:[%s5116_s23 + $0x3a8] sm:$0xff]  }
  0x51   : > { %v4591_v38 = vpop.eup %4590 }
  0x52   : > { %3707 = vmatmul.msk.bf16.gmra.mxu3 %vm1208_vm0, %v1147_v42  ;;  %v3775_v42 = vunpack.c.l.bf16 %v4327_v35  ;;  %v1114_v46 = vpack.c.bf16 %v4591_v38, %v4589_v36 }
  0x54   : > { %v4593_v40 = vpop.eup %4592  ;;  %4596 = vtanh.f32 %v3775_v42 }
  0x55   : > { %v4595_v43 = vpop.eup %4594  ;;  %4598 = vtanh.f32 %v3776_v44 }
  0x56   : > { %v1150_v50 = vpack.c.bf16 %v4595_v43, %v4593_v40  ;;  %4600 = vtanh.f32 %v3919_v47  ;;  %v4215_v43 = vunpack.c.l.bf16 %v4437_v34 }
  0x57   : > { %4602 = vtanh.f32 %v3920_v48 }
  0x58   : > { %4604 = vtanh.f32 %v4063_v51  ;;  %v4330_v51 = vld [vmem:[%s5116_s23 + $0x50] sm:$0xff]  }
  0x59   : > { %4606 = vtanh.f32 %v4064_v52 }
  0x5a   : > { %v4597_v55 = vpop.eup %4596 }
  0x5b   : > { %v4599_v56 = vpop.eup %4598 }
  0x5c   : > { %3600 = vmatmul.msk.bf16.gmra.mxu0 %vm1208_vm0, %v1040_v53  ;;  %v4207_v53 = vunpack.c.l.bf16 %v4435_v49  ;;  %v1043_v61 = vpack.c.bf16 %v4599_v56, %v4597_v55 }
  0x5e   : > { %3636 = vmatmul.msk.bf16.gmra.mxu1 %vm1208_vm0, %v1076_v57  ;;  %4608 = vtanh.f32 %v4207_v53  ;;  %v4601_v57 = vpop.eup %4600 }
  0x5f   : > { %4610 = vtanh.f32 %v4208_v54  ;;  %v4603_v59 = vpop.eup %4602 }
  0x60   : > { %3672 = vmatmul.msk.bf16.gmra.mxu2 %vm1208_vm0, %v1112_v62  ;;  %v4605_v60 = vpop.eup %4604  ;;  %v4364_v62 = vld [vmem:[%s5116_s23 + $0x160] sm:$0xff]   ;;  %4612 = vtanh.f32 %v3779_v0 }
  0x61   : > { %v4607_v63 = vpop.eup %4606  ;;  %v3923_v6 = vunpack.c.l.bf16 %v4364_v62  ;;  %v3924_v8 = vunpack.c.h.bf16 %v4364_v62  ;;  %4614 = vtanh.f32 %v3780_v3 }
  0x62   : > { %3708 = vmatmul.msk.bf16.gmra.mxu3 %vm1208_vm0, %v1148_v2  ;;  %v1079_v2 = vpack.c.bf16 %v4603_v59, %v4601_v57  ;;  %v1115_v7 = vpack.c.bf16 %v4607_v63, %v4605_v60 }
  0x63   : > { %4616 = vtanh.f32 %v3923_v6 }
  0x64   : > { %v4609_v1 = vpop.eup %4608  ;;  %4618 = vtanh.f32 %v3924_v8 }
  0x65   : > { %v4611_v5 = vpop.eup %4610  ;;  %4620 = vtanh.f32 %v4067_v10  ;;  %v4402_v10 = vld [vmem:[%s5116_s23 + $0x290] sm:$0xff]  }
  0x66   : > { %v1151_v11 = vpack.c.bf16 %v4611_v5, %v4609_v1  ;;  %4622 = vtanh.f32 %v4068_v12  ;;  %v4613_v15 = vpop.eup %4612  ;;  %v3788_v5 = vunpack.c.h.bf16 %v4330_v51 }
  0x67   : > { %v4615_v16 = vpop.eup %4614 }
  0x68   : > { %v1044_v24 = vpack.c.bf16 %v4615_v16, %v4613_v15 }
  0x6c   : > { %3601 = vmatmul.msk.bf16.gmra.mxu0 %vm1208_vm0, %v1041_v13  ;;  %v4211_v13 = vunpack.c.l.bf16 %v4436_v9 }
  0x6e   : > { %3637 = vmatmul.msk.bf16.gmra.mxu1 %vm1208_vm0, %v1077_v17  ;;  %4624 = vtanh.f32 %v4211_v13  ;;  %v4617_v17 = vpop.eup %4616 }
  0x6f   : > { %4626 = vtanh.f32 %v4212_v14  ;;  %v4619_v19 = vpop.eup %4618 }
  0x70   : > { %3673 = vmatmul.msk.bf16.gmra.mxu2 %vm1208_vm0, %v1113_v22  ;;  %v4621_v21 = vpop.eup %4620  ;;  %v4365_v22 = vld [vmem:[%s5116_s23 + $0x168] sm:$0xff]   ;;  %v1080_v32 = vpack.c.bf16 %v4619_v19, %v4617_v17  ;;  %4628 = vtanh.f32 %v3783_v25 }
  0x71   : > { %v4623_v23 = vpop.eup %4622  ;;  %v3927_v33 = vunpack.c.l.bf16 %v4365_v22  ;;  %4630 = vtanh.f32 %v3784_v29 }
  0x72   : > { %3709 = vmatmul.msk.bf16.gmra.mxu3 %vm1208_vm0, %v1149_v26  ;;  %v4401_v26 = vld [vmem:[%s5116_s23 + $0x288] sm:$0xff]   ;;  %v1116_v36 = vpack.c.bf16 %v4623_v23, %v4621_v21 }
  0x73   : > { %v4071_v38 = vunpack.c.l.bf16 %v4401_v26  ;;  %v4072_v42 = vunpack.c.h.bf16 %v4401_v26  ;;  %4632 = vtanh.f32 %v3927_v33 }
  0x74   : > { %v4625_v27 = vpop.eup %4624 }
  0x75   : > { %v4627_v30 = vpop.eup %4626 }
  0x76   : > { %v4629_v49 = vpop.eup %4628 }
  0x77   : > { %v4631_v52 = vpop.eup %4630 }
  0x78   : > { %v1045_v9 = vpack.c.bf16 %v4631_v52, %v4629_v49 }
  0x79   : > { %v4633_v55 = vpop.eup %4632 }
  0x7c   : > { %3602 = vmatmul.msk.bf16.gmra.mxu0 %vm1208_vm0, %v1042_v37  ;;  %v3928_v37 = vunpack.c.h.bf16 %v4365_v22 }
  0x7e   : > { %3638 = vmatmul.msk.bf16.gmra.mxu1 %vm1208_vm0, %v1078_v41  ;;  %v1152_v41 = vpack.c.bf16 %v4627_v30, %v4625_v27  ;;  %4634 = vtanh.f32 %v3928_v37  ;;  %v4076_v30 = vunpack.c.h.bf16 %v4402_v10 }
  0x7f   : > { %4636 = vtanh.f32 %v4071_v38 }
  0x80   : > { %3674 = vmatmul.msk.bf16.gmra.mxu2 %vm1208_vm0, %v1114_v46  ;;  %v4216_v46 = vunpack.c.h.bf16 %v4437_v34  ;;  %4638 = vtanh.f32 %v4072_v42 }
  0x81   : > { %4640 = vtanh.f32 %v4215_v43 }
  0x82   : > { %3710 = vmatmul.msk.bf16.gmra.mxu3 %vm1208_vm0, %v1150_v50  ;;  %4642 = vtanh.f32 %v4216_v46 }
  0x84   : > { %v4635_v59 = vpop.eup %4634 }
  0x85   : > { %v4637_v62 = vpop.eup %4636  ;;  %v1081_v17 = vpack.c.bf16 %v4635_v59, %v4633_v55  ;;  %v4367_v59 = vld [vmem:[%s5116_s23 + $0x178] sm:$0xff]  }
  0x86   : > { %v4639_v3 = vpop.eup %4638 }
  0x87   : > { %v4641_v6 = vpop.eup %4640  ;;  %v1117_v22 = vpack.c.bf16 %v4639_v3, %v4637_v62  ;;  %v4403_v3 = vld [vmem:[%s5116_s23 + $0x298] sm:$0xff]  }
  0x8c   : > { %3603 = vmatmul.msk.bf16.gmra.mxu0 %vm1208_vm0, %v1043_v61  ;;  %v3787_v61 = vunpack.c.l.bf16 %v4330_v51 }
  0x8e   : > { %3639 = vmatmul.msk.bf16.gmra.mxu1 %vm1208_vm0, %v1079_v2  ;;  %v4366_v2 = vld [vmem:[%s5116_s23 + $0x170] sm:$0xff]   ;;  %4644 = vtanh.f32 %v3787_v61 }
  0x8f   : > { %v3931_v14 = vunpack.c.l.bf16 %v4366_v2  ;;  %4646 = vtanh.f32 %v3788_v5  ;;  %v3932_v23 = vunpack.c.h.bf16 %v4366_v2 }
  0x90   : > { %3675 = vmatmul.msk.bf16.gmra.mxu2 %vm1208_vm0, %v1115_v7 }
  0x91   : > { %4648 = vtanh.f32 %v3931_v14 }
  0x92   : > { %3711 = vmatmul.msk.bf16.gmra.mxu3 %vm1208_vm0, %v1151_v11  ;;  %v4643_v11 = vpop.eup %4642  ;;  %4650 = vtanh.f32 %v3932_v23  ;;  %v4080_v23 = vunpack.c.h.bf16 %v4403_v3 }
  0x93   : > { %v1153_v29 = vpack.c.bf16 %v4643_v11, %v4641_v6  ;;  %v4439_v11 = vld [vmem:[%s5116_s23 + $0x3b8] sm:$0xff]  }
  0x94   : > { %v5228_v37 = vpop.eup %4644 }
  0x99   : > { %v1650_v28 = vpop.f32.mrf.mxu0 }
  0x9a   : > { %v1651_v31 = vadd.f32 %v5190_v20, %v1650_v28 }
  0x9b   : > { %v1830_v35 = vpop.f32.mrf.mxu1 }
  0x9c   : > { %vm2370_vm1 = vcmp.ge.f32.partialorder %v1651_v31, 0.0  ;;  %v2658_v39 = vmul.f32 0.2, %v1651_v31  ;;  %v1831_v40 = vadd.f32 %v5190_v20, %v1830_v35  ;;  %3604 = vmatmul.msk.bf16.gmra.mxu0 %vm1208_vm0, %v1044_v24  ;;  %v4075_v24 = vunpack.c.l.bf16 %v4402_v10 }
  0x9e   : > { %v2946_v44 = vsel %vm2370_vm1, %v1651_v31, %v2658_v39  ;;  %vm2442_vm2 = vcmp.ge.f32.partialorder %v1831_v40, 0.0  ;;  %v2730_v45 = vmul.f32 0.2, %v1831_v40  ;;  %3640 = vmatmul.msk.bf16.gmra.mxu1 %vm1208_vm0, %v1080_v32  ;;  %v4219_v31 = vunpack.c.l.bf16 %v4438_v18 }
  0x9f   : > { %3234 = vst [vmem:[%s5200_s29] sm:$0xff] %v2946_v44  ;;  %4652 = vtanh.f32 %v4075_v24  ;;  %v4223_v24 = vunpack.c.l.bf16 %v4439_v11 }
  0xa0   : > { %v3018_v47 = vsel %vm2442_vm2, %v1831_v40, %v2730_v45  ;;  %3676 = vmatmul.msk.bf16.gmra.mxu2 %vm1208_vm0, %v1116_v36  ;;  %v4220_v36 = vunpack.c.h.bf16 %v4438_v18  ;;  %v5231_v40 = vpop.eup %4646  ;;  %4654 = vtanh.f32 %v4076_v30  ;;  %v4331_v45 = vld [vmem:[%s5116_s23 + $0x58] sm:$0xff]  }
  0xa1   : > { %3306 = vst [vmem:[%s5200_s29 + $0x240] sm:$0xff] %v3018_v47  ;;  %v1652_v48 = vpop.f32.mrf.mxu0  ;;  %4656 = vtanh.f32 %v4219_v31  ;;  %v4649_v46 = vpop.eup %4648  ;;  %v3792_v62 = vunpack.c.h.bf16 %v4331_v45  ;;  %v1046_v2 = vpack.c.bf16 %v5231_v40, %v5228_v37 }
  0xa2   : > { %3712 = vmatmul.msk.bf16.gmra.mxu3 %vm1208_vm0, %v1152_v41  ;;  %v1653_v50 = vadd.f32 %v5190_v20, %v1652_v48  ;;  %4658 = vtanh.f32 %v4220_v36  ;;  %v4651_v52 = vpop.eup %4650 }
  0xa3   : > { %v2010_v53 = vpop.f32.mrf.mxu2  ;;  %v1832_v54 = vpop.f32.mrf.mxu1  ;;  %v1082_v10 = vpack.c.bf16 %v4651_v52, %v4649_v46  ;;  %v4368_v52 = vld [vmem:[%s5116_s23 + $0x180] sm:$0xff]  }
  0xa4   : > { %v2011_v56 = vadd.f32 %v5190_v20, %v2010_v53  ;;  %vm2371_vm3 = vcmp.ge.f32.partialorder %v1653_v50, 0.0  ;;  %v2659_v57 = vmul.f32 0.2, %v1653_v50  ;;  %v1833_v58 = vadd.f32 %v5190_v20, %v1832_v54 }
  0xa5   : > { %v2190_v60 = vpop.f32.mrf.mxu3  ;;  %v3791_v54 = vunpack.c.l.bf16 %v4331_v45  ;;  %v4653_v55 = vpop.eup %4652 }
  0xa6   : > { %vm2514_vm4 = vcmp.ge.f32.partialorder %v2011_v56, 0.0  ;;  %v2802_v63 = vmul.f32 0.2, %v2011_v56  ;;  %v2191_v0 = vadd.f32 %v5190_v20, %v2190_v60  ;;  %v2947_v1 = vsel %vm2371_vm3, %v1653_v50, %v2659_v57  ;;  %v4655_v60 = vpop.eup %4654 }
  0xa7   : > { %3235 = vst [vmem:[%s5200_s29 + $0x8] sm:$0xff] %v2947_v1  ;;  %vm2443_vm5 = vcmp.ge.f32.partialorder %v1833_v58, 0.0  ;;  %v2731_v4 = vmul.f32 0.2, %v1833_v58  ;;  %4660 = vtanh.f32 %v3791_v54  ;;  %v1118_v14 = vpack.c.bf16 %v4655_v60, %v4653_v55  ;;  %v4404_v60 = vld [vmem:[%s5116_s23 + $0x2a0] sm:$0xff]  }
  0xa8   : > { %v3090_v7 = vsel %vm2514_vm4, %v2011_v56, %v2802_v63  ;;  %vm2586_vm6 = vcmp.ge.f32.partialorder %v2191_v0, 0.0  ;;  %v2874_v8 = vmul.f32 0.2, %v2191_v0  ;;  %v4657_v63 = vpop.eup %4656  ;;  %4662 = vtanh.f32 %v3792_v62 }
  0xa9   : > { %3378 = vst [vmem:[%s5200_s29 + $0x480] sm:$0xff] %v3090_v7  ;;  %v3019_v12 = vsel %vm2443_vm5, %v1833_v58, %v2731_v4  ;;  %v1655_v13 = vpop.f32.mrf.mxu0  ;;  %v4659_v4 = vpop.eup %4658  ;;  %v3935_v7 = vunpack.c.l.bf16 %v4367_v59 }
  0xaa   : > { %v3162_v15 = vsel %vm2586_vm6, %v2191_v0, %v2874_v8  ;;  %3307 = vst [vmem:[%s5200_s29 + $0x248] sm:$0xff] %v3019_v12  ;;  %v1656_v16 = vadd.f32 %v5190_v20, %v1655_v13 }
  0xab   : > { %3450 = vst [vmem:[%s5200_s29 + $0x6c0] sm:$0xff] %v3162_v15  ;;  %v2012_v19 = vpop.f32.mrf.mxu2  ;;  %v1835_v21 = vpop.f32.mrf.mxu1  ;;  %v3936_v15 = vunpack.c.h.bf16 %v4367_v59  ;;  %4664 = vtanh.f32 %v3935_v7 }
  0xac   : > { %v2013_v25 = vadd.f32 %v5190_v20, %v2012_v19  ;;  %vm2372_vm7 = vcmp.ge.f32.partialorder %v1656_v16, 0.0  ;;  %v2660_v26 = vmul.f32 0.2, %v1656_v16  ;;  %v1836_v27 = vadd.f32 %v5190_v20, %v1835_v21  ;;  %3605 = vmatmul.msk.bf16.gmra.mxu0 %vm1208_vm0, %v1045_v9 }
  0xad   : > { %v2192_v28 = vpop.f32.mrf.mxu3  ;;  %4666 = vtanh.f32 %v3936_v15  ;;  %v5258_v30 = vpop.eup %4660  ;;  %v4084_v15 = vunpack.c.h.bf16 %v4404_v60 }
  0xae   : > { %vm2515_vm8 = vcmp.ge.f32.partialorder %v2013_v25, 0.0  ;;  %v2803_v32 = vmul.f32 0.2, %v2013_v25  ;;  %v2193_v33 = vadd.f32 %v5190_v20, %v2192_v28  ;;  %v2948_v34 = vsel %vm2372_vm7, %v1656_v16, %v2660_v26  ;;  %3641 = vmatmul.msk.bf16.gmra.mxu1 %vm1208_vm0, %v1081_v17 }
  0xaf   : > { %3236 = vst [vmem:[%s5200_s29 + $0x10] sm:$0xff] %v2948_v34  ;;  %vm2444_vm9 = vcmp.ge.f32.partialorder %v1836_v27, 0.0  ;;  %v2732_v35 = vmul.f32 0.2, %v1836_v27  ;;  %v4079_v16 = vunpack.c.l.bf16 %v4403_v3 }
  0xb0   : > { %v3091_v38 = vsel %vm2515_vm8, %v2013_v25, %v2803_v32  ;;  %vm2587_vm10 = vcmp.ge.f32.partialorder %v2193_v33, 0.0  ;;  %v2875_v39 = vmul.f32 0.2, %v2193_v33  ;;  %3677 = vmatmul.msk.bf16.gmra.mxu2 %vm1208_vm0, %v1117_v22  ;;  %v1154_v22 = vpack.c.bf16 %v4659_v4, %v4657_v63  ;;  %v4440_v4 = vld [vmem:[%s5116_s23 + $0x3c0] sm:$0xff]  }
  0xb1   : > { %3379 = vst [vmem:[%s5200_s29 + $0x488] sm:$0xff] %v3091_v38  ;;  %v3020_v41 = vsel %vm2444_vm9, %v1836_v27, %v2732_v35  ;;  %v1657_v42 = vpop.f32.mrf.mxu0  ;;  %4668 = vtanh.f32 %v4079_v16  ;;  %v4332_v38 = vld [vmem:[%s5116_s23 + $0x60] sm:$0xff]   ;;  %v4227_v16 = vunpack.c.l.bf16 %v4440_v4 }
  0xb2   : > { %v3163_v43 = vsel %vm2587_vm10, %v2193_v33, %v2875_v39  ;;  %3308 = vst [vmem:[%s5200_s29 + $0x250] sm:$0xff] %v3020_v41  ;;  %3713 = vmatmul.msk.bf16.gmra.mxu3 %vm1208_vm0, %v1153_v29  ;;  %v1658_v44 = vadd.f32 %v5190_v20, %v1657_v42  ;;  %v4224_v29 = vunpack.c.h.bf16 %v4439_v11  ;;  %v5261_v33 = vpop.eup %4662  ;;  %4670 = vtanh.f32 %v4080_v23 }
  0xb3   : > { %3451 = vst [vmem:[%s5200_s29 + $0x6c8] sm:$0xff] %v3163_v43  ;;  %v2015_v47 = vpop.f32.mrf.mxu2  ;;  %v1837_v48 = vpop.f32.mrf.mxu1  ;;  %4672 = vtanh.f32 %v4223_v24  ;;  %v3796_v55 = vunpack.c.h.bf16 %v4332_v38  ;;  %v1047_v59 = vpack.c.bf16 %v5261_v33, %v5258_v30 }
  0xb4   : > { %v2016_v49 = vadd.f32 %v5190_v20, %v2015_v47  ;;  %vm2373_vm11 = vcmp.ge.f32.partialorder %v1658_v44, 0.0  ;;  %v2661_v50 = vmul.f32 0.2, %v1658_v44  ;;  %v1838_v51 = vadd.f32 %v5190_v20, %v1837_v48  ;;  %v4665_v39 = vpop.eup %4664 }
  0xb5   : > { %v2195_v53 = vpop.f32.mrf.mxu3  ;;  %4674 = vtanh.f32 %v4224_v29  ;;  %v4667_v45 = vpop.eup %4666  ;;  %v3795_v47 = vunpack.c.l.bf16 %v4332_v38 }
  0xb6   : > { %vm2516_vm12 = vcmp.ge.f32.partialorder %v2016_v49, 0.0  ;;  %v2804_v56 = vmul.f32 0.2, %v2016_v49  ;;  %v2196_v57 = vadd.f32 %v5190_v20, %v2195_v53  ;;  %v2949_v58 = vsel %vm2373_vm11, %v1658_v44, %v2661_v50 }
  0xb7   : > { %3237 = vst [vmem:[%s5200_s29 + $0x18] sm:$0xff] %v2949_v58  ;;  %vm2445_vm13 = vcmp.ge.f32.partialorder %v1838_v51, 0.0  ;;  %v2733_v61 = vmul.f32 0.2, %v1838_v51  ;;  %v4669_v48 = vpop.eup %4668  ;;  %v1083_v3 = vpack.c.bf16 %v4667_v45, %v4665_v39  ;;  %4676 = vtanh.f32 %v3795_v47  ;;  %v4369_v45 = vld [vmem:[%s5116_s23 + $0x188] sm:$0xff]  }
  0xb8   : > { %v3092_v0 = vsel %vm2516_vm12, %v2016_v49, %v2804_v56  ;;  %vm2588_vm14 = vcmp.ge.f32.partialorder %v2196_v57, 0.0  ;;  %v2876_v1 = vmul.f32 0.2, %v2196_v57  ;;  %v4671_v53 = vpop.eup %4670  ;;  %4678 = vtanh.f32 %v3796_v55 }
  0xb9   : > { %3380 = vst [vmem:[%s5200_s29 + $0x490] sm:$0xff] %v3092_v0  ;;  %v3021_v5 = vsel %vm2445_vm13, %v1838_v51, %v2733_v61  ;;  %v1660_v6 = vpop.f32.mrf.mxu0  ;;  %v4673_v56 = vpop.eup %4672  ;;  %v3939_v0 = vunpack.c.l.bf16 %v4368_v52  ;;  %v1119_v7 = vpack.c.bf16 %v4671_v53, %v4669_v48  ;;  %v4405_v53 = vld [vmem:[%s5116_s23 + $0x2a8] sm:$0xff]  }
  0xba   : > { %v3164_v8 = vsel %vm2588_vm14, %v2196_v57, %v2876_v1  ;;  %3309 = vst [vmem:[%s5200_s29 + $0x258] sm:$0xff] %v3021_v5  ;;  %v1661_v9 = vadd.f32 %v5190_v20, %v1660_v6 }
  0xbb   : > { %3452 = vst [vmem:[%s5200_s29 + $0x6d0] sm:$0xff] %v3164_v8  ;;  %v2017_v12 = vpop.f32.mrf.mxu2  ;;  %v1840_v13 = vpop.f32.mrf.mxu1  ;;  %v3940_v8 = vunpack.c.h.bf16 %v4368_v52  ;;  %4680 = vtanh.f32 %v3939_v0 }
  0xbc   : > { %v2018_v17 = vadd.f32 %v5190_v20, %v2017_v12  ;;  %vm2374_vm15 = vcmp.ge.f32.partialorder %v1661_v9, 0.0  ;;  %v2662_v18 = vmul.f32 0.2, %v1661_v9  ;;  %v1841_v19 = vadd.f32 %v5190_v20, %v1840_v13  ;;  %3606 = vmatmul.msk.bf16.gmra.mxu0 %vm1208_vm0, %v1046_v2  ;;  %v4675_v61 = vpop.eup %4674 }
  0xbd   : > { %v2197_v21 = vpop.f32.mrf.mxu3  ;;  %4682 = vtanh.f32 %v3940_v8  ;;  %v5288_v23 = vpop.eup %4676  ;;  %v4088_v8 = vunpack.c.h.bf16 %v4405_v53 }
  0xbe   : > { %vm2517_vm1 = vcmp.ge.f32.partialorder %v2018_v17, 0.0  ;;  %v2805_v25 = vmul.f32 0.2, %v2018_v17  ;;  %v2198_v26 = vadd.f32 %v5190_v20, %v2197_v21  ;;  %v2950_v27 = vsel %vm2374_vm15, %v1661_v9, %v2662_v18  ;;  %3642 = vmatmul.msk.bf16.gmra.mxu1 %vm1208_vm0, %v1082_v10 }
  0xbf   : > { %3238 = vst [vmem:[%s5200_s29 + $0x20] sm:$0xff] %v2950_v27  ;;  %vm2446_vm2 = vcmp.ge.f32.partialorder %v1841_v19, 0.0  ;;  %v2734_v28 = vmul.f32 0.2, %v1841_v19  ;;  %v4083_v9 = vunpack.c.l.bf16 %v4404_v60 }
  0xc0   : > { %v3093_v31 = vsel %vm2517_vm1, %v2018_v17, %v2805_v25  ;;  %vm2589_vm3 = vcmp.ge.f32.partialorder %v2198_v26, 0.0  ;;  %v2877_v32 = vmul.f32 0.2, %v2198_v26  ;;  %3678 = vmatmul.msk.bf16.gmra.mxu2 %vm1208_vm0, %v1118_v14  ;;  %v1155_v14 = vpack.c.bf16 %v4675_v61, %v4673_v56  ;;  %v4441_v61 = vld [vmem:[%s5116_s23 + $0x3c8] sm:$0xff]  }
  0xc1   : > { %3381 = vst [vmem:[%s5200_s29 + $0x498] sm:$0xff] %v3093_v31  ;;  %v3022_v34 = vsel %vm2446_vm2, %v1841_v19, %v2734_v28  ;;  %v1662_v35 = vpop.f32.mrf.mxu0  ;;  %4684 = vtanh.f32 %v4083_v9  ;;  %v4333_v31 = vld [vmem:[%s5116_s23 + $0x68] sm:$0xff]   ;;  %v4231_v9 = vunpack.c.l.bf16 %v4441_v61 }
  0xc2   : > { %v3165_v36 = vsel %vm2589_vm3, %v2198_v26, %v2877_v32  ;;  %3310 = vst [vmem:[%s5200_s29 + $0x260] sm:$0xff] %v3022_v34  ;;  %3714 = vmatmul.msk.bf16.gmra.mxu3 %vm1208_vm0, %v1154_v22  ;;  %v1663_v37 = vadd.f32 %v5190_v20, %v1662_v35  ;;  %v4228_v22 = vunpack.c.h.bf16 %v4440_v4  ;;  %v5291_v26 = vpop.eup %4678  ;;  %4686 = vtanh.f32 %v4084_v15 }
  0xc3   : > { %3453 = vst [vmem:[%s5200_s29 + $0x6d8] sm:$0xff] %v3165_v36  ;;  %v2020_v40 = vpop.f32.mrf.mxu2  ;;  %v1842_v41 = vpop.f32.mrf.mxu1  ;;  %4688 = vtanh.f32 %v4227_v16  ;;  %v3800_v48 = vunpack.c.h.bf16 %v4333_v31  ;;  %v1048_v52 = vpack.c.bf16 %v5291_v26, %v5288_v23 }
  0xc4   : > { %v2021_v42 = vadd.f32 %v5190_v20, %v2020_v40  ;;  %vm2375_vm4 = vcmp.ge.f32.partialorder %v1663_v37, 0.0  ;;  %v2663_v43 = vmul.f32 0.2, %v1663_v37  ;;  %v1843_v44 = vadd.f32 %v5190_v20, %v1842_v41  ;;  %v4681_v32 = vpop.eup %4680 }
  0xc5   : > { %v2200_v46 = vpop.f32.mrf.mxu3  ;;  %4690 = vtanh.f32 %v4228_v22  ;;  %v4683_v38 = vpop.eup %4682  ;;  %v3799_v40 = vunpack.c.l.bf16 %v4333_v31 }
  0xc6   : > { %vm2518_vm5 = vcmp.ge.f32.partialorder %v2021_v42, 0.0  ;;  %v2806_v49 = vmul.f32 0.2, %v2021_v42  ;;  %v2201_v50 = vadd.f32 %v5190_v20, %v2200_v46  ;;  %v2951_v51 = vsel %vm2375_vm4, %v1663_v37, %v2663_v43 }
  0xc7   : > { %3239 = vst [vmem:[%s5200_s29 + $0x28] sm:$0xff] %v2951_v51  ;;  %vm2447_vm6 = vcmp.ge.f32.partialorder %v1843_v44, 0.0  ;;  %v2735_v54 = vmul.f32 0.2, %v1843_v44  ;;  %v4685_v41 = vpop.eup %4684  ;;  %v1084_v60 = vpack.c.bf16 %v4683_v38, %v4681_v32  ;;  %4692 = vtanh.f32 %v3799_v40  ;;  %v4370_v38 = vld [vmem:[%s5116_s23 + $0x190] sm:$0xff]  }
  0xc8   : > { %v3094_v57 = vsel %vm2518_vm5, %v2021_v42, %v2806_v49  ;;  %vm2590_vm7 = vcmp.ge.f32.partialorder %v2201_v50, 0.0  ;;  %v2878_v58 = vmul.f32 0.2, %v2201_v50  ;;  %v4687_v46 = vpop.eup %4686  ;;  %4694 = vtanh.f32 %v3800_v48 }
  0xc9   : > { %3382 = vst [vmem:[%s5200_s29 + $0x4a0] sm:$0xff] %v3094_v57  ;;  %v3023_v62 = vsel %vm2447_vm6, %v1843_v44, %v2735_v54  ;;  %v1665_v63 = vpop.f32.mrf.mxu0  ;;  %v4689_v49 = vpop.eup %4688  ;;  %v3943_v57 = vunpack.c.l.bf16 %v4369_v45  ;;  %v1120_v0 = vpack.c.bf16 %v4687_v46, %v4685_v41  ;;  %v4406_v46 = vld [vmem:[%s5116_s23 + $0x2b0] sm:$0xff]  }
  0xca   : > { %v3166_v1 = vsel %vm2590_vm7, %v2201_v50, %v2878_v58  ;;  %3311 = vst [vmem:[%s5200_s29 + $0x268] sm:$0xff] %v3023_v62  ;;  %v1666_v2 = vadd.f32 %v5190_v20, %v1665_v63 }
  0xcb   : > { %3454 = vst [vmem:[%s5200_s29 + $0x6e0] sm:$0xff] %v3166_v1  ;;  %v2022_v5 = vpop.f32.mrf.mxu2  ;;  %v1845_v6 = vpop.f32.mrf.mxu1  ;;  %v3944_v1 = vunpack.c.h.bf16 %v4369_v45  ;;  %4696 = vtanh.f32 %v3943_v57 }
  0xcc   : > { %v2023_v10 = vadd.f32 %v5190_v20, %v2022_v5  ;;  %vm2376_vm8 = vcmp.ge.f32.partialorder %v1666_v2, 0.0  ;;  %v2664_v11 = vmul.f32 0.2, %v1666_v2  ;;  %v1846_v12 = vadd.f32 %v5190_v20, %v1845_v6  ;;  %3607 = vmatmul.msk.bf16.gmra.mxu0 %vm1208_vm0, %v1047_v59  ;;  %v4691_v54 = vpop.eup %4690 }
  0xcd   : > { %v2202_v13 = vpop.f32.mrf.mxu3  ;;  %4698 = vtanh.f32 %v3944_v1  ;;  %v5318_v15 = vpop.eup %4692  ;;  %v4092_v1 = vunpack.c.h.bf16 %v4406_v46 }
  0xce   : > { %vm2519_vm9 = vcmp.ge.f32.partialorder %v2023_v10, 0.0  ;;  %v2807_v17 = vmul.f32 0.2, %v2023_v10  ;;  %v2203_v18 = vadd.f32 %v5190_v20, %v2202_v13  ;;  %v2952_v19 = vsel %vm2376_vm8, %v1666_v2, %v2664_v11  ;;  %3643 = vmatmul.msk.bf16.gmra.mxu1 %vm1208_vm0, %v1083_v3 }
  0xcf   : > { %3240 = vst [vmem:[%s5200_s29 + $0x30] sm:$0xff] %v2952_v19  ;;  %vm2448_vm10 = vcmp.ge.f32.partialorder %v1846_v12, 0.0  ;;  %v2736_v21 = vmul.f32 0.2, %v1846_v12  ;;  %v4087_v2 = vunpack.c.l.bf16 %v4405_v53 }
  0xd0   : > { %v3095_v24 = vsel %vm2519_vm9, %v2023_v10, %v2807_v17  ;;  %vm2591_vm11 = vcmp.ge.f32.partialorder %v2203_v18, 0.0  ;;  %v2879_v25 = vmul.f32 0.2, %v2203_v18  ;;  %3679 = vmatmul.msk.bf16.gmra.mxu2 %vm1208_vm0, %v1119_v7  ;;  %v1156_v7 = vpack.c.bf16 %v4691_v54, %v4689_v49  ;;  %v4442_v54 = vld [vmem:[%s5116_s23 + $0x3d0] sm:$0xff]  }
  0xd1   : > { %3383 = vst [vmem:[%s5200_s29 + $0x4a8] sm:$0xff] %v3095_v24  ;;  %v3024_v27 = vsel %vm2448_vm10, %v1846_v12, %v2736_v21  ;;  %v1667_v28 = vpop.f32.mrf.mxu0  ;;  %4700 = vtanh.f32 %v4087_v2  ;;  %v4334_v24 = vld [vmem:[%s5116_s23 + $0x70] sm:$0xff]   ;;  %v4235_v2 = vunpack.c.l.bf16 %v4442_v54 }
  0xd2   : > { %v3167_v29 = vsel %vm2591_vm11, %v2203_v18, %v2879_v25  ;;  %3312 = vst [vmem:[%s5200_s29 + $0x270] sm:$0xff] %v3024_v27  ;;  %3715 = vmatmul.msk.bf16.gmra.mxu3 %vm1208_vm0, %v1155_v14  ;;  %v1668_v30 = vadd.f32 %v5190_v20, %v1667_v28  ;;  %v4232_v14 = vunpack.c.h.bf16 %v4441_v61  ;;  %v5321_v18 = vpop.eup %4694  ;;  %4702 = vtanh.f32 %v4088_v8 }
  0xd3   : > { %3455 = vst [vmem:[%s5200_s29 + $0x6e8] sm:$0xff] %v3167_v29  ;;  %v2025_v33 = vpop.f32.mrf.mxu2  ;;  %v1847_v34 = vpop.f32.mrf.mxu1  ;;  %4704 = vtanh.f32 %v4231_v9  ;;  %v3804_v41 = vunpack.c.h.bf16 %v4334_v24  ;;  %v1049_v45 = vpack.c.bf16 %v5321_v18, %v5318_v15 }
  0xd4   : > { %v2026_v35 = vadd.f32 %v5190_v20, %v2025_v33  ;;  %vm2377_vm12 = vcmp.ge.f32.partialorder %v1668_v30, 0.0  ;;  %v2665_v36 = vmul.f32 0.2, %v1668_v30  ;;  %v1848_v37 = vadd.f32 %v5190_v20, %v1847_v34  ;;  %v4697_v25 = vpop.eup %4696 }
  0xd5   : > { %v2205_v39 = vpop.f32.mrf.mxu3  ;;  %4706 = vtanh.f32 %v4232_v14  ;;  %v4699_v31 = vpop.eup %4698  ;;  %v3803_v33 = vunpack.c.l.bf16 %v4334_v24 }
  0xd6   : > { %vm2520_vm13 = vcmp.ge.f32.partialorder %v2026_v35, 0.0  ;;  %v2808_v42 = vmul.f32 0.2, %v2026_v35  ;;  %v2206_v43 = vadd.f32 %v5190_v20, %v2205_v39  ;;  %v2953_v44 = vsel %vm2377_vm12, %v1668_v30, %v2665_v36 }
  0xd7   : > { %3241 = vst [vmem:[%s5200_s29 + $0x38] sm:$0xff] %v2953_v44  ;;  %vm2449_vm14 = vcmp.ge.f32.partialorder %v1848_v37, 0.0  ;;  %v2737_v47 = vmul.f32 0.2, %v1848_v37  ;;  %v4701_v34 = vpop.eup %4700  ;;  %v1085_v53 = vpack.c.bf16 %v4699_v31, %v4697_v25  ;;  %4708 = vtanh.f32 %v3803_v33  ;;  %v4371_v31 = vld [vmem:[%s5116_s23 + $0x198] sm:$0xff]  }
  0xd8   : > { %v3096_v50 = vsel %vm2520_vm13, %v2026_v35, %v2808_v42  ;;  %vm2592_vm15 = vcmp.ge.f32.partialorder %v2206_v43, 0.0  ;;  %v2880_v51 = vmul.f32 0.2, %v2206_v43  ;;  %v4703_v39 = vpop.eup %4702  ;;  %4710 = vtanh.f32 %v3804_v41 }
  0xd9   : > { %3384 = vst [vmem:[%s5200_s29 + $0x4b0] sm:$0xff] %v3096_v50  ;;  %v3025_v55 = vsel %vm2449_vm14, %v1848_v37, %v2737_v47  ;;  %v1670_v56 = vpop.f32.mrf.mxu0  ;;  %v4705_v42 = vpop.eup %4704  ;;  %v3947_v50 = vunpack.c.l.bf16 %v4370_v38  ;;  %v1121_v57 = vpack.c.bf16 %v4703_v39, %v4701_v34  ;;  %v4407_v39 = vld [vmem:[%s5116_s23 + $0x2b8] sm:$0xff]  }
  0xda   : > { %v3168_v58 = vsel %vm2592_vm15, %v2206_v43, %v2880_v51  ;;  %3313 = vst [vmem:[%s5200_s29 + $0x278] sm:$0xff] %v3025_v55  ;;  %v1671_v59 = vadd.f32 %v5190_v20, %v1670_v56 }
  0xdb   : > { %3456 = vst [vmem:[%s5200_s29 + $0x6f0] sm:$0xff] %v3168_v58  ;;  %v2027_v62 = vpop.f32.mrf.mxu2  ;;  %v1850_v63 = vpop.f32.mrf.mxu1  ;;  %v3948_v58 = vunpack.c.h.bf16 %v4370_v38  ;;  %4712 = vtanh.f32 %v3947_v50 }
  0xdc   : > { %v2028_v3 = vadd.f32 %v5190_v20, %v2027_v62  ;;  %vm2378_vm1 = vcmp.ge.f32.partialorder %v1671_v59, 0.0  ;;  %v2666_v4 = vmul.f32 0.2, %v1671_v59  ;;  %v1851_v5 = vadd.f32 %v5190_v20, %v1850_v63  ;;  %3608 = vmatmul.msk.bf16.gmra.mxu0 %vm1208_vm0, %v1048_v52  ;;  %v4707_v47 = vpop.eup %4706 }
  0xdd   : > { %v2207_v6 = vpop.f32.mrf.mxu3  ;;  %4714 = vtanh.f32 %v3948_v58  ;;  %v5348_v8 = vpop.eup %4708  ;;  %v4096_v58 = vunpack.c.h.bf16 %v4407_v39 }
  0xde   : > { %vm2521_vm2 = vcmp.ge.f32.partialorder %v2028_v3, 0.0  ;;  %v2809_v10 = vmul.f32 0.2, %v2028_v3  ;;  %v2208_v11 = vadd.f32 %v5190_v20, %v2207_v6  ;;  %v2954_v12 = vsel %vm2378_vm1, %v1671_v59, %v2666_v4  ;;  %3644 = vmatmul.msk.bf16.gmra.mxu1 %vm1208_vm0, %v1084_v60 }
  0xdf   : > { %3242 = vst [vmem:[%s5200_s29 + $0x40] sm:$0xff] %v2954_v12  ;;  %vm2450_vm3 = vcmp.ge.f32.partialorder %v1851_v5, 0.0  ;;  %v2738_v13 = vmul.f32 0.2, %v1851_v5  ;;  %v4091_v59 = vunpack.c.l.bf16 %v4406_v46 }
  0xe0   : > { %v3097_v16 = vsel %vm2521_vm2, %v2028_v3, %v2809_v10  ;;  %vm2593_vm4 = vcmp.ge.f32.partialorder %v2208_v11, 0.0  ;;  %v2881_v17 = vmul.f32 0.2, %v2208_v11  ;;  %3680 = vmatmul.msk.bf16.gmra.mxu2 %vm1208_vm0, %v1120_v0  ;;  %v1157_v0 = vpack.c.bf16 %v4707_v47, %v4705_v42  ;;  %v4443_v47 = vld [vmem:[%s5116_s23 + $0x3d8] sm:$0xff]  }
  0xe1   : > { %3385 = vst [vmem:[%s5200_s29 + $0x4b8] sm:$0xff] %v3097_v16  ;;  %v3026_v19 = vsel %vm2450_vm3, %v1851_v5, %v2738_v13  ;;  %v1672_v21 = vpop.f32.mrf.mxu0  ;;  %4716 = vtanh.f32 %v4091_v59  ;;  %v4335_v16 = vld [vmem:[%s5116_s23 + $0x78] sm:$0xff]   ;;  %v4239_v59 = vunpack.c.l.bf16 %v4443_v47 }
  0xe2   : > { %v3169_v22 = vsel %vm2593_vm4, %v2208_v11, %v2881_v17  ;;  %3314 = vst [vmem:[%s5200_s29 + $0x280] sm:$0xff] %v3026_v19  ;;  %3716 = vmatmul.msk.bf16.gmra.mxu3 %vm1208_vm0, %v1156_v7  ;;  %v1673_v23 = vadd.f32 %v5190_v20, %v1672_v21  ;;  %v4236_v7 = vunpack.c.h.bf16 %v4442_v54  ;;  %v5351_v11 = vpop.eup %4710  ;;  %4718 = vtanh.f32 %v4092_v1 }
  0xe3   : > { %3457 = vst [vmem:[%s5200_s29 + $0x6f8] sm:$0xff] %v3169_v22  ;;  %v2030_v26 = vpop.f32.mrf.mxu2  ;;  %v1852_v27 = vpop.f32.mrf.mxu1  ;;  %4720 = vtanh.f32 %v4235_v2  ;;  %v3808_v34 = vunpack.c.h.bf16 %v4335_v16  ;;  %v1050_v38 = vpack.c.bf16 %v5351_v11, %v5348_v8 }
  0xe4   : > { %v2031_v28 = vadd.f32 %v5190_v20, %v2030_v26  ;;  %vm2379_vm5 = vcmp.ge.f32.partialorder %v1673_v23, 0.0  ;;  %v2667_v29 = vmul.f32 0.2, %v1673_v23  ;;  %v1853_v30 = vadd.f32 %v5190_v20, %v1852_v27  ;;  %v5358_v17 = vpop.eup %4712 }
  0xe5   : > { %v2210_v32 = vpop.f32.mrf.mxu3  ;;  %4722 = vtanh.f32 %v4236_v7  ;;  %v4715_v24 = vpop.eup %4714  ;;  %v3807_v26 = vunpack.c.l.bf16 %v4335_v16 }
  0xe6   : > { %vm2522_vm6 = vcmp.ge.f32.partialorder %v2031_v28, 0.0  ;;  %v2810_v35 = vmul.f32 0.2, %v2031_v28  ;;  %v2211_v36 = vadd.f32 %v5190_v20, %v2210_v32  ;;  %v2955_v37 = vsel %vm2379_vm5, %v1673_v23, %v2667_v29 }
  0xe7   : > { %3243 = vst [vmem:[%s5200_s29 + $0x48] sm:$0xff] %v2955_v37  ;;  %vm2451_vm7 = vcmp.ge.f32.partialorder %v1853_v30, 0.0  ;;  %v2739_v40 = vmul.f32 0.2, %v1853_v30  ;;  %v4717_v27 = vpop.eup %4716  ;;  %v1086_v46 = vpack.c.bf16 %v4715_v24, %v5358_v17  ;;  %4724 = vtanh.f32 %v3807_v26  ;;  %v4372_v24 = vld [vmem:[%s5116_s23 + $0x1a0] sm:$0xff]  }
  0xe8   : > { %v3098_v43 = vsel %vm2522_vm6, %v2031_v28, %v2810_v35  ;;  %vm2594_vm8 = vcmp.ge.f32.partialorder %v2211_v36, 0.0  ;;  %v2882_v44 = vmul.f32 0.2, %v2211_v36  ;;  %v4719_v32 = vpop.eup %4718  ;;  %4726 = vtanh.f32 %v3808_v34 }
  0xe9   : > { %3386 = vst [vmem:[%s5200_s29 + $0x4c0] sm:$0xff] %v3098_v43  ;;  %v3027_v48 = vsel %vm2451_vm7, %v1853_v30, %v2739_v40  ;;  %v1675_v49 = vpop.f32.mrf.mxu0  ;;  %v4721_v35 = vpop.eup %4720  ;;  %v3951_v43 = vunpack.c.l.bf16 %v4371_v31  ;;  %v1122_v50 = vpack.c.bf16 %v4719_v32, %v4717_v27  ;;  %v4408_v32 = vld [vmem:[%s5116_s23 + $0x2c0] sm:$0xff]  }
  0xea   : > { %v3170_v51 = vsel %vm2594_vm8, %v2211_v36, %v2882_v44  ;;  %3315 = vst [vmem:[%s5200_s29 + $0x288] sm:$0xff] %v3027_v48  ;;  %v1676_v52 = vadd.f32 %v5190_v20, %v1675_v49 }
  0xeb   : > { %3458 = vst [vmem:[%s5200_s29 + $0x700] sm:$0xff] %v3170_v51  ;;  %v2032_v55 = vpop.f32.mrf.mxu2  ;;  %v1855_v56 = vpop.f32.mrf.mxu1  ;;  %v3952_v51 = vunpack.c.h.bf16 %v4371_v31  ;;  %4728 = vtanh.f32 %v3951_v43 }
  0xec   : > { %v2033_v60 = vadd.f32 %v5190_v20, %v2032_v55  ;;  %vm2380_vm9 = vcmp.ge.f32.partialorder %v1676_v52, 0.0  ;;  %v2668_v61 = vmul.f32 0.2, %v1676_v52  ;;  %v1856_v62 = vadd.f32 %v5190_v20, %v1855_v56  ;;  %3609 = vmatmul.msk.bf16.gmra.mxu0 %vm1208_vm0, %v1049_v45  ;;  %v4723_v40 = vpop.eup %4722 }
  0xed   : > { %v2212_v63 = vpop.f32.mrf.mxu3  ;;  %4730 = vtanh.f32 %v3952_v51  ;;  %v5386_v1 = vpop.eup %4724  ;;  %v4100_v51 = vunpack.c.h.bf16 %v4408_v32 }
  0xee   : > { %vm2523_vm10 = vcmp.ge.f32.partialorder %v2033_v60, 0.0  ;;  %v2811_v3 = vmul.f32 0.2, %v2033_v60  ;;  %v2213_v4 = vadd.f32 %v5190_v20, %v2212_v63  ;;  %v2956_v5 = vsel %vm2380_vm9, %v1676_v52, %v2668_v61  ;;  %3645 = vmatmul.msk.bf16.gmra.mxu1 %vm1208_vm0, %v1085_v53  ;;  %v5378_v53 = vld [vmem:[%s6182_s2] ss:$0 sm:$0xff] }
  0xef   : > { %3244 = vst [vmem:[%s5200_s29 + $0x50] sm:$0xff] %v2956_v5  ;;  %vm2452_vm11 = vcmp.ge.f32.partialorder %v1856_v62, 0.0  ;;  %v2740_v6 = vmul.f32 0.2, %v1856_v62  ;;  %v4095_v52 = vunpack.c.l.bf16 %v4407_v39 }
  0xf0   : > { %v3099_v9 = vsel %vm2523_vm10, %v2033_v60, %v2811_v3  ;;  %vm2595_vm12 = vcmp.ge.f32.partialorder %v2213_v4, 0.0  ;;  %v2883_v10 = vmul.f32 0.2, %v2213_v4  ;;  %3681 = vmatmul.msk.bf16.gmra.mxu2 %vm1208_vm0, %v1121_v57  ;;  %v1158_v57 = vpack.c.bf16 %v4723_v40, %v4721_v35  ;;  %v4444_v40 = vld [vmem:[%s5116_s23 + $0x3e0] sm:$0xff]  }
  0xf1   : > { %3387 = vst [vmem:[%s5200_s29 + $0x4c8] sm:$0xff] %v3099_v9  ;;  %v3028_v12 = vsel %vm2452_vm11, %v1856_v62, %v2740_v6  ;;  %v1677_v13 = vpop.f32.mrf.mxu0  ;;  %4732 = vtanh.f32 %v4095_v52  ;;  %v4336_v9 = vld [vmem:[%s5116_s23 + $0x80] sm:$0xff]   ;;  %v4243_v52 = vunpack.c.l.bf16 %v4444_v40 }
  0xf2   : > { %v3171_v14 = vsel %vm2595_vm12, %v2213_v4, %v2883_v10  ;;  %3316 = vst [vmem:[%s5200_s29 + $0x290] sm:$0xff] %v3028_v12  ;;  %3717 = vmatmul.msk.bf16.gmra.mxu3 %vm1208_vm0, %v1157_v0  ;;  %v1678_v15 = vadd.f32 %v5190_v20, %v1677_v13  ;;  %v4240_v0 = vunpack.c.h.bf16 %v4443_v47  ;;  %v5389_v4 = vpop.eup %4726  ;;  %4734 = vtanh.f32 %v4096_v58 }
  0xf3   : > { %3459 = vst [vmem:[%s5200_s29 + $0x708] sm:$0xff] %v3171_v14  ;;  %v2035_v18 = vpop.f32.mrf.mxu2  ;;  %v1857_v19 = vpop.f32.mrf.mxu1  ;;  %4736 = vtanh.f32 %v4239_v59  ;;  %v3812_v27 = vunpack.c.h.bf16 %v4336_v9  ;;  %v1051_v31 = vpack.c.bf16 %v5389_v4, %v5386_v1 }
  0xf4   : > { %v2036_v21 = vadd.f32 %v5190_v20, %v2035_v18  ;;  %vm2381_vm13 = vcmp.ge.f32.partialorder %v1678_v15, 0.0  ;;  %v2669_v22 = vmul.f32 0.2, %v1678_v15  ;;  %v1858_v23 = vadd.f32 %v5190_v20, %v1857_v19  ;;  %v4729_v10 = vpop.eup %4728 }
  0xf5   : > { %v2215_v25 = vpop.f32.mrf.mxu3  ;;  %4738 = vtanh.f32 %v4240_v0  ;;  %v4731_v16 = vpop.eup %4730  ;;  %v3811_v18 = vunpack.c.l.bf16 %v4336_v9 }
  0xf6   : > { %vm2524_vm14 = vcmp.ge.f32.partialorder %v2036_v21, 0.0  ;;  %v2812_v28 = vmul.f32 0.2, %v2036_v21  ;;  %v2216_v29 = vadd.f32 %v5190_v20, %v2215_v25  ;;  %v2957_v30 = vsel %vm2381_vm13, %v1678_v15, %v2669_v22 }
  0xf7   : > { %3245 = vst [vmem:[%s5200_s29 + $0x58] sm:$0xff] %v2957_v30  ;;  %vm2453_vm15 = vcmp.ge.f32.partialorder %v1858_v23, 0.0  ;;  %v2741_v33 = vmul.f32 0.2, %v1858_v23  ;;  %v4733_v19 = vpop.eup %4732  ;;  %v1087_v39 = vpack.c.bf16 %v4731_v16, %v4729_v10  ;;  %4740 = vtanh.f32 %v3811_v18  ;;  %v4373_v16 = vld [vmem:[%s5116_s23 + $0x1a8] sm:$0xff]  }
  0xf8   : > { %v3100_v36 = vsel %vm2524_vm14, %v2036_v21, %v2812_v28  ;;  %vm2596_vm1 = vcmp.ge.f32.partialorder %v2216_v29, 0.0  ;;  %v2884_v37 = vmul.f32 0.2, %v2216_v29  ;;  %v4735_v25 = vpop.eup %4734  ;;  %4742 = vtanh.f32 %v3812_v27 }
  0xf9   : > { %3388 = vst [vmem:[%s5200_s29 + $0x4d0] sm:$0xff] %v3100_v36  ;;  %v3029_v41 = vsel %vm2453_vm15, %v1858_v23, %v2741_v33  ;;  %v1680_v42 = vpop.f32.mrf.mxu0  ;;  %v4737_v28 = vpop.eup %4736  ;;  %v3955_v36 = vunpack.c.l.bf16 %v4372_v24  ;;  %v1123_v43 = vpack.c.bf16 %v4735_v25, %v4733_v19  ;;  %v4409_v25 = vld [vmem:[%s5116_s23 + $0x2c8] sm:$0xff]  }
  0xfa   : > { %v3172_v44 = vsel %vm2596_vm1, %v2216_v29, %v2884_v37  ;;  %3317 = vst [vmem:[%s5200_s29 + $0x298] sm:$0xff] %v3029_v41  ;;  %v1681_v45 = vadd.f32 %v5190_v20, %v1680_v42 }
  0xfb   : > { %3460 = vst [vmem:[%s5200_s29 + $0x710] sm:$0xff] %v3172_v44  ;;  %v2037_v48 = vpop.f32.mrf.mxu2  ;;  %v1860_v49 = vpop.f32.mrf.mxu1  ;;  %v3956_v44 = vunpack.c.h.bf16 %v4372_v24  ;;  %4744 = vtanh.f32 %v3955_v36 }
  0xfc   : > { %v2038_v54 = vadd.f32 %v5378_v53, %v2037_v48  ;;  %vm2382_vm2 = vcmp.ge.f32.partialorder %v1681_v45, 0.0  ;;  %v2670_v20 = vmul.f32 0.2, %v1681_v45  ;;  %v1861_v55 = vadd.f32 %v5378_v53, %v1860_v49  ;;  %3610 = vmatmul.msk.bf16.gmra.mxu0 %vm1208_vm0, %v1050_v38  ;;  %v4739_v33 = vpop.eup %4738 }
  0xfd   : > { %v2217_v56 = vpop.f32.mrf.mxu3  ;;  %4746 = vtanh.f32 %v3956_v44  ;;  %v5416_v58 = vpop.eup %4740  ;;  %v4104_v44 = vunpack.c.h.bf16 %v4409_v25 }
  0xfe   : > { %vm2525_vm3 = vcmp.ge.f32.partialorder %v2038_v54, 0.0  ;;  %v2813_v60 = vmul.f32 0.2, %v2038_v54  ;;  %v2218_v61 = vadd.f32 %v5378_v53, %v2217_v56  ;;  %v2958_v62 = vsel %vm2382_vm2, %v1681_v45, %v2670_v20  ;;  %3646 = vmatmul.msk.bf16.gmra.mxu1 %vm1208_vm0, %v1086_v46 }
  0xff   : > { %3246 = vst [vmem:[%s5200_s29 + $0x60] sm:$0xff] %v2958_v62  ;;  %vm2454_vm4 = vcmp.ge.f32.partialorder %v1861_v55, 0.0  ;;  %v2742_v63 = vmul.f32 0.2, %v1861_v55  ;;  %v4099_v45 = vunpack.c.l.bf16 %v4408_v32 }
 0x100   : > { %v3101_v2 = vsel %vm2525_vm3, %v2038_v54, %v2813_v60  ;;  %vm2597_vm5 = vcmp.ge.f32.partialorder %v2218_v61, 0.0  ;;  %v2885_v3 = vmul.f32 0.2, %v2218_v61  ;;  %3682 = vmatmul.msk.bf16.gmra.mxu2 %vm1208_vm0, %v1122_v50  ;;  %v1159_v50 = vpack.c.bf16 %v4739_v33, %v4737_v28  ;;  %v4445_v33 = vld [vmem:[%s5116_s23 + $0x3e8] sm:$0xff]  }
 0x101   : > { %3389 = vst [vmem:[%s5200_s29 + $0x4d8] sm:$0xff] %v3101_v2  ;;  %v3030_v5 = vsel %vm2454_vm4, %v1861_v55, %v2742_v63  ;;  %v1682_v6 = vpop.f32.mrf.mxu0  ;;  %4748 = vtanh.f32 %v4099_v45  ;;  %v4337_v2 = vld [vmem:[%s5116_s23 + $0x88] sm:$0xff]   ;;  %v4247_v45 = vunpack.c.l.bf16 %v4445_v33 }
 0x102   : > { %v3173_v7 = vsel %vm2597_vm5, %v2218_v61, %v2885_v3  ;;  %3318 = vst [vmem:[%s5200_s29 + $0x2a0] sm:$0xff] %v3030_v5  ;;  %3718 = vmatmul.msk.bf16.gmra.mxu3 %vm1208_vm0, %v1158_v57  ;;  %v1683_v8 = vadd.f32 %v5378_v53, %v1682_v6  ;;  %v4244_v57 = vunpack.c.h.bf16 %v4444_v40  ;;  %v5419_v61 = vpop.eup %4742  ;;  %4750 = vtanh.f32 %v4100_v51 }
 0x103   : > { %3461 = vst [vmem:[%s5200_s29 + $0x718] sm:$0xff] %v3173_v7  ;;  %v2040_v11 = vpop.f32.mrf.mxu2  ;;  %v1862_v12 = vpop.f32.mrf.mxu1  ;;  %4752 = vtanh.f32 %v4243_v52  ;;  %v3816_v19 = vunpack.c.h.bf16 %v4337_v2  ;;  %v1052_v24 = vpack.c.bf16 %v5419_v61, %v5416_v58 }
 0x104   : > { %v2041_v13 = vadd.f32 %v5378_v53, %v2040_v11  ;;  %vm2383_vm6 = vcmp.ge.f32.partialorder %v1683_v8, 0.0  ;;  %v2671_v14 = vmul.f32 0.2, %v1683_v8  ;;  %v1863_v15 = vadd.f32 %v5378_v53, %v1862_v12  ;;  %v4745_v3 = vpop.eup %4744 }
 0x105   : > { %v2220_v17 = vpop.f32.mrf.mxu3  ;;  %4754 = vtanh.f32 %v4244_v57  ;;  %v4747_v9 = vpop.eup %4746  ;;  %v3815_v11 = vunpack.c.l.bf16 %v4337_v2 }
 0x106   : > { %vm2526_vm7 = vcmp.ge.f32.partialorder %v2041_v13, 0.0  ;;  %v2814_v21 = vmul.f32 0.2, %v2041_v13  ;;  %v2221_v22 = vadd.f32 %v5378_v53, %v2220_v17  ;;  %v2959_v23 = vsel %vm2383_vm6, %v1683_v8, %v2671_v14 }
 0x107   : > { %3247 = vst [vmem:[%s5200_s29 + $0x68] sm:$0xff] %v2959_v23  ;;  %vm2455_vm8 = vcmp.ge.f32.partialorder %v1863_v15, 0.0  ;;  %v2743_v26 = vmul.f32 0.2, %v1863_v15  ;;  %v4749_v12 = vpop.eup %4748  ;;  %v1088_v32 = vpack.c.bf16 %v4747_v9, %v4745_v3  ;;  %4756 = vtanh.f32 %v3815_v11  ;;  %v4374_v9 = vld [vmem:[%s5116_s23 + $0x1b0] sm:$0xff]  }
 0x108   : > { %v3102_v29 = vsel %vm2526_vm7, %v2041_v13, %v2814_v21  ;;  %vm2598_vm9 = vcmp.ge.f32.partialorder %v2221_v22, 0.0  ;;  %v2886_v30 = vmul.f32 0.2, %v2221_v22  ;;  %v4751_v17 = vpop.eup %4750  ;;  %4758 = vtanh.f32 %v3816_v19 }
 0x109   : > { %3390 = vst [vmem:[%s5200_s29 + $0x4e0] sm:$0xff] %v3102_v29  ;;  %v3031_v34 = vsel %vm2455_vm8, %v1863_v15, %v2743_v26  ;;  %v1685_v35 = vpop.f32.mrf.mxu0  ;;  %v4753_v21 = vpop.eup %4752  ;;  %v3959_v29 = vunpack.c.l.bf16 %v4373_v16  ;;  %v1124_v36 = vpack.c.bf16 %v4751_v17, %v4749_v12  ;;  %v4410_v17 = vld [vmem:[%s5116_s23 + $0x2d0] sm:$0xff]  }
 0x10a   : > { %v3174_v37 = vsel %vm2598_vm9, %v2221_v22, %v2886_v30  ;;  %3319 = vst [vmem:[%s5200_s29 + $0x2a8] sm:$0xff] %v3031_v34  ;;  %v1686_v38 = vadd.f32 %v5378_v53, %v1685_v35 }
 0x10b   : > { %3462 = vst [vmem:[%s5200_s29 + $0x720] sm:$0xff] %v3174_v37  ;;  %v2042_v41 = vpop.f32.mrf.mxu2  ;;  %v1865_v42 = vpop.f32.mrf.mxu1  ;;  %v3960_v37 = vunpack.c.h.bf16 %v4373_v16  ;;  %4760 = vtanh.f32 %v3959_v29 }
 0x10c   : > { %v2043_v46 = vadd.f32 %v5378_v53, %v2042_v41  ;;  %vm2384_vm10 = vcmp.ge.f32.partialorder %v1686_v38, 0.0  ;;  %v2672_v47 = vmul.f32 0.2, %v1686_v38  ;;  %v1866_v48 = vadd.f32 %v5378_v53, %v1865_v42  ;;  %3611 = vmatmul.msk.bf16.gmra.mxu0 %vm1208_vm0, %v1051_v31  ;;  %v4755_v26 = vpop.eup %4754 }
 0x10d   : > { %v2222_v49 = vpop.f32.mrf.mxu3  ;;  %4762 = vtanh.f32 %v3960_v37  ;;  %v5446_v51 = vpop.eup %4756  ;;  %v4108_v37 = vunpack.c.h.bf16 %v4410_v17 }
 0x10e   : > { %vm2527_vm11 = vcmp.ge.f32.partialorder %v2043_v46, 0.0  ;;  %v2815_v54 = vmul.f32 0.2, %v2043_v46  ;;  %v2223_v20 = vadd.f32 %v5378_v53, %v2222_v49  ;;  %v2960_v55 = vsel %vm2384_vm10, %v1686_v38, %v2672_v47  ;;  %3647 = vmatmul.msk.bf16.gmra.mxu1 %vm1208_vm0, %v1087_v39 }
 0x10f   : > { %3248 = vst [vmem:[%s5200_s29 + $0x70] sm:$0xff] %v2960_v55  ;;  %vm2456_vm12 = vcmp.ge.f32.partialorder %v1866_v48, 0.0  ;;  %v2744_v56 = vmul.f32 0.2, %v1866_v48  ;;  %v4103_v38 = vunpack.c.l.bf16 %v4409_v25 }
 0x110   : > { %v3103_v59 = vsel %vm2527_vm11, %v2043_v46, %v2815_v54  ;;  %vm2599_vm13 = vcmp.ge.f32.partialorder %v2223_v20, 0.0  ;;  %v2887_v60 = vmul.f32 0.2, %v2223_v20  ;;  %3683 = vmatmul.msk.bf16.gmra.mxu2 %vm1208_vm0, %v1123_v43  ;;  %v1160_v43 = vpack.c.bf16 %v4755_v26, %v4753_v21  ;;  %v4446_v26 = vld [vmem:[%s5116_s23 + $0x3f0] sm:$0xff]  }
 0x111   : > { %3391 = vst [vmem:[%s5200_s29 + $0x4e8] sm:$0xff] %v3103_v59  ;;  %v3032_v62 = vsel %vm2456_vm12, %v1866_v48, %v2744_v56  ;;  %v1687_v63 = vpop.f32.mrf.mxu0  ;;  %4764 = vtanh.f32 %v4103_v38  ;;  %v4338_v59 = vld [vmem:[%s5116_s23 + $0x90] sm:$0xff]   ;;  %v4251_v38 = vunpack.c.l.bf16 %v4446_v26 }
 0x112   : > { %v3175_v0 = vsel %vm2599_vm13, %v2223_v20, %v2887_v60  ;;  %3320 = vst [vmem:[%s5200_s29 + $0x2b0] sm:$0xff] %v3032_v62  ;;  %3719 = vmatmul.msk.bf16.gmra.mxu3 %vm1208_vm0, %v1159_v50  ;;  %v1688_v1 = vadd.f32 %v5378_v53, %v1687_v63  ;;  %v4248_v50 = vunpack.c.h.bf16 %v4445_v33  ;;  %v5449_v20 = vpop.eup %4758  ;;  %4766 = vtanh.f32 %v4104_v44 }
 0x113   : > { %3463 = vst [vmem:[%s5200_s29 + $0x728] sm:$0xff] %v3175_v0  ;;  %v2045_v4 = vpop.f32.mrf.mxu2  ;;  %v1867_v5 = vpop.f32.mrf.mxu1  ;;  %4768 = vtanh.f32 %v4247_v45  ;;  %v3820_v12 = vunpack.c.h.bf16 %v4338_v59  ;;  %v1053_v16 = vpack.c.bf16 %v5449_v20, %v5446_v51 }
 0x114   : > { %v2046_v6 = vadd.f32 %v5378_v53, %v2045_v4  ;;  %vm2385_vm14 = vcmp.ge.f32.partialorder %v1688_v1, 0.0  ;;  %v2673_v7 = vmul.f32 0.2, %v1688_v1  ;;  %v1868_v8 = vadd.f32 %v5378_v53, %v1867_v5  ;;  %v4761_v60 = vpop.eup %4760 }
 0x115   : > { %v2225_v10 = vpop.f32.mrf.mxu3  ;;  %4770 = vtanh.f32 %v4248_v50  ;;  %v4763_v2 = vpop.eup %4762  ;;  %v3819_v4 = vunpack.c.l.bf16 %v4338_v59 }
 0x116   : > { %vm2528_vm15 = vcmp.ge.f32.partialorder %v2046_v6, 0.0  ;;  %v2816_v13 = vmul.f32 0.2, %v2046_v6  ;;  %v2226_v14 = vadd.f32 %v5378_v53, %v2225_v10  ;;  %v2961_v15 = vsel %vm2385_vm14, %v1688_v1, %v2673_v7 }
 0x117   : > { %3249 = vst [vmem:[%s5200_s29 + $0x78] sm:$0xff] %v2961_v15  ;;  %vm2457_vm1 = vcmp.ge.f32.partialorder %v1868_v8, 0.0  ;;  %v2745_v18 = vmul.f32 0.2, %v1868_v8  ;;  %v4765_v5 = vpop.eup %4764  ;;  %v1089_v25 = vpack.c.bf16 %v4763_v2, %v4761_v60  ;;  %4772 = vtanh.f32 %v3819_v4  ;;  %v4375_v2 = vld [vmem:[%s5116_s23 + $0x1b8] sm:$0xff]  }
 0x118   : > { %v3104_v22 = vsel %vm2528_vm15, %v2046_v6, %v2816_v13  ;;  %vm2600_vm2 = vcmp.ge.f32.partialorder %v2226_v14, 0.0  ;;  %v2888_v23 = vmul.f32 0.2, %v2226_v14  ;;  %v4767_v10 = vpop.eup %4766  ;;  %4774 = vtanh.f32 %v3820_v12 }
 0x119   : > { %3392 = vst [vmem:[%s5200_s29 + $0x4f0] sm:$0xff] %v3104_v22  ;;  %v3033_v27 = vsel %vm2457_vm1, %v1868_v8, %v2745_v18  ;;  %v1690_v28 = vpop.f32.mrf.mxu0  ;;  %v4769_v13 = vpop.eup %4768  ;;  %v3963_v22 = vunpack.c.l.bf16 %v4374_v9  ;;  %v1125_v29 = vpack.c.bf16 %v4767_v10, %v4765_v5  ;;  %v4411_v10 = vld [vmem:[%s5116_s23 + $0x2d8] sm:$0xff]  }
 0x11a   : > { %v3176_v30 = vsel %vm2600_vm2, %v2226_v14, %v2888_v23  ;;  %3321 = vst [vmem:[%s5200_s29 + $0x2b8] sm:$0xff] %v3033_v27  ;;  %v1691_v31 = vadd.f32 %v5378_v53, %v1690_v28 }
 0x11b   : > { %3464 = vst [vmem:[%s5200_s29 + $0x730] sm:$0xff] %v3176_v30  ;;  %v2047_v34 = vpop.f32.mrf.mxu2  ;;  %v1870_v35 = vpop.f32.mrf.mxu1  ;;  %v3964_v30 = vunpack.c.h.bf16 %v4374_v9  ;;  %4776 = vtanh.f32 %v3963_v22 }
 0x11c   : > { %v2048_v39 = vadd.f32 %v5378_v53, %v2047_v34  ;;  %vm2386_vm3 = vcmp.ge.f32.partialorder %v1691_v31, 0.0  ;;  %v2674_v40 = vmul.f32 0.2, %v1691_v31  ;;  %v1871_v41 = vadd.f32 %v5378_v53, %v1870_v35  ;;  %3612 = vmatmul.msk.bf16.gmra.mxu0 %vm1208_vm0, %v1052_v24  ;;  %v4771_v18 = vpop.eup %4770 }
 0x11d   : > { %v2227_v42 = vpop.f32.mrf.mxu3  ;;  %4778 = vtanh.f32 %v3964_v30  ;;  %v5476_v44 = vpop.eup %4772  ;;  %v4112_v30 = vunpack.c.h.bf16 %v4411_v10 }
 0x11e   : > { %vm2529_vm4 = vcmp.ge.f32.partialorder %v2048_v39, 0.0  ;;  %v2817_v46 = vmul.f32 0.2, %v2048_v39  ;;  %v2228_v47 = vadd.f32 %v5378_v53, %v2227_v42  ;;  %v2962_v48 = vsel %vm2386_vm3, %v1691_v31, %v2674_v40  ;;  %3648 = vmatmul.msk.bf16.gmra.mxu1 %vm1208_vm0, %v1088_v32 }
 0x11f   : > { %3250 = vst [vmem:[%s5200_s29 + $0x80] sm:$0xff] %v2962_v48  ;;  %vm2458_vm5 = vcmp.ge.f32.partialorder %v1871_v41, 0.0  ;;  %v2746_v49 = vmul.f32 0.2, %v1871_v41  ;;  %v4107_v31 = vunpack.c.l.bf16 %v4410_v17 }
 0x120   : > { %v3105_v52 = vsel %vm2529_vm4, %v2048_v39, %v2817_v46  ;;  %vm2601_vm6 = vcmp.ge.f32.partialorder %v2228_v47, 0.0  ;;  %v2889_v54 = vmul.f32 0.2, %v2228_v47  ;;  %3684 = vmatmul.msk.bf16.gmra.mxu2 %vm1208_vm0, %v1124_v36  ;;  %v1161_v36 = vpack.c.bf16 %v4771_v18, %v4769_v13  ;;  %v4447_v18 = vld [vmem:[%s5116_s23 + $0x3f8] sm:$0xff]  }
 0x121   : > { %3393 = vst [vmem:[%s5200_s29 + $0x4f8] sm:$0xff] %v3105_v52  ;;  %v3034_v55 = vsel %vm2458_vm5, %v1871_v41, %v2746_v49  ;;  %v1692_v56 = vpop.f32.mrf.mxu0  ;;  %4780 = vtanh.f32 %v4107_v31  ;;  %v4339_v52 = vld [vmem:[%s5116_s23 + $0x98] sm:$0xff]   ;;  %v4255_v31 = vunpack.c.l.bf16 %v4447_v18 }
 0x122   : > { %v3177_v57 = vsel %vm2601_vm6, %v2228_v47, %v2889_v54  ;;  %3322 = vst [vmem:[%s5200_s29 + $0x2c0] sm:$0xff] %v3034_v55  ;;  %3720 = vmatmul.msk.bf16.gmra.mxu3 %vm1208_vm0, %v1160_v43  ;;  %v1693_v58 = vadd.f32 %v5378_v53, %v1692_v56  ;;  %v4252_v43 = vunpack.c.h.bf16 %v4446_v26  ;;  %v5479_v47 = vpop.eup %4774  ;;  %4782 = vtanh.f32 %v4108_v37 }
 0x123   : > { %3465 = vst [vmem:[%s5200_s29 + $0x738] sm:$0xff] %v3177_v57  ;;  %v2050_v61 = vpop.f32.mrf.mxu2  ;;  %v1872_v62 = vpop.f32.mrf.mxu1  ;;  %4784 = vtanh.f32 %v4251_v38  ;;  %v3824_v5 = vunpack.c.h.bf16 %v4339_v52  ;;  %v1054_v9 = vpack.c.bf16 %v5479_v47, %v5476_v44 }
 0x124   : > { %v2051_v63 = vadd.f32 %v5378_v53, %v2050_v61  ;;  %vm2387_vm7 = vcmp.ge.f32.partialorder %v1693_v58, 0.0  ;;  %v2675_v0 = vmul.f32 0.2, %v1693_v58  ;;  %v1873_v1 = vadd.f32 %v5378_v53, %v1872_v62  ;;  %v4777_v54 = vpop.eup %4776 }
 0x125   : > { %v2230_v3 = vpop.f32.mrf.mxu3  ;;  %4786 = vtanh.f32 %v4252_v43  ;;  %v4779_v59 = vpop.eup %4778  ;;  %v3823_v61 = vunpack.c.l.bf16 %v4339_v52 }
 0x126   : > { %vm2530_vm8 = vcmp.ge.f32.partialorder %v2051_v63, 0.0  ;;  %v2818_v6 = vmul.f32 0.2, %v2051_v63  ;;  %v2231_v7 = vadd.f32 %v5378_v53, %v2230_v3  ;;  %v2963_v8 = vsel %vm2387_vm7, %v1693_v58, %v2675_v0 }
 0x127   : > { %3251 = vst [vmem:[%s5200_s29 + $0x88] sm:$0xff] %v2963_v8  ;;  %vm2459_vm9 = vcmp.ge.f32.partialorder %v1873_v1, 0.0  ;;  %v2747_v11 = vmul.f32 0.2, %v1873_v1  ;;  %v4781_v62 = vpop.eup %4780  ;;  %v1090_v17 = vpack.c.bf16 %v4779_v59, %v4777_v54  ;;  %4788 = vtanh.f32 %v3823_v61  ;;  %v4376_v59 = vld [vmem:[%s5116_s23 + $0x1c0] sm:$0xff]  }
 0x128   : > { %v3106_v14 = vsel %vm2530_vm8, %v2051_v63, %v2818_v6  ;;  %vm2602_vm10 = vcmp.ge.f32.partialorder %v2231_v7, 0.0  ;;  %v2890_v15 = vmul.f32 0.2, %v2231_v7  ;;  %v4783_v3 = vpop.eup %4782  ;;  %4790 = vtanh.f32 %v3824_v5 }
 0x129   : > { %3394 = vst [vmem:[%s5200_s29 + $0x500] sm:$0xff] %v3106_v14  ;;  %v3035_v19 = vsel %vm2459_vm9, %v1873_v1, %v2747_v11  ;;  %v1695_v21 = vpop.f32.mrf.mxu0  ;;  %v4785_v6 = vpop.eup %4784  ;;  %v3967_v14 = vunpack.c.l.bf16 %v4375_v2  ;;  %v1126_v22 = vpack.c.bf16 %v4783_v3, %v4781_v62  ;;  %v4412_v3 = vld [vmem:[%s5116_s23 + $0x2e0] sm:$0xff]  }
 0x12a   : > { %v3178_v23 = vsel %vm2602_vm10, %v2231_v7, %v2890_v15  ;;  %3323 = vst [vmem:[%s5200_s29 + $0x2c8] sm:$0xff] %v3035_v19  ;;  %v1696_v24 = vadd.f32 %v5378_v53, %v1695_v21 }
 0x12b   : > { %3466 = vst [vmem:[%s5200_s29 + $0x740] sm:$0xff] %v3178_v23  ;;  %v2052_v27 = vpop.f32.mrf.mxu2  ;;  %v1875_v28 = vpop.f32.mrf.mxu1  ;;  %v3968_v23 = vunpack.c.h.bf16 %v4375_v2  ;;  %4792 = vtanh.f32 %v3967_v14 }
 0x12c   : > { %v2053_v32 = vadd.f32 %v5378_v53, %v2052_v27  ;;  %vm2388_vm11 = vcmp.ge.f32.partialorder %v1696_v24, 0.0  ;;  %v2676_v33 = vmul.f32 0.2, %v1696_v24  ;;  %v1876_v34 = vadd.f32 %v5378_v53, %v1875_v28  ;;  %3613 = vmatmul.msk.bf16.gmra.mxu0 %vm1208_vm0, %v1053_v16  ;;  %v4787_v11 = vpop.eup %4786 }
 0x12d   : > { %v2232_v35 = vpop.f32.mrf.mxu3  ;;  %4794 = vtanh.f32 %v3968_v23  ;;  %v5506_v37 = vpop.eup %4788  ;;  %v4116_v23 = vunpack.c.h.bf16 %v4412_v3 }
 0x12e   : > { %vm2531_vm12 = vcmp.ge.f32.partialorder %v2053_v32, 0.0  ;;  %v2819_v39 = vmul.f32 0.2, %v2053_v32  ;;  %v2233_v40 = vadd.f32 %v5378_v53, %v2232_v35  ;;  %v2964_v41 = vsel %vm2388_vm11, %v1696_v24, %v2676_v33  ;;  %3649 = vmatmul.msk.bf16.gmra.mxu1 %vm1208_vm0, %v1089_v25 }
 0x12f   : > { %3252 = vst [vmem:[%s5200_s29 + $0x90] sm:$0xff] %v2964_v41  ;;  %vm2460_vm13 = vcmp.ge.f32.partialorder %v1876_v34, 0.0  ;;  %v2748_v42 = vmul.f32 0.2, %v1876_v34  ;;  %v4111_v24 = vunpack.c.l.bf16 %v4411_v10 }
 0x130   : > { %v3107_v45 = vsel %vm2531_vm12, %v2053_v32, %v2819_v39  ;;  %vm2603_vm14 = vcmp.ge.f32.partialorder %v2233_v40, 0.0  ;;  %v2891_v46 = vmul.f32 0.2, %v2233_v40  ;;  %3685 = vmatmul.msk.bf16.gmra.mxu2 %vm1208_vm0, %v1125_v29  ;;  %v1162_v29 = vpack.c.bf16 %v4787_v11, %v4785_v6  ;;  %v4448_v11 = vld [vmem:[%s5116_s23 + $0x400] sm:$0xff]  }
 0x131   : > { %3395 = vst [vmem:[%s5200_s29 + $0x508] sm:$0xff] %v3107_v45  ;;  %v3036_v48 = vsel %vm2460_vm13, %v1876_v34, %v2748_v42  ;;  %v1697_v49 = vpop.f32.mrf.mxu0  ;;  %4796 = vtanh.f32 %v4111_v24  ;;  %v4340_v45 = vld [vmem:[%s5116_s23 + $0xa0] sm:$0xff]   ;;  %v4259_v24 = vunpack.c.l.bf16 %v4448_v11 }
 0x132   : > { %v3179_v50 = vsel %vm2603_vm14, %v2233_v40, %v2891_v46  ;;  %3324 = vst [vmem:[%s5200_s29 + $0x2d0] sm:$0xff] %v3036_v48  ;;  %3721 = vmatmul.msk.bf16.gmra.mxu3 %vm1208_vm0, %v1161_v36  ;;  %v1698_v51 = vadd.f32 %v5378_v53, %v1697_v49  ;;  %v4256_v36 = vunpack.c.h.bf16 %v4447_v18  ;;  %v5509_v40 = vpop.eup %4790  ;;  %4798 = vtanh.f32 %v4112_v30 }
 0x133   : > { %3467 = vst [vmem:[%s5200_s29 + $0x748] sm:$0xff] %v3179_v50  ;;  %v2055_v20 = vpop.f32.mrf.mxu2  ;;  %v1877_v55 = vpop.f32.mrf.mxu1  ;;  %4800 = vtanh.f32 %v4255_v31  ;;  %v3828_v62 = vunpack.c.h.bf16 %v4340_v45  ;;  %v1055_v2 = vpack.c.bf16 %v5509_v40, %v5506_v37 }
 0x134   : > { %v2056_v56 = vadd.f32 %v5378_v53, %v2055_v20  ;;  %vm2389_vm15 = vcmp.ge.f32.partialorder %v1698_v51, 0.0  ;;  %v2677_v57 = vmul.f32 0.2, %v1698_v51  ;;  %v1878_v58 = vadd.f32 %v5378_v53, %v1877_v55  ;;  %v4793_v46 = vpop.eup %4792 }
 0x135   : > { %v2235_v60 = vpop.f32.mrf.mxu3  ;;  %4802 = vtanh.f32 %v4256_v36  ;;  %v4795_v52 = vpop.eup %4794  ;;  %v3827_v20 = vunpack.c.l.bf16 %v4340_v45 }
 0x136   : > { %vm2532_vm1 = vcmp.ge.f32.partialorder %v2056_v56, 0.0  ;;  %v2820_v63 = vmul.f32 0.2, %v2056_v56  ;;  %v2236_v0 = vadd.f32 %v5378_v53, %v2235_v60  ;;  %v2965_v1 = vsel %vm2389_vm15, %v1698_v51, %v2677_v57 }
 0x137   : > { %3253 = vst [vmem:[%s5200_s29 + $0x98] sm:$0xff] %v2965_v1  ;;  %vm2461_vm2 = vcmp.ge.f32.partialorder %v1878_v58, 0.0  ;;  %v2749_v4 = vmul.f32 0.2, %v1878_v58  ;;  %v4797_v55 = vpop.eup %4796  ;;  %v1091_v10 = vpack.c.bf16 %v4795_v52, %v4793_v46  ;;  %4804 = vtanh.f32 %v3827_v20  ;;  %v4377_v52 = vld [vmem:[%s5116_s23 + $0x1c8] sm:$0xff]  }
 0x138   : > { %v3108_v7 = vsel %vm2532_vm1, %v2056_v56, %v2820_v63  ;;  %vm2604_vm3 = vcmp.ge.f32.partialorder %v2236_v0, 0.0  ;;  %v2892_v8 = vmul.f32 0.2, %v2236_v0  ;;  %v4799_v60 = vpop.eup %4798  ;;  %4806 = vtanh.f32 %v3828_v62 }
 0x139   : > { %3396 = vst [vmem:[%s5200_s29 + $0x510] sm:$0xff] %v3108_v7  ;;  %v3037_v12 = vsel %vm2461_vm2, %v1878_v58, %v2749_v4  ;;  %v1700_v13 = vpop.f32.mrf.mxu0  ;;  %v4801_v63 = vpop.eup %4800  ;;  %v3971_v7 = vunpack.c.l.bf16 %v4376_v59  ;;  %v1127_v14 = vpack.c.bf16 %v4799_v60, %v4797_v55  ;;  %v4413_v60 = vld [vmem:[%s5116_s23 + $0x2e8] sm:$0xff]  }
 0x13a   : > { %v3180_v15 = vsel %vm2604_vm3, %v2236_v0, %v2892_v8  ;;  %3325 = vst [vmem:[%s5200_s29 + $0x2d8] sm:$0xff] %v3037_v12  ;;  %v1701_v16 = vadd.f32 %v5378_v53, %v1700_v13 }
 0x13b   : > { %3468 = vst [vmem:[%s5200_s29 + $0x750] sm:$0xff] %v3180_v15  ;;  %v2057_v19 = vpop.f32.mrf.mxu2  ;;  %v1880_v21 = vpop.f32.mrf.mxu1  ;;  %v3972_v15 = vunpack.c.h.bf16 %v4376_v59  ;;  %4808 = vtanh.f32 %v3971_v7 }
 0x13c   : > { %v2058_v25 = vadd.f32 %v5378_v53, %v2057_v19  ;;  %vm2390_vm4 = vcmp.ge.f32.partialorder %v1701_v16, 0.0  ;;  %v2678_v26 = vmul.f32 0.2, %v1701_v16  ;;  %v1881_v27 = vadd.f32 %v5378_v53, %v1880_v21  ;;  %3614 = vmatmul.msk.bf16.gmra.mxu0 %vm1208_vm0, %v1054_v9  ;;  %v4803_v4 = vpop.eup %4802 }
 0x13d   : > { %v2237_v28 = vpop.f32.mrf.mxu3  ;;  %4810 = vtanh.f32 %v3972_v15  ;;  %v5536_v30 = vpop.eup %4804  ;;  %v4120_v15 = vunpack.c.h.bf16 %v4413_v60 }
 0x13e   : > { %vm2533_vm5 = vcmp.ge.f32.partialorder %v2058_v25, 0.0  ;;  %v2821_v32 = vmul.f32 0.2, %v2058_v25  ;;  %v2238_v33 = vadd.f32 %v5378_v53, %v2237_v28  ;;  %v2966_v34 = vsel %vm2390_vm4, %v1701_v16, %v2678_v26  ;;  %3650 = vmatmul.msk.bf16.gmra.mxu1 %vm1208_vm0, %v1090_v17 }
 0x13f   : > { %3254 = vst [vmem:[%s5200_s29 + $0xa0] sm:$0xff] %v2966_v34  ;;  %vm2462_vm6 = vcmp.ge.f32.partialorder %v1881_v27, 0.0  ;;  %v2750_v35 = vmul.f32 0.2, %v1881_v27  ;;  %v4115_v16 = vunpack.c.l.bf16 %v4412_v3 }
 0x140   : > { %v3109_v38 = vsel %vm2533_vm5, %v2058_v25, %v2821_v32  ;;  %vm2605_vm7 = vcmp.ge.f32.partialorder %v2238_v33, 0.0  ;;  %v2893_v39 = vmul.f32 0.2, %v2238_v33  ;;  %3686 = vmatmul.msk.bf16.gmra.mxu2 %vm1208_vm0, %v1126_v22  ;;  %v1163_v22 = vpack.c.bf16 %v4803_v4, %v4801_v63  ;;  %v4449_v4 = vld [vmem:[%s5116_s23 + $0x408] sm:$0xff]  }
 0x141   : > { %3397 = vst [vmem:[%s5200_s29 + $0x518] sm:$0xff] %v3109_v38  ;;  %v3038_v41 = vsel %vm2462_vm6, %v1881_v27, %v2750_v35  ;;  %v1702_v42 = vpop.f32.mrf.mxu0  ;;  %4812 = vtanh.f32 %v4115_v16  ;;  %v4341_v38 = vld [vmem:[%s5116_s23 + $0xa8] sm:$0xff]   ;;  %v4263_v16 = vunpack.c.l.bf16 %v4449_v4 }
 0x142   : > { %v3181_v43 = vsel %vm2605_vm7, %v2238_v33, %v2893_v39  ;;  %3326 = vst [vmem:[%s5200_s29 + $0x2e0] sm:$0xff] %v3038_v41  ;;  %3722 = vmatmul.msk.bf16.gmra.mxu3 %vm1208_vm0, %v1162_v29  ;;  %v1703_v44 = vadd.f32 %v5378_v53, %v1702_v42  ;;  %v4260_v29 = vunpack.c.h.bf16 %v4448_v11  ;;  %v5539_v33 = vpop.eup %4806  ;;  %4814 = vtanh.f32 %v4116_v23 }
 0x143   : > { %3469 = vst [vmem:[%s5200_s29 + $0x758] sm:$0xff] %v3181_v43  ;;  %v2060_v47 = vpop.f32.mrf.mxu2  ;;  %v1882_v48 = vpop.f32.mrf.mxu1  ;;  %4816 = vtanh.f32 %v4259_v24  ;;  %v3832_v55 = vunpack.c.h.bf16 %v4341_v38  ;;  %v1056_v59 = vpack.c.bf16 %v5539_v33, %v5536_v30 }
 0x144   : > { %v2061_v49 = vadd.f32 %v5378_v53, %v2060_v47  ;;  %vm2391_vm8 = vcmp.ge.f32.partialorder %v1703_v44, 0.0  ;;  %v2679_v50 = vmul.f32 0.2, %v1703_v44  ;;  %v1883_v51 = vadd.f32 %v5378_v53, %v1882_v48  ;;  %v5546_v39 = vpop.eup %4808 }
 0x145   : > { %v2240_v54 = vpop.f32.mrf.mxu3  ;;  %4818 = vtanh.f32 %v4260_v29  ;;  %v4811_v45 = vpop.eup %4810  ;;  %v3831_v47 = vunpack.c.l.bf16 %v4341_v38 }
 0x146   : > { %vm2534_vm9 = vcmp.ge.f32.partialorder %v2061_v49, 0.0  ;;  %v2822_v56 = vmul.f32 0.2, %v2061_v49  ;;  %v2241_v57 = vadd.f32 %v5378_v53, %v2240_v54  ;;  %v2967_v58 = vsel %vm2391_vm8, %v1703_v44, %v2679_v50 }
 0x147   : > { %3255 = vst [vmem:[%s5200_s29 + $0xa8] sm:$0xff] %v2967_v58  ;;  %vm2463_vm10 = vcmp.ge.f32.partialorder %v1883_v51, 0.0  ;;  %v2751_v61 = vmul.f32 0.2, %v1883_v51  ;;  %v4813_v48 = vpop.eup %4812  ;;  %v1092_v3 = vpack.c.bf16 %v4811_v45, %v5546_v39  ;;  %4820 = vtanh.f32 %v3831_v47  ;;  %v4378_v45 = vld [vmem:[%s5116_s23 + $0x1d0] sm:$0xff]  }
 0x148   : > { %v3110_v0 = vsel %vm2534_vm9, %v2061_v49, %v2822_v56  ;;  %vm2606_vm11 = vcmp.ge.f32.partialorder %v2241_v57, 0.0  ;;  %v2894_v1 = vmul.f32 0.2, %v2241_v57  ;;  %v4815_v54 = vpop.eup %4814  ;;  %4822 = vtanh.f32 %v3832_v55 }
 0x149   : > { %3398 = vst [vmem:[%s5200_s29 + $0x520] sm:$0xff] %v3110_v0  ;;  %v3039_v5 = vsel %vm2463_vm10, %v1883_v51, %v2751_v61  ;;  %v1705_v6 = vpop.f32.mrf.mxu0  ;;  %v4817_v56 = vpop.eup %4816  ;;  %v3975_v0 = vunpack.c.l.bf16 %v4377_v52  ;;  %v1128_v7 = vpack.c.bf16 %v4815_v54, %v4813_v48  ;;  %v4414_v54 = vld [vmem:[%s5116_s23 + $0x2f0] sm:$0xff]  }
 0x14a   : > { %v3182_v8 = vsel %vm2606_vm11, %v2241_v57, %v2894_v1  ;;  %3327 = vst [vmem:[%s5200_s29 + $0x2e8] sm:$0xff] %v3039_v5  ;;  %v1706_v9 = vadd.f32 %v5378_v53, %v1705_v6 }
 0x14b   : > { %3470 = vst [vmem:[%s5200_s29 + $0x760] sm:$0xff] %v3182_v8  ;;  %v2062_v12 = vpop.f32.mrf.mxu2  ;;  %v1885_v13 = vpop.f32.mrf.mxu1  ;;  %v3976_v8 = vunpack.c.h.bf16 %v4377_v52  ;;  %4824 = vtanh.f32 %v3975_v0 }
 0x14c   : > { %v2063_v17 = vadd.f32 %v5378_v53, %v2062_v12  ;;  %vm2392_vm12 = vcmp.ge.f32.partialorder %v1706_v9, 0.0  ;;  %v2680_v18 = vmul.f32 0.2, %v1706_v9  ;;  %v1886_v19 = vadd.f32 %v5378_v53, %v1885_v13  ;;  %3615 = vmatmul.msk.bf16.gmra.mxu0 %vm1208_vm0, %v1055_v2  ;;  %v4819_v61 = vpop.eup %4818 }
 0x14d   : > { %v2242_v21 = vpop.f32.mrf.mxu3  ;;  %4826 = vtanh.f32 %v3976_v8  ;;  %v5574_v23 = vpop.eup %4820  ;;  %v4124_v8 = vunpack.c.h.bf16 %v4414_v54 }
 0x14e   : > { %vm2535_vm13 = vcmp.ge.f32.partialorder %v2063_v17, 0.0  ;;  %v2823_v25 = vmul.f32 0.2, %v2063_v17  ;;  %v2243_v26 = vadd.f32 %v5378_v53, %v2242_v21  ;;  %v2968_v27 = vsel %vm2392_vm12, %v1706_v9, %v2680_v18  ;;  %3651 = vmatmul.msk.bf16.gmra.mxu1 %vm1208_vm0, %v1091_v10  ;;  %v5569_v18 = vld [vmem:[%s6182_s2] ss:$0 sm:$0xff] }
 0x14f   : > { %3256 = vst [vmem:[%s5200_s29 + $0xb0] sm:$0xff] %v2968_v27  ;;  %vm2464_vm14 = vcmp.ge.f32.partialorder %v1886_v19, 0.0  ;;  %v2752_v28 = vmul.f32 0.2, %v1886_v19  ;;  %v4119_v9 = vunpack.c.l.bf16 %v4413_v60 }
 0x150   : > { %v3111_v31 = vsel %vm2535_vm13, %v2063_v17, %v2823_v25  ;;  %vm2607_vm15 = vcmp.ge.f32.partialorder %v2243_v26, 0.0  ;;  %v2895_v32 = vmul.f32 0.2, %v2243_v26  ;;  %3687 = vmatmul.msk.bf16.gmra.mxu2 %vm1208_vm0, %v1127_v14  ;;  %v1164_v14 = vpack.c.bf16 %v4819_v61, %v4817_v56  ;;  %v4450_v61 = vld [vmem:[%s5116_s23 + $0x410] sm:$0xff]  }
 0x151   : > { %3399 = vst [vmem:[%s5200_s29 + $0x528] sm:$0xff] %v3111_v31  ;;  %v3040_v34 = vsel %vm2464_vm14, %v1886_v19, %v2752_v28  ;;  %v1707_v35 = vpop.f32.mrf.mxu0  ;;  %4828 = vtanh.f32 %v4119_v9  ;;  %v4342_v31 = vld [vmem:[%s5116_s23 + $0xb0] sm:$0xff]   ;;  %v4267_v9 = vunpack.c.l.bf16 %v4450_v61 }
 0x152   : > { %v3183_v36 = vsel %vm2607_vm15, %v2243_v26, %v2895_v32  ;;  %3328 = vst [vmem:[%s5200_s29 + $0x2f0] sm:$0xff] %v3040_v34  ;;  %3723 = vmatmul.msk.bf16.gmra.mxu3 %vm1208_vm0, %v1163_v22  ;;  %v1708_v37 = vadd.f32 %v5378_v53, %v1707_v35  ;;  %v4264_v22 = vunpack.c.h.bf16 %v4449_v4  ;;  %v5577_v26 = vpop.eup %4822  ;;  %4830 = vtanh.f32 %v4120_v15 }
 0x153   : > { %3471 = vst [vmem:[%s5200_s29 + $0x768] sm:$0xff] %v3183_v36  ;;  %v2065_v40 = vpop.f32.mrf.mxu2  ;;  %v1887_v41 = vpop.f32.mrf.mxu1  ;;  %4832 = vtanh.f32 %v4263_v16  ;;  %v3836_v48 = vunpack.c.h.bf16 %v4342_v31  ;;  %v1057_v52 = vpack.c.bf16 %v5577_v26, %v5574_v23 }
 0x154   : > { %v2066_v42 = vadd.f32 %v5378_v53, %v2065_v40  ;;  %vm2393_vm1 = vcmp.ge.f32.partialorder %v1708_v37, 0.0  ;;  %v2681_v43 = vmul.f32 0.2, %v1708_v37  ;;  %v1888_v44 = vadd.f32 %v5378_v53, %v1887_v41  ;;  %v4825_v32 = vpop.eup %4824 }
 0x155   : > { %v2245_v46 = vpop.f32.mrf.mxu3  ;;  %4834 = vtanh.f32 %v4264_v22  ;;  %v4827_v38 = vpop.eup %4826  ;;  %v3835_v40 = vunpack.c.l.bf16 %v4342_v31 }
 0x156   : > { %vm2536_vm2 = vcmp.ge.f32.partialorder %v2066_v42, 0.0  ;;  %v2824_v49 = vmul.f32 0.2, %v2066_v42  ;;  %v2246_v50 = vadd.f32 %v5378_v53, %v2245_v46  ;;  %v2969_v51 = vsel %vm2393_vm1, %v1708_v37, %v2681_v43 }
 0x157   : > { %3257 = vst [vmem:[%s5200_s29 + $0xb8] sm:$0xff] %v2969_v51  ;;  %vm2465_vm3 = vcmp.ge.f32.partialorder %v1888_v44, 0.0  ;;  %v2753_v20 = vmul.f32 0.2, %v1888_v44  ;;  %v4829_v41 = vpop.eup %4828  ;;  %v1093_v60 = vpack.c.bf16 %v4827_v38, %v4825_v32  ;;  %4836 = vtanh.f32 %v3835_v40  ;;  %v4379_v38 = vld [vmem:[%s5116_s23 + $0x1d8] sm:$0xff]  }
 0x158   : > { %v3112_v57 = vsel %vm2536_vm2, %v2066_v42, %v2824_v49  ;;  %vm2608_vm4 = vcmp.ge.f32.partialorder %v2246_v50, 0.0  ;;  %v2896_v58 = vmul.f32 0.2, %v2246_v50  ;;  %v4831_v46 = vpop.eup %4830  ;;  %4838 = vtanh.f32 %v3836_v48 }
 0x159   : > { %3400 = vst [vmem:[%s5200_s29 + $0x530] sm:$0xff] %v3112_v57  ;;  %v3041_v62 = vsel %vm2465_vm3, %v1888_v44, %v2753_v20  ;;  %v1710_v63 = vpop.f32.mrf.mxu0  ;;  %v4833_v49 = vpop.eup %4832  ;;  %v3979_v57 = vunpack.c.l.bf16 %v4378_v45  ;;  %v1129_v0 = vpack.c.bf16 %v4831_v46, %v4829_v41  ;;  %v4415_v46 = vld [vmem:[%s5116_s23 + $0x2f8] sm:$0xff]  }
 0x15a   : > { %v3184_v1 = vsel %vm2608_vm4, %v2246_v50, %v2896_v58  ;;  %3329 = vst [vmem:[%s5200_s29 + $0x2f8] sm:$0xff] %v3041_v62  ;;  %v1711_v2 = vadd.f32 %v5378_v53, %v1710_v63 }
 0x15b   : > { %3472 = vst [vmem:[%s5200_s29 + $0x770] sm:$0xff] %v3184_v1  ;;  %v2067_v5 = vpop.f32.mrf.mxu2  ;;  %v1890_v6 = vpop.f32.mrf.mxu1  ;;  %v3980_v1 = vunpack.c.h.bf16 %v4378_v45  ;;  %4840 = vtanh.f32 %v3979_v57 }
 0x15c   : > { %v2068_v10 = vadd.f32 %v5378_v53, %v2067_v5  ;;  %vm2394_vm5 = vcmp.ge.f32.partialorder %v1711_v2, 0.0  ;;  %v2682_v11 = vmul.f32 0.2, %v1711_v2  ;;  %v1891_v12 = vadd.f32 %v5378_v53, %v1890_v6  ;;  %3616 = vmatmul.msk.bf16.gmra.mxu0 %vm1208_vm0, %v1056_v59  ;;  %v4835_v20 = vpop.eup %4834 }
 0x15d   : > { %v2247_v13 = vpop.f32.mrf.mxu3  ;;  %4842 = vtanh.f32 %v3980_v1  ;;  %v5604_v15 = vpop.eup %4836  ;;  %v4128_v1 = vunpack.c.h.bf16 %v4415_v46 }
 0x15e   : > { %vm2537_vm6 = vcmp.ge.f32.partialorder %v2068_v10, 0.0  ;;  %v2825_v17 = vmul.f32 0.2, %v2068_v10  ;;  %v2248_v19 = vadd.f32 %v5569_v18, %v2247_v13  ;;  %v2970_v21 = vsel %vm2394_vm5, %v1711_v2, %v2682_v11  ;;  %3652 = vmatmul.msk.bf16.gmra.mxu1 %vm1208_vm0, %v1092_v3 }
 0x15f   : > { %3258 = vst [vmem:[%s5200_s29 + $0xc0] sm:$0xff] %v2970_v21  ;;  %vm2466_vm7 = vcmp.ge.f32.partialorder %v1891_v12, 0.0  ;;  %v2754_v53 = vmul.f32 0.2, %v1891_v12  ;;  %v4123_v2 = vunpack.c.l.bf16 %v4414_v54 }
 0x160   : > { %v3113_v24 = vsel %vm2537_vm6, %v2068_v10, %v2825_v17  ;;  %vm2609_vm8 = vcmp.ge.f32.partialorder %v2248_v19, 0.0  ;;  %v2897_v25 = vmul.f32 0.2, %v2248_v19  ;;  %3688 = vmatmul.msk.bf16.gmra.mxu2 %vm1208_vm0, %v1128_v7  ;;  %v1165_v7 = vpack.c.bf16 %v4835_v20, %v4833_v49  ;;  %v4451_v20 = vld [vmem:[%s5116_s23 + $0x418] sm:$0xff]  }
 0x161   : > { %3401 = vst [vmem:[%s5200_s29 + $0x538] sm:$0xff] %v3113_v24  ;;  %v3042_v27 = vsel %vm2466_vm7, %v1891_v12, %v2754_v53  ;;  %v1712_v28 = vpop.f32.mrf.mxu0  ;;  %4844 = vtanh.f32 %v4123_v2  ;;  %v4343_v24 = vld [vmem:[%s5116_s23 + $0xb8] sm:$0xff]   ;;  %v4271_v2 = vunpack.c.l.bf16 %v4451_v20 }
 0x162   : > { %v3185_v29 = vsel %vm2609_vm8, %v2248_v19, %v2897_v25  ;;  %3330 = vst [vmem:[%s5200_s29 + $0x300] sm:$0xff] %v3042_v27  ;;  %3724 = vmatmul.msk.bf16.gmra.mxu3 %vm1208_vm0, %v1164_v14  ;;  %v1713_v30 = vadd.f32 %v5569_v18, %v1712_v28  ;;  %v4268_v14 = vunpack.c.h.bf16 %v4450_v61  ;;  %v5607_v19 = vpop.eup %4838  ;;  %4846 = vtanh.f32 %v4124_v8 }
 0x163   : > { %3473 = vst [vmem:[%s5200_s29 + $0x778] sm:$0xff] %v3185_v29  ;;  %v2070_v33 = vpop.f32.mrf.mxu2  ;;  %v1892_v34 = vpop.f32.mrf.mxu1  ;;  %4848 = vtanh.f32 %v4267_v9  ;;  %v3840_v41 = vunpack.c.h.bf16 %v4343_v24  ;;  %v1058_v45 = vpack.c.bf16 %v5607_v19, %v5604_v15 }
 0x164   : > { %v2071_v35 = vadd.f32 %v5569_v18, %v2070_v33  ;;  %vm2395_vm9 = vcmp.ge.f32.partialorder %v1713_v30, 0.0  ;;  %v2683_v36 = vmul.f32 0.2, %v1713_v30  ;;  %v1893_v37 = vadd.f32 %v5569_v18, %v1892_v34  ;;  %v4841_v25 = vpop.eup %4840 }
 0x165   : > { %v2250_v39 = vpop.f32.mrf.mxu3  ;;  %4850 = vtanh.f32 %v4268_v14  ;;  %v4843_v31 = vpop.eup %4842  ;;  %v3839_v33 = vunpack.c.l.bf16 %v4343_v24 }
 0x166   : > { %vm2538_vm10 = vcmp.ge.f32.partialorder %v2071_v35, 0.0  ;;  %v2826_v42 = vmul.f32 0.2, %v2071_v35  ;;  %v2251_v43 = vadd.f32 %v5569_v18, %v2250_v39  ;;  %v2971_v44 = vsel %vm2395_vm9, %v1713_v30, %v2683_v36 }
 0x167   : > { %3259 = vst [vmem:[%s5200_s29 + $0xc8] sm:$0xff] %v2971_v44  ;;  %vm2467_vm11 = vcmp.ge.f32.partialorder %v1893_v37, 0.0  ;;  %v2755_v47 = vmul.f32 0.2, %v1893_v37  ;;  %v4845_v34 = vpop.eup %4844  ;;  %v1094_v54 = vpack.c.bf16 %v4843_v31, %v4841_v25  ;;  %4852 = vtanh.f32 %v3839_v33  ;;  %v4380_v31 = vld [vmem:[%s5116_s23 + $0x1e0] sm:$0xff]  }
 0x168   : > { %v3114_v50 = vsel %vm2538_vm10, %v2071_v35, %v2826_v42  ;;  %vm2610_vm12 = vcmp.ge.f32.partialorder %v2251_v43, 0.0  ;;  %v2898_v51 = vmul.f32 0.2, %v2251_v43  ;;  %v4847_v39 = vpop.eup %4846  ;;  %4854 = vtanh.f32 %v3840_v41 }
 0x169   : > { %3402 = vst [vmem:[%s5200_s29 + $0x540] sm:$0xff] %v3114_v50  ;;  %v3043_v55 = vsel %vm2467_vm11, %v1893_v37, %v2755_v47  ;;  %v1715_v56 = vpop.f32.mrf.mxu0  ;;  %v4849_v42 = vpop.eup %4848  ;;  %v3983_v50 = vunpack.c.l.bf16 %v4379_v38  ;;  %v1130_v57 = vpack.c.bf16 %v4847_v39, %v4845_v34  ;;  %v4416_v39 = vld [vmem:[%s5116_s23 + $0x300] sm:$0xff]  }
 0x16a   : > { %v3186_v58 = vsel %vm2610_vm12, %v2251_v43, %v2898_v51  ;;  %3331 = vst [vmem:[%s5200_s29 + $0x308] sm:$0xff] %v3043_v55  ;;  %v1716_v59 = vadd.f32 %v5569_v18, %v1715_v56 }
 0x16b   : > { %3474 = vst [vmem:[%s5200_s29 + $0x780] sm:$0xff] %v3186_v58  ;;  %v2072_v62 = vpop.f32.mrf.mxu2  ;;  %v1895_v63 = vpop.f32.mrf.mxu1  ;;  %v3984_v58 = vunpack.c.h.bf16 %v4379_v38  ;;  %4856 = vtanh.f32 %v3983_v50 }
 0x16c   : > { %v2073_v3 = vadd.f32 %v5569_v18, %v2072_v62  ;;  %vm2396_vm13 = vcmp.ge.f32.partialorder %v1716_v59, 0.0  ;;  %v2684_v4 = vmul.f32 0.2, %v1716_v59  ;;  %v1896_v5 = vadd.f32 %v5569_v18, %v1895_v63  ;;  %3617 = vmatmul.msk.bf16.gmra.mxu0 %vm1208_vm0, %v1057_v52  ;;  %v4851_v47 = vpop.eup %4850 }
 0x16d   : > { %v2252_v6 = vpop.f32.mrf.mxu3  ;;  %4858 = vtanh.f32 %v3984_v58  ;;  %v5634_v8 = vpop.eup %4852  ;;  %v4132_v58 = vunpack.c.h.bf16 %v4416_v39 }
 0x16e   : > { %vm2539_vm14 = vcmp.ge.f32.partialorder %v2073_v3, 0.0  ;;  %v2827_v10 = vmul.f32 0.2, %v2073_v3  ;;  %v2253_v11 = vadd.f32 %v5569_v18, %v2252_v6  ;;  %v2972_v12 = vsel %vm2396_vm13, %v1716_v59, %v2684_v4  ;;  %3653 = vmatmul.msk.bf16.gmra.mxu1 %vm1208_vm0, %v1093_v60 }
 0x16f   : > { %3260 = vst [vmem:[%s5200_s29 + $0xd0] sm:$0xff] %v2972_v12  ;;  %vm2468_vm15 = vcmp.ge.f32.partialorder %v1896_v5, 0.0  ;;  %v2756_v13 = vmul.f32 0.2, %v1896_v5  ;;  %v4127_v59 = vunpack.c.l.bf16 %v4415_v46 }
 0x170   : > { %v3115_v16 = vsel %vm2539_vm14, %v2073_v3, %v2827_v10  ;;  %vm2611_vm1 = vcmp.ge.f32.partialorder %v2253_v11, 0.0  ;;  %v2899_v17 = vmul.f32 0.2, %v2253_v11  ;;  %3689 = vmatmul.msk.bf16.gmra.mxu2 %vm1208_vm0, %v1129_v0  ;;  %v1166_v0 = vpack.c.bf16 %v4851_v47, %v4849_v42  ;;  %v4452_v47 = vld [vmem:[%s5116_s23 + $0x420] sm:$0xff]  }
 0x171   : > { %3403 = vst [vmem:[%s5200_s29 + $0x548] sm:$0xff] %v3115_v16  ;;  %v3044_v21 = vsel %vm2468_vm15, %v1896_v5, %v2756_v13  ;;  %v1717_v53 = vpop.f32.mrf.mxu0  ;;  %4860 = vtanh.f32 %v4127_v59  ;;  %v4344_v16 = vld [vmem:[%s5116_s23 + $0xc0] sm:$0xff]   ;;  %v4275_v59 = vunpack.c.l.bf16 %v4452_v47 }
 0x172   : > { %v3187_v22 = vsel %vm2611_vm1, %v2253_v11, %v2899_v17  ;;  %3332 = vst [vmem:[%s5200_s29 + $0x310] sm:$0xff] %v3044_v21  ;;  %3725 = vmatmul.msk.bf16.gmra.mxu3 %vm1208_vm0, %v1165_v7  ;;  %v1718_v23 = vadd.f32 %v5569_v18, %v1717_v53  ;;  %v4272_v7 = vunpack.c.h.bf16 %v4451_v20  ;;  %v5637_v11 = vpop.eup %4854  ;;  %4862 = vtanh.f32 %v4128_v1 }
 0x173   : > { %3475 = vst [vmem:[%s5200_s29 + $0x788] sm:$0xff] %v3187_v22  ;;  %v2075_v26 = vpop.f32.mrf.mxu2  ;;  %v1897_v27 = vpop.f32.mrf.mxu1  ;;  %4864 = vtanh.f32 %v4271_v2  ;;  %v3844_v34 = vunpack.c.h.bf16 %v4344_v16  ;;  %v1059_v38 = vpack.c.bf16 %v5637_v11, %v5634_v8 }
 0x174   : > { %v2076_v28 = vadd.f32 %v5569_v18, %v2075_v26  ;;  %vm2397_vm2 = vcmp.ge.f32.partialorder %v1718_v23, 0.0  ;;  %v2685_v29 = vmul.f32 0.2, %v1718_v23  ;;  %v1898_v30 = vadd.f32 %v5569_v18, %v1897_v27  ;;  %v4857_v17 = vpop.eup %4856 }
 0x175   : > { %v2255_v32 = vpop.f32.mrf.mxu3  ;;  %4866 = vtanh.f32 %v4272_v7  ;;  %v4859_v24 = vpop.eup %4858  ;;  %v3843_v26 = vunpack.c.l.bf16 %v4344_v16 }
 0x176   : > { %vm2540_vm3 = vcmp.ge.f32.partialorder %v2076_v28, 0.0  ;;  %v2828_v35 = vmul.f32 0.2, %v2076_v28  ;;  %v2256_v36 = vadd.f32 %v5569_v18, %v2255_v32  ;;  %v2973_v37 = vsel %vm2397_vm2, %v1718_v23, %v2685_v29 }
 0x177   : > { %3261 = vst [vmem:[%s5200_s29 + $0xd8] sm:$0xff] %v2973_v37  ;;  %vm2469_vm4 = vcmp.ge.f32.partialorder %v1898_v30, 0.0  ;;  %v2757_v40 = vmul.f32 0.2, %v1898_v30  ;;  %v4861_v27 = vpop.eup %4860  ;;  %v1095_v46 = vpack.c.bf16 %v4859_v24, %v4857_v17  ;;  %4868 = vtanh.f32 %v3843_v26  ;;  %v4381_v24 = vld [vmem:[%s5116_s23 + $0x1e8] sm:$0xff]  }
 0x178   : > { %v3116_v43 = vsel %vm2540_vm3, %v2076_v28, %v2828_v35  ;;  %vm2612_vm5 = vcmp.ge.f32.partialorder %v2256_v36, 0.0  ;;  %v2900_v44 = vmul.f32 0.2, %v2256_v36  ;;  %v4863_v32 = vpop.eup %4862  ;;  %4870 = vtanh.f32 %v3844_v34 }
 0x179   : > { %3404 = vst [vmem:[%s5200_s29 + $0x550] sm:$0xff] %v3116_v43  ;;  %v3045_v48 = vsel %vm2469_vm4, %v1898_v30, %v2757_v40  ;;  %v1720_v49 = vpop.f32.mrf.mxu0  ;;  %v4865_v35 = vpop.eup %4864  ;;  %v3987_v43 = vunpack.c.l.bf16 %v4380_v31  ;;  %v1131_v50 = vpack.c.bf16 %v4863_v32, %v4861_v27  ;;  %v4417_v32 = vld [vmem:[%s5116_s23 + $0x308] sm:$0xff]  }
 0x17a   : > { %v3188_v51 = vsel %vm2612_vm5, %v2256_v36, %v2900_v44  ;;  %3333 = vst [vmem:[%s5200_s29 + $0x318] sm:$0xff] %v3045_v48  ;;  %v1721_v52 = vadd.f32 %v5569_v18, %v1720_v49 }
 0x17b   : > { %3476 = vst [vmem:[%s5200_s29 + $0x790] sm:$0xff] %v3188_v51  ;;  %v2077_v55 = vpop.f32.mrf.mxu2  ;;  %v1900_v56 = vpop.f32.mrf.mxu1  ;;  %v3988_v51 = vunpack.c.h.bf16 %v4380_v31  ;;  %4872 = vtanh.f32 %v3987_v43 }
 0x17c   : > { %v2078_v60 = vadd.f32 %v5569_v18, %v2077_v55  ;;  %vm2398_vm6 = vcmp.ge.f32.partialorder %v1721_v52, 0.0  ;;  %v2686_v61 = vmul.f32 0.2, %v1721_v52  ;;  %v1901_v62 = vadd.f32 %v5569_v18, %v1900_v56  ;;  %3618 = vmatmul.msk.bf16.gmra.mxu0 %vm1208_vm0, %v1058_v45  ;;  %v4867_v40 = vpop.eup %4866 }
 0x17d   : > { %v2257_v63 = vpop.f32.mrf.mxu3  ;;  %4874 = vtanh.f32 %v3988_v51  ;;  %v5664_v1 = vpop.eup %4868  ;;  %v4136_v51 = vunpack.c.h.bf16 %v4417_v32 }
 0x17e   : > { %vm2541_vm7 = vcmp.ge.f32.partialorder %v2078_v60, 0.0  ;;  %v2829_v3 = vmul.f32 0.2, %v2078_v60  ;;  %v2258_v4 = vadd.f32 %v5569_v18, %v2257_v63  ;;  %v2974_v5 = vsel %vm2398_vm6, %v1721_v52, %v2686_v61  ;;  %3654 = vmatmul.msk.bf16.gmra.mxu1 %vm1208_vm0, %v1094_v54 }
 0x17f   : > { %3262 = vst [vmem:[%s5200_s29 + $0xe0] sm:$0xff] %v2974_v5  ;;  %vm2470_vm8 = vcmp.ge.f32.partialorder %v1901_v62, 0.0  ;;  %v2758_v6 = vmul.f32 0.2, %v1901_v62  ;;  %v4131_v52 = vunpack.c.l.bf16 %v4416_v39 }
 0x180   : > { %v3117_v9 = vsel %vm2541_vm7, %v2078_v60, %v2829_v3  ;;  %vm2613_vm9 = vcmp.ge.f32.partialorder %v2258_v4, 0.0  ;;  %v2901_v10 = vmul.f32 0.2, %v2258_v4  ;;  %3690 = vmatmul.msk.bf16.gmra.mxu2 %vm1208_vm0, %v1130_v57  ;;  %v1167_v57 = vpack.c.bf16 %v4867_v40, %v4865_v35  ;;  %v4453_v40 = vld [vmem:[%s5116_s23 + $0x428] sm:$0xff]  }
 0x181   : > { %3405 = vst [vmem:[%s5200_s29 + $0x558] sm:$0xff] %v3117_v9  ;;  %v3046_v12 = vsel %vm2470_vm8, %v1901_v62, %v2758_v6  ;;  %v1722_v13 = vpop.f32.mrf.mxu0  ;;  %4876 = vtanh.f32 %v4131_v52  ;;  %v4345_v9 = vld [vmem:[%s5116_s23 + $0xc8] sm:$0xff]   ;;  %v4279_v52 = vunpack.c.l.bf16 %v4453_v40 }
 0x182   : > { %v3189_v14 = vsel %vm2613_vm9, %v2258_v4, %v2901_v10  ;;  %3334 = vst [vmem:[%s5200_s29 + $0x320] sm:$0xff] %v3046_v12  ;;  %3726 = vmatmul.msk.bf16.gmra.mxu3 %vm1208_vm0, %v1166_v0  ;;  %v1723_v15 = vadd.f32 %v5569_v18, %v1722_v13  ;;  %v4276_v0 = vunpack.c.h.bf16 %v4452_v47  ;;  %v5667_v4 = vpop.eup %4870  ;;  %4878 = vtanh.f32 %v4132_v58 }
 0x183   : > { %3477 = vst [vmem:[%s5200_s29 + $0x798] sm:$0xff] %v3189_v14  ;;  %v2080_v19 = vpop.f32.mrf.mxu2  ;;  %v1902_v21 = vpop.f32.mrf.mxu1  ;;  %4880 = vtanh.f32 %v4275_v59  ;;  %v3848_v27 = vunpack.c.h.bf16 %v4345_v9  ;;  %v1060_v31 = vpack.c.bf16 %v5667_v4, %v5664_v1 }
 0x184   : > { %v2081_v53 = vadd.f32 %v5569_v18, %v2080_v19  ;;  %vm2399_vm10 = vcmp.ge.f32.partialorder %v1723_v15, 0.0  ;;  %v2687_v22 = vmul.f32 0.2, %v1723_v15  ;;  %v1903_v23 = vadd.f32 %v5569_v18, %v1902_v21  ;;  %v4873_v10 = vpop.eup %4872 }
 0x185   : > { %v2260_v25 = vpop.f32.mrf.mxu3  ;;  %4882 = vtanh.f32 %v4276_v0  ;;  %v4875_v16 = vpop.eup %4874  ;;  %v3847_v19 = vunpack.c.l.bf16 %v4345_v9 }
 0x186   : > { %vm2542_vm11 = vcmp.ge.f32.partialorder %v2081_v53, 0.0  ;;  %v2830_v28 = vmul.f32 0.2, %v2081_v53  ;;  %v2261_v29 = vadd.f32 %v5569_v18, %v2260_v25  ;;  %v2975_v30 = vsel %vm2399_vm10, %v1723_v15, %v2687_v22 }
 0x187   : > { %3263 = vst [vmem:[%s5200_s29 + $0xe8] sm:$0xff] %v2975_v30  ;;  %vm2471_vm12 = vcmp.ge.f32.partialorder %v1903_v23, 0.0  ;;  %v2759_v33 = vmul.f32 0.2, %v1903_v23  ;;  %v4877_v21 = vpop.eup %4876  ;;  %v1096_v39 = vpack.c.bf16 %v4875_v16, %v4873_v10  ;;  %4884 = vtanh.f32 %v3847_v19  ;;  %v4382_v16 = vld [vmem:[%s5116_s23 + $0x1f0] sm:$0xff]  }
 0x188   : > { %v3118_v36 = vsel %vm2542_vm11, %v2081_v53, %v2830_v28  ;;  %vm2614_vm13 = vcmp.ge.f32.partialorder %v2261_v29, 0.0  ;;  %v2902_v37 = vmul.f32 0.2, %v2261_v29  ;;  %v4879_v25 = vpop.eup %4878  ;;  %4886 = vtanh.f32 %v3848_v27 }
 0x189   : > { %3406 = vst [vmem:[%s5200_s29 + $0x560] sm:$0xff] %v3118_v36  ;;  %v3047_v41 = vsel %vm2471_vm12, %v1903_v23, %v2759_v33  ;;  %v1725_v42 = vpop.f32.mrf.mxu0  ;;  %v4881_v28 = vpop.eup %4880  ;;  %v3991_v36 = vunpack.c.l.bf16 %v4381_v24  ;;  %v1132_v43 = vpack.c.bf16 %v4879_v25, %v4877_v21  ;;  %v4418_v25 = vld [vmem:[%s5116_s23 + $0x310] sm:$0xff]  }
 0x18a   : > { %v3190_v44 = vsel %vm2614_vm13, %v2261_v29, %v2902_v37  ;;  %3335 = vst [vmem:[%s5200_s29 + $0x328] sm:$0xff] %v3047_v41  ;;  %v1726_v45 = vadd.f32 %v5569_v18, %v1725_v42 }
 0x18b   : > { %3478 = vst [vmem:[%s5200_s29 + $0x7a0] sm:$0xff] %v3190_v44  ;;  %v2082_v48 = vpop.f32.mrf.mxu2  ;;  %v1905_v49 = vpop.f32.mrf.mxu1  ;;  %v3992_v44 = vunpack.c.h.bf16 %v4381_v24  ;;  %4888 = vtanh.f32 %v3991_v36 }
 0x18c   : > { %v2083_v54 = vadd.f32 %v5569_v18, %v2082_v48  ;;  %vm2400_vm14 = vcmp.ge.f32.partialorder %v1726_v45, 0.0  ;;  %v2688_v20 = vmul.f32 0.2, %v1726_v45  ;;  %v1906_v55 = vadd.f32 %v5569_v18, %v1905_v49  ;;  %3619 = vmatmul.msk.bf16.gmra.mxu0 %vm1208_vm0, %v1059_v38  ;;  %v4883_v33 = vpop.eup %4882 }
 0x18d   : > { %v2262_v56 = vpop.f32.mrf.mxu3  ;;  %4890 = vtanh.f32 %v3992_v44  ;;  %v5694_v58 = vpop.eup %4884  ;;  %v4140_v44 = vunpack.c.h.bf16 %v4418_v25 }
 0x18e   : > { %vm2543_vm15 = vcmp.ge.f32.partialorder %v2083_v54, 0.0  ;;  %v2831_v60 = vmul.f32 0.2, %v2083_v54  ;;  %v2263_v61 = vadd.f32 %v5569_v18, %v2262_v56  ;;  %v2976_v62 = vsel %vm2400_vm14, %v1726_v45, %v2688_v20  ;;  %3655 = vmatmul.msk.bf16.gmra.mxu1 %vm1208_vm0, %v1095_v46 }
 0x18f   : > { %3264 = vst [vmem:[%s5200_s29 + $0xf0] sm:$0xff] %v2976_v62  ;;  %vm2472_vm1 = vcmp.ge.f32.partialorder %v1906_v55, 0.0  ;;  %v2760_v63 = vmul.f32 0.2, %v1906_v55  ;;  %v4135_v45 = vunpack.c.l.bf16 %v4417_v32 }
 0x190   : > { %v3119_v2 = vsel %vm2543_vm15, %v2083_v54, %v2831_v60  ;;  %vm2615_vm2 = vcmp.ge.f32.partialorder %v2263_v61, 0.0  ;;  %v2903_v3 = vmul.f32 0.2, %v2263_v61  ;;  %3691 = vmatmul.msk.bf16.gmra.mxu2 %vm1208_vm0, %v1131_v50  ;;  %v1168_v50 = vpack.c.bf16 %v4883_v33, %v4881_v28  ;;  %v4454_v33 = vld [vmem:[%s5116_s23 + $0x430] sm:$0xff]  }
 0x191   : > { %3407 = vst [vmem:[%s5200_s29 + $0x568] sm:$0xff] %v3119_v2  ;;  %v3048_v5 = vsel %vm2472_vm1, %v1906_v55, %v2760_v63  ;;  %v1727_v6 = vpop.f32.mrf.mxu0  ;;  %4892 = vtanh.f32 %v4135_v45  ;;  %v4346_v2 = vld [vmem:[%s5116_s23 + $0xd0] sm:$0xff]   ;;  %v4283_v45 = vunpack.c.l.bf16 %v4454_v33 }
 0x192   : > { %v3191_v7 = vsel %vm2615_vm2, %v2263_v61, %v2903_v3  ;;  %3336 = vst [vmem:[%s5200_s29 + $0x330] sm:$0xff] %v3048_v5  ;;  %3727 = vmatmul.msk.bf16.gmra.mxu3 %vm1208_vm0, %v1167_v57  ;;  %v1728_v8 = vadd.f32 %v5569_v18, %v1727_v6  ;;  %v4280_v57 = vunpack.c.h.bf16 %v4453_v40  ;;  %v5697_v61 = vpop.eup %4886  ;;  %4894 = vtanh.f32 %v4136_v51 }
 0x193   : > { %3479 = vst [vmem:[%s5200_s29 + $0x7a8] sm:$0xff] %v3191_v7  ;;  %v2085_v11 = vpop.f32.mrf.mxu2  ;;  %v1907_v12 = vpop.f32.mrf.mxu1  ;;  %4896 = vtanh.f32 %v4279_v52  ;;  %v3852_v21 = vunpack.c.h.bf16 %v4346_v2  ;;  %v1061_v24 = vpack.c.bf16 %v5697_v61, %v5694_v58 }
 0x194   : > { %v2086_v13 = vadd.f32 %v5569_v18, %v2085_v11  ;;  %vm2401_vm3 = vcmp.ge.f32.partialorder %v1728_v8, 0.0  ;;  %v2689_v14 = vmul.f32 0.2, %v1728_v8  ;;  %v1908_v15 = vadd.f32 %v5569_v18, %v1907_v12  ;;  %v4889_v3 = vpop.eup %4888 }
 0x195   : > { %v2265_v17 = vpop.f32.mrf.mxu3  ;;  %4898 = vtanh.f32 %v4280_v57  ;;  %v4891_v9 = vpop.eup %4890  ;;  %v3851_v11 = vunpack.c.l.bf16 %v4346_v2 }
 0x196   : > { %vm2544_vm4 = vcmp.ge.f32.partialorder %v2086_v13, 0.0  ;;  %v2832_v53 = vmul.f32 0.2, %v2086_v13  ;;  %v2266_v22 = vadd.f32 %v5569_v18, %v2265_v17  ;;  %v2977_v23 = vsel %vm2401_vm3, %v1728_v8, %v2689_v14 }
 0x197   : > { %3265 = vst [vmem:[%s5200_s29 + $0xf8] sm:$0xff] %v2977_v23  ;;  %vm2473_vm5 = vcmp.ge.f32.partialorder %v1908_v15, 0.0  ;;  %v2761_v26 = vmul.f32 0.2, %v1908_v15  ;;  %v4893_v12 = vpop.eup %4892  ;;  %v1097_v32 = vpack.c.bf16 %v4891_v9, %v4889_v3  ;;  %4900 = vtanh.f32 %v3851_v11  ;;  %v4383_v9 = vld [vmem:[%s5116_s23 + $0x1f8] sm:$0xff]  }
 0x198   : > { %v3120_v29 = vsel %vm2544_vm4, %v2086_v13, %v2832_v53  ;;  %vm2616_vm6 = vcmp.ge.f32.partialorder %v2266_v22, 0.0  ;;  %v2904_v30 = vmul.f32 0.2, %v2266_v22  ;;  %v4895_v17 = vpop.eup %4894  ;;  %4902 = vtanh.f32 %v3852_v21 }
 0x199   : > { %3408 = vst [vmem:[%s5200_s29 + $0x570] sm:$0xff] %v3120_v29  ;;  %v3049_v34 = vsel %vm2473_vm5, %v1908_v15, %v2761_v26  ;;  %v1730_v35 = vpop.f32.mrf.mxu0  ;;  %v4897_v53 = vpop.eup %4896  ;;  %v3995_v29 = vunpack.c.l.bf16 %v4382_v16  ;;  %v1133_v36 = vpack.c.bf16 %v4895_v17, %v4893_v12  ;;  %v4419_v17 = vld [vmem:[%s5116_s23 + $0x318] sm:$0xff]  }
 0x19a   : > { %v3192_v37 = vsel %vm2616_vm6, %v2266_v22, %v2904_v30  ;;  %3337 = vst [vmem:[%s5200_s29 + $0x338] sm:$0xff] %v3049_v34  ;;  %v1731_v38 = vadd.f32 %v5569_v18, %v1730_v35 }
 0x19b   : > { %3480 = vst [vmem:[%s5200_s29 + $0x7b0] sm:$0xff] %v3192_v37  ;;  %v2087_v41 = vpop.f32.mrf.mxu2  ;;  %v1910_v42 = vpop.f32.mrf.mxu1  ;;  %v3996_v37 = vunpack.c.h.bf16 %v4382_v16  ;;  %4904 = vtanh.f32 %v3995_v29 }
 0x19c   : > { %v2088_v46 = vadd.f32 %v5569_v18, %v2087_v41  ;;  %vm2402_vm7 = vcmp.ge.f32.partialorder %v1731_v38, 0.0  ;;  %v2690_v47 = vmul.f32 0.2, %v1731_v38  ;;  %v1911_v48 = vadd.f32 %v5569_v18, %v1910_v42  ;;  %3620 = vmatmul.msk.bf16.gmra.mxu0 %vm1208_vm0, %v1060_v31  ;;  %v4899_v26 = vpop.eup %4898 }
 0x19d   : > { %v2267_v49 = vpop.f32.mrf.mxu3  ;;  %4906 = vtanh.f32 %v3996_v37  ;;  %v5724_v51 = vpop.eup %4900  ;;  %v4144_v37 = vunpack.c.h.bf16 %v4419_v17 }
 0x19e   : > { %vm2545_vm8 = vcmp.ge.f32.partialorder %v2088_v46, 0.0  ;;  %v2833_v54 = vmul.f32 0.2, %v2088_v46  ;;  %v2268_v20 = vadd.f32 %v5569_v18, %v2267_v49  ;;  %v2978_v55 = vsel %vm2402_vm7, %v1731_v38, %v2690_v47  ;;  %3656 = vmatmul.msk.bf16.gmra.mxu1 %vm1208_vm0, %v1096_v39 }
 0x19f   : > { %3266 = vst [vmem:[%s5200_s29 + $0x100] sm:$0xff] %v2978_v55  ;;  %vm2474_vm9 = vcmp.ge.f32.partialorder %v1911_v48, 0.0  ;;  %v2762_v56 = vmul.f32 0.2, %v1911_v48  ;;  %v4139_v38 = vunpack.c.l.bf16 %v4418_v25 }
 0x1a0   : > { %v3121_v59 = vsel %vm2545_vm8, %v2088_v46, %v2833_v54  ;;  %vm2617_vm10 = vcmp.ge.f32.partialorder %v2268_v20, 0.0  ;;  %v2905_v60 = vmul.f32 0.2, %v2268_v20  ;;  %3692 = vmatmul.msk.bf16.gmra.mxu2 %vm1208_vm0, %v1132_v43  ;;  %v1169_v43 = vpack.c.bf16 %v4899_v26, %v4897_v53  ;;  %v4455_v26 = vld [vmem:[%s5116_s23 + $0x438] sm:$0xff]  }
 0x1a1   : > { %3409 = vst [vmem:[%s5200_s29 + $0x578] sm:$0xff] %v3121_v59  ;;  %v3050_v62 = vsel %vm2474_vm9, %v1911_v48, %v2762_v56  ;;  %v1732_v63 = vpop.f32.mrf.mxu0  ;;  %4908 = vtanh.f32 %v4139_v38  ;;  %v4347_v59 = vld [vmem:[%s5116_s23 + $0xd8] sm:$0xff]   ;;  %v4287_v38 = vunpack.c.l.bf16 %v4455_v26 }
 0x1a2   : > { %v3193_v0 = vsel %vm2617_vm10, %v2268_v20, %v2905_v60  ;;  %3338 = vst [vmem:[%s5200_s29 + $0x340] sm:$0xff] %v3050_v62  ;;  %3728 = vmatmul.msk.bf16.gmra.mxu3 %vm1208_vm0, %v1168_v50  ;;  %v1733_v1 = vadd.f32 %v5569_v18, %v1732_v63  ;;  %v4284_v50 = vunpack.c.h.bf16 %v4454_v33  ;;  %v5727_v20 = vpop.eup %4902  ;;  %4910 = vtanh.f32 %v4140_v44 }
 0x1a3   : > { %3481 = vst [vmem:[%s5200_s29 + $0x7b8] sm:$0xff] %v3193_v0  ;;  %v2090_v4 = vpop.f32.mrf.mxu2  ;;  %v1912_v5 = vpop.f32.mrf.mxu1  ;;  %4912 = vtanh.f32 %v4283_v45  ;;  %v3856_v12 = vunpack.c.h.bf16 %v4347_v59  ;;  %v1062_v16 = vpack.c.bf16 %v5727_v20, %v5724_v51 }
 0x1a4   : > { %v2091_v6 = vadd.f32 %v5569_v18, %v2090_v4  ;;  %vm2403_vm11 = vcmp.ge.f32.partialorder %v1733_v1, 0.0  ;;  %v2691_v7 = vmul.f32 0.2, %v1733_v1  ;;  %v1913_v8 = vadd.f32 %v5569_v18, %v1912_v5  ;;  %v4905_v60 = vpop.eup %4904 }
 0x1a5   : > { %v2270_v10 = vpop.f32.mrf.mxu3  ;;  %4914 = vtanh.f32 %v4284_v50  ;;  %v4907_v2 = vpop.eup %4906  ;;  %v3855_v4 = vunpack.c.l.bf16 %v4347_v59  ;;  %v5765_v50 = vld [vmem:[%s6182_s2] ss:$0 sm:$0xff] }
 0x1a6   : > { %vm2546_vm12 = vcmp.ge.f32.partialorder %v2091_v6, 0.0  ;;  %v2834_v13 = vmul.f32 0.2, %v2091_v6  ;;  %v2271_v14 = vadd.f32 %v5569_v18, %v2270_v10  ;;  %v2979_v15 = vsel %vm2403_vm11, %v1733_v1, %v2691_v7 }
 0x1a7   : > { %3267 = vst [vmem:[%s5200_s29 + $0x108] sm:$0xff] %v2979_v15  ;;  %vm2475_vm13 = vcmp.ge.f32.partialorder %v1913_v8, 0.0  ;;  %v2763_v19 = vmul.f32 0.2, %v1913_v8  ;;  %v4909_v5 = vpop.eup %4908  ;;  %v1098_v25 = vpack.c.bf16 %v4907_v2, %v4905_v60  ;;  %4916 = vtanh.f32 %v3855_v4  ;;  %v4384_v2 = vld [vmem:[%s5116_s23 + $0x200] sm:$0xff]  }
 0x1a8   : > { %v3122_v22 = vsel %vm2546_vm12, %v2091_v6, %v2834_v13  ;;  %vm2618_vm14 = vcmp.ge.f32.partialorder %v2271_v14, 0.0  ;;  %v2906_v23 = vmul.f32 0.2, %v2271_v14  ;;  %v4911_v10 = vpop.eup %4910  ;;  %4918 = vtanh.f32 %v3856_v12 }
 0x1a9   : > { %3410 = vst [vmem:[%s5200_s29 + $0x580] sm:$0xff] %v3122_v22  ;;  %v3051_v27 = vsel %vm2475_vm13, %v1913_v8, %v2763_v19  ;;  %v1735_v28 = vpop.f32.mrf.mxu0  ;;  %v4913_v13 = vpop.eup %4912  ;;  %v3999_v22 = vunpack.c.l.bf16 %v4383_v9  ;;  %v1134_v29 = vpack.c.bf16 %v4911_v10, %v4909_v5  ;;  %v4420_v10 = vld [vmem:[%s5116_s23 + $0x320] sm:$0xff]  }
 0x1aa   : > { %v3194_v30 = vsel %vm2618_vm14, %v2271_v14, %v2906_v23  ;;  %3339 = vst [vmem:[%s5200_s29 + $0x348] sm:$0xff] %v3051_v27  ;;  %v1736_v31 = vadd.f32 %v5569_v18, %v1735_v28 }
 0x1ab   : > { %3482 = vst [vmem:[%s5200_s29 + $0x7c0] sm:$0xff] %v3194_v30  ;;  %v2092_v34 = vpop.f32.mrf.mxu2  ;;  %v1915_v35 = vpop.f32.mrf.mxu1  ;;  %v4000_v30 = vunpack.c.h.bf16 %v4383_v9  ;;  %4920 = vtanh.f32 %v3999_v22 }
 0x1ac   : > { %v2093_v39 = vadd.f32 %v5569_v18, %v2092_v34  ;;  %vm2404_vm15 = vcmp.ge.f32.partialorder %v1736_v31, 0.0  ;;  %v2692_v40 = vmul.f32 0.2, %v1736_v31  ;;  %v1916_v41 = vadd.f32 %v5569_v18, %v1915_v35  ;;  %3621 = vmatmul.msk.bf16.gmra.mxu0 %vm1208_vm0, %v1061_v24  ;;  %v4915_v19 = vpop.eup %4914 }
 0x1ad   : > { %v2272_v42 = vpop.f32.mrf.mxu3  ;;  %4922 = vtanh.f32 %v4000_v30  ;;  %v5754_v44 = vpop.eup %4916  ;;  %v4148_v30 = vunpack.c.h.bf16 %v4420_v10 }
 0x1ae   : > { %vm2547_vm1 = vcmp.ge.f32.partialorder %v2093_v39, 0.0  ;;  %v2835_v46 = vmul.f32 0.2, %v2093_v39  ;;  %v2273_v47 = vadd.f32 %v5569_v18, %v2272_v42  ;;  %v2980_v48 = vsel %vm2404_vm15, %v1736_v31, %v2692_v40  ;;  %3657 = vmatmul.msk.bf16.gmra.mxu1 %vm1208_vm0, %v1097_v32 }
 0x1af   : > { %3268 = vst [vmem:[%s5200_s29 + $0x110] sm:$0xff] %v2980_v48  ;;  %vm2476_vm2 = vcmp.ge.f32.partialorder %v1916_v41, 0.0  ;;  %v2764_v49 = vmul.f32 0.2, %v1916_v41  ;;  %v4143_v31 = vunpack.c.l.bf16 %v4419_v17 }
 0x1b0   : > { %v3123_v52 = vsel %vm2547_vm1, %v2093_v39, %v2835_v46  ;;  %vm2619_vm3 = vcmp.ge.f32.partialorder %v2273_v47, 0.0  ;;  %v2907_v54 = vmul.f32 0.2, %v2273_v47  ;;  %3693 = vmatmul.msk.bf16.gmra.mxu2 %vm1208_vm0, %v1133_v36  ;;  %v1170_v36 = vpack.c.bf16 %v4915_v19, %v4913_v13  ;;  %v4456_v19 = vld [vmem:[%s5116_s23 + $0x440] sm:$0xff]  }
 0x1b1   : > { %3411 = vst [vmem:[%s5200_s29 + $0x588] sm:$0xff] %v3123_v52  ;;  %v3052_v55 = vsel %vm2476_vm2, %v1916_v41, %v2764_v49  ;;  %v1737_v56 = vpop.f32.mrf.mxu0  ;;  %4924 = vtanh.f32 %v4143_v31  ;;  %v4348_v52 = vld [vmem:[%s5116_s23 + $0xe0] sm:$0xff]   ;;  %v4291_v31 = vunpack.c.l.bf16 %v4456_v19 }
 0x1b2   : > { %v3195_v57 = vsel %vm2619_vm3, %v2273_v47, %v2907_v54  ;;  %3340 = vst [vmem:[%s5200_s29 + $0x350] sm:$0xff] %v3052_v55  ;;  %3729 = vmatmul.msk.bf16.gmra.mxu3 %vm1208_vm0, %v1169_v43  ;;  %v1738_v58 = vadd.f32 %v5569_v18, %v1737_v56  ;;  %v4288_v43 = vunpack.c.h.bf16 %v4455_v26  ;;  %4926 = vtanh.f32 %v4144_v37 }
 0x1b3   : > { %3483 = vst [vmem:[%s5200_s29 + $0x7c8] sm:$0xff] %v3195_v57  ;;  %v2095_v61 = vpop.f32.mrf.mxu2  ;;  %v1917_v62 = vpop.f32.mrf.mxu1  ;;  %4928 = vtanh.f32 %v4287_v38  ;;  %v3860_v5 = vunpack.c.h.bf16 %v4348_v52 }
 0x1b4   : > { %v2096_v63 = vadd.f32 %v5569_v18, %v2095_v61  ;;  %vm2405_vm4 = vcmp.ge.f32.partialorder %v1738_v58, 0.0  ;;  %v2693_v0 = vmul.f32 0.2, %v1738_v58  ;;  %v1918_v1 = vadd.f32 %v5569_v18, %v1917_v62 }
 0x1b5   : > { %v2275_v3 = vpop.f32.mrf.mxu3  ;;  %4930 = vtanh.f32 %v4288_v43  ;;  %v3859_v61 = vunpack.c.l.bf16 %v4348_v52 }
 0x1b6   : > { %vm2548_vm5 = vcmp.ge.f32.partialorder %v2096_v63, 0.0  ;;  %v2836_v6 = vmul.f32 0.2, %v2096_v63  ;;  %v2276_v7 = vadd.f32 %v5569_v18, %v2275_v3  ;;  %v2981_v8 = vsel %vm2405_vm4, %v1738_v58, %v2693_v0 }
 0x1b7   : > { %3269 = vst [vmem:[%s5200_s29 + $0x118] sm:$0xff] %v2981_v8  ;;  %vm2477_vm6 = vcmp.ge.f32.partialorder %v1918_v1, 0.0  ;;  %v2765_v11 = vmul.f32 0.2, %v1918_v1  ;;  %4932 = vtanh.f32 %v3859_v61 }
 0x1b8   : > { %v3124_v14 = vsel %vm2548_vm5, %v2096_v63, %v2836_v6  ;;  %vm2620_vm7 = vcmp.ge.f32.partialorder %v2276_v7, 0.0  ;;  %v2908_v15 = vmul.f32 0.2, %v2276_v7  ;;  %4934 = vtanh.f32 %v3860_v5 }
 0x1b9   : > { %3412 = vst [vmem:[%s5200_s29 + $0x590] sm:$0xff] %v3124_v14  ;;  %v3053_v21 = vsel %vm2477_vm6, %v1918_v1, %v2765_v11  ;;  %v1740_v53 = vpop.f32.mrf.mxu0  ;;  %v4003_v14 = vunpack.c.l.bf16 %v4384_v2 }
 0x1ba   : > { %v3196_v23 = vsel %vm2620_vm7, %v2276_v7, %v2908_v15  ;;  %3341 = vst [vmem:[%s5200_s29 + $0x358] sm:$0xff] %v3053_v21  ;;  %v1741_v24 = vadd.f32 %v5569_v18, %v1740_v53 }
 0x1bb   : > { %3484 = vst [vmem:[%s5200_s29 + $0x7d0] sm:$0xff] %v3196_v23  ;;  %v2097_v27 = vpop.f32.mrf.mxu2  ;;  %v1920_v28 = vpop.f32.mrf.mxu1  ;;  %v4004_v23 = vunpack.c.h.bf16 %v4384_v2  ;;  %4936 = vtanh.f32 %v4003_v14 }
 0x1bc   : > { %v2098_v32 = vadd.f32 %v5569_v18, %v2097_v27  ;;  %vm2406_vm8 = vcmp.ge.f32.partialorder %v1741_v24, 0.0  ;;  %v2694_v33 = vmul.f32 0.2, %v1741_v24  ;;  %v1921_v34 = vadd.f32 %v5569_v18, %v1920_v28  ;;  %3622 = vmatmul.msk.bf16.gmra.mxu0 %vm1208_vm0, %v1062_v16 }
 0x1bd   : > { %v2277_v35 = vpop.f32.mrf.mxu3  ;;  %4938 = vtanh.f32 %v4004_v23 }
 0x1be   : > { %vm2549_vm9 = vcmp.ge.f32.partialorder %v2098_v32, 0.0  ;;  %v2837_v39 = vmul.f32 0.2, %v2098_v32  ;;  %v2278_v40 = vadd.f32 %v5569_v18, %v2277_v35  ;;  %v2982_v41 = vsel %vm2406_vm8, %v1741_v24, %v2694_v33  ;;  %3658 = vmatmul.msk.bf16.gmra.mxu1 %vm1208_vm0, %v1098_v25  ;;  %v5757_v18 = vpop.eup %4918 }
 0x1bf   : > { %3270 = vst [vmem:[%s5200_s29 + $0x120] sm:$0xff] %v2982_v41  ;;  %vm2478_vm10 = vcmp.ge.f32.partialorder %v1921_v34, 0.0  ;;  %v2766_v42 = vmul.f32 0.2, %v1921_v34  ;;  %v4921_v54 = vpop.eup %4920  ;;  %v1063_v9 = vpack.c.bf16 %v5757_v18, %v5754_v44  ;;  %v4147_v24 = vunpack.c.l.bf16 %v4420_v10 }
 0x1c0   : > { %v3125_v45 = vsel %vm2549_vm9, %v2098_v32, %v2837_v39  ;;  %vm2621_vm11 = vcmp.ge.f32.partialorder %v2278_v40, 0.0  ;;  %v2909_v46 = vmul.f32 0.2, %v2278_v40  ;;  %3694 = vmatmul.msk.bf16.gmra.mxu2 %vm1208_vm0, %v1134_v29  ;;  %v4923_v59 = vpop.eup %4922 }
 0x1c1   : > { %3413 = vst [vmem:[%s5200_s29 + $0x598] sm:$0xff] %v3125_v45  ;;  %v3054_v47 = vsel %vm2478_vm10, %v1921_v34, %v2766_v42  ;;  %v1742_v48 = vpop.f32.mrf.mxu0  ;;  %v4925_v62 = vpop.eup %4924  ;;  %v1099_v17 = vpack.c.bf16 %v4923_v59, %v4921_v54  ;;  %4940 = vtanh.f32 %v4147_v24  ;;  %v4349_v45 = vld [vmem:[%s5116_s23 + $0xe8] sm:$0xff]  }
 0x1c2   : > { %v3197_v49 = vsel %vm2621_vm11, %v2278_v40, %v2909_v46  ;;  %3342 = vst [vmem:[%s5200_s29 + $0x360] sm:$0xff] %v3054_v47  ;;  %3730 = vmatmul.msk.bf16.gmra.mxu3 %vm1208_vm0, %v1170_v36  ;;  %v1743_v51 = vadd.f32 %v5765_v50, %v1742_v48  ;;  %v4927_v3 = vpop.eup %4926  ;;  %v4292_v36 = vunpack.c.h.bf16 %v4456_v19  ;;  %4942 = vtanh.f32 %v4148_v30  ;;  %v4385_v59 = vld [vmem:[%s5116_s23 + $0x208] sm:$0xff]  }
 0x1c3   : > { %3485 = vst [vmem:[%s5200_s29 + $0x7d8] sm:$0xff] %v3197_v49  ;;  %v2100_v20 = vpop.f32.mrf.mxu2  ;;  %v1922_v55 = vpop.f32.mrf.mxu1  ;;  %v1135_v22 = vpack.c.bf16 %v4927_v3, %v4925_v62  ;;  %4944 = vtanh.f32 %v4291_v31  ;;  %v3864_v62 = vunpack.c.h.bf16 %v4349_v45  ;;  %v4421_v3 = vld [vmem:[%s5116_s23 + $0x328] sm:$0xff]  }
 0x1c4   : > { %v2101_v56 = vadd.f32 %v5765_v50, %v2100_v20  ;;  %vm2407_vm12 = vcmp.ge.f32.partialorder %v1743_v51, 0.0  ;;  %v2695_v57 = vmul.f32 0.2, %v1743_v51  ;;  %v1923_v58 = vadd.f32 %v5765_v50, %v1922_v55  ;;  %v4929_v6 = vpop.eup %4928 }
 0x1c5   : > { %v2280_v60 = vpop.f32.mrf.mxu3  ;;  %v4931_v11 = vpop.eup %4930  ;;  %4946 = vtanh.f32 %v4292_v36  ;;  %v3863_v20 = vunpack.c.l.bf16 %v4349_v45  ;;  %v4152_v23 = vunpack.c.h.bf16 %v4421_v3 }
 0x1c6   : > { %vm2550_vm13 = vcmp.ge.f32.partialorder %v2101_v56, 0.0  ;;  %v2838_v63 = vmul.f32 0.2, %v2101_v56  ;;  %v2281_v0 = vadd.f32 %v5765_v50, %v2280_v60  ;;  %v2983_v1 = vsel %vm2407_vm12, %v1743_v51, %v2695_v57  ;;  %v5789_v37 = vpop.eup %4932 }
 0x1c7   : > { %3271 = vst [vmem:[%s5200_s29 + $0x128] sm:$0xff] %v2983_v1  ;;  %vm2479_vm14 = vcmp.ge.f32.partialorder %v1923_v58, 0.0  ;;  %v2767_v4 = vmul.f32 0.2, %v1923_v58  ;;  %v1171_v29 = vpack.c.bf16 %v4931_v11, %v4929_v6  ;;  %v5792_v40 = vpop.eup %4934  ;;  %4948 = vtanh.f32 %v3863_v20  ;;  %v4457_v11 = vld [vmem:[%s5116_s23 + $0x448] sm:$0xff]  }
 0x1c8   : > { %v3126_v7 = vsel %vm2550_vm13, %v2101_v56, %v2838_v63  ;;  %vm2622_vm15 = vcmp.ge.f32.partialorder %v2281_v0, 0.0  ;;  %v2910_v8 = vmul.f32 0.2, %v2281_v0  ;;  %v4937_v46 = vpop.eup %4936  ;;  %v1064_v2 = vpack.c.bf16 %v5792_v40, %v5789_v37 }
 0x1c9   : > { %3414 = vst [vmem:[%s5200_s29 + $0x5a0] sm:$0xff] %v3126_v7  ;;  %v3055_v12 = vsel %vm2479_vm14, %v1923_v58, %v2767_v4  ;;  %v1745_v13 = vpop.f32.mrf.mxu0  ;;  %v4939_v52 = vpop.eup %4938  ;;  %v4007_v7 = vunpack.c.l.bf16 %v4385_v59  ;;  %4950 = vtanh.f32 %v3864_v62  ;;  %v4295_v24 = vunpack.c.l.bf16 %v4457_v11 }
 0x1ca   : > { %v3198_v15 = vsel %vm2622_vm15, %v2281_v0, %v2910_v8  ;;  %3343 = vst [vmem:[%s5200_s29 + $0x368] sm:$0xff] %v3055_v12  ;;  %v1746_v16 = vadd.f32 %v5765_v50, %v1745_v13  ;;  %v4941_v55 = vpop.eup %4940  ;;  %v1100_v10 = vpack.c.bf16 %v4939_v52, %v4937_v46  ;;  %v4386_v52 = vld [vmem:[%s5116_s23 + $0x210] sm:$0xff]  }
 0x1cb   : > { %3486 = vst [vmem:[%s5200_s29 + $0x7e0] sm:$0xff] %v3198_v15  ;;  %v2102_v21 = vpop.f32.mrf.mxu2  ;;  %v1925_v53 = vpop.f32.mrf.mxu1  ;;  %v4008_v15 = vunpack.c.h.bf16 %v4385_v59  ;;  %4952 = vtanh.f32 %v4007_v7 }
 0x1cc   : > { %v2103_v25 = vadd.f32 %v5765_v50, %v2102_v21  ;;  %vm2408_vm1 = vcmp.ge.f32.partialorder %v1746_v16, 0.0  ;;  %v2696_v26 = vmul.f32 0.2, %v1746_v16  ;;  %v1926_v27 = vadd.f32 %v5765_v50, %v1925_v53  ;;  %3623 = vmatmul.msk.bf16.gmra.mxu0 %vm1208_vm0, %v1063_v9  ;;  %v4943_v60 = vpop.eup %4942 }
 0x1cd   : > { %v2282_v28 = vpop.f32.mrf.mxu3  ;;  %v4945_v63 = vpop.eup %4944  ;;  %v1136_v14 = vpack.c.bf16 %v4943_v60, %v4941_v55  ;;  %4954 = vtanh.f32 %v4008_v15  ;;  %v4422_v60 = vld [vmem:[%s5116_s23 + $0x330] sm:$0xff]  }
 0x1ce   : > { %vm2551_vm2 = vcmp.ge.f32.partialorder %v2103_v25, 0.0  ;;  %v2839_v32 = vmul.f32 0.2, %v2103_v25  ;;  %v2283_v33 = vadd.f32 %v5765_v50, %v2282_v28  ;;  %v2984_v34 = vsel %vm2408_vm1, %v1746_v16, %v2696_v26  ;;  %3659 = vmatmul.msk.bf16.gmra.mxu1 %vm1208_vm0, %v1099_v17  ;;  %v4947_v4 = vpop.eup %4946 }
 0x1cf   : > { %3272 = vst [vmem:[%s5200_s29 + $0x130] sm:$0xff] %v2984_v34  ;;  %vm2480_vm3 = vcmp.ge.f32.partialorder %v1926_v27, 0.0  ;;  %v2768_v35 = vmul.f32 0.2, %v1926_v27  ;;  %v4151_v16 = vunpack.c.l.bf16 %v4421_v3  ;;  %v5819_v30 = vpop.eup %4948  ;;  %v4156_v15 = vunpack.c.h.bf16 %v4422_v60 }
 0x1d0   : > { %v3127_v38 = vsel %vm2551_vm2, %v2103_v25, %v2839_v32  ;;  %vm2623_vm4 = vcmp.ge.f32.partialorder %v2283_v33, 0.0  ;;  %v2911_v39 = vmul.f32 0.2, %v2283_v33  ;;  %3695 = vmatmul.msk.bf16.gmra.mxu2 %vm1208_vm0, %v1135_v22  ;;  %v1172_v22 = vpack.c.bf16 %v4947_v4, %v4945_v63  ;;  %v4458_v4 = vld [vmem:[%s5116_s23 + $0x450] sm:$0xff]  }
 0x1d1   : > { %3415 = vst [vmem:[%s5200_s29 + $0x5a8] sm:$0xff] %v3127_v38  ;;  %v3056_v41 = vsel %vm2480_vm3, %v1926_v27, %v2768_v35  ;;  %v1747_v42 = vpop.f32.mrf.mxu0  ;;  %4956 = vtanh.f32 %v4151_v16  ;;  %v4350_v38 = vld [vmem:[%s5116_s23 + $0xf0] sm:$0xff]   ;;  %v4299_v16 = vunpack.c.l.bf16 %v4458_v4 }
 0x1d2   : > { %v3199_v43 = vsel %vm2623_vm4, %v2283_v33, %v2911_v39  ;;  %3344 = vst [vmem:[%s5200_s29 + $0x370] sm:$0xff] %v3056_v41  ;;  %3731 = vmatmul.msk.bf16.gmra.mxu3 %vm1208_vm0, %v1171_v29  ;;  %v1748_v44 = vadd.f32 %v5765_v50, %v1747_v42  ;;  %v4296_v29 = vunpack.c.h.bf16 %v4457_v11  ;;  %v5822_v33 = vpop.eup %4950  ;;  %4958 = vtanh.f32 %v4152_v23 }
 0x1d3   : > { %3487 = vst [vmem:[%s5200_s29 + $0x7e8] sm:$0xff] %v3199_v43  ;;  %v2105_v18 = vpop.f32.mrf.mxu2  ;;  %v1927_v47 = vpop.f32.mrf.mxu1  ;;  %4960 = vtanh.f32 %v4295_v24  ;;  %v3868_v55 = vunpack.c.h.bf16 %v4350_v38  ;;  %v1065_v59 = vpack.c.bf16 %v5822_v33, %v5819_v30 }
 0x1d4   : > { %v2106_v48 = vadd.f32 %v5765_v50, %v2105_v18  ;;  %vm2409_vm5 = vcmp.ge.f32.partialorder %v1748_v44, 0.0  ;;  %v2697_v49 = vmul.f32 0.2, %v1748_v44  ;;  %v1928_v51 = vadd.f32 %v5765_v50, %v1927_v47  ;;  %v4953_v39 = vpop.eup %4952 }
 0x1d5   : > { %v2285_v54 = vpop.f32.mrf.mxu3  ;;  %4962 = vtanh.f32 %v4296_v29  ;;  %v4955_v45 = vpop.eup %4954  ;;  %v3867_v18 = vunpack.c.l.bf16 %v4350_v38 }
 0x1d6   : > { %vm2552_vm6 = vcmp.ge.f32.partialorder %v2106_v48, 0.0  ;;  %v2840_v56 = vmul.f32 0.2, %v2106_v48  ;;  %v2286_v57 = vadd.f32 %v5765_v50, %v2285_v54  ;;  %v2985_v58 = vsel %vm2409_vm5, %v1748_v44, %v2697_v49 }
 0x1d7   : > { %3273 = vst [vmem:[%s5200_s29 + $0x138] sm:$0xff] %v2985_v58  ;;  %vm2481_vm7 = vcmp.ge.f32.partialorder %v1928_v51, 0.0  ;;  %v2769_v61 = vmul.f32 0.2, %v1928_v51  ;;  %v4957_v47 = vpop.eup %4956  ;;  %v1101_v3 = vpack.c.bf16 %v4955_v45, %v4953_v39  ;;  %4964 = vtanh.f32 %v3867_v18  ;;  %v4387_v45 = vld [vmem:[%s5116_s23 + $0x218] sm:$0xff]  }
 0x1d8   : > { %v3128_v0 = vsel %vm2552_vm6, %v2106_v48, %v2840_v56  ;;  %vm2624_vm8 = vcmp.ge.f32.partialorder %v2286_v57, 0.0  ;;  %v2912_v1 = vmul.f32 0.2, %v2286_v57  ;;  %v4959_v54 = vpop.eup %4958  ;;  %4966 = vtanh.f32 %v3868_v55 }
 0x1d9   : > { %3416 = vst [vmem:[%s5200_s29 + $0x5b0] sm:$0xff] %v3128_v0  ;;  %v3057_v5 = vsel %vm2481_vm7, %v1928_v51, %v2769_v61  ;;  %v1750_v6 = vpop.f32.mrf.mxu0  ;;  %v4961_v56 = vpop.eup %4960  ;;  %v4011_v0 = vunpack.c.l.bf16 %v4386_v52  ;;  %v1137_v7 = vpack.c.bf16 %v4959_v54, %v4957_v47  ;;  %v4423_v54 = vld [vmem:[%s5116_s23 + $0x338] sm:$0xff]  }
 0x1da   : > { %v3200_v8 = vsel %vm2624_vm8, %v2286_v57, %v2912_v1  ;;  %3345 = vst [vmem:[%s5200_s29 + $0x378] sm:$0xff] %v3057_v5  ;;  %v1751_v9 = vadd.f32 %v5765_v50, %v1750_v6 }
 0x1db   : > { %3488 = vst [vmem:[%s5200_s29 + $0x7f0] sm:$0xff] %v3200_v8  ;;  %v2107_v12 = vpop.f32.mrf.mxu2  ;;  %v1930_v13 = vpop.f32.mrf.mxu1  ;;  %v4012_v8 = vunpack.c.h.bf16 %v4386_v52  ;;  %4968 = vtanh.f32 %v4011_v0 }
 0x1dc   : > { %v2108_v17 = vadd.f32 %v5765_v50, %v2107_v12  ;;  %vm2410_vm9 = vcmp.ge.f32.partialorder %v1751_v9, 0.0  ;;  %v2698_v19 = vmul.f32 0.2, %v1751_v9  ;;  %v1931_v21 = vadd.f32 %v5765_v50, %v1930_v13  ;;  %3624 = vmatmul.msk.bf16.gmra.mxu0 %vm1208_vm0, %v1064_v2  ;;  %v4963_v61 = vpop.eup %4962 }
 0x1dd   : > { %v2287_v53 = vpop.f32.mrf.mxu3  ;;  %4970 = vtanh.f32 %v4012_v8  ;;  %v5849_v23 = vpop.eup %4964  ;;  %v4160_v8 = vunpack.c.h.bf16 %v4423_v54 }
 0x1de   : > { %vm2553_vm10 = vcmp.ge.f32.partialorder %v2108_v17, 0.0  ;;  %v2841_v25 = vmul.f32 0.2, %v2108_v17  ;;  %v2288_v26 = vadd.f32 %v5765_v50, %v2287_v53  ;;  %v2986_v27 = vsel %vm2410_vm9, %v1751_v9, %v2698_v19  ;;  %3660 = vmatmul.msk.bf16.gmra.mxu1 %vm1208_vm0, %v1100_v10 }
 0x1df   : > { %3274 = vst [vmem:[%s5200_s29 + $0x140] sm:$0xff] %v2986_v27  ;;  %vm2482_vm11 = vcmp.ge.f32.partialorder %v1931_v21, 0.0  ;;  %v2770_v28 = vmul.f32 0.2, %v1931_v21  ;;  %v4155_v9 = vunpack.c.l.bf16 %v4422_v60 }
 0x1e0   : > { %v3129_v31 = vsel %vm2553_vm10, %v2108_v17, %v2841_v25  ;;  %vm2625_vm12 = vcmp.ge.f32.partialorder %v2288_v26, 0.0  ;;  %v2913_v32 = vmul.f32 0.2, %v2288_v26  ;;  %3696 = vmatmul.msk.bf16.gmra.mxu2 %vm1208_vm0, %v1136_v14  ;;  %v1173_v14 = vpack.c.bf16 %v4963_v61, %v4961_v56  ;;  %v4459_v61 = vld [vmem:[%s5116_s23 + $0x458] sm:$0xff]  }
 0x1e1   : > { %3417 = vst [vmem:[%s5200_s29 + $0x5b8] sm:$0xff] %v3129_v31  ;;  %v3058_v34 = vsel %vm2482_vm11, %v1931_v21, %v2770_v28  ;;  %v1752_v35 = vpop.f32.mrf.mxu0  ;;  %4972 = vtanh.f32 %v4155_v9  ;;  %v4351_v31 = vld [vmem:[%s5116_s23 + $0xf8] sm:$0xff]   ;;  %v4303_v9 = vunpack.c.l.bf16 %v4459_v61 }
 0x1e2   : > { %v3201_v36 = vsel %vm2625_vm12, %v2288_v26, %v2913_v32  ;;  %3346 = vst [vmem:[%s5200_s29 + $0x380] sm:$0xff] %v3058_v34  ;;  %3732 = vmatmul.msk.bf16.gmra.mxu3 %vm1208_vm0, %v1172_v22  ;;  %v1753_v37 = vadd.f32 %v5765_v50, %v1752_v35  ;;  %v4300_v22 = vunpack.c.h.bf16 %v4458_v4  ;;  %v5852_v26 = vpop.eup %4966  ;;  %4974 = vtanh.f32 %v4156_v15 }
 0x1e3   : > { %3489 = vst [vmem:[%s5200_s29 + $0x7f8] sm:$0xff] %v3201_v36  ;;  %v2110_v40 = vpop.f32.mrf.mxu2  ;;  %v1932_v41 = vpop.f32.mrf.mxu1  ;;  %4976 = vtanh.f32 %v4299_v16  ;;  %v3872_v47 = vunpack.c.h.bf16 %v4351_v31  ;;  %v1066_v52 = vpack.c.bf16 %v5852_v26, %v5849_v23 }
 0x1e4   : > { %v2111_v42 = vadd.f32 %v5765_v50, %v2110_v40  ;;  %vm2411_vm13 = vcmp.ge.f32.partialorder %v1753_v37, 0.0  ;;  %v2699_v43 = vmul.f32 0.2, %v1753_v37  ;;  %v1933_v44 = vadd.f32 %v5765_v50, %v1932_v41  ;;  %v4969_v32 = vpop.eup %4968 }
 0x1e5   : > { %v2290_v46 = vpop.f32.mrf.mxu3  ;;  %4978 = vtanh.f32 %v4300_v22  ;;  %v4971_v38 = vpop.eup %4970  ;;  %v3871_v40 = vunpack.c.l.bf16 %v4351_v31 }
 0x1e6   : > { %vm2554_vm14 = vcmp.ge.f32.partialorder %v2111_v42, 0.0  ;;  %v2842_v48 = vmul.f32 0.2, %v2111_v42  ;;  %v2291_v49 = vadd.f32 %v5765_v50, %v2290_v46  ;;  %v2987_v51 = vsel %vm2411_vm13, %v1753_v37, %v2699_v43 }
 0x1e7   : > { %3275 = vst [vmem:[%s5200_s29 + $0x148] sm:$0xff] %v2987_v51  ;;  %vm2483_vm15 = vcmp.ge.f32.partialorder %v1933_v44, 0.0  ;;  %v2771_v20 = vmul.f32 0.2, %v1933_v44  ;;  %v4973_v41 = vpop.eup %4972  ;;  %v1102_v60 = vpack.c.bf16 %v4971_v38, %v4969_v32  ;;  %4980 = vtanh.f32 %v3871_v40  ;;  %v4388_v38 = vld [vmem:[%s5116_s23 + $0x220] sm:$0xff]  }
 0x1e8   : > { %v3130_v57 = vsel %vm2554_vm14, %v2111_v42, %v2842_v48  ;;  %vm2626_vm1 = vcmp.ge.f32.partialorder %v2291_v49, 0.0  ;;  %v2914_v58 = vmul.f32 0.2, %v2291_v49  ;;  %v4975_v46 = vpop.eup %4974  ;;  %4982 = vtanh.f32 %v3872_v47 }
 0x1e9   : > { %3418 = vst [vmem:[%s5200_s29 + $0x5c0] sm:$0xff] %v3130_v57  ;;  %v3059_v62 = vsel %vm2483_vm15, %v1933_v44, %v2771_v20  ;;  %v1755_v63 = vpop.f32.mrf.mxu0  ;;  %v4977_v48 = vpop.eup %4976  ;;  %v4015_v57 = vunpack.c.l.bf16 %v4387_v45  ;;  %v1138_v0 = vpack.c.bf16 %v4975_v46, %v4973_v41  ;;  %v4424_v46 = vld [vmem:[%s5116_s23 + $0x340] sm:$0xff]  }
 0x1ea   : > { %v3202_v1 = vsel %vm2626_vm1, %v2291_v49, %v2914_v58  ;;  %3347 = vst [vmem:[%s5200_s29 + $0x388] sm:$0xff] %v3059_v62  ;;  %v1756_v2 = vadd.f32 %v5765_v50, %v1755_v63 }
 0x1eb   : > { %3490 = vst [vmem:[%s5200_s29 + $0x800] sm:$0xff] %v3202_v1  ;;  %v2112_v5 = vpop.f32.mrf.mxu2  ;;  %v1935_v6 = vpop.f32.mrf.mxu1  ;;  %v4016_v1 = vunpack.c.h.bf16 %v4387_v45  ;;  %4984 = vtanh.f32 %v4015_v57 }
 0x1ec   : > { %v2113_v10 = vadd.f32 %v5765_v50, %v2112_v5  ;;  %vm2412_vm2 = vcmp.ge.f32.partialorder %v1756_v2, 0.0  ;;  %v2700_v11 = vmul.f32 0.2, %v1756_v2  ;;  %v1936_v12 = vadd.f32 %v5765_v50, %v1935_v6  ;;  %3625 = vmatmul.msk.bf16.gmra.mxu0 %vm1208_vm0, %v1065_v59  ;;  %v4979_v20 = vpop.eup %4978 }
 0x1ed   : > { %v2292_v13 = vpop.f32.mrf.mxu3  ;;  %4986 = vtanh.f32 %v4016_v1  ;;  %v5879_v15 = vpop.eup %4980  ;;  %v4164_v1 = vunpack.c.h.bf16 %v4424_v46 }
 0x1ee   : > { %vm2555_vm3 = vcmp.ge.f32.partialorder %v2113_v10, 0.0  ;;  %v2843_v17 = vmul.f32 0.2, %v2113_v10  ;;  %v2293_v19 = vadd.f32 %v5765_v50, %v2292_v13  ;;  %v2988_v21 = vsel %vm2412_vm2, %v1756_v2, %v2700_v11  ;;  %3661 = vmatmul.msk.bf16.gmra.mxu1 %vm1208_vm0, %v1101_v3 }
 0x1ef   : > { %3276 = vst [vmem:[%s5200_s29 + $0x150] sm:$0xff] %v2988_v21  ;;  %vm2484_vm4 = vcmp.ge.f32.partialorder %v1936_v12, 0.0  ;;  %v2772_v53 = vmul.f32 0.2, %v1936_v12  ;;  %v4159_v2 = vunpack.c.l.bf16 %v4423_v54 }
 0x1f0   : > { %v3131_v24 = vsel %vm2555_vm3, %v2113_v10, %v2843_v17  ;;  %vm2627_vm5 = vcmp.ge.f32.partialorder %v2293_v19, 0.0  ;;  %v2915_v25 = vmul.f32 0.2, %v2293_v19  ;;  %3697 = vmatmul.msk.bf16.gmra.mxu2 %vm1208_vm0, %v1137_v7  ;;  %v1174_v7 = vpack.c.bf16 %v4979_v20, %v4977_v48  ;;  %v4460_v20 = vld [vmem:[%s5116_s23 + $0x460] sm:$0xff]  }
 0x1f1   : > { %3419 = vst [vmem:[%s5200_s29 + $0x5c8] sm:$0xff] %v3131_v24  ;;  %v3060_v27 = vsel %vm2484_vm4, %v1936_v12, %v2772_v53  ;;  %v1757_v28 = vpop.f32.mrf.mxu0  ;;  %4988 = vtanh.f32 %v4159_v2  ;;  %v4352_v24 = vld [vmem:[%s5116_s23 + $0x100] sm:$0xff]   ;;  %v4307_v2 = vunpack.c.l.bf16 %v4460_v20 }
 0x1f2   : > { %v3203_v29 = vsel %vm2627_vm5, %v2293_v19, %v2915_v25  ;;  %3348 = vst [vmem:[%s5200_s29 + $0x390] sm:$0xff] %v3060_v27  ;;  %3733 = vmatmul.msk.bf16.gmra.mxu3 %vm1208_vm0, %v1173_v14  ;;  %v1758_v30 = vadd.f32 %v5765_v50, %v1757_v28  ;;  %v4304_v14 = vunpack.c.h.bf16 %v4459_v61  ;;  %v5882_v19 = vpop.eup %4982  ;;  %4990 = vtanh.f32 %v4160_v8 }
 0x1f3   : > { %3491 = vst [vmem:[%s5200_s29 + $0x808] sm:$0xff] %v3203_v29  ;;  %v2115_v33 = vpop.f32.mrf.mxu2  ;;  %v1937_v34 = vpop.f32.mrf.mxu1  ;;  %4992 = vtanh.f32 %v4303_v9  ;;  %v3876_v41 = vunpack.c.h.bf16 %v4352_v24  ;;  %v1067_v45 = vpack.c.bf16 %v5882_v19, %v5879_v15 }
 0x1f4   : > { %v2116_v35 = vadd.f32 %v5765_v50, %v2115_v33  ;;  %vm2413_vm6 = vcmp.ge.f32.partialorder %v1758_v30, 0.0  ;;  %v2701_v36 = vmul.f32 0.2, %v1758_v30  ;;  %v1938_v37 = vadd.f32 %v5765_v50, %v1937_v34  ;;  %v4985_v25 = vpop.eup %4984 }
 0x1f5   : > { %v2295_v39 = vpop.f32.mrf.mxu3  ;;  %4994 = vtanh.f32 %v4304_v14  ;;  %v4987_v31 = vpop.eup %4986  ;;  %v3875_v33 = vunpack.c.l.bf16 %v4352_v24 }
 0x1f6   : > { %vm2556_vm7 = vcmp.ge.f32.partialorder %v2116_v35, 0.0  ;;  %v2844_v42 = vmul.f32 0.2, %v2116_v35  ;;  %v2296_v43 = vadd.f32 %v5765_v50, %v2295_v39  ;;  %v2989_v44 = vsel %vm2413_vm6, %v1758_v30, %v2701_v36 }
 0x1f7   : > { %3277 = vst [vmem:[%s5200_s29 + $0x158] sm:$0xff] %v2989_v44  ;;  %vm2485_vm8 = vcmp.ge.f32.partialorder %v1938_v37, 0.0  ;;  %v2773_v18 = vmul.f32 0.2, %v1938_v37  ;;  %v4989_v34 = vpop.eup %4988  ;;  %v1103_v54 = vpack.c.bf16 %v4987_v31, %v4985_v25  ;;  %4996 = vtanh.f32 %v3875_v33  ;;  %v4389_v31 = vld [vmem:[%s5116_s23 + $0x228] sm:$0xff]  }
 0x1f8   : > { %v3132_v49 = vsel %vm2556_vm7, %v2116_v35, %v2844_v42  ;;  %vm2628_vm9 = vcmp.ge.f32.partialorder %v2296_v43, 0.0  ;;  %v2916_v51 = vmul.f32 0.2, %v2296_v43  ;;  %v4991_v39 = vpop.eup %4990  ;;  %4998 = vtanh.f32 %v3876_v41 }
 0x1f9   : > { %3420 = vst [vmem:[%s5200_s29 + $0x5d0] sm:$0xff] %v3132_v49  ;;  %v3061_v55 = vsel %vm2485_vm8, %v1938_v37, %v2773_v18  ;;  %v1760_v56 = vpop.f32.mrf.mxu0  ;;  %v4993_v42 = vpop.eup %4992  ;;  %v4019_v49 = vunpack.c.l.bf16 %v4388_v38  ;;  %v1139_v57 = vpack.c.bf16 %v4991_v39, %v4989_v34  ;;  %v4425_v39 = vld [vmem:[%s5116_s23 + $0x348] sm:$0xff]  }
 0x1fa   : > { %v3204_v58 = vsel %vm2628_vm9, %v2296_v43, %v2916_v51  ;;  %3349 = vst [vmem:[%s5200_s29 + $0x398] sm:$0xff] %v3061_v55  ;;  %v1761_v59 = vadd.f32 %v5765_v50, %v1760_v56 }
 0x1fb   : > { %3492 = vst [vmem:[%s5200_s29 + $0x810] sm:$0xff] %v3204_v58  ;;  %v2117_v62 = vpop.f32.mrf.mxu2  ;;  %v1940_v63 = vpop.f32.mrf.mxu1  ;;  %v4020_v58 = vunpack.c.h.bf16 %v4388_v38  ;;  %5000 = vtanh.f32 %v4019_v49 }
 0x1fc   : > { %v2118_v3 = vadd.f32 %v5765_v50, %v2117_v62  ;;  %vm2414_vm10 = vcmp.ge.f32.partialorder %v1761_v59, 0.0  ;;  %v2702_v4 = vmul.f32 0.2, %v1761_v59  ;;  %v1941_v5 = vadd.f32 %v5765_v50, %v1940_v63  ;;  %3626 = vmatmul.msk.bf16.gmra.mxu0 %vm1208_vm0, %v1066_v52  ;;  %v4995_v18 = vpop.eup %4994 }
 0x1fd   : > { %v2297_v6 = vpop.f32.mrf.mxu3  ;;  %5002 = vtanh.f32 %v4020_v58  ;;  %v5909_v8 = vpop.eup %4996  ;;  %v4168_v58 = vunpack.c.h.bf16 %v4425_v39 }
 0x1fe   : > { %vm2557_vm11 = vcmp.ge.f32.partialorder %v2118_v3, 0.0  ;;  %v2845_v10 = vmul.f32 0.2, %v2118_v3  ;;  %v2298_v11 = vadd.f32 %v5765_v50, %v2297_v6  ;;  %v2990_v12 = vsel %vm2414_vm10, %v1761_v59, %v2702_v4  ;;  %3662 = vmatmul.msk.bf16.gmra.mxu1 %vm1208_vm0, %v1102_v60 }
 0x1ff   : > { %3278 = vst [vmem:[%s5200_s29 + $0x160] sm:$0xff] %v2990_v12  ;;  %vm2486_vm12 = vcmp.ge.f32.partialorder %v1941_v5, 0.0  ;;  %v2774_v13 = vmul.f32 0.2, %v1941_v5  ;;  %v4163_v59 = vunpack.c.l.bf16 %v4424_v46 }
 0x200   : > { %v3133_v16 = vsel %vm2557_vm11, %v2118_v3, %v2845_v10  ;;  %vm2629_vm13 = vcmp.ge.f32.partialorder %v2298_v11, 0.0  ;;  %v2917_v17 = vmul.f32 0.2, %v2298_v11  ;;  %3698 = vmatmul.msk.bf16.gmra.mxu2 %vm1208_vm0, %v1138_v0  ;;  %v1175_v0 = vpack.c.bf16 %v4995_v18, %v4993_v42  ;;  %v4461_v18 = vld [vmem:[%s5116_s23 + $0x468] sm:$0xff]  }
 0x201   : > { %3421 = vst [vmem:[%s5200_s29 + $0x5d8] sm:$0xff] %v3133_v16  ;;  %v3062_v21 = vsel %vm2486_vm12, %v1941_v5, %v2774_v13  ;;  %v1762_v53 = vpop.f32.mrf.mxu0  ;;  %5004 = vtanh.f32 %v4163_v59  ;;  %v4353_v16 = vld [vmem:[%s5116_s23 + $0x108] sm:$0xff]   ;;  %v4311_v59 = vunpack.c.l.bf16 %v4461_v18 }
 0x202   : > { %v3205_v22 = vsel %vm2629_vm13, %v2298_v11, %v2917_v17  ;;  %3350 = vst [vmem:[%s5200_s29 + $0x3a0] sm:$0xff] %v3062_v21  ;;  %3734 = vmatmul.msk.bf16.gmra.mxu3 %vm1208_vm0, %v1174_v7  ;;  %v1763_v23 = vadd.f32 %v5765_v50, %v1762_v53  ;;  %v4308_v7 = vunpack.c.h.bf16 %v4460_v20  ;;  %v5912_v11 = vpop.eup %4998  ;;  %5006 = vtanh.f32 %v4164_v1 }
 0x203   : > { %3493 = vst [vmem:[%s5200_s29 + $0x818] sm:$0xff] %v3205_v22  ;;  %v2120_v26 = vpop.f32.mrf.mxu2  ;;  %v1942_v27 = vpop.f32.mrf.mxu1  ;;  %5008 = vtanh.f32 %v4307_v2  ;;  %v3880_v34 = vunpack.c.h.bf16 %v4353_v16  ;;  %v1068_v38 = vpack.c.bf16 %v5912_v11, %v5909_v8 }
 0x204   : > { %v2121_v28 = vadd.f32 %v5765_v50, %v2120_v26  ;;  %vm2415_vm14 = vcmp.ge.f32.partialorder %v1763_v23, 0.0  ;;  %v2703_v29 = vmul.f32 0.2, %v1763_v23  ;;  %v1943_v30 = vadd.f32 %v5765_v50, %v1942_v27  ;;  %v5001_v17 = vpop.eup %5000 }
 0x205   : > { %v2300_v32 = vpop.f32.mrf.mxu3  ;;  %5010 = vtanh.f32 %v4308_v7  ;;  %v5003_v24 = vpop.eup %5002  ;;  %v3879_v26 = vunpack.c.l.bf16 %v4353_v16 }
 0x206   : > { %vm2558_vm15 = vcmp.ge.f32.partialorder %v2121_v28, 0.0  ;;  %v2846_v35 = vmul.f32 0.2, %v2121_v28  ;;  %v2301_v36 = vadd.f32 %v5765_v50, %v2300_v32  ;;  %v2991_v37 = vsel %vm2415_vm14, %v1763_v23, %v2703_v29 }
 0x207   : > { %3279 = vst [vmem:[%s5200_s29 + $0x168] sm:$0xff] %v2991_v37  ;;  %vm2487_vm1 = vcmp.ge.f32.partialorder %v1943_v30, 0.0  ;;  %v2775_v40 = vmul.f32 0.2, %v1943_v30  ;;  %v5005_v27 = vpop.eup %5004  ;;  %v1104_v46 = vpack.c.bf16 %v5003_v24, %v5001_v17  ;;  %5012 = vtanh.f32 %v3879_v26  ;;  %v4390_v24 = vld [vmem:[%s5116_s23 + $0x230] sm:$0xff]  }
 0x208   : > { %v3134_v43 = vsel %vm2558_vm15, %v2121_v28, %v2846_v35  ;;  %vm2630_vm2 = vcmp.ge.f32.partialorder %v2301_v36, 0.0  ;;  %v2918_v44 = vmul.f32 0.2, %v2301_v36  ;;  %v5007_v32 = vpop.eup %5006  ;;  %5014 = vtanh.f32 %v3880_v34 }
 0x209   : > { %3422 = vst [vmem:[%s5200_s29 + $0x5e0] sm:$0xff] %v3134_v43  ;;  %v3063_v47 = vsel %vm2487_vm1, %v1943_v30, %v2775_v40  ;;  %v1765_v48 = vpop.f32.mrf.mxu0  ;;  %v5009_v35 = vpop.eup %5008  ;;  %v4023_v43 = vunpack.c.l.bf16 %v4389_v31  ;;  %v1140_v49 = vpack.c.bf16 %v5007_v32, %v5005_v27  ;;  %v4426_v32 = vld [vmem:[%s5116_s23 + $0x350] sm:$0xff]  }
 0x20a   : > { %v3206_v51 = vsel %vm2630_vm2, %v2301_v36, %v2918_v44  ;;  %3351 = vst [vmem:[%s5200_s29 + $0x3a8] sm:$0xff] %v3063_v47  ;;  %v1766_v52 = vadd.f32 %v5765_v50, %v1765_v48 }
 0x20b   : > { %3494 = vst [vmem:[%s5200_s29 + $0x820] sm:$0xff] %v3206_v51  ;;  %v2122_v55 = vpop.f32.mrf.mxu2  ;;  %v1945_v56 = vpop.f32.mrf.mxu1  ;;  %v4024_v51 = vunpack.c.h.bf16 %v4389_v31  ;;  %5016 = vtanh.f32 %v4023_v43 }
 0x20c   : > { %v2123_v60 = vadd.f32 %v5765_v50, %v2122_v55  ;;  %vm2416_vm3 = vcmp.ge.f32.partialorder %v1766_v52, 0.0  ;;  %v2704_v61 = vmul.f32 0.2, %v1766_v52  ;;  %v1946_v62 = vadd.f32 %v5765_v50, %v1945_v56  ;;  %3627 = vmatmul.msk.bf16.gmra.mxu0 %vm1208_vm0, %v1067_v45  ;;  %v5011_v40 = vpop.eup %5010 }
 0x20d   : > { %v2302_v63 = vpop.f32.mrf.mxu3  ;;  %5018 = vtanh.f32 %v4024_v51  ;;  %v5939_v1 = vpop.eup %5012  ;;  %v4172_v51 = vunpack.c.h.bf16 %v4426_v32 }
 0x20e   : > { %vm2559_vm4 = vcmp.ge.f32.partialorder %v2123_v60, 0.0  ;;  %v2847_v3 = vmul.f32 0.2, %v2123_v60  ;;  %v2303_v4 = vadd.f32 %v5765_v50, %v2302_v63  ;;  %v2992_v5 = vsel %vm2416_vm3, %v1766_v52, %v2704_v61  ;;  %3663 = vmatmul.msk.bf16.gmra.mxu1 %vm1208_vm0, %v1103_v54 }
 0x20f   : > { %3280 = vst [vmem:[%s5200_s29 + $0x170] sm:$0xff] %v2992_v5  ;;  %vm2488_vm5 = vcmp.ge.f32.partialorder %v1946_v62, 0.0  ;;  %v2776_v6 = vmul.f32 0.2, %v1946_v62  ;;  %v4167_v52 = vunpack.c.l.bf16 %v4425_v39 }
 0x210   : > { %v3135_v9 = vsel %vm2559_vm4, %v2123_v60, %v2847_v3  ;;  %vm2631_vm6 = vcmp.ge.f32.partialorder %v2303_v4, 0.0  ;;  %v2919_v10 = vmul.f32 0.2, %v2303_v4  ;;  %3699 = vmatmul.msk.bf16.gmra.mxu2 %vm1208_vm0, %v1139_v57  ;;  %v1176_v57 = vpack.c.bf16 %v5011_v40, %v5009_v35  ;;  %v4462_v40 = vld [vmem:[%s5116_s23 + $0x470] sm:$0xff]  }
 0x211   : > { %3423 = vst [vmem:[%s5200_s29 + $0x5e8] sm:$0xff] %v3135_v9  ;;  %v3064_v12 = vsel %vm2488_vm5, %v1946_v62, %v2776_v6  ;;  %v1767_v13 = vpop.f32.mrf.mxu0  ;;  %5020 = vtanh.f32 %v4167_v52  ;;  %v4354_v9 = vld [vmem:[%s5116_s23 + $0x110] sm:$0xff]   ;;  %v4315_v52 = vunpack.c.l.bf16 %v4462_v40 }
 0x212   : > { %v3207_v14 = vsel %vm2631_vm6, %v2303_v4, %v2919_v10  ;;  %3352 = vst [vmem:[%s5200_s29 + $0x3b0] sm:$0xff] %v3064_v12  ;;  %3735 = vmatmul.msk.bf16.gmra.mxu3 %vm1208_vm0, %v1175_v0  ;;  %v1768_v15 = vadd.f32 %v5765_v50, %v1767_v13  ;;  %v4312_v0 = vunpack.c.h.bf16 %v4461_v18  ;;  %v5942_v4 = vpop.eup %5014  ;;  %5022 = vtanh.f32 %v4168_v58  ;;  %v5955_v13 = vld [vmem:[%s6182_s2] ss:$0 sm:$0xff] }
 0x213   : > { %3495 = vst [vmem:[%s5200_s29 + $0x828] sm:$0xff] %v3207_v14  ;;  %v2125_v19 = vpop.f32.mrf.mxu2  ;;  %v1947_v21 = vpop.f32.mrf.mxu1  ;;  %5024 = vtanh.f32 %v4311_v59  ;;  %v3884_v27 = vunpack.c.h.bf16 %v4354_v9  ;;  %v1069_v31 = vpack.c.bf16 %v5942_v4, %v5939_v1 }
 0x214   : > { %v2126_v53 = vadd.f32 %v5765_v50, %v2125_v19  ;;  %vm2417_vm7 = vcmp.ge.f32.partialorder %v1768_v15, 0.0  ;;  %v2705_v22 = vmul.f32 0.2, %v1768_v15  ;;  %v1948_v23 = vadd.f32 %v5765_v50, %v1947_v21  ;;  %v5949_v10 = vpop.eup %5016 }
 0x215   : > { %v2305_v25 = vpop.f32.mrf.mxu3  ;;  %5026 = vtanh.f32 %v4312_v0  ;;  %v5019_v16 = vpop.eup %5018  ;;  %v3883_v19 = vunpack.c.l.bf16 %v4354_v9 }
 0x216   : > { %vm2560_vm8 = vcmp.ge.f32.partialorder %v2126_v53, 0.0  ;;  %v2848_v28 = vmul.f32 0.2, %v2126_v53  ;;  %v2306_v29 = vadd.f32 %v5765_v50, %v2305_v25  ;;  %v2993_v30 = vsel %vm2417_vm7, %v1768_v15, %v2705_v22 }
 0x217   : > { %3281 = vst [vmem:[%s5200_s29 + $0x178] sm:$0xff] %v2993_v30  ;;  %vm2489_vm9 = vcmp.ge.f32.partialorder %v1948_v23, 0.0  ;;  %v2777_v33 = vmul.f32 0.2, %v1948_v23  ;;  %v5021_v21 = vpop.eup %5020  ;;  %v1105_v39 = vpack.c.bf16 %v5019_v16, %v5949_v10  ;;  %5028 = vtanh.f32 %v3883_v19  ;;  %v4391_v16 = vld [vmem:[%s5116_s23 + $0x238] sm:$0xff]  }
 0x218   : > { %v3136_v36 = vsel %vm2560_vm8, %v2126_v53, %v2848_v28  ;;  %vm2632_vm10 = vcmp.ge.f32.partialorder %v2306_v29, 0.0  ;;  %v2920_v37 = vmul.f32 0.2, %v2306_v29  ;;  %v5023_v25 = vpop.eup %5022  ;;  %5030 = vtanh.f32 %v3884_v27 }
 0x219   : > { %3424 = vst [vmem:[%s5200_s29 + $0x5f0] sm:$0xff] %v3136_v36  ;;  %v3065_v41 = vsel %vm2489_vm9, %v1948_v23, %v2777_v33  ;;  %v1770_v42 = vpop.f32.mrf.mxu0  ;;  %v5025_v28 = vpop.eup %5024  ;;  %v4027_v36 = vunpack.c.l.bf16 %v4390_v24  ;;  %v1141_v43 = vpack.c.bf16 %v5023_v25, %v5021_v21  ;;  %v4427_v25 = vld [vmem:[%s5116_s23 + $0x358] sm:$0xff]  }
 0x21a   : > { %v3208_v44 = vsel %vm2632_vm10, %v2306_v29, %v2920_v37  ;;  %3353 = vst [vmem:[%s5200_s29 + $0x3b8] sm:$0xff] %v3065_v41  ;;  %v1771_v45 = vadd.f32 %v5765_v50, %v1770_v42 }
 0x21b   : > { %3496 = vst [vmem:[%s5200_s29 + $0x830] sm:$0xff] %v3208_v44  ;;  %v2127_v47 = vpop.f32.mrf.mxu2  ;;  %v1950_v48 = vpop.f32.mrf.mxu1  ;;  %v4028_v44 = vunpack.c.h.bf16 %v4390_v24  ;;  %5032 = vtanh.f32 %v4027_v36 }
 0x21c   : > { %v2128_v54 = vadd.f32 %v5765_v50, %v2127_v47  ;;  %vm2418_vm11 = vcmp.ge.f32.partialorder %v1771_v45, 0.0  ;;  %v2706_v20 = vmul.f32 0.2, %v1771_v45  ;;  %v1951_v55 = vadd.f32 %v5765_v50, %v1950_v48  ;;  %3628 = vmatmul.msk.bf16.gmra.mxu0 %vm1208_vm0, %v1068_v38  ;;  %v5027_v33 = vpop.eup %5026 }
 0x21d   : > { %v2307_v56 = vpop.f32.mrf.mxu3  ;;  %5034 = vtanh.f32 %v4028_v44  ;;  %v5977_v58 = vpop.eup %5028  ;;  %v4176_v44 = vunpack.c.h.bf16 %v4427_v25 }
 0x21e   : > { %vm2561_vm12 = vcmp.ge.f32.partialorder %v2128_v54, 0.0  ;;  %v2849_v60 = vmul.f32 0.2, %v2128_v54  ;;  %v2308_v61 = vadd.f32 %v5765_v50, %v2307_v56  ;;  %v2994_v62 = vsel %vm2418_vm11, %v1771_v45, %v2706_v20  ;;  %3664 = vmatmul.msk.bf16.gmra.mxu1 %vm1208_vm0, %v1104_v46 }
 0x21f   : > { %3282 = vst [vmem:[%s5200_s29 + $0x180] sm:$0xff] %v2994_v62  ;;  %vm2490_vm13 = vcmp.ge.f32.partialorder %v1951_v55, 0.0  ;;  %v2778_v63 = vmul.f32 0.2, %v1951_v55  ;;  %v4171_v45 = vunpack.c.l.bf16 %v4426_v32 }
 0x220   : > { %v3137_v2 = vsel %vm2561_vm12, %v2128_v54, %v2849_v60  ;;  %vm2633_vm14 = vcmp.ge.f32.partialorder %v2308_v61, 0.0  ;;  %v2921_v3 = vmul.f32 0.2, %v2308_v61  ;;  %3700 = vmatmul.msk.bf16.gmra.mxu2 %vm1208_vm0, %v1140_v49  ;;  %v1177_v49 = vpack.c.bf16 %v5027_v33, %v5025_v28  ;;  %v4463_v33 = vld [vmem:[%s5116_s23 + $0x478] sm:$0xff]  }
 0x221   : > { %3425 = vst [vmem:[%s5200_s29 + $0x5f8] sm:$0xff] %v3137_v2  ;;  %v3066_v5 = vsel %vm2490_vm13, %v1951_v55, %v2778_v63  ;;  %v1772_v6 = vpop.f32.mrf.mxu0  ;;  %5036 = vtanh.f32 %v4171_v45  ;;  %v4355_v2 = vld [vmem:[%s5116_s23 + $0x118] sm:$0xff]   ;;  %v4319_v45 = vunpack.c.l.bf16 %v4463_v33 }
 0x222   : > { %v3209_v7 = vsel %vm2633_vm14, %v2308_v61, %v2921_v3  ;;  %3354 = vst [vmem:[%s5200_s29 + $0x3c0] sm:$0xff] %v3066_v5  ;;  %3736 = vmatmul.msk.bf16.gmra.mxu3 %vm1208_vm0, %v1176_v57  ;;  %v1773_v8 = vadd.f32 %v5765_v50, %v1772_v6  ;;  %v4316_v57 = vunpack.c.h.bf16 %v4462_v40  ;;  %v5980_v61 = vpop.eup %5030  ;;  %5038 = vtanh.f32 %v4172_v51 }
 0x223   : > { %3497 = vst [vmem:[%s5200_s29 + $0x838] sm:$0xff] %v3209_v7  ;;  %v2130_v11 = vpop.f32.mrf.mxu2  ;;  %v1952_v12 = vpop.f32.mrf.mxu1  ;;  %5040 = vtanh.f32 %v4315_v52  ;;  %v3888_v21 = vunpack.c.h.bf16 %v4355_v2  ;;  %v1070_v24 = vpack.c.bf16 %v5980_v61, %v5977_v58 }
 0x224   : > { %v2131_v14 = vadd.f32 %v5955_v13, %v2130_v11  ;;  %vm2419_vm15 = vcmp.ge.f32.partialorder %v1773_v8, 0.0  ;;  %v2707_v15 = vmul.f32 0.2, %v1773_v8  ;;  %v1953_v50 = vadd.f32 %v5955_v13, %v1952_v12  ;;  %v5033_v3 = vpop.eup %5032 }
 0x225   : > { %v2310_v17 = vpop.f32.mrf.mxu3  ;;  %5042 = vtanh.f32 %v4316_v57  ;;  %v5035_v9 = vpop.eup %5034  ;;  %v3887_v11 = vunpack.c.l.bf16 %v4355_v2 }
 0x226   : > { %vm2562_vm1 = vcmp.ge.f32.partialorder %v2131_v14, 0.0  ;;  %v2850_v53 = vmul.f32 0.2, %v2131_v14  ;;  %v2311_v22 = vadd.f32 %v5955_v13, %v2310_v17  ;;  %v2995_v23 = vsel %vm2419_vm15, %v1773_v8, %v2707_v15 }
 0x227   : > { %3283 = vst [vmem:[%s5200_s29 + $0x188] sm:$0xff] %v2995_v23  ;;  %vm2491_vm2 = vcmp.ge.f32.partialorder %v1953_v50, 0.0  ;;  %v2779_v26 = vmul.f32 0.2, %v1953_v50  ;;  %v5037_v12 = vpop.eup %5036  ;;  %v1106_v32 = vpack.c.bf16 %v5035_v9, %v5033_v3  ;;  %5044 = vtanh.f32 %v3887_v11 }
 0x228   : > { %v3138_v29 = vsel %vm2562_vm1, %v2131_v14, %v2850_v53  ;;  %vm2634_vm3 = vcmp.ge.f32.partialorder %v2311_v22, 0.0  ;;  %v2922_v30 = vmul.f32 0.2, %v2311_v22  ;;  %v5039_v17 = vpop.eup %5038  ;;  %5046 = vtanh.f32 %v3888_v21 }
 0x229   : > { %3426 = vst [vmem:[%s5200_s29 + $0x600] sm:$0xff] %v3138_v29  ;;  %v3067_v34 = vsel %vm2491_vm2, %v1953_v50, %v2779_v26  ;;  %v1775_v35 = vpop.f32.mrf.mxu0  ;;  %v5041_v53 = vpop.eup %5040  ;;  %v4031_v29 = vunpack.c.l.bf16 %v4391_v16  ;;  %v1142_v36 = vpack.c.bf16 %v5039_v17, %v5037_v12 }
 0x22a   : > { %v3210_v37 = vsel %vm2634_vm3, %v2311_v22, %v2922_v30  ;;  %3355 = vst [vmem:[%s5200_s29 + $0x3c8] sm:$0xff] %v3067_v34  ;;  %v1776_v38 = vadd.f32 %v5955_v13, %v1775_v35 }
 0x22b   : > { %3498 = vst [vmem:[%s5200_s29 + $0x840] sm:$0xff] %v3210_v37  ;;  %v2132_v41 = vpop.f32.mrf.mxu2  ;;  %v1955_v42 = vpop.f32.mrf.mxu1  ;;  %v4032_v37 = vunpack.c.h.bf16 %v4391_v16  ;;  %5048 = vtanh.f32 %v4031_v29 }
 0x22c   : > { %v2133_v46 = vadd.f32 %v5955_v13, %v2132_v41  ;;  %vm2420_vm4 = vcmp.ge.f32.partialorder %v1776_v38, 0.0  ;;  %v2708_v18 = vmul.f32 0.2, %v1776_v38  ;;  %v1956_v47 = vadd.f32 %v5955_v13, %v1955_v42  ;;  %3629 = vmatmul.msk.bf16.gmra.mxu0 %vm1208_vm0, %v1069_v31  ;;  %v5043_v26 = vpop.eup %5042 }
 0x22d   : > { %v2312_v48 = vpop.f32.mrf.mxu3  ;;  %5050 = vtanh.f32 %v4032_v37  ;;  %v5045_v51 = vpop.eup %5044 }
 0x22e   : > { %vm2563_vm5 = vcmp.ge.f32.partialorder %v2133_v46, 0.0  ;;  %v2851_v54 = vmul.f32 0.2, %v2133_v46  ;;  %v2313_v20 = vadd.f32 %v5955_v13, %v2312_v48  ;;  %v2996_v55 = vsel %vm2420_vm4, %v1776_v38, %v2708_v18  ;;  %3665 = vmatmul.msk.bf16.gmra.mxu1 %vm1208_vm0, %v1105_v39 }
 0x22f   : > { %3284 = vst [vmem:[%s5200_s29 + $0x190] sm:$0xff] %v2996_v55  ;;  %vm2492_vm6 = vcmp.ge.f32.partialorder %v1956_v47, 0.0  ;;  %v2780_v56 = vmul.f32 0.2, %v1956_v47  ;;  %v4175_v38 = vunpack.c.l.bf16 %v4427_v25 }
 0x230   : > { %v3139_v59 = vsel %vm2563_vm5, %v2133_v46, %v2851_v54  ;;  %vm2635_vm7 = vcmp.ge.f32.partialorder %v2313_v20, 0.0  ;;  %v2923_v60 = vmul.f32 0.2, %v2313_v20  ;;  %3701 = vmatmul.msk.bf16.gmra.mxu2 %vm1208_vm0, %v1141_v43  ;;  %v1178_v43 = vpack.c.bf16 %v5043_v26, %v5041_v53 }
 0x231   : > { %3427 = vst [vmem:[%s5200_s29 + $0x608] sm:$0xff] %v3139_v59  ;;  %v3068_v62 = vsel %vm2492_vm6, %v1956_v47, %v2780_v56  ;;  %v1777_v63 = vpop.f32.mrf.mxu0  ;;  %5052 = vtanh.f32 %v4175_v38 }
 0x232   : > { %v3211_v0 = vsel %vm2635_vm7, %v2313_v20, %v2923_v60  ;;  %3356 = vst [vmem:[%s5200_s29 + $0x3d0] sm:$0xff] %v3068_v62  ;;  %3737 = vmatmul.msk.bf16.gmra.mxu3 %vm1208_vm0, %v1177_v49  ;;  %v1778_v1 = vadd.f32 %v5955_v13, %v1777_v63  ;;  %v4320_v49 = vunpack.c.h.bf16 %v4463_v33  ;;  %v5047_v20 = vpop.eup %5046  ;;  %5054 = vtanh.f32 %v4176_v44 }
 0x233   : > { %3499 = vst [vmem:[%s5200_s29 + $0x848] sm:$0xff] %v3211_v0  ;;  %v2135_v4 = vpop.f32.mrf.mxu2  ;;  %v1957_v5 = vpop.f32.mrf.mxu1  ;;  %5056 = vtanh.f32 %v4319_v45  ;;  %v1071_v12 = vpack.c.bf16 %v5047_v20, %v5045_v51 }
 0x234   : > { %v2136_v6 = vadd.f32 %v5955_v13, %v2135_v4  ;;  %vm2421_vm8 = vcmp.ge.f32.partialorder %v1778_v1, 0.0  ;;  %v2709_v7 = vmul.f32 0.2, %v1778_v1  ;;  %v1958_v8 = vadd.f32 %v5955_v13, %v1957_v5  ;;  %v5049_v59 = vpop.eup %5048 }
 0x235   : > { %v2315_v10 = vpop.f32.mrf.mxu3  ;;  %5058 = vtanh.f32 %v4320_v49 }
 0x236   : > { %vm2564_vm9 = vcmp.ge.f32.partialorder %v2136_v6, 0.0  ;;  %v2852_v14 = vmul.f32 0.2, %v2136_v6  ;;  %v2316_v15 = vadd.f32 %v5955_v13, %v2315_v10  ;;  %v2997_v50 = vsel %vm2421_vm8, %v1778_v1, %v2709_v7  ;;  %v5051_v1 = vpop.eup %5050 }
 0x237   : > { %3285 = vst [vmem:[%s5200_s29 + $0x198] sm:$0xff] %v2997_v50  ;;  %vm2493_vm10 = vcmp.ge.f32.partialorder %v1958_v8, 0.0  ;;  %v2781_v19 = vmul.f32 0.2, %v1958_v8  ;;  %v5053_v3 = vpop.eup %5052 }
 0x238   : > { %v3140_v22 = vsel %vm2564_vm9, %v2136_v6, %v2852_v14  ;;  %vm2636_vm11 = vcmp.ge.f32.partialorder %v2316_v15, 0.0  ;;  %v2924_v23 = vmul.f32 0.2, %v2316_v15  ;;  %v5055_v7 = vpop.eup %5054 }
 0x239   : > { %3428 = vst [vmem:[%s5200_s29 + $0x610] sm:$0xff] %v3140_v22  ;;  %v3069_v27 = vsel %vm2493_vm10, %v1958_v8, %v2781_v19  ;;  %v1780_v28 = vpop.f32.mrf.mxu0  ;;  %v5057_v9 = vpop.eup %5056  ;;  %v1107_v19 = vpack.c.bf16 %v5051_v1, %v5049_v59  ;;  %v1143_v22 = vpack.c.bf16 %v5055_v7, %v5053_v3 }
 0x23a   : > { %v3212_v30 = vsel %vm2636_vm11, %v2316_v15, %v2924_v23  ;;  %3357 = vst [vmem:[%s5200_s29 + $0x3d8] sm:$0xff] %v3069_v27  ;;  %v1781_v31 = vadd.f32 %v5955_v13, %v1780_v28 }
 0x23b   : > { %3500 = vst [vmem:[%s5200_s29 + $0x850] sm:$0xff] %v3212_v30  ;;  %v2137_v34 = vpop.f32.mrf.mxu2  ;;  %v1960_v35 = vpop.f32.mrf.mxu1 }
 0x23c   : > { %v2138_v39 = vadd.f32 %v5955_v13, %v2137_v34  ;;  %vm2422_vm12 = vcmp.ge.f32.partialorder %v1781_v31, 0.0  ;;  %v2710_v40 = vmul.f32 0.2, %v1781_v31  ;;  %v1961_v41 = vadd.f32 %v5955_v13, %v1960_v35  ;;  %3630 = vmatmul.msk.bf16.gmra.mxu0 %vm1208_vm0, %v1070_v24  ;;  %v5059_v14 = vpop.eup %5058 }
 0x23d   : > { %v2317_v42 = vpop.f32.mrf.mxu3  ;;  %v1179_v27 = vpack.c.bf16 %v5059_v14, %v5057_v9 }
 0x23e   : > { %vm2565_vm13 = vcmp.ge.f32.partialorder %v2138_v39, 0.0  ;;  %v2853_v46 = vmul.f32 0.2, %v2138_v39  ;;  %v2318_v18 = vadd.f32 %v5955_v13, %v2317_v42  ;;  %v2998_v47 = vsel %vm2422_vm12, %v1781_v31, %v2710_v40  ;;  %3666 = vmatmul.msk.bf16.gmra.mxu1 %vm1208_vm0, %v1106_v32 }
 0x23f   : > { %3286 = vst [vmem:[%s5200_s29 + $0x1a0] sm:$0xff] %v2998_v47  ;;  %vm2494_vm14 = vcmp.ge.f32.partialorder %v1961_v41, 0.0  ;;  %v2782_v48 = vmul.f32 0.2, %v1961_v41 }
 0x240   : > { %v3141_v52 = vsel %vm2565_vm13, %v2138_v39, %v2853_v46  ;;  %vm2637_vm15 = vcmp.ge.f32.partialorder %v2318_v18, 0.0  ;;  %v2925_v54 = vmul.f32 0.2, %v2318_v18  ;;  %3702 = vmatmul.msk.bf16.gmra.mxu2 %vm1208_vm0, %v1142_v36 }
 0x241   : > { %3429 = vst [vmem:[%s5200_s29 + $0x618] sm:$0xff] %v3141_v52  ;;  %v3070_v55 = vsel %vm2494_vm14, %v1961_v41, %v2782_v48  ;;  %v1782_v56 = vpop.f32.mrf.mxu0 }
 0x242   : > { %v3213_v57 = vsel %vm2637_vm15, %v2318_v18, %v2925_v54  ;;  %3358 = vst [vmem:[%s5200_s29 + $0x3e0] sm:$0xff] %v3070_v55  ;;  %3738 = vmatmul.msk.bf16.gmra.mxu3 %vm1208_vm0, %v1178_v43  ;;  %v1783_v58 = vadd.f32 %v5955_v13, %v1782_v56 }
 0x243   : > { %3501 = vst [vmem:[%s5200_s29 + $0x858] sm:$0xff] %v3213_v57  ;;  %v2140_v60 = vpop.f32.mrf.mxu2  ;;  %v1962_v61 = vpop.f32.mrf.mxu1 }
 0x244   : > { %v2141_v62 = vadd.f32 %v5955_v13, %v2140_v60  ;;  %vm2423_vm1 = vcmp.ge.f32.partialorder %v1783_v58, 0.0  ;;  %v2711_v63 = vmul.f32 0.2, %v1783_v58  ;;  %v1963_v0 = vadd.f32 %v5955_v13, %v1962_v61 }
 0x245   : > { %v2320_v2 = vpop.f32.mrf.mxu3 }
 0x246   : > { %vm2566_vm2 = vcmp.ge.f32.partialorder %v2141_v62, 0.0  ;;  %v2854_v4 = vmul.f32 0.2, %v2141_v62  ;;  %v2321_v5 = vadd.f32 %v5955_v13, %v2320_v2  ;;  %v2999_v6 = vsel %vm2423_vm1, %v1783_v58, %v2711_v63 }
 0x247   : > { %3287 = vst [vmem:[%s5200_s29 + $0x1a8] sm:$0xff] %v2999_v6  ;;  %vm2495_vm3 = vcmp.ge.f32.partialorder %v1963_v0, 0.0  ;;  %v2783_v8 = vmul.f32 0.2, %v1963_v0 }
 0x248   : > { %v3142_v10 = vsel %vm2566_vm2, %v2141_v62, %v2854_v4  ;;  %vm2638_vm4 = vcmp.ge.f32.partialorder %v2321_v5, 0.0  ;;  %v2926_v11 = vmul.f32 0.2, %v2321_v5 }
 0x249   : > { %3430 = vst [vmem:[%s5200_s29 + $0x620] sm:$0xff] %v3142_v10  ;;  %v3071_v15 = vsel %vm2495_vm3, %v1963_v0, %v2783_v8  ;;  %v1785_v50 = vpop.f32.mrf.mxu0 }
 0x24a   : > { %v3214_v16 = vsel %vm2638_vm4, %v2321_v5, %v2926_v11  ;;  %3359 = vst [vmem:[%s5200_s29 + $0x3e8] sm:$0xff] %v3071_v15  ;;  %v1786_v17 = vadd.f32 %v5955_v13, %v1785_v50 }
 0x24b   : > { %3502 = vst [vmem:[%s5200_s29 + $0x860] sm:$0xff] %v3214_v16  ;;  %v2142_v21 = vpop.f32.mrf.mxu2  ;;  %v1965_v53 = vpop.f32.mrf.mxu1 }
 0x24c   : > { %v2143_v23 = vadd.f32 %v5955_v13, %v2142_v21  ;;  %vm2424_vm5 = vcmp.ge.f32.partialorder %v1786_v17, 0.0  ;;  %v2712_v24 = vmul.f32 0.2, %v1786_v17  ;;  %v1966_v25 = vadd.f32 %v5955_v13, %v1965_v53  ;;  %3631 = vmatmul.msk.bf16.gmra.mxu0 %vm1208_vm0, %v1071_v12 }
 0x24d   : > { %v2322_v26 = vpop.f32.mrf.mxu3 }
 0x24e   : > { %vm2567_vm6 = vcmp.ge.f32.partialorder %v2143_v23, 0.0  ;;  %v2855_v28 = vmul.f32 0.2, %v2143_v23  ;;  %v2323_v29 = vadd.f32 %v5955_v13, %v2322_v26  ;;  %v3000_v30 = vsel %vm2424_vm5, %v1786_v17, %v2712_v24  ;;  %3667 = vmatmul.msk.bf16.gmra.mxu1 %vm1208_vm0, %v1107_v19 }
 0x24f   : > { %3288 = vst [vmem:[%s5200_s29 + $0x1b0] sm:$0xff] %v3000_v30  ;;  %vm2496_vm7 = vcmp.ge.f32.partialorder %v1966_v25, 0.0  ;;  %v2784_v31 = vmul.f32 0.2, %v1966_v25 }
 0x250   : > { %v3143_v32 = vsel %vm2567_vm6, %v2143_v23, %v2855_v28  ;;  %vm2639_vm8 = vcmp.ge.f32.partialorder %v2323_v29, 0.0  ;;  %v2927_v33 = vmul.f32 0.2, %v2323_v29  ;;  %3703 = vmatmul.msk.bf16.gmra.mxu2 %vm1208_vm0, %v1143_v22 }
 0x251   : > { %3431 = vst [vmem:[%s5200_s29 + $0x628] sm:$0xff] %v3143_v32  ;;  %v3072_v34 = vsel %vm2496_vm7, %v1966_v25, %v2784_v31  ;;  %v1787_v35 = vpop.f32.mrf.mxu0 }
 0x252   : > { %v3215_v36 = vsel %vm2639_vm8, %v2323_v29, %v2927_v33  ;;  %3360 = vst [vmem:[%s5200_s29 + $0x3f0] sm:$0xff] %v3072_v34  ;;  %3739 = vmatmul.msk.bf16.gmra.mxu3 %vm1208_vm0, %v1179_v27  ;;  %v1788_v37 = vadd.f32 %v5955_v13, %v1787_v35 }
 0x253   : > { %3503 = vst [vmem:[%s5200_s29 + $0x868] sm:$0xff] %v3215_v36  ;;  %v2145_v38 = vpop.f32.mrf.mxu2  ;;  %v1967_v39 = vpop.f32.mrf.mxu1 }
 0x254   : > { %v2146_v40 = vadd.f32 %v5955_v13, %v2145_v38  ;;  %vm2425_vm9 = vcmp.ge.f32.partialorder %v1788_v37, 0.0  ;;  %v2713_v41 = vmul.f32 0.2, %v1788_v37  ;;  %v1968_v42 = vadd.f32 %v5955_v13, %v1967_v39 }
 0x255   : > { %v2325_v43 = vpop.f32.mrf.mxu3 }
 0x256   : > { %vm2568_vm10 = vcmp.ge.f32.partialorder %v2146_v40, 0.0  ;;  %v2856_v44 = vmul.f32 0.2, %v2146_v40  ;;  %v2326_v45 = vadd.f32 %v5955_v13, %v2325_v43  ;;  %v3001_v46 = vsel %vm2425_vm9, %v1788_v37, %v2713_v41 }
 0x257   : > { %3289 = vst [vmem:[%s5200_s29 + $0x1b8] sm:$0xff] %v3001_v46  ;;  %vm2497_vm0 = vcmp.ge.f32.partialorder %v1968_v42, 0.0  ;;  %v2785_v18 = vmul.f32 0.2, %v1968_v42 }
 0x258   : > { %v3144_v47 = vsel %vm2568_vm10, %v2146_v40, %v2856_v44  ;;  %vm2640_vm11 = vcmp.ge.f32.partialorder %v2326_v45, 0.0  ;;  %v2928_v48 = vmul.f32 0.2, %v2326_v45 }
 0x259   : > { %3432 = vst [vmem:[%s5200_s29 + $0x630] sm:$0xff] %v3144_v47  ;;  %v3073_v49 = vsel %vm2497_vm0, %v1968_v42, %v2785_v18  ;;  %v1790_v51 = vpop.f32.mrf.mxu0 }
 0x25a   : > { %v3216_v52 = vsel %vm2640_vm11, %v2326_v45, %v2928_v48  ;;  %3361 = vst [vmem:[%s5200_s29 + $0x3f8] sm:$0xff] %v3073_v49  ;;  %v1791_v54 = vadd.f32 %v5955_v13, %v1790_v51 }
 0x25b   : > { %3504 = vst [vmem:[%s5200_s29 + $0x870] sm:$0xff] %v3216_v52  ;;  %v2147_v20 = vpop.f32.mrf.mxu2  ;;  %v1970_v55 = vpop.f32.mrf.mxu1 }
 0x25c   : > { %v2148_v56 = vadd.f32 %v5955_v13, %v2147_v20  ;;  %vm2426_vm12 = vcmp.ge.f32.partialorder %v1791_v54, 0.0  ;;  %v2714_v57 = vmul.f32 0.2, %v1791_v54  ;;  %v1971_v58 = vadd.f32 %v5955_v13, %v1970_v55 }
 0x25d   : > { %v2327_v59 = vpop.f32.mrf.mxu3 }
 0x25e   : > { %vm2569_vm13 = vcmp.ge.f32.partialorder %v2148_v56, 0.0  ;;  %v2857_v60 = vmul.f32 0.2, %v2148_v56  ;;  %v2328_v61 = vadd.f32 %v5955_v13, %v2327_v59  ;;  %v3002_v62 = vsel %vm2426_vm12, %v1791_v54, %v2714_v57 }
 0x25f   : > { %3290 = vst [vmem:[%s5200_s29 + $0x1c0] sm:$0xff] %v3002_v62  ;;  %vm2498_vm14 = vcmp.ge.f32.partialorder %v1971_v58, 0.0  ;;  %v2786_v63 = vmul.f32 0.2, %v1971_v58 }
 0x260   : > { %v3145_v0 = vsel %vm2569_vm13, %v2148_v56, %v2857_v60  ;;  %vm2641_vm15 = vcmp.ge.f32.partialorder %v2328_v61, 0.0  ;;  %v2929_v1 = vmul.f32 0.2, %v2328_v61 }
 0x261   : > { %3433 = vst [vmem:[%s5200_s29 + $0x638] sm:$0xff] %v3145_v0  ;;  %v3074_v2 = vsel %vm2498_vm14, %v1971_v58, %v2786_v63  ;;  %v1792_v3 = vpop.f32.mrf.mxu0 }
 0x262   : > { %v3217_v4 = vsel %vm2641_vm15, %v2328_v61, %v2929_v1  ;;  %3362 = vst [vmem:[%s5200_s29 + $0x400] sm:$0xff] %v3074_v2  ;;  %v1793_v5 = vadd.f32 %v5955_v13, %v1792_v3 }
 0x263   : > { %3505 = vst [vmem:[%s5200_s29 + $0x878] sm:$0xff] %v3217_v4  ;;  %v2150_v6 = vpop.f32.mrf.mxu2  ;;  %v1972_v7 = vpop.f32.mrf.mxu1 }
 0x264   : > { %v2151_v8 = vadd.f32 %v5955_v13, %v2150_v6  ;;  %vm2427_vm1 = vcmp.ge.f32.partialorder %v1793_v5, 0.0  ;;  %v2715_v9 = vmul.f32 0.2, %v1793_v5  ;;  %v1973_v10 = vadd.f32 %v5955_v13, %v1972_v7 }
 0x265   : > { %v2330_v11 = vpop.f32.mrf.mxu3 }
 0x266   : > { %vm2570_vm2 = vcmp.ge.f32.partialorder %v2151_v8, 0.0  ;;  %v2858_v12 = vmul.f32 0.2, %v2151_v8  ;;  %v2331_v14 = vadd.f32 %v5955_v13, %v2330_v11  ;;  %v3003_v15 = vsel %vm2427_vm1, %v1793_v5, %v2715_v9 }
 0x267   : > { %3291 = vst [vmem:[%s5200_s29 + $0x1c8] sm:$0xff] %v3003_v15  ;;  %vm2499_vm3 = vcmp.ge.f32.partialorder %v1973_v10, 0.0  ;;  %v2787_v50 = vmul.f32 0.2, %v1973_v10 }
 0x268   : > { %v3146_v16 = vsel %vm2570_vm2, %v2151_v8, %v2858_v12  ;;  %vm2642_vm4 = vcmp.ge.f32.partialorder %v2331_v14, 0.0  ;;  %v2930_v17 = vmul.f32 0.2, %v2331_v14 }
 0x269   : > { %3434 = vst [vmem:[%s5200_s29 + $0x640] sm:$0xff] %v3146_v16  ;;  %v3075_v19 = vsel %vm2499_vm3, %v1973_v10, %v2787_v50  ;;  %v1795_v21 = vpop.f32.mrf.mxu0 }
 0x26a   : > { %v3218_v53 = vsel %vm2642_vm4, %v2331_v14, %v2930_v17  ;;  %3363 = vst [vmem:[%s5200_s29 + $0x408] sm:$0xff] %v3075_v19  ;;  %v1796_v22 = vadd.f32 %v5955_v13, %v1795_v21 }
 0x26b   : > { %3506 = vst [vmem:[%s5200_s29 + $0x880] sm:$0xff] %v3218_v53  ;;  %v2152_v23 = vpop.f32.mrf.mxu2  ;;  %v1975_v24 = vpop.f32.mrf.mxu1 }
 0x26c   : > { %v2153_v25 = vadd.f32 %v5955_v13, %v2152_v23  ;;  %vm2428_vm5 = vcmp.ge.f32.partialorder %v1796_v22, 0.0  ;;  %v2716_v26 = vmul.f32 0.2, %v1796_v22  ;;  %v1976_v27 = vadd.f32 %v5955_v13, %v1975_v24 }
 0x26d   : > { %v2332_v28 = vpop.f32.mrf.mxu3 }
 0x26e   : > { %vm2571_vm6 = vcmp.ge.f32.partialorder %v2153_v25, 0.0  ;;  %v2859_v29 = vmul.f32 0.2, %v2153_v25  ;;  %v2333_v30 = vadd.f32 %v5955_v13, %v2332_v28  ;;  %v3004_v31 = vsel %vm2428_vm5, %v1796_v22, %v2716_v26 }
 0x26f   : > { %3292 = vst [vmem:[%s5200_s29 + $0x1d0] sm:$0xff] %v3004_v31  ;;  %vm2500_vm7 = vcmp.ge.f32.partialorder %v1976_v27, 0.0  ;;  %v2788_v32 = vmul.f32 0.2, %v1976_v27 }
 0x270   : > { %v3147_v33 = vsel %vm2571_vm6, %v2153_v25, %v2859_v29  ;;  %vm2643_vm8 = vcmp.ge.f32.partialorder %v2333_v30, 0.0  ;;  %v2931_v34 = vmul.f32 0.2, %v2333_v30 }
 0x271   : > { %3435 = vst [vmem:[%s5200_s29 + $0x648] sm:$0xff] %v3147_v33  ;;  %v3076_v35 = vsel %vm2500_vm7, %v1976_v27, %v2788_v32  ;;  %v1797_v36 = vpop.f32.mrf.mxu0 }
 0x272   : > { %v3219_v37 = vsel %vm2643_vm8, %v2333_v30, %v2931_v34  ;;  %3364 = vst [vmem:[%s5200_s29 + $0x410] sm:$0xff] %v3076_v35  ;;  %v1798_v38 = vadd.f32 %v5955_v13, %v1797_v36 }
 0x273   : > { %3507 = vst [vmem:[%s5200_s29 + $0x888] sm:$0xff] %v3219_v37  ;;  %v2155_v39 = vpop.f32.mrf.mxu2  ;;  %v1977_v40 = vpop.f32.mrf.mxu1 }
 0x274   : > { %v2156_v41 = vadd.f32 %v5955_v13, %v2155_v39  ;;  %vm2429_vm9 = vcmp.ge.f32.partialorder %v1798_v38, 0.0  ;;  %v2717_v42 = vmul.f32 0.2, %v1798_v38  ;;  %v1978_v43 = vadd.f32 %v5955_v13, %v1977_v40 }
 0x275   : > { %v2335_v44 = vpop.f32.mrf.mxu3 }
 0x276   : > { %vm2572_vm10 = vcmp.ge.f32.partialorder %v2156_v41, 0.0  ;;  %v2860_v45 = vmul.f32 0.2, %v2156_v41  ;;  %v2336_v46 = vadd.f32 %v5955_v13, %v2335_v44  ;;  %v3005_v18 = vsel %vm2429_vm9, %v1798_v38, %v2717_v42 }
 0x277   : > { %3293 = vst [vmem:[%s5200_s29 + $0x1d8] sm:$0xff] %v3005_v18  ;;  %vm2501_vm0 = vcmp.ge.f32.partialorder %v1978_v43, 0.0  ;;  %v2789_v47 = vmul.f32 0.2, %v1978_v43 }
 0x278   : > { %v3148_v48 = vsel %vm2572_vm10, %v2156_v41, %v2860_v45  ;;  %vm2644_vm11 = vcmp.ge.f32.partialorder %v2336_v46, 0.0  ;;  %v2932_v49 = vmul.f32 0.2, %v2336_v46 }
 0x279   : > { %3436 = vst [vmem:[%s5200_s29 + $0x650] sm:$0xff] %v3148_v48  ;;  %v3077_v51 = vsel %vm2501_vm0, %v1978_v43, %v2789_v47  ;;  %v1800_v52 = vpop.f32.mrf.mxu0 }
 0x27a   : > { %v3220_v54 = vsel %vm2644_vm11, %v2336_v46, %v2932_v49  ;;  %3365 = vst [vmem:[%s5200_s29 + $0x418] sm:$0xff] %v3077_v51  ;;  %v1801_v20 = vadd.f32 %v5955_v13, %v1800_v52 }
 0x27b   : > { %3508 = vst [vmem:[%s5200_s29 + $0x890] sm:$0xff] %v3220_v54  ;;  %v2157_v55 = vpop.f32.mrf.mxu2  ;;  %v1980_v56 = vpop.f32.mrf.mxu1 }
 0x27c   : > { %v2158_v57 = vadd.f32 %v5955_v13, %v2157_v55  ;;  %vm2430_vm12 = vcmp.ge.f32.partialorder %v1801_v20, 0.0  ;;  %v2718_v58 = vmul.f32 0.2, %v1801_v20  ;;  %v1981_v59 = vadd.f32 %v5955_v13, %v1980_v56 }
 0x27d   : > { %v2337_v60 = vpop.f32.mrf.mxu3 }
 0x27e   : > { %vm2573_vm13 = vcmp.ge.f32.partialorder %v2158_v57, 0.0  ;;  %v2861_v61 = vmul.f32 0.2, %v2158_v57  ;;  %v2338_v62 = vadd.f32 %v5955_v13, %v2337_v60  ;;  %v3006_v63 = vsel %vm2430_vm12, %v1801_v20, %v2718_v58 }
 0x27f   : > { %3294 = vst [vmem:[%s5200_s29 + $0x1e0] sm:$0xff] %v3006_v63  ;;  %vm2502_vm14 = vcmp.ge.f32.partialorder %v1981_v59, 0.0  ;;  %v2790_v0 = vmul.f32 0.2, %v1981_v59 }
 0x280   : > { %v3149_v1 = vsel %vm2573_vm13, %v2158_v57, %v2861_v61  ;;  %vm2645_vm15 = vcmp.ge.f32.partialorder %v2338_v62, 0.0  ;;  %v2933_v2 = vmul.f32 0.2, %v2338_v62 }
 0x281   : > { %3437 = vst [vmem:[%s5200_s29 + $0x658] sm:$0xff] %v3149_v1  ;;  %v3078_v3 = vsel %vm2502_vm14, %v1981_v59, %v2790_v0  ;;  %v1802_v4 = vpop.f32.mrf.mxu0 }
 0x282   : > { %v3221_v5 = vsel %vm2645_vm15, %v2338_v62, %v2933_v2  ;;  %3366 = vst [vmem:[%s5200_s29 + $0x420] sm:$0xff] %v3078_v3  ;;  %v1803_v6 = vadd.f32 %v5955_v13, %v1802_v4 }
 0x283   : > { %3509 = vst [vmem:[%s5200_s29 + $0x898] sm:$0xff] %v3221_v5  ;;  %v2160_v7 = vpop.f32.mrf.mxu2  ;;  %v1982_v8 = vpop.f32.mrf.mxu1 }
 0x284   : > { %v2161_v9 = vadd.f32 %v5955_v13, %v2160_v7  ;;  %vm2431_vm1 = vcmp.ge.f32.partialorder %v1803_v6, 0.0  ;;  %v2719_v10 = vmul.f32 0.2, %v1803_v6  ;;  %v1983_v11 = vadd.f32 %v5955_v13, %v1982_v8 }
 0x285   : > { %v2340_v12 = vpop.f32.mrf.mxu3 }
 0x286   : > { %vm2574_vm2 = vcmp.ge.f32.partialorder %v2161_v9, 0.0  ;;  %v2862_v14 = vmul.f32 0.2, %v2161_v9  ;;  %v2341_v15 = vadd.f32 %v5955_v13, %v2340_v12  ;;  %v3007_v50 = vsel %vm2431_vm1, %v1803_v6, %v2719_v10 }
 0x287   : > { %3295 = vst [vmem:[%s5200_s29 + $0x1e8] sm:$0xff] %v3007_v50  ;;  %vm2503_vm3 = vcmp.ge.f32.partialorder %v1983_v11, 0.0  ;;  %v2791_v16 = vmul.f32 0.2, %v1983_v11 }
 0x288   : > { %v3150_v17 = vsel %vm2574_vm2, %v2161_v9, %v2862_v14  ;;  %vm2646_vm4 = vcmp.ge.f32.partialorder %v2341_v15, 0.0  ;;  %v2934_v19 = vmul.f32 0.2, %v2341_v15 }
 0x289   : > { %3438 = vst [vmem:[%s5200_s29 + $0x660] sm:$0xff] %v3150_v17  ;;  %v3079_v21 = vsel %vm2503_vm3, %v1983_v11, %v2791_v16  ;;  %v1805_v53 = vpop.f32.mrf.mxu0 }
 0x28a   : > { %v3222_v22 = vsel %vm2646_vm4, %v2341_v15, %v2934_v19  ;;  %3367 = vst [vmem:[%s5200_s29 + $0x428] sm:$0xff] %v3079_v21  ;;  %v1806_v23 = vadd.f32 %v5955_v13, %v1805_v53 }
 0x28b   : > { %3510 = vst [vmem:[%s5200_s29 + $0x8a0] sm:$0xff] %v3222_v22  ;;  %v2162_v24 = vpop.f32.mrf.mxu2  ;;  %v1985_v25 = vpop.f32.mrf.mxu1 }
 0x28c   : > { %v2163_v26 = vadd.f32 %v5955_v13, %v2162_v24  ;;  %vm2432_vm5 = vcmp.ge.f32.partialorder %v1806_v23, 0.0  ;;  %v2720_v27 = vmul.f32 0.2, %v1806_v23  ;;  %v1986_v28 = vadd.f32 %v5955_v13, %v1985_v25 }
 0x28d   : > { %v2342_v29 = vpop.f32.mrf.mxu3 }
 0x28e   : > { %vm2575_vm6 = vcmp.ge.f32.partialorder %v2163_v26, 0.0  ;;  %v2863_v30 = vmul.f32 0.2, %v2163_v26  ;;  %v2343_v31 = vadd.f32 %v5955_v13, %v2342_v29  ;;  %v3008_v32 = vsel %vm2432_vm5, %v1806_v23, %v2720_v27 }
 0x28f   : > { %3296 = vst [vmem:[%s5200_s29 + $0x1f0] sm:$0xff] %v3008_v32  ;;  %vm2504_vm7 = vcmp.ge.f32.partialorder %v1986_v28, 0.0  ;;  %v2792_v33 = vmul.f32 0.2, %v1986_v28 }
 0x290   : > { %v3151_v34 = vsel %vm2575_vm6, %v2163_v26, %v2863_v30  ;;  %vm2647_vm8 = vcmp.ge.f32.partialorder %v2343_v31, 0.0  ;;  %v2935_v35 = vmul.f32 0.2, %v2343_v31 }
 0x291   : > { %3439 = vst [vmem:[%s5200_s29 + $0x668] sm:$0xff] %v3151_v34  ;;  %v3080_v36 = vsel %vm2504_vm7, %v1986_v28, %v2792_v33  ;;  %v1807_v37 = vpop.f32.mrf.mxu0 }
 0x292   : > { %v3223_v38 = vsel %vm2647_vm8, %v2343_v31, %v2935_v35  ;;  %3368 = vst [vmem:[%s5200_s29 + $0x430] sm:$0xff] %v3080_v36  ;;  %v1808_v39 = vadd.f32 %v5955_v13, %v1807_v37 }
 0x293   : > { %3511 = vst [vmem:[%s5200_s29 + $0x8a8] sm:$0xff] %v3223_v38  ;;  %v2165_v40 = vpop.f32.mrf.mxu2  ;;  %v1987_v41 = vpop.f32.mrf.mxu1 }
 0x294   : > { %v2166_v42 = vadd.f32 %v5955_v13, %v2165_v40  ;;  %vm2433_vm9 = vcmp.ge.f32.partialorder %v1808_v39, 0.0  ;;  %v2721_v43 = vmul.f32 0.2, %v1808_v39  ;;  %v1988_v44 = vadd.f32 %v5955_v13, %v1987_v41  ;;  %v6130_v40 = vld [vmem:[%s6182_s2] ss:$0 sm:$0xff] }
 0x295   : > { %v2345_v45 = vpop.f32.mrf.mxu3 }
 0x296   : > { %vm2576_vm10 = vcmp.ge.f32.partialorder %v2166_v42, 0.0  ;;  %v2864_v46 = vmul.f32 0.2, %v2166_v42  ;;  %v2346_v18 = vadd.f32 %v5955_v13, %v2345_v45  ;;  %v3009_v47 = vsel %vm2433_vm9, %v1808_v39, %v2721_v43 }
 0x297   : > { %3297 = vst [vmem:[%s5200_s29 + $0x1f8] sm:$0xff] %v3009_v47  ;;  %vm2505_vm0 = vcmp.ge.f32.partialorder %v1988_v44, 0.0  ;;  %v2793_v48 = vmul.f32 0.2, %v1988_v44 }
 0x298   : > { %v3152_v49 = vsel %vm2576_vm10, %v2166_v42, %v2864_v46  ;;  %vm2648_vm11 = vcmp.ge.f32.partialorder %v2346_v18, 0.0  ;;  %v2936_v51 = vmul.f32 0.2, %v2346_v18 }
 0x299   : > { %3440 = vst [vmem:[%s5200_s29 + $0x670] sm:$0xff] %v3152_v49  ;;  %v3081_v52 = vsel %vm2505_vm0, %v1988_v44, %v2793_v48  ;;  %v1810_v54 = vpop.f32.mrf.mxu0 }
 0x29a   : > { %v3224_v20 = vsel %vm2648_vm11, %v2346_v18, %v2936_v51  ;;  %3369 = vst [vmem:[%s5200_s29 + $0x438] sm:$0xff] %v3081_v52  ;;  %v1811_v55 = vadd.f32 %v5955_v13, %v1810_v54 }
 0x29b   : > { %3512 = vst [vmem:[%s5200_s29 + $0x8b0] sm:$0xff] %v3224_v20  ;;  %v2167_v56 = vpop.f32.mrf.mxu2  ;;  %v1990_v57 = vpop.f32.mrf.mxu1 }
 0x29c   : > { %v2168_v58 = vadd.f32 %v5955_v13, %v2167_v56  ;;  %vm2434_vm12 = vcmp.ge.f32.partialorder %v1811_v55, 0.0  ;;  %v2722_v59 = vmul.f32 0.2, %v1811_v55  ;;  %v1991_v60 = vadd.f32 %v5955_v13, %v1990_v57 }
 0x29d   : > { %v2347_v61 = vpop.f32.mrf.mxu3 }
 0x29e   : > { %vm2577_vm13 = vcmp.ge.f32.partialorder %v2168_v58, 0.0  ;;  %v2865_v62 = vmul.f32 0.2, %v2168_v58  ;;  %v2348_v63 = vadd.f32 %v5955_v13, %v2347_v61  ;;  %v3010_v0 = vsel %vm2434_vm12, %v1811_v55, %v2722_v59 }
 0x29f   : > { %3298 = vst [vmem:[%s5200_s29 + $0x200] sm:$0xff] %v3010_v0  ;;  %vm2506_vm14 = vcmp.ge.f32.partialorder %v1991_v60, 0.0  ;;  %v2794_v1 = vmul.f32 0.2, %v1991_v60 }
 0x2a0   : > { %v3153_v2 = vsel %vm2577_vm13, %v2168_v58, %v2865_v62  ;;  %vm2649_vm15 = vcmp.ge.f32.partialorder %v2348_v63, 0.0  ;;  %v2937_v3 = vmul.f32 0.2, %v2348_v63 }
 0x2a1   : > { %3441 = vst [vmem:[%s5200_s29 + $0x678] sm:$0xff] %v3153_v2  ;;  %v3082_v4 = vsel %vm2506_vm14, %v1991_v60, %v2794_v1  ;;  %v1812_v5 = vpop.f32.mrf.mxu0 }
 0x2a2   : > { %v3225_v6 = vsel %vm2649_vm15, %v2348_v63, %v2937_v3  ;;  %3370 = vst [vmem:[%s5200_s29 + $0x440] sm:$0xff] %v3082_v4  ;;  %v1813_v7 = vadd.f32 %v5955_v13, %v1812_v5 }
 0x2a3   : > { %3513 = vst [vmem:[%s5200_s29 + $0x8b8] sm:$0xff] %v3225_v6  ;;  %v2170_v8 = vpop.f32.mrf.mxu2  ;;  %v1992_v9 = vpop.f32.mrf.mxu1 }
 0x2a4   : > { %v2171_v10 = vadd.f32 %v5955_v13, %v2170_v8  ;;  %vm2435_vm1 = vcmp.ge.f32.partialorder %v1813_v7, 0.0  ;;  %v2723_v11 = vmul.f32 0.2, %v1813_v7  ;;  %v1993_v12 = vadd.f32 %v5955_v13, %v1992_v9 }
 0x2a5   : > { %v2350_v14 = vpop.f32.mrf.mxu3 }
 0x2a6   : > { %vm2578_vm2 = vcmp.ge.f32.partialorder %v2171_v10, 0.0  ;;  %v2866_v15 = vmul.f32 0.2, %v2171_v10  ;;  %v2351_v50 = vadd.f32 %v5955_v13, %v2350_v14  ;;  %v3011_v16 = vsel %vm2435_vm1, %v1813_v7, %v2723_v11 }
 0x2a7   : > { %3299 = vst [vmem:[%s5200_s29 + $0x208] sm:$0xff] %v3011_v16  ;;  %vm2507_vm3 = vcmp.ge.f32.partialorder %v1993_v12, 0.0  ;;  %v2795_v17 = vmul.f32 0.2, %v1993_v12 }
 0x2a8   : > { %v3154_v19 = vsel %vm2578_vm2, %v2171_v10, %v2866_v15  ;;  %vm2650_vm4 = vcmp.ge.f32.partialorder %v2351_v50, 0.0  ;;  %v2938_v21 = vmul.f32 0.2, %v2351_v50 }
 0x2a9   : > { %3442 = vst [vmem:[%s5200_s29 + $0x680] sm:$0xff] %v3154_v19  ;;  %v3083_v53 = vsel %vm2507_vm3, %v1993_v12, %v2795_v17  ;;  %v1815_v22 = vpop.f32.mrf.mxu0 }
 0x2aa   : > { %v3226_v23 = vsel %vm2650_vm4, %v2351_v50, %v2938_v21  ;;  %3371 = vst [vmem:[%s5200_s29 + $0x448] sm:$0xff] %v3083_v53  ;;  %v1816_v24 = vadd.f32 %v5955_v13, %v1815_v22 }
 0x2ab   : > { %3514 = vst [vmem:[%s5200_s29 + $0x8c0] sm:$0xff] %v3226_v23  ;;  %v2172_v25 = vpop.f32.mrf.mxu2  ;;  %v1995_v26 = vpop.f32.mrf.mxu1 }
 0x2ac   : > { %v2173_v27 = vadd.f32 %v5955_v13, %v2172_v25  ;;  %vm2436_vm5 = vcmp.ge.f32.partialorder %v1816_v24, 0.0  ;;  %v2724_v28 = vmul.f32 0.2, %v1816_v24  ;;  %v1996_v29 = vadd.f32 %v5955_v13, %v1995_v26 }
 0x2ad   : > { %v2352_v30 = vpop.f32.mrf.mxu3 }
 0x2ae   : > { %vm2579_vm6 = vcmp.ge.f32.partialorder %v2173_v27, 0.0  ;;  %v2867_v31 = vmul.f32 0.2, %v2173_v27  ;;  %v2353_v32 = vadd.f32 %v5955_v13, %v2352_v30  ;;  %v3012_v33 = vsel %vm2436_vm5, %v1816_v24, %v2724_v28 }
 0x2af   : > { %3300 = vst [vmem:[%s5200_s29 + $0x210] sm:$0xff] %v3012_v33  ;;  %vm2508_vm7 = vcmp.ge.f32.partialorder %v1996_v29, 0.0  ;;  %v2796_v34 = vmul.f32 0.2, %v1996_v29 }
 0x2b0   : > { %v3155_v35 = vsel %vm2579_vm6, %v2173_v27, %v2867_v31  ;;  %vm2651_vm8 = vcmp.ge.f32.partialorder %v2353_v32, 0.0  ;;  %v2939_v36 = vmul.f32 0.2, %v2353_v32 }
 0x2b1   : > { %3443 = vst [vmem:[%s5200_s29 + $0x688] sm:$0xff] %v3155_v35  ;;  %v3084_v37 = vsel %vm2508_vm7, %v1996_v29, %v2796_v34  ;;  %v1817_v38 = vpop.f32.mrf.mxu0 }
 0x2b2   : > { %v3227_v39 = vsel %vm2651_vm8, %v2353_v32, %v2939_v36  ;;  %3372 = vst [vmem:[%s5200_s29 + $0x450] sm:$0xff] %v3084_v37  ;;  %v1818_v13 = vadd.f32 %v6130_v40, %v1817_v38 }
 0x2b3   : > { %3515 = vst [vmem:[%s5200_s29 + $0x8c8] sm:$0xff] %v3227_v39  ;;  %v2175_v41 = vpop.f32.mrf.mxu2  ;;  %v1997_v42 = vpop.f32.mrf.mxu1 }
 0x2b4   : > { %v2176_v43 = vadd.f32 %v6130_v40, %v2175_v41  ;;  %vm2437_vm9 = vcmp.ge.f32.partialorder %v1818_v13, 0.0  ;;  %v2725_v44 = vmul.f32 0.2, %v1818_v13  ;;  %v1998_v45 = vadd.f32 %v6130_v40, %v1997_v42 }
 0x2b5   : > { %v2355_v46 = vpop.f32.mrf.mxu3 }
 0x2b6   : > { %vm2580_vm10 = vcmp.ge.f32.partialorder %v2176_v43, 0.0  ;;  %v2868_v18 = vmul.f32 0.2, %v2176_v43  ;;  %v2356_v47 = vadd.f32 %v6130_v40, %v2355_v46  ;;  %v3013_v48 = vsel %vm2437_vm9, %v1818_v13, %v2725_v44 }
 0x2b7   : > { %3301 = vst [vmem:[%s5200_s29 + $0x218] sm:$0xff] %v3013_v48  ;;  %vm2509_vm0 = vcmp.ge.f32.partialorder %v1998_v45, 0.0  ;;  %v2797_v49 = vmul.f32 0.2, %v1998_v45 }
 0x2b8   : > { %v3156_v51 = vsel %vm2580_vm10, %v2176_v43, %v2868_v18  ;;  %vm2652_vm11 = vcmp.ge.f32.partialorder %v2356_v47, 0.0  ;;  %v2940_v52 = vmul.f32 0.2, %v2356_v47 }
 0x2b9   : > { %3444 = vst [vmem:[%s5200_s29 + $0x690] sm:$0xff] %v3156_v51  ;;  %v3085_v54 = vsel %vm2509_vm0, %v1998_v45, %v2797_v49  ;;  %v1820_v20 = vpop.f32.mrf.mxu0 }
 0x2ba   : > { %v3228_v55 = vsel %vm2652_vm11, %v2356_v47, %v2940_v52  ;;  %3373 = vst [vmem:[%s5200_s29 + $0x458] sm:$0xff] %v3085_v54  ;;  %v1821_v56 = vadd.f32 %v6130_v40, %v1820_v20 }
 0x2bb   : > { %3516 = vst [vmem:[%s5200_s29 + $0x8d0] sm:$0xff] %v3228_v55  ;;  %v2177_v57 = vpop.f32.mrf.mxu2  ;;  %v2000_v58 = vpop.f32.mrf.mxu1 }
 0x2bc   : > { %v2178_v59 = vadd.f32 %v6130_v40, %v2177_v57  ;;  %vm2438_vm12 = vcmp.ge.f32.partialorder %v1821_v56, 0.0  ;;  %v2726_v60 = vmul.f32 0.2, %v1821_v56  ;;  %v2001_v61 = vadd.f32 %v6130_v40, %v2000_v58 }
 0x2bd   : > { %v2357_v62 = vpop.f32.mrf.mxu3 }
 0x2be   : > { %vm2581_vm13 = vcmp.ge.f32.partialorder %v2178_v59, 0.0  ;;  %v2869_v63 = vmul.f32 0.2, %v2178_v59  ;;  %v2358_v0 = vadd.f32 %v6130_v40, %v2357_v62  ;;  %v3014_v1 = vsel %vm2438_vm12, %v1821_v56, %v2726_v60 }
 0x2bf   : > { %3302 = vst [vmem:[%s5200_s29 + $0x220] sm:$0xff] %v3014_v1  ;;  %vm2510_vm14 = vcmp.ge.f32.partialorder %v2001_v61, 0.0  ;;  %v2798_v2 = vmul.f32 0.2, %v2001_v61 }
 0x2c0   : > { %v3157_v3 = vsel %vm2581_vm13, %v2178_v59, %v2869_v63  ;;  %vm2653_vm15 = vcmp.ge.f32.partialorder %v2358_v0, 0.0  ;;  %v2941_v4 = vmul.f32 0.2, %v2358_v0 }
 0x2c1   : > { %3445 = vst [vmem:[%s5200_s29 + $0x698] sm:$0xff] %v3157_v3  ;;  %v3086_v5 = vsel %vm2510_vm14, %v2001_v61, %v2798_v2  ;;  %v1822_v6 = vpop.f32.mrf.mxu0 }
 0x2c2   : > { %v3229_v7 = vsel %vm2653_vm15, %v2358_v0, %v2941_v4  ;;  %3374 = vst [vmem:[%s5200_s29 + $0x460] sm:$0xff] %v3086_v5  ;;  %v1823_v8 = vadd.f32 %v6130_v40, %v1822_v6 }
 0x2c3   : > { %3517 = vst [vmem:[%s5200_s29 + $0x8d8] sm:$0xff] %v3229_v7  ;;  %v2180_v9 = vpop.f32.mrf.mxu2  ;;  %v2002_v10 = vpop.f32.mrf.mxu1 }
 0x2c4   : > { %v2181_v11 = vadd.f32 %v6130_v40, %v2180_v9  ;;  %vm2439_vm1 = vcmp.ge.f32.partialorder %v1823_v8, 0.0  ;;  %v2727_v12 = vmul.f32 0.2, %v1823_v8  ;;  %v2003_v14 = vadd.f32 %v6130_v40, %v2002_v10 }
 0x2c5   : > { %v2360_v15 = vpop.f32.mrf.mxu3 }
 0x2c6   : > { %vm2582_vm2 = vcmp.ge.f32.partialorder %v2181_v11, 0.0  ;;  %v2870_v50 = vmul.f32 0.2, %v2181_v11  ;;  %v2361_v16 = vadd.f32 %v6130_v40, %v2360_v15  ;;  %v3015_v17 = vsel %vm2439_vm1, %v1823_v8, %v2727_v12 }
 0x2c7   : > { %3303 = vst [vmem:[%s5200_s29 + $0x228] sm:$0xff] %v3015_v17  ;;  %vm2511_vm3 = vcmp.ge.f32.partialorder %v2003_v14, 0.0  ;;  %v2799_v19 = vmul.f32 0.2, %v2003_v14 }
 0x2c8   : > { %v3158_v21 = vsel %vm2582_vm2, %v2181_v11, %v2870_v50  ;;  %vm2654_vm4 = vcmp.ge.f32.partialorder %v2361_v16, 0.0  ;;  %v2942_v53 = vmul.f32 0.2, %v2361_v16 }
 0x2c9   : > { %3446 = vst [vmem:[%s5200_s29 + $0x6a0] sm:$0xff] %v3158_v21  ;;  %v3087_v22 = vsel %vm2511_vm3, %v2003_v14, %v2799_v19  ;;  %v1825_v23 = vpop.f32.mrf.mxu0 }
 0x2ca   : > { %v3230_v24 = vsel %vm2654_vm4, %v2361_v16, %v2942_v53  ;;  %3375 = vst [vmem:[%s5200_s29 + $0x468] sm:$0xff] %v3087_v22  ;;  %v1826_v25 = vadd.f32 %v6130_v40, %v1825_v23 }
 0x2cb   : > { %3518 = vst [vmem:[%s5200_s29 + $0x8e0] sm:$0xff] %v3230_v24  ;;  %v2182_v26 = vpop.f32.mrf.mxu2  ;;  %v2005_v27 = vpop.f32.mrf.mxu1 }
 0x2cc   : > { %v2183_v28 = vadd.f32 %v6130_v40, %v2182_v26  ;;  %vm2440_vm5 = vcmp.ge.f32.partialorder %v1826_v25, 0.0  ;;  %v2728_v29 = vmul.f32 0.2, %v1826_v25  ;;  %v2006_v30 = vadd.f32 %v6130_v40, %v2005_v27 }
 0x2cd   : > { %v2362_v31 = vpop.f32.mrf.mxu3 }
 0x2ce   : > { %vm2583_vm6 = vcmp.ge.f32.partialorder %v2183_v28, 0.0  ;;  %v2871_v32 = vmul.f32 0.2, %v2183_v28  ;;  %v2363_v33 = vadd.f32 %v6130_v40, %v2362_v31  ;;  %v3016_v34 = vsel %vm2440_vm5, %v1826_v25, %v2728_v29 }
 0x2cf   : > { %3304 = vst [vmem:[%s5200_s29 + $0x230] sm:$0xff] %v3016_v34  ;;  %vm2512_vm7 = vcmp.ge.f32.partialorder %v2006_v30, 0.0  ;;  %v2800_v35 = vmul.f32 0.2, %v2006_v30 }
 0x2d0   : > { %v3159_v36 = vsel %vm2583_vm6, %v2183_v28, %v2871_v32  ;;  %vm2655_vm8 = vcmp.ge.f32.partialorder %v2363_v33, 0.0  ;;  %v2943_v37 = vmul.f32 0.2, %v2363_v33 }
 0x2d1   : > { %3447 = vst [vmem:[%s5200_s29 + $0x6a8] sm:$0xff] %v3159_v36  ;;  %v3088_v38 = vsel %vm2512_vm7, %v2006_v30, %v2800_v35  ;;  %v1827_v39 = vpop.f32.mrf.mxu0 }
 0x2d2   : > { %v3231_v13 = vsel %vm2655_vm8, %v2363_v33, %v2943_v37  ;;  %3376 = vst [vmem:[%s5200_s29 + $0x470] sm:$0xff] %v3088_v38  ;;  %v1828_v41 = vadd.f32 %v6130_v40, %v1827_v39 }
 0x2d3   : > { %3519 = vst [vmem:[%s5200_s29 + $0x8e8] sm:$0xff] %v3231_v13  ;;  %v2185_v42 = vpop.f32.mrf.mxu2  ;;  %v2007_v43 = vpop.f32.mrf.mxu1 }
 0x2d4   : > { %v2186_v44 = vadd.f32 %v6130_v40, %v2185_v42  ;;  %vm2441_vm9 = vcmp.ge.f32.partialorder %v1828_v41, 0.0  ;;  %v2729_v45 = vmul.f32 0.2, %v1828_v41  ;;  %v2008_v46 = vadd.f32 %v6130_v40, %v2007_v43 }
 0x2d5   : > { %v2365_v18 = vpop.f32.mrf.mxu3 }
 0x2d6   : > { %vm2584_vm10 = vcmp.ge.f32.partialorder %v2186_v44, 0.0  ;;  %v2872_v47 = vmul.f32 0.2, %v2186_v44  ;;  %v2366_v48 = vadd.f32 %v6130_v40, %v2365_v18  ;;  %v3017_v49 = vsel %vm2441_vm9, %v1828_v41, %v2729_v45 }
 0x2d7   : > { %3305 = vst [vmem:[%s5200_s29 + $0x238] sm:$0xff] %v3017_v49  ;;  %vm2513_vm0 = vcmp.ge.f32.partialorder %v2008_v46, 0.0  ;;  %v2801_v51 = vmul.f32 0.2, %v2008_v46 }
 0x2d8   : > { %v3160_v52 = vsel %vm2584_vm10, %v2186_v44, %v2872_v47  ;;  %vm2656_vm11 = vcmp.ge.f32.partialorder %v2366_v48, 0.0  ;;  %v2944_v54 = vmul.f32 0.2, %v2366_v48 }
 0x2d9   : > { %3448 = vst [vmem:[%s5200_s29 + $0x6b0] sm:$0xff] %v3160_v52  ;;  %v3089_v20 = vsel %vm2513_vm0, %v2008_v46, %v2801_v51 }
 0x2da   : > { %v3232_v55 = vsel %vm2656_vm11, %v2366_v48, %v2944_v54  ;;  %3377 = vst [vmem:[%s5200_s29 + $0x478] sm:$0xff] %v3089_v20 }
 0x2db   : > { %3520 = vst [vmem:[%s5200_s29 + $0x8f0] sm:$0xff] %v3232_v55  ;;  %v2187_v56 = vpop.f32.mrf.mxu2 }
 0x2dc   : > { %v2188_v57 = vadd.f32 %v6130_v40, %v2187_v56 }
 0x2dd   : > { %v2367_v58 = vpop.f32.mrf.mxu3 }
 0x2de   : > { %vm2585_vm12 = vcmp.ge.f32.partialorder %v2188_v57, 0.0  ;;  %v2873_v59 = vmul.f32 0.2, %v2188_v57  ;;  %v2368_v60 = vadd.f32 %v6130_v40, %v2367_v58 }
 0x2e0   : > { %v3161_v61 = vsel %vm2585_vm12, %v2188_v57, %v2873_v59  ;;  %vm2657_vm13 = vcmp.ge.f32.partialorder %v2368_v60, 0.0  ;;  %v2945_v62 = vmul.f32 0.2, %v2368_v60 }
 0x2e1   : > { %3449 = vst [vmem:[%s5200_s29 + $0x6b8] sm:$0xff] %v3161_v61 }
 0x2e2   : > { %v3233_v63 = vsel %vm2657_vm13, %v2368_v60, %v2945_v62 }
 0x2e3   : > { %3521 = vst [vmem:[%s5200_s29 + $0x8f8] sm:$0xff] %v3233_v63 }
 0x2e4 PF: > { %s13_s12 = sadd.s32 1, %s5071_s12  }
 0x2e5   : > { %p10_p4 = scmp.ge.s32.totalorder %s13_s12, 4  }
 0x2e7   :  { %12 = sbr.rel (!%p10_p4) target bundleno = 1 (0x1), region = 62 }

// kernel: discriminator_forward.8
= control target key start
LH: loop header
LB: loop body
LE: loop exit
PB: predicated region body
PF: predicated region fallthrough
CT: control target
= control target key end

     0   :  { %s1747_s12 = smov 0   ;;  %s2873_s0 = inlined_call_operand.vmem [shape: bf16[2,576,128], index: 0, kind: input, shape index: {}]   ;;  %s2874_s1 = inlined_call_operand.vmem [shape: bf16[128,128], index: 1, kind: input, shape index: {}]   ;;  %s2875_s2 = inlined_call_operand.vmem [shape: f32[1,128], index: 2, kind: input, shape index: {}]   ;;  %s2876_s3 = inlined_call_operand.vmem [shape: f32[2,576,128], index: 3, kind: output, shape index: {}]  }
   0x1 LB: > { %s1449_s13 = sadd.s32 4294967295, %s1724_s12   ;;  %p1453_p0 = scmp.ge.s32.totalorder %s1724_s12, 1  ;;  %s1724_s12 = sphi %s1747_s12, %s13_s12  }
   0x2   : > { %p137_p1 = scmp.lt.s32.totalorder %s1724_s12, 3 }
   0x4   : > { %p138_p2 = pnand %p1453_p0, %p137_p1 }
   0x6   : > { %141 = sbr.rel (%p138_p2) target bundleno = 692 (0x2b4), region = 32 }
   0xb   : > { %v1677_v0 = vld [vmem:[%s2874_s1 + $0x38] sm:$0xff]  ;;  %v1676_v1 = vld [vmem:[%s2874_s1 + $0x30] sm:$0xff]  ;;  %v1675_v2 = vld [vmem:[%s2874_s1 + $0x28] sm:$0xff]  ;;  %p161_p3 = scmp.lt.s32.totalorder %s1449_s13, 1 }
   0xc   : > { %527 = vmatpush.bf16.msra.mxu0 %v1677_v0  ;;  %1678 = vmatpush.bf16.msra.mxu1 %v1677_v0  ;;  %v1674_v3 = vld [vmem:[%s2874_s1 + $0x20] sm:$0xff]  ;;  %v1673_v4 = vld [vmem:[%s2874_s1 + $0x18] sm:$0xff]  ;;  %v1672_v5 = vld [vmem:[%s2874_s1 + $0x10] sm:$0xff] }
   0xd   : > { %1679 = vmatpush.bf16.msra.mxu2 %v1677_v0  ;;  %1680 = vmatpush.bf16.msra.mxu3 %v1677_v0  ;;  %s3043_s13 = smov (!%p161_p3, %s1449_s13), 1  ;;  %v1671_v6 = vld [vmem:[%s2874_s1 + $0x8] sm:$0xff]  ;;  %v1670_v7 = vld [vmem:[%s2874_s1] sm:$0xff] }
   0xe   : > { %s1702_s28 = smul.u32 288, %s3043_s13 }
   0xf   : > { %s1703_s9 = smul.u32 576, %s3043_s13 }
  0x10   : > { %528 = vmatpush.bf16.msra.mxu0 %v1676_v1  ;;  %1681 = vmatpush.bf16.msra.mxu1 %v1676_v1  ;;  %s1785_s6 = scalar_lea.vmem %s2873_s0, %s1702_s28 }
  0x11   : > { %1682 = vmatpush.bf16.msra.mxu2 %v1676_v1  ;;  %1683 = vmatpush.bf16.msra.mxu3 %v1676_v1  ;;  %v1634_v8 = vld [vmem:[%s1785_s6] sm:$0xff]  ;;  %v1643_v9 = vld [vmem:[%s1785_s6 + $0x48] sm:$0xff]  ;;  %v1644_v11 = vld [vmem:[%s1785_s6 + $0x50] sm:$0xff]  ;;  %s2595_s14 = scalar_lea.vmem %s2876_s3, %s1703_s9 }
  0x12   : > { %v1635_v10 = vld [vmem:[%s1785_s6 + $0x8] sm:$0xff]  ;;  %v1652_v12 = vld [vmem:[%s1785_s6 + $0x90] sm:$0xff]  ;;  %v1645_v14 = vld [vmem:[%s1785_s6 + $0x58] sm:$0xff] }
  0x13   : > { %v1636_v13 = vld [vmem:[%s1785_s6 + $0x10] sm:$0xff]  ;;  %v1653_v15 = vld [vmem:[%s1785_s6 + $0x98] sm:$0xff]  ;;  %v1646_v17 = vld [vmem:[%s1785_s6 + $0x60] sm:$0xff] }
  0x14   : > { %529 = vmatpush.bf16.msra.mxu0 %v1675_v2  ;;  %1684 = vmatpush.bf16.msra.mxu1 %v1675_v2  ;;  %v1637_v16 = vld [vmem:[%s1785_s6 + $0x18] sm:$0xff]  ;;  %v1654_v18 = vld [vmem:[%s1785_s6 + $0xa0] sm:$0xff]  ;;  %v1647_v21 = vld [vmem:[%s1785_s6 + $0x68] sm:$0xff] }
  0x15   : > { %1685 = vmatpush.bf16.msra.mxu2 %v1675_v2  ;;  %1686 = vmatpush.bf16.msra.mxu3 %v1675_v2  ;;  %v1661_v19 = vld [vmem:[%s1785_s6 + $0xd8] sm:$0xff]  ;;  %v1638_v20 = vld [vmem:[%s1785_s6 + $0x20] sm:$0xff]  ;;  %v1655_v22 = vld [vmem:[%s1785_s6 + $0xa8] sm:$0xff] }
  0x16   : > { %v1662_v23 = vld [vmem:[%s1785_s6 + $0xe0] sm:$0xff]  ;;  %v1639_v24 = vld [vmem:[%s1785_s6 + $0x28] sm:$0xff]  ;;  %v1648_v25 = vld [vmem:[%s1785_s6 + $0x70] sm:$0xff] }
  0x17   : > { %v1656_v26 = vld [vmem:[%s1785_s6 + $0xb0] sm:$0xff]  ;;  %v1649_v28 = vld [vmem:[%s1785_s6 + $0x78] sm:$0xff]  ;;  %v1663_v29 = vld [vmem:[%s1785_s6 + $0xe8] sm:$0xff] }
  0x18   : > { %530 = vmatpush.bf16.msra.mxu0 %v1674_v3  ;;  %1687 = vmatpush.bf16.msra.mxu1 %v1674_v3  ;;  %v1640_v27 = vld [vmem:[%s1785_s6 + $0x30] sm:$0xff]  ;;  %v1657_v30 = vld [vmem:[%s1785_s6 + $0xb8] sm:$0xff]  ;;  %v1650_v32 = vld [vmem:[%s1785_s6 + $0x80] sm:$0xff] }
  0x19   : > { %1688 = vmatpush.bf16.msra.mxu2 %v1674_v3  ;;  %1689 = vmatpush.bf16.msra.mxu3 %v1674_v3  ;;  %v1641_v31 = vld [vmem:[%s1785_s6 + $0x38] sm:$0xff]  ;;  %v1664_v33 = vld [vmem:[%s1785_s6 + $0xf0] sm:$0xff]  ;;  %v1658_v34 = vld [vmem:[%s1785_s6 + $0xc0] sm:$0xff] }
  0x1a   : > { %v1642_v35 = vld [vmem:[%s1785_s6 + $0x40] sm:$0xff]  ;;  %v1651_v36 = vld [vmem:[%s1785_s6 + $0x88] sm:$0xff]  ;;  %v1665_v37 = vld [vmem:[%s1785_s6 + $0xf8] sm:$0xff] }
  0x1b   : > { %v1659_v42 = vld [vmem:[%s1785_s6 + $0xc8] sm:$0xff]  ;;  %v1666_v43 = vld [vmem:[%s1785_s6 + $0x100] sm:$0xff]  ;;  %v1660_v47 = vld [vmem:[%s1785_s6 + $0xd0] sm:$0xff] }
  0x1c   : > { %531 = vmatpush.bf16.msra.mxu0 %v1673_v4  ;;  %1690 = vmatpush.bf16.msra.mxu1 %v1673_v4  ;;  %v1667_v49 = vld [vmem:[%s1785_s6 + $0x108] sm:$0xff]  ;;  %v1668_v55 = vld [vmem:[%s1785_s6 + $0x110] sm:$0xff]  ;;  %v1669_v61 = vld [vmem:[%s1785_s6 + $0x118] sm:$0xff] }
  0x1d   : > { %1691 = vmatpush.bf16.msra.mxu2 %v1673_v4  ;;  %1692 = vmatpush.bf16.msra.mxu3 %v1673_v4 }
  0x20   : > { %532 = vmatpush.bf16.msra.mxu0 %v1672_v5  ;;  %1693 = vmatpush.bf16.msra.mxu1 %v1672_v5 }
  0x21   : > { %1694 = vmatpush.bf16.msra.mxu2 %v1672_v5  ;;  %1695 = vmatpush.bf16.msra.mxu3 %v1672_v5 }
  0x24   : > { %533 = vmatpush.bf16.msra.mxu0 %v1671_v6  ;;  %1696 = vmatpush.bf16.msra.mxu1 %v1671_v6 }
  0x25   : > { %1697 = vmatpush.bf16.msra.mxu2 %v1671_v6  ;;  %1698 = vmatpush.bf16.msra.mxu3 %v1671_v6 }
  0x28   : > { %534 = vmatpush.bf16.msra.mxu0 %v1670_v7  ;;  %1699 = vmatpush.bf16.msra.mxu1 %v1670_v7 }
  0x29   : > { %1700 = vmatpush.bf16.msra.mxu2 %v1670_v7  ;;  %1701 = vmatpush.bf16.msra.mxu3 %v1670_v7 }
  0x2b   : > { %535 = vmatmul.bf16.vlgmr.msra.gmra.mxu0 %v1634_v8  ;;  %580 = vmatmul.bf16.vlgmr.msra.gmra.mxu1 %v1643_v9 }
  0x2c   : > { %625 = vmatmul.bf16.vlgmr.msra.gmra.mxu2 %v1652_v12  ;;  %670 = vmatmul.bf16.vlgmr.msra.gmra.mxu3 %v1661_v19 }
  0x3b   : > { %540 = vmatmul.bf16.gmra.mxu0 %v1635_v10  ;;  %585 = vmatmul.bf16.gmra.mxu1 %v1644_v11 }
  0x3c   : > { %630 = vmatmul.bf16.gmra.mxu2 %v1653_v15  ;;  %675 = vmatmul.bf16.gmra.mxu3 %v1662_v23 }
  0x4b   : > { %545 = vmatmul.bf16.gmra.mxu0 %v1636_v13  ;;  %590 = vmatmul.bf16.gmra.mxu1 %v1645_v14  ;;  %v1868_v14 = vld [vmem:[%s2875_s2] ss:$0 sm:$0xff] }
  0x4c   : > { %635 = vmatmul.bf16.gmra.mxu2 %v1654_v18  ;;  %680 = vmatmul.bf16.gmra.mxu3 %v1663_v29 }
  0x5b   : > { %550 = vmatmul.bf16.gmra.mxu0 %v1637_v16  ;;  %595 = vmatmul.bf16.gmra.mxu1 %v1646_v17 }
  0x5c   : > { %640 = vmatmul.bf16.gmra.mxu2 %v1655_v22  ;;  %685 = vmatmul.bf16.gmra.mxu3 %v1664_v33 }
  0x6b   : > { %555 = vmatmul.bf16.gmra.mxu0 %v1638_v20  ;;  %600 = vmatmul.bf16.gmra.mxu1 %v1647_v21 }
  0x6c   : > { %645 = vmatmul.bf16.gmra.mxu2 %v1656_v26  ;;  %690 = vmatmul.bf16.gmra.mxu3 %v1665_v37 }
  0x7b   : > { %560 = vmatmul.bf16.gmra.mxu0 %v1639_v24  ;;  %605 = vmatmul.bf16.gmra.mxu1 %v1648_v25 }
  0x7c   : > { %650 = vmatmul.bf16.gmra.mxu2 %v1657_v30  ;;  %695 = vmatmul.bf16.gmra.mxu3 %v1666_v43 }
  0x8b   : > { %565 = vmatmul.bf16.gmra.mxu0 %v1640_v27  ;;  %610 = vmatmul.bf16.gmra.mxu1 %v1649_v28 }
  0x8c   : > { %655 = vmatmul.bf16.gmra.mxu2 %v1658_v34  ;;  %700 = vmatmul.bf16.gmra.mxu3 %v1667_v49 }
  0x9b   : > { %570 = vmatmul.bf16.gmra.mxu0 %v1641_v31  ;;  %615 = vmatmul.bf16.gmra.mxu1 %v1650_v32 }
  0x9c   : > { %660 = vmatmul.bf16.gmra.mxu2 %v1659_v42  ;;  %705 = vmatmul.bf16.gmra.mxu3 %v1668_v55 }
  0xa8   : > { %v536_v38 = vpop.f32.mrf.mxu0  ;;  %v1817_v39 = vpop.f32.mrf.mxu1 }
  0xa9   : > { %v1876_v18 = vadd.f32 %v1868_v14, %v536_v38 }
  0xab   : > { %575 = vmatmul.bf16.gmra.mxu0 %v1642_v35  ;;  %620 = vmatmul.bf16.gmra.mxu1 %v1651_v36 }
  0xac   : > { %665 = vmatmul.bf16.gmra.mxu2 %v1660_v47  ;;  %710 = vmatmul.bf16.gmra.mxu3 %v1669_v61 }
  0xaf   : > { %v1829_v51 = vpop.f32.mrf.mxu2  ;;  %v1847_v2 = vpop.f32.mrf.mxu3 }
  0xb0   : > { %v538_v40 = vpop.f32.mrf.mxu0  ;;  %v1819_v41 = vpop.f32.mrf.mxu1 }
  0xb1   : > { %v1873_v16 = vadd.f32 %v1868_v14, %v538_v40 }
  0xb3   : > { %v716_v21 = vadd.f32 %v1873_v16, %v1876_v18 }
  0xb7   : > { %v1833_v54 = vpop.f32.mrf.mxu2  ;;  %v1853_v6 = vpop.f32.mrf.mxu3 }
  0xb8   : > { %v541_v44 = vpop.f32.mrf.mxu0  ;;  %v1823_v45 = vpop.f32.mrf.mxu1 }
  0xb9   : > { %v1879_v19 = vadd.f32 %v1868_v14, %v541_v44 }
  0xbb   : > { %v717_v23 = vadd.f32 %v716_v21, %v1879_v19 }
  0xbf   : > { %v1838_v59 = vpop.f32.mrf.mxu2  ;;  %v1859_v10 = vpop.f32.mrf.mxu3 }
  0xc0   : > { %v543_v46 = vpop.f32.mrf.mxu0  ;;  %v1826_v48 = vpop.f32.mrf.mxu1 }
  0xc1   : > { %v1886_v22 = vadd.f32 %v1868_v14, %v543_v46 }
  0xc3   : > { %v718_v26 = vadd.f32 %v717_v23, %v1886_v22 }
  0xc7   : > { %v1843_v63 = vpop.f32.mrf.mxu2  ;;  %v1870_v15 = vpop.f32.mrf.mxu3 }
  0xc8   : > { %v546_v50 = vpop.f32.mrf.mxu0  ;;  %v1831_v53 = vpop.f32.mrf.mxu1 }
  0xc9   : > { %v1890_v24 = vadd.f32 %v1868_v14, %v546_v50 }
  0xcb   : > { %v719_v30 = vadd.f32 %v718_v26, %v1890_v24 }
  0xcf   : > { %v1849_v3 = vpop.f32.mrf.mxu2  ;;  %v1898_v29 = vpop.f32.mrf.mxu3 }
  0xd0   : > { %v548_v52 = vpop.f32.mrf.mxu0  ;;  %v1836_v57 = vpop.f32.mrf.mxu1 }
  0xd1   : > { %v1896_v27 = vadd.f32 %v1868_v14, %v548_v52 }
  0xd3   : > { %v720_v32 = vadd.f32 %v719_v30, %v1896_v27 }
  0xd7   : > { %v1855_v7 = vpop.f32.mrf.mxu2  ;;  %v1922_v46 = vpop.f32.mrf.mxu3 }
  0xd8   : > { %v551_v56 = vpop.f32.mrf.mxu0  ;;  %v1840_v60 = vpop.f32.mrf.mxu1 }
  0xd9   : > { %v1902_v31 = vadd.f32 %v1868_v14, %v551_v56 }
  0xdb   : > { %v721_v35 = vadd.f32 %v720_v32, %v1902_v31 }
  0xdf   : > { %v1861_v12 = vpop.f32.mrf.mxu2 }
  0xe0   : > { %v553_v58 = vpop.f32.mrf.mxu0  ;;  %v1845_v0 = vpop.f32.mrf.mxu1 }
  0xe1   : > { %v1906_v33 = vadd.f32 %v1868_v14, %v553_v58 }
  0xe3   : > { %v722_v37 = vadd.f32 %v721_v35, %v1906_v33 }
  0xe7   : > { %v1881_v20 = vpop.f32.mrf.mxu2 }
  0xe8   : > { %v556_v62 = vpop.f32.mrf.mxu0  ;;  %v1851_v5 = vpop.f32.mrf.mxu1 }
  0xe9   : > { %v1912_v36 = vadd.f32 %v1868_v14, %v556_v62 }
  0xeb   : > { %v723_v43 = vadd.f32 %v722_v37, %v1912_v36  ;;  %v1961_v37 = vadd.f32 %v1868_v14, %v1817_v39  ;;  %v1978_v39 = vadd.f32 %v1868_v14, %v1826_v48  ;;  %v1995_v48 = vadd.f32 %v1868_v14, %v1840_v60 }
  0xed   : > { %2933 = vst [vmem:[#allocation3_spill] sm:$0xff] %v1995_v48 }
  0xef   : > { %v1908_v34 = vpop.f32.mrf.mxu2 }
  0xf0   : > { %v558_v1 = vpop.f32.mrf.mxu0  ;;  %v1857_v9 = vpop.f32.mrf.mxu1 }
  0xf1   : > { %v1916_v38 = vadd.f32 %v1868_v14, %v558_v1  ;;  %v2012_v60 = vadd.f32 %v1868_v14, %v1857_v9 }
  0xf3   : > { %v724_v47 = vadd.f32 %v723_v43, %v1916_v38  ;;  %2936 = vst [vmem:[#allocation6_spill] sm:$0xff] %v2012_v60 }
  0xf7   : > { %v1932_v55 = vpop.f32.mrf.mxu2 }
  0xf8   : > { %v561_v4 = vpop.f32.mrf.mxu0  ;;  %v1863_v13 = vpop.f32.mrf.mxu1 }
  0xf9   : > { %v1920_v44 = vadd.f32 %v1868_v14, %v561_v4 }
  0xfb   : > { %v725_v50 = vadd.f32 %v724_v47, %v1920_v44  ;;  %v1966_v47 = vadd.f32 %v1868_v14, %v1819_v41  ;;  %v1985_v41 = vadd.f32 %v1868_v14, %v1831_v53  ;;  %v2002_v53 = vadd.f32 %v1868_v14, %v1845_v0 }
  0xfd   : > { %2934 = vst [vmem:[#allocation4_spill] sm:$0xff] %v2002_v53 }
  0xff   : > { %v1953_v32 = vpop.f32.mrf.mxu2 }
 0x100   : > { %v563_v8 = vpop.f32.mrf.mxu0  ;;  %v1892_v25 = vpop.f32.mrf.mxu1 }
 0x101   : > { %v1926_v49 = vadd.f32 %v1868_v14, %v563_v8 }
 0x103   : > { %v726_v56 = vadd.f32 %v725_v50, %v1926_v49 }
 0x108   : > { %v566_v11 = vpop.f32.mrf.mxu0  ;;  %v611_v42 = vpop.f32.mrf.mxu1 }
 0x109   : > { %v1930_v52 = vadd.f32 %v1868_v14, %v566_v11  ;;  %v1946_v11 = vpop.f32.mrf.mxu3  ;;  %v2028_v9 = vadd.f32 %v1868_v14, %v611_v42 }
 0x10b   : > { %v727_v62 = vadd.f32 %v726_v56, %v1930_v52 }
 0x110   : > { %v568_v17 = vpop.f32.mrf.mxu0  ;;  %v613_v4 = vpop.f32.mrf.mxu1 }
 0x111   : > { %v1936_v58 = vadd.f32 %v1868_v14, %v568_v17  ;;  %v1969_v56 = vpop.f32.mrf.mxu3 }
 0x113   : > { %v728_v8 = vadd.f32 %v727_v62, %v1936_v58 }
 0x118   : > { %v571_v28 = vpop.f32.mrf.mxu0  ;;  %v616_v43 = vpop.f32.mrf.mxu1 }
 0x119   : > { %v1940_v1 = vadd.f32 %v1868_v14, %v571_v28 }
 0x11b   : > { %v729_v23 = vadd.f32 %v728_v8, %v1940_v1 }
 0x120   : > { %v573_v40 = vpop.f32.mrf.mxu0 }
 0x121   : > { %v1944_v21 = vadd.f32 %v1868_v14, %v573_v40 }
 0x123   : > { %v730_v17 = vadd.f32 %v729_v23, %v1944_v21  ;;  %v1981_v23 = vpop.f32.mrf.mxu2 }
 0x128   : > { %v576_v61 = vpop.f32.mrf.mxu0 }
 0x129   : > { %v1950_v26 = vadd.f32 %v1868_v14, %v576_v61  ;;  %v1973_v61 = vadd.f32 %v1868_v14, %v1823_v45  ;;  %v1990_v45 = vadd.f32 %v1868_v14, %v1836_v57  ;;  %v2007_v57 = vadd.f32 %v1868_v14, %v1851_v5 }
 0x12a   : > { %v2022_v5 = vadd.f32 %v1868_v14, %v1892_v25 }
 0x12b   : > { %v731_v28 = vadd.f32 %v730_v17, %v1950_v26  ;;  %2932 = vst [vmem:[#allocation2_spill] sm:$0xff] %v1990_v45 }
 0x12c   : > { %2935 = vst [vmem:[#allocation5_spill] sm:$0xff] %v2007_v57 }
 0x130   : > { %v578_v30 = vpop.f32.mrf.mxu0 }
 0x131   : > { %v1957_v35 = vadd.f32 %v1868_v14, %v578_v30 }
 0x133   : > { %v732_v40 = vadd.f32 %v731_v28, %v1957_v35  ;;  %v618_v28 = vpop.f32.mrf.mxu1 }
 0x135   : > { %v733_v50 = vadd.f32 %v732_v40, %v1961_v37 }
 0x137   : > { %v734_v62 = vadd.f32 %v733_v50, %v1966_v47  ;;  %v1998_v50 = vpop.f32.mrf.mxu3 }
 0x139   : > { %v735_v8 = vadd.f32 %v734_v62, %v1973_v61 }
 0x13b   : > { %v736_v17 = vadd.f32 %v735_v8, %v1978_v39 }
 0x13d   : > { %v737_v30 = vadd.f32 %v736_v17, %v1985_v41  ;;  %v656_v17 = vpop.f32.mrf.mxu2 }
 0x13f   : > { %v738_v40 = vadd.f32 %v737_v30, %v1990_v45  ;;  %v2017_v45 = vadd.f32 %v1868_v14, %v1863_v13 }
 0x141   : > { %v739_v62 = vadd.f32 %v738_v40, %v1995_v48  ;;  %2937 = vst [vmem:[#allocation7_spill] sm:$0xff] %v2017_v45  ;;  %v621_v40 = vpop.f32.mrf.mxu1 }
 0x143   : > { %v740_v8 = vadd.f32 %v739_v62, %v2002_v53  ;;  %v2025_v53 = vpop.f32.mrf.mxu3 }
 0x145   : > { %v741_v30 = vadd.f32 %v740_v8, %v2007_v57  ;;  %v2032_v57 = vadd.f32 %v1868_v14, %v613_v4 }
 0x147   : > { %v742_v0 = vadd.f32 %v741_v30, %v2012_v60  ;;  %v658_v30 = vpop.f32.mrf.mxu2  ;;  %v2036_v60 = vadd.f32 %v1868_v14, %v616_v43 }
 0x149   : > { %v743_v62 = vadd.f32 %v742_v0, %v2017_v45  ;;  %v2041_v45 = vadd.f32 %v1868_v14, %v618_v28  ;;  %v623_v42 = vpop.f32.mrf.mxu1 }
 0x14a   : > { %v2051_v43 = vadd.f32 %v1868_v14, %v623_v42  ;;  %v2070_v42 = vadd.f32 %v1868_v14, %v1843_v63  ;;  %v2085_v63 = vadd.f32 %v1868_v14, %v1861_v12 }
 0x14b   : > { %v744_v8 = vadd.f32 %v743_v62, %v2022_v5  ;;  %2938 = vst [vmem:[#allocation8_spill] sm:$0xff] %v2041_v45  ;;  %v2045_v62 = vadd.f32 %v1868_v14, %v621_v40  ;;  %v2047_v4 = vpop.f32.mrf.mxu3 }
 0x14c   : > { %2940 = vst [vmem:[#allocation10_spill] sm:$0xff] %v2051_v43 }
 0x14d   : > { %v745_v13 = vadd.f32 %v744_v8, %v2028_v9  ;;  %2939 = vst [vmem:[#allocation9_spill] sm:$0xff] %v2045_v62 }
 0x14e   : > { %2944 = vst [vmem:[#allocation14_spill] sm:$0xff] %v2070_v42 }
 0x14f   : > { %v746_v25 = vadd.f32 %v745_v13, %v2032_v57  ;;  %v2055_v13 = vadd.f32 %v1868_v14, %v1829_v51  ;;  %2947 = vst [vmem:[#allocation17_spill] sm:$0xff] %v2085_v63 }
 0x151   : > { %v747_v0 = vadd.f32 %v746_v25, %v2036_v60  ;;  %2941 = vst [vmem:[#allocation11_spill] sm:$0xff] %v2055_v13  ;;  %v661_v25 = vpop.f32.mrf.mxu2 }
 0x153   : > { %v748_v48 = vadd.f32 %v747_v0, %v2041_v45  ;;  %v2060_v0 = vadd.f32 %v1868_v14, %v1833_v54  ;;  %v2065_v45 = vadd.f32 %v1868_v14, %v1838_v59 }
 0x155   : > { %v749_v8 = vadd.f32 %v748_v48, %v2045_v62  ;;  %2942 = vst [vmem:[#allocation12_spill] sm:$0xff] %v2060_v0 }
 0x156   : > { %2943 = vst [vmem:[#allocation13_spill] sm:$0xff] %v2065_v45 }
 0x157   : > { %v750_v28 = vadd.f32 %v749_v8, %v2051_v43  ;;  %v698_v8 = vpop.f32.mrf.mxu3  ;;  %v2075_v43 = vadd.f32 %v1868_v14, %v1849_v3 }
 0x159   : > { %v751_v40 = vadd.f32 %v750_v28, %v2055_v13  ;;  %2945 = vst [vmem:[#allocation15_spill] sm:$0xff] %v2075_v43  ;;  %v2080_v28 = vadd.f32 %v1868_v14, %v1855_v7 }
 0x15b   : > { %v752_v48 = vadd.f32 %v751_v40, %v2060_v0  ;;  %2946 = vst [vmem:[#allocation16_spill] sm:$0xff] %v2080_v28  ;;  %v663_v40 = vpop.f32.mrf.mxu2 }
 0x15d   : > { %v753_v51 = vadd.f32 %v752_v48, %v2065_v45  ;;  %v2090_v45 = vadd.f32 %v1868_v14, %v1881_v20 }
 0x15f   : > { %v754_v54 = vadd.f32 %v753_v51, %v2070_v42  ;;  %2948 = vst [vmem:[#allocation18_spill] sm:$0xff] %v2090_v45  ;;  %v2095_v51 = vadd.f32 %v1868_v14, %v1908_v34  ;;  %v2110_v34 = vadd.f32 %v1868_v14, %v1981_v23 }
 0x161   : > { %v755_v59 = vadd.f32 %v754_v54, %v2075_v43  ;;  %2949 = vst [vmem:[#allocation19_spill] sm:$0xff] %v2095_v51  ;;  %v701_v54 = vpop.f32.mrf.mxu3  ;;  %v2100_v43 = vadd.f32 %v1868_v14, %v1932_v55 }
 0x162   : > { %2952 = vst [vmem:[#allocation22_spill] sm:$0xff] %v2110_v34 }
 0x163   : > { %v756_v48 = vadd.f32 %v755_v59, %v2080_v28  ;;  %2950 = vst [vmem:[#allocation20_spill] sm:$0xff] %v2100_v43  ;;  %v2105_v59 = vadd.f32 %v1868_v14, %v1953_v32 }
 0x165   : > { %v757_v3 = vadd.f32 %v756_v48, %v2085_v63  ;;  %2951 = vst [vmem:[#allocation21_spill] sm:$0xff] %v2105_v59  ;;  %v666_v48 = vpop.f32.mrf.mxu2 }
 0x167   : > { %v758_v7 = vadd.f32 %v757_v3, %v2090_v45  ;;  %v2114_v45 = vadd.f32 %v1868_v14, %v656_v17 }
 0x169   : > { %v759_v12 = vadd.f32 %v758_v7, %v2095_v51  ;;  %2953 = vst [vmem:[#allocation23_spill] sm:$0xff] %v2114_v45  ;;  %v2118_v7 = vadd.f32 %v1868_v14, %v658_v30  ;;  %v703_v51 = vpop.f32.mrf.mxu3 }
 0x16b   : > { %v760_v20 = vadd.f32 %v759_v12, %v2100_v43  ;;  %2954 = vst [vmem:[#allocation24_spill] sm:$0xff] %v2118_v7  ;;  %v2123_v43 = vadd.f32 %v1868_v14, %v661_v25  ;;  %v672_v25 = vadd.f32 %v1868_v14, %v1847_v2  ;;  %v684_v2 = vadd.f32 %v1868_v14, %v1922_v46 }
 0x16c   : > { %v697_v46 = vadd.f32 %v1868_v14, %v2047_v4 }
 0x16d   : > { %v761_v3 = vadd.f32 %v760_v20, %v2105_v59  ;;  %2955 = vst [vmem:[#allocation25_spill] sm:$0xff] %v2123_v43  ;;  %v2127_v20 = vadd.f32 %v1868_v14, %v663_v40  ;;  %v668_v17 = vpop.f32.mrf.mxu2  ;;  %v674_v40 = vadd.f32 %v1868_v14, %v1853_v6  ;;  %v687_v6 = vadd.f32 %v1868_v14, %v1946_v11 }
 0x16e   : > { %v699_v11 = vadd.f32 %v1868_v14, %v698_v8 }
 0x16f   : > { %v762_v55 = vadd.f32 %v761_v3, %v2110_v34  ;;  %2956 = vst [vmem:[#allocation26_spill] sm:$0xff] %v2127_v20  ;;  %v2131_v3 = vadd.f32 %v1868_v14, %v666_v48 }
 0x171   : > { %v763_v32 = vadd.f32 %v762_v55, %v2114_v45  ;;  %2957 = vst [vmem:[#allocation27_spill] sm:$0xff] %v2131_v3  ;;  %v2135_v55 = vadd.f32 %v1868_v14, %v668_v17  ;;  %v682_v17 = vadd.f32 %v1868_v14, %v1898_v29  ;;  %v694_v29 = vadd.f32 %v1868_v14, %v2025_v53 }
 0x172   : > { %v702_v45 = vadd.f32 %v1868_v14, %v701_v54 }
 0x173   : > { %v764_v12 = vadd.f32 %v763_v32, %v2118_v7  ;;  %2958 = vst [vmem:[#allocation28_spill] sm:$0xff] %v2135_v55 }
 0x175   : > { %v765_v23 = vadd.f32 %v764_v12, %v2123_v43  ;;  %v706_v12 = vpop.f32.mrf.mxu3 }
 0x177   : > { %v766_v59 = vadd.f32 %v765_v23, %v2127_v20  ;;  %v677_v23 = vadd.f32 %v1868_v14, %v1859_v10  ;;  %v689_v10 = vadd.f32 %v1868_v14, %v1969_v56 }
 0x179   : > { %v767_v30 = vadd.f32 %v766_v59, %v2131_v3  ;;  %v679_v59 = vadd.f32 %v1868_v14, %v1870_v15  ;;  %v692_v15 = vadd.f32 %v1868_v14, %v1998_v50 }
 0x17b   : > { %v768_v32 = vadd.f32 %v767_v30, %v2135_v55 }
 0x17d   : > { %v769_v43 = vadd.f32 %v768_v32, %v672_v25  ;;  %v708_v55 = vpop.f32.mrf.mxu3 }
 0x17e   : > { %v709_v53 = vadd.f32 %v1868_v14, %v708_v55 }
 0x17f   : > { %v770_v48 = vadd.f32 %v769_v43, %v674_v40 }
 0x181   : > { %v771_v3 = vadd.f32 %v770_v48, %v677_v23 }
 0x183   : > { %v772_v20 = vadd.f32 %v771_v3, %v679_v59 }
 0x185   : > { %v773_v30 = vadd.f32 %v772_v20, %v682_v17  ;;  %v711_v7 = vpop.f32.mrf.mxu3 }
 0x186   : > { %v712_v4 = vadd.f32 %v1868_v14, %v711_v7 }
 0x187   : > { %v774_v32 = vadd.f32 %v773_v30, %v684_v2 }
 0x189   : > { %v775_v43 = vadd.f32 %v774_v32, %v687_v6  ;;  %v704_v32 = vadd.f32 %v1868_v14, %v703_v51 }
 0x18b   : > { %v776_v48 = vadd.f32 %v775_v43, %v689_v10  ;;  %v707_v43 = vadd.f32 %v1868_v14, %v706_v12 }
 0x18d   : > { %v777_v3 = vadd.f32 %v776_v48, %v692_v15  ;;  %v713_v48 = vpop.f32.mrf.mxu3 }
 0x18f   : > { %v778_v20 = vadd.f32 %v777_v3, %v694_v29  ;;  %v1726_v3 = vmov 576.0  }
 0x190   : > { %1714 = vrcp.f32 %v1726_v3 }
 0x191   : > { %v779_v30 = vadd.f32 %v778_v20, %v697_v46  ;;  %v714_v20 = vadd.f32 %v1868_v14, %v713_v48 }
 0x193   : > { %v780_v56 = vadd.f32 %v779_v30, %v699_v11 }
 0x195   : > { %v781_v34 = vadd.f32 %v780_v56, %v702_v45 }
 0x196   : > { %v1715_v42 = vpop.eup %1714 }
 0x197   : > { %v782_v50 = vadd.f32 %v781_v34, %v704_v32  ;;  %v794_v56 = vmul.f32 576.0, %v1715_v42  ;;  %vm798_vm0 = vweird.f32 %v1715_v42 }
 0x199   : > { %v783_v63 = vadd.f32 %v782_v50, %v707_v43  ;;  %v795_v0 = vsub.f32 1.0, %v794_v56 }
 0x19b   : > { %v784_v28 = vadd.f32 %v783_v63, %v709_v53  ;;  %v796_v50 = vmul.f32 %v1715_v42, %v795_v0 }
 0x19d   : > { %v785_v8 = vadd.f32 %v784_v28, %v712_v4  ;;  %v797_v55 = vadd.f32 %v1715_v42, %v796_v50 }
 0x19f   : > { %v786_v54 = vadd.f32 %v785_v8, %v714_v20  ;;  %v2167_v62 = vsel %vm798_vm0, %v1715_v42, %v797_v55 }
 0x1a1   : > { %v787_v30 = vrot.slane %v786_v54, 4 }
 0x1a3   : > { %v788_v51 = vadd.f32 %v787_v30, %v786_v54 }
 0x1a5   : > { %v789_v34 = vrot.slane %v788_v51, 2 }
 0x1a7   : > { %v790_v12 = vadd.f32 %v789_v34, %v788_v51 }
 0x1a9   : > { %v791_v13 = vrot.slane %v790_v12, 1 }
 0x1ab   : > { %v792_v63 = vadd.f32 %v791_v13, %v790_v12 }
 0x1ad   : > { %v2170_v7 = vmul.f32 %v2167_v62, %v792_v63 }
 0x1af   : > { %v2173_v14 = vsub.f32 %v672_v25, %v2170_v7  ;;  %v2176_v28 = vsub.f32 %v674_v40, %v2170_v7  ;;  %v2179_v48 = vsub.f32 %v677_v23, %v2170_v7  ;;  %v2182_v0 = vsub.f32 %v679_v59, %v2170_v7 }
 0x1b0   : > { %v2185_v3 = vsub.f32 %v682_v17, %v2170_v7  ;;  %v2188_v13 = vsub.f32 %v684_v2, %v2170_v7  ;;  %v2191_v42 = vsub.f32 %v687_v6, %v2170_v7  ;;  %v2194_v25 = vsub.f32 %v689_v10, %v2170_v7 }
 0x1b1   : > { %v2197_v40 = vsub.f32 %v692_v15, %v2170_v7  ;;  %v2200_v23 = vsub.f32 %v694_v29, %v2170_v7  ;;  %v2203_v59 = vsub.f32 %v697_v46, %v2170_v7  ;;  %v2206_v17 = vsub.f32 %v699_v11, %v2170_v7 }
 0x1b2   : > { %v2209_v2 = vsub.f32 %v702_v45, %v2170_v7  ;;  %v2212_v6 = vsub.f32 %v704_v32, %v2170_v7  ;;  %v2215_v10 = vsub.f32 %v707_v43, %v2170_v7  ;;  %v2218_v15 = vsub.f32 %v709_v53, %v2170_v7 }
 0x1b3   : > { %2959 = vst [vmem:[#allocation29_spill] sm:$0xff] %v2206_v17  ;;  %v2221_v29 = vsub.f32 %v712_v4, %v2170_v7  ;;  %v2224_v46 = vsub.f32 %v714_v20, %v2170_v7  ;;  %v2228_v11 = vsub.f32 %v1876_v18, %v2170_v7  ;;  %v2232_v45 = vsub.f32 %v1873_v16, %v2170_v7 }
 0x1b4   : > { %2960 = vst [vmem:[#allocation30_spill] sm:$0xff] %v2209_v2  ;;  %v2236_v32 = vsub.f32 %v1879_v19, %v2170_v7  ;;  %v2244_v4 = vsub.f32 %v1886_v22, %v2170_v7  ;;  %v2248_v18 = vsub.f32 %v1890_v24, %v2170_v7  ;;  %v2254_v19 = vsub.f32 %v1896_v27, %v2170_v7 }
 0x1b5   : > { %2961 = vst [vmem:[#allocation31_spill] sm:$0xff] %v2212_v6  ;;  %v873_v43 = vmul.f32 %v2228_v11, %v2228_v11  ;;  %v874_v53 = vmul.f32 %v2232_v45, %v2232_v45  ;;  %v2260_v22 = vsub.f32 %v1902_v31, %v2170_v7  ;;  %v2266_v51 = vsub.f32 %v1906_v33, %v2170_v7 }
 0x1b6   : > { %2962 = vst [vmem:[#allocation32_spill] sm:$0xff] %v2215_v10  ;;  %v875_v16 = vmul.f32 %v2236_v32, %v2236_v32  ;;  %v876_v20 = vmul.f32 %v2244_v4, %v2244_v4  ;;  %v877_v24 = vmul.f32 %v2248_v18, %v2248_v18  ;;  %v878_v27 = vmul.f32 %v2254_v19, %v2254_v19 }
 0x1b7   : > { %2963 = vst [vmem:[#allocation33_spill] sm:$0xff] %v2218_v15  ;;  %v945_v8 = vadd.f32 %v874_v53, %v873_v43  ;;  %v2272_v34 = vsub.f32 %v1912_v36, %v2170_v7  ;;  %v879_v31 = vmul.f32 %v2260_v22, %v2260_v22  ;;  %v2278_v50 = vsub.f32 %v1916_v38, %v2170_v7 }
 0x1b8   : > { %2964 = vst [vmem:[#allocation34_spill] sm:$0xff] %v2221_v29  ;;  %v880_v33 = vmul.f32 %v2266_v51, %v2266_v51  ;;  %v2284_v63 = vsub.f32 %v1920_v44, %v2170_v7  ;;  %v2290_v53 = vsub.f32 %v1926_v49, %v2170_v7 }
 0x1b9   : > { %v946_v54 = vadd.f32 %v945_v8, %v875_v16  ;;  %v881_v36 = vmul.f32 %v2272_v34, %v2272_v34  ;;  %v882_v38 = vmul.f32 %v2278_v50, %v2278_v50  ;;  %v2296_v8 = vsub.f32 %v1930_v52, %v2170_v7 }
 0x1ba   : > { %v883_v44 = vmul.f32 %v2284_v63, %v2284_v63  ;;  %v884_v49 = vmul.f32 %v2290_v53, %v2290_v53 }
 0x1bb   : > { %v947_v30 = vadd.f32 %v946_v54, %v876_v20  ;;  %v2302_v54 = vsub.f32 %v1936_v58, %v2170_v7  ;;  %v885_v52 = vmul.f32 %v2296_v8, %v2296_v8 }
 0x1bd   : > { %v948_v56 = vadd.f32 %v947_v30, %v877_v24  ;;  %v2308_v30 = vsub.f32 %v1940_v1, %v2170_v7  ;;  %v886_v58 = vmul.f32 %v2302_v54, %v2302_v54 }
 0x1bf   : > { %v949_v12 = vadd.f32 %v948_v56, %v878_v27  ;;  %v2314_v56 = vsub.f32 %v1944_v21, %v2170_v7  ;;  %v887_v1 = vmul.f32 %v2308_v30, %v2308_v30 }
 0x1c1   : > { %v950_v55 = vadd.f32 %v949_v12, %v879_v31  ;;  %v2320_v12 = vsub.f32 %v1950_v26, %v2170_v7  ;;  %v888_v21 = vmul.f32 %v2314_v56, %v2314_v56 }
 0x1c3   : > { %v951_v43 = vadd.f32 %v950_v55, %v880_v33  ;;  %v2326_v55 = vsub.f32 %v1957_v35, %v2170_v7  ;;  %v889_v26 = vmul.f32 %v2320_v12, %v2320_v12 }
 0x1c5   : > { %v952_v16 = vadd.f32 %v951_v43, %v881_v36  ;;  %v2332_v43 = vsub.f32 %v1961_v37, %v2170_v7  ;;  %v890_v35 = vmul.f32 %v2326_v55, %v2326_v55 }
 0x1c7   : > { %v953_v20 = vadd.f32 %v952_v16, %v882_v38  ;;  %v2338_v16 = vsub.f32 %v1966_v47, %v2170_v7  ;;  %v891_v37 = vmul.f32 %v2332_v43, %v2332_v43 }
 0x1c9   : > { %v954_v24 = vadd.f32 %v953_v20, %v883_v44  ;;  %v2344_v20 = vsub.f32 %v1973_v61, %v2170_v7  ;;  %v892_v47 = vmul.f32 %v2338_v16, %v2338_v16 }
 0x1cb   : > { %v955_v27 = vadd.f32 %v954_v24, %v884_v49  ;;  %v2350_v24 = vsub.f32 %v1978_v39, %v2170_v7  ;;  %v893_v61 = vmul.f32 %v2344_v20, %v2344_v20 }
 0x1cd   : > { %v956_v31 = vadd.f32 %v955_v27, %v885_v52  ;;  %v2356_v27 = vsub.f32 %v1985_v41, %v2170_v7  ;;  %v894_v39 = vmul.f32 %v2350_v24, %v2350_v24 }
 0x1cf   : > { %v957_v33 = vadd.f32 %v956_v31, %v886_v58  ;;  %v2965_v31 = vld [vmem:[#allocation2_spill] sm:$0xff]  ;;  %v895_v41 = vmul.f32 %v2356_v27, %v2356_v27 }
 0x1d1   : > { %v958_v36 = vadd.f32 %v957_v33, %v887_v1  ;;  %v2362_v1 = vsub.f32 %v2965_v31, %v2170_v7 }
 0x1d3   : > { %v959_v38 = vadd.f32 %v958_v36, %v888_v21  ;;  %v2966_v21 = vld [vmem:[#allocation3_spill] sm:$0xff] }
 0x1d4   : > { %v2368_v36 = vsub.f32 %v2966_v21, %v2170_v7  ;;  %v2970_v21 = vld [vmem:[#allocation7_spill] sm:$0xff] }
 0x1d5   : > { %v960_v44 = vadd.f32 %v959_v38, %v889_v26  ;;  %v2967_v38 = vld [vmem:[#allocation4_spill] sm:$0xff] }
 0x1d7   : > { %v961_v49 = vadd.f32 %v960_v44, %v890_v35  ;;  %v2374_v35 = vsub.f32 %v2967_v38, %v2170_v7  ;;  %v896_v44 = vmul.f32 %v2362_v1, %v2362_v1  ;;  %v2392_v38 = vsub.f32 %v2970_v21, %v2170_v7 }
 0x1d8   : > { %v2410_v21 = vsub.f32 %v2032_v57, %v2170_v7 }
 0x1d9   : > { %v962_v52 = vadd.f32 %v961_v49, %v891_v37  ;;  %v2968_v49 = vld [vmem:[#allocation5_spill] sm:$0xff]  ;;  %2971 = vst [vmem:[#allocation2_spill] sm:$0xff] %v2392_v38 }
 0x1da   : > { %2974 = vst [vmem:[#allocation5_spill] sm:$0xff] %v2410_v21  ;;  %v904_v57 = vmul.f32 %v2410_v21, %v2410_v21 }
 0x1db   : > { %v963_v58 = vadd.f32 %v962_v52, %v892_v47  ;;  %v2380_v47 = vsub.f32 %v2968_v49, %v2170_v7  ;;  %v897_v52 = vmul.f32 %v2368_v36, %v2368_v36  ;;  %v2398_v49 = vsub.f32 %v2022_v5, %v2170_v7 }
 0x1dd   : > { %v964_v33 = vadd.f32 %v963_v58, %v893_v61  ;;  %v2969_v58 = vld [vmem:[#allocation6_spill] sm:$0xff]  ;;  %2972 = vst [vmem:[#allocation3_spill] sm:$0xff] %v2398_v49  ;;  %v902_v5 = vmul.f32 %v2398_v49, %v2398_v49 }
 0x1de   : > { %v2386_v31 = vsub.f32 %v2969_v58, %v2170_v7  ;;  %v2404_v58 = vsub.f32 %v2028_v9, %v2170_v7 }
 0x1df   : > { %v965_v26 = vadd.f32 %v964_v33, %v894_v39  ;;  %v898_v39 = vmul.f32 %v2374_v35, %v2374_v35 }
 0x1e0   : > { %2973 = vst [vmem:[#allocation4_spill] sm:$0xff] %v2404_v58  ;;  %v903_v9 = vmul.f32 %v2404_v58, %v2404_v58 }
 0x1e1   : > { %v966_v37 = vadd.f32 %v965_v26, %v895_v41  ;;  %v899_v41 = vmul.f32 %v2380_v47, %v2380_v47 }
 0x1e3   : > { %v967_v61 = vadd.f32 %v966_v37, %v896_v44  ;;  %v900_v44 = vmul.f32 %v2386_v31, %v2386_v31 }
 0x1e5   : > { %v968_v33 = vadd.f32 %v967_v61, %v897_v52  ;;  %v901_v52 = vmul.f32 %v2392_v38, %v2392_v38 }
 0x1e7   : > { %v969_v26 = vadd.f32 %v968_v33, %v898_v39  ;;  %v2416_v33 = vsub.f32 %v2036_v60, %v2170_v7 }
 0x1e9   : > { %v970_v37 = vadd.f32 %v969_v26, %v899_v41  ;;  %2975 = vst [vmem:[#allocation6_spill] sm:$0xff] %v2416_v33  ;;  %v2976_v26 = vld [vmem:[#allocation8_spill] sm:$0xff]  ;;  %v905_v60 = vmul.f32 %v2416_v33, %v2416_v33 }
 0x1ea   : > { %v2422_v38 = vsub.f32 %v2976_v26, %v2170_v7  ;;  %v2982_v26 = vld [vmem:[#allocation11_spill] sm:$0xff] }
 0x1eb   : > { %v971_v61 = vadd.f32 %v970_v37, %v900_v44  ;;  %v2978_v37 = vld [vmem:[#allocation9_spill] sm:$0xff]  ;;  %v2440_v21 = vsub.f32 %v2982_v26, %v2170_v7  ;;  %v2988_v26 = vld [vmem:[#allocation14_spill] sm:$0xff] }
 0x1ec   : > { %2977 = vst [vmem:[#allocation7_spill] sm:$0xff] %v2422_v38  ;;  %v2428_v49 = vsub.f32 %v2978_v37, %v2170_v7  ;;  %v2984_v37 = vld [vmem:[#allocation12_spill] sm:$0xff] }
 0x1ed   : > { %v972_v39 = vadd.f32 %v971_v61, %v901_v52  ;;  %v2980_v61 = vld [vmem:[#allocation10_spill] sm:$0xff]  ;;  %v2446_v33 = vsub.f32 %v2984_v37, %v2170_v7  ;;  %v2990_v37 = vld [vmem:[#allocation15_spill] sm:$0xff] }
 0x1ee   : > { %2979 = vst [vmem:[#allocation8_spill] sm:$0xff] %v2428_v49  ;;  %v2434_v58 = vsub.f32 %v2980_v61, %v2170_v7  ;;  %v2986_v61 = vld [vmem:[#allocation13_spill] sm:$0xff] }
 0x1ef   : > { %v973_v41 = vadd.f32 %v972_v39, %v902_v5  ;;  %v906_v5 = vmul.f32 %v2422_v38, %v2422_v38  ;;  %2983 = vst [vmem:[#allocation10_spill] sm:$0xff] %v2440_v21  ;;  %v2452_v38 = vsub.f32 %v2986_v61, %v2170_v7  ;;  %v2992_v61 = vld [vmem:[#allocation16_spill] sm:$0xff] }
 0x1f0   : > { %2981 = vst [vmem:[#allocation9_spill] sm:$0xff] %v2434_v58 }
 0x1f1   : > { %v974_v44 = vadd.f32 %v973_v41, %v903_v9  ;;  %v907_v9 = vmul.f32 %v2428_v49, %v2428_v49  ;;  %2985 = vst [vmem:[#allocation11_spill] sm:$0xff] %v2446_v33  ;;  %v2458_v49 = vsub.f32 %v2988_v26, %v2170_v7  ;;  %v2994_v26 = vld [vmem:[#allocation17_spill] sm:$0xff] }
 0x1f2   : > { %2987 = vst [vmem:[#allocation12_spill] sm:$0xff] %v2452_v38 }
 0x1f3   : > { %v975_v52 = vadd.f32 %v974_v44, %v904_v57  ;;  %v908_v57 = vmul.f32 %v2434_v58, %v2434_v58  ;;  %2989 = vst [vmem:[#allocation13_spill] sm:$0xff] %v2458_v49  ;;  %v2464_v58 = vsub.f32 %v2990_v37, %v2170_v7  ;;  %v2996_v37 = vld [vmem:[#allocation18_spill] sm:$0xff] }
 0x1f5   : > { %v976_v39 = vadd.f32 %v975_v52, %v905_v60  ;;  %v909_v60 = vmul.f32 %v2440_v21, %v2440_v21  ;;  %2991 = vst [vmem:[#allocation14_spill] sm:$0xff] %v2464_v58  ;;  %v2470_v21 = vsub.f32 %v2992_v61, %v2170_v7  ;;  %v2998_v61 = vld [vmem:[#allocation19_spill] sm:$0xff] }
 0x1f7   : > { %v977_v41 = vadd.f32 %v976_v39, %v906_v5  ;;  %v910_v5 = vmul.f32 %v2446_v33, %v2446_v33  ;;  %2993 = vst [vmem:[#allocation15_spill] sm:$0xff] %v2470_v21  ;;  %v2476_v33 = vsub.f32 %v2994_v26, %v2170_v7  ;;  %v3000_v26 = vld [vmem:[#allocation20_spill] sm:$0xff] }
 0x1f9   : > { %v978_v44 = vadd.f32 %v977_v41, %v907_v9  ;;  %v911_v9 = vmul.f32 %v2452_v38, %v2452_v38  ;;  %2995 = vst [vmem:[#allocation16_spill] sm:$0xff] %v2476_v33  ;;  %v2482_v38 = vsub.f32 %v2996_v37, %v2170_v7  ;;  %v3002_v37 = vld [vmem:[#allocation21_spill] sm:$0xff] }
 0x1fb   : > { %v979_v52 = vadd.f32 %v978_v44, %v908_v57  ;;  %v912_v57 = vmul.f32 %v2458_v49, %v2458_v49  ;;  %2997 = vst [vmem:[#allocation17_spill] sm:$0xff] %v2482_v38  ;;  %v2488_v49 = vsub.f32 %v2998_v61, %v2170_v7  ;;  %v3004_v61 = vld [vmem:[#allocation22_spill] sm:$0xff] }
 0x1fd   : > { %v980_v39 = vadd.f32 %v979_v52, %v909_v60  ;;  %v913_v60 = vmul.f32 %v2464_v58, %v2464_v58  ;;  %2999 = vst [vmem:[#allocation18_spill] sm:$0xff] %v2488_v49  ;;  %v2494_v58 = vsub.f32 %v3000_v26, %v2170_v7  ;;  %v3006_v26 = vld [vmem:[#allocation23_spill] sm:$0xff] }
 0x1ff   : > { %v981_v41 = vadd.f32 %v980_v39, %v910_v5  ;;  %v914_v5 = vmul.f32 %v2470_v21, %v2470_v21  ;;  %3001 = vst [vmem:[#allocation19_spill] sm:$0xff] %v2494_v58  ;;  %v2500_v21 = vsub.f32 %v3002_v37, %v2170_v7  ;;  %v3008_v37 = vld [vmem:[#allocation24_spill] sm:$0xff] }
 0x201   : > { %v982_v44 = vadd.f32 %v981_v41, %v911_v9  ;;  %v915_v9 = vmul.f32 %v2476_v33, %v2476_v33  ;;  %3003 = vst [vmem:[#allocation20_spill] sm:$0xff] %v2500_v21  ;;  %v2506_v33 = vsub.f32 %v3004_v61, %v2170_v7  ;;  %v3009_v61 = vld [vmem:[#allocation25_spill] sm:$0xff] }
 0x203   : > { %v983_v52 = vadd.f32 %v982_v44, %v912_v57  ;;  %v916_v57 = vmul.f32 %v2482_v38, %v2482_v38  ;;  %3005 = vst [vmem:[#allocation21_spill] sm:$0xff] %v2506_v33  ;;  %v2512_v38 = vsub.f32 %v3006_v26, %v2170_v7  ;;  %v3011_v26 = vld [vmem:[#allocation26_spill] sm:$0xff] }
 0x205   : > { %v984_v39 = vadd.f32 %v983_v52, %v913_v60  ;;  %v917_v60 = vmul.f32 %v2488_v49, %v2488_v49  ;;  %3007 = vst [vmem:[#allocation22_spill] sm:$0xff] %v2512_v38  ;;  %v2518_v49 = vsub.f32 %v3008_v37, %v2170_v7  ;;  %v3012_v37 = vld [vmem:[#allocation27_spill] sm:$0xff] }
 0x207   : > { %v985_v41 = vadd.f32 %v984_v39, %v914_v5  ;;  %v918_v5 = vmul.f32 %v2494_v58, %v2494_v58  ;;  %v2524_v58 = vsub.f32 %v3009_v61, %v2170_v7  ;;  %v3013_v61 = vld [vmem:[#allocation28_spill] sm:$0xff] }
 0x209   : > { %v986_v44 = vadd.f32 %v985_v41, %v915_v9  ;;  %v919_v9 = vmul.f32 %v2500_v21, %v2500_v21  ;;  %3010 = vst [vmem:[#allocation23_spill] sm:$0xff] %v2524_v58  ;;  %v2530_v21 = vsub.f32 %v3011_v26, %v2170_v7 }
 0x20b   : > { %v987_v52 = vadd.f32 %v986_v44, %v916_v57  ;;  %v920_v57 = vmul.f32 %v2506_v33, %v2506_v33  ;;  %v2536_v33 = vsub.f32 %v3012_v37, %v2170_v7 }
 0x20d   : > { %v988_v39 = vadd.f32 %v987_v52, %v917_v60  ;;  %v921_v60 = vmul.f32 %v2512_v38, %v2512_v38  ;;  %v2542_v38 = vsub.f32 %v3013_v61, %v2170_v7  ;;  %v925_v26 = vmul.f32 %v2536_v33, %v2536_v33 }
 0x20e   : > { %v928_v7 = vmul.f32 %v2176_v28, %v2176_v28  ;;  %v929_v61 = vmul.f32 %v2179_v48, %v2179_v48 }
 0x20f   : > { %v989_v41 = vadd.f32 %v988_v39, %v918_v5  ;;  %v922_v5 = vmul.f32 %v2518_v49, %v2518_v49 }
 0x211   : > { %v990_v44 = vadd.f32 %v989_v41, %v919_v9  ;;  %v923_v9 = vmul.f32 %v2524_v58, %v2524_v58  ;;  %v927_v58 = vmul.f32 %v2173_v14, %v2173_v14 }
 0x213   : > { %v991_v52 = vadd.f32 %v990_v44, %v920_v57  ;;  %v924_v57 = vmul.f32 %v2530_v21, %v2530_v21 }
 0x215   : > { %v992_v39 = vadd.f32 %v991_v52, %v921_v60  ;;  %v926_v52 = vmul.f32 %v2542_v38, %v2542_v38 }
 0x217   : > { %v993_v41 = vadd.f32 %v992_v39, %v922_v5 }
 0x219   : > { %v994_v44 = vadd.f32 %v993_v41, %v923_v9  ;;  %v930_v41 = vmul.f32 %v2182_v0, %v2182_v0 }
 0x21b   : > { %v995_v60 = vadd.f32 %v994_v44, %v924_v57  ;;  %v931_v44 = vmul.f32 %v2185_v3, %v2185_v3 }
 0x21d   : > { %v996_v37 = vadd.f32 %v995_v60, %v925_v26  ;;  %v932_v60 = vmul.f32 %v2188_v13, %v2188_v13 }
 0x21f   : > { %v997_v5 = vadd.f32 %v996_v37, %v926_v52  ;;  %v933_v37 = vmul.f32 %v2191_v42, %v2191_v42 }
 0x221   : > { %v998_v39 = vadd.f32 %v997_v5, %v927_v58  ;;  %v934_v5 = vmul.f32 %v2194_v25, %v2194_v25 }
 0x223   : > { %v999_v9 = vadd.f32 %v998_v39, %v928_v7  ;;  %v935_v39 = vmul.f32 %v2197_v40, %v2197_v40 }
 0x225   : > { %v1000_v57 = vadd.f32 %v999_v9, %v929_v61  ;;  %v936_v9 = vmul.f32 %v2200_v23, %v2200_v23 }
 0x227   : > { %v1001_v26 = vadd.f32 %v1000_v57, %v930_v41  ;;  %v937_v57 = vmul.f32 %v2203_v59, %v2203_v59 }
 0x229   : > { %v1002_v52 = vadd.f32 %v1001_v26, %v931_v44  ;;  %v938_v26 = vmul.f32 %v2206_v17, %v2206_v17 }
 0x22b   : > { %v1003_v58 = vadd.f32 %v1002_v52, %v932_v60  ;;  %v939_v52 = vmul.f32 %v2209_v2, %v2209_v2 }
 0x22d   : > { %v1004_v7 = vadd.f32 %v1003_v58, %v933_v37  ;;  %v940_v58 = vmul.f32 %v2212_v6, %v2212_v6 }
 0x22f   : > { %v1005_v61 = vadd.f32 %v1004_v7, %v934_v5  ;;  %v941_v7 = vmul.f32 %v2215_v10, %v2215_v10 }
 0x231   : > { %v1006_v41 = vadd.f32 %v1005_v61, %v935_v39  ;;  %v942_v61 = vmul.f32 %v2218_v15, %v2218_v15 }
 0x233   : > { %v1007_v44 = vadd.f32 %v1006_v41, %v936_v9  ;;  %v943_v41 = vmul.f32 %v2221_v29, %v2221_v29 }
 0x235   : > { %v1008_v60 = vadd.f32 %v1007_v44, %v937_v57  ;;  %v944_v44 = vmul.f32 %v2224_v46, %v2224_v46 }
 0x237   : > { %v1009_v37 = vadd.f32 %v1008_v60, %v938_v26 }
 0x239   : > { %v1010_v5 = vadd.f32 %v1009_v37, %v939_v52 }
 0x23b   : > { %v1011_v39 = vadd.f32 %v1010_v5, %v940_v58 }
 0x23d   : > { %v1012_v9 = vadd.f32 %v1011_v39, %v941_v7 }
 0x23f   : > { %v1013_v57 = vadd.f32 %v1012_v9, %v942_v61 }
 0x241   : > { %v1014_v26 = vadd.f32 %v1013_v57, %v943_v41 }
 0x243   : > { %v1015_v60 = vadd.f32 %v1014_v26, %v944_v44 }
 0x245   : > { %v1016_v2 = vrot.slane %v1015_v60, 4 }
 0x247   : > { %v1017_v6 = vadd.f32 %v1016_v2, %v1015_v60 }
 0x249   : > { %v1018_v52 = vrot.slane %v1017_v6, 2 }
 0x24b   : > { %v1019_v37 = vadd.f32 %v1018_v52, %v1017_v6 }
 0x24d   : > { %v1020_v17 = vrot.slane %v1019_v37, 1 }
 0x24f   : > { %v1021_v58 = vadd.f32 %v1020_v17, %v1019_v37 }
 0x251   : > { %v1022_v5 = vmul.f32 %v1021_v58, %v2167_v62 }
 0x253   : > { %v1023_v15 = vadd.f32 1e-05, %v1022_v5 }
 0x255   : > { %1716 = vrsqrt.f32 %v1023_v15  ;;  %vm1030_vm2 = vweird.f32 %v1023_v15 }
 0x25b   : > { %v1717_v7 = vpop.eup %1716 }
 0x25c   : > { %v1025_v39 = vmul.f32 %v1717_v7, %v1023_v15  ;;  %vm1031_vm1 = vweird.f32 %v1717_v7 }
 0x25d   : > { %vm1032_vm3 = vmor %vm1030_vm2, %vm1031_vm1 }
 0x25e   : > { %v1026_v29 = vmul.f32 %v1717_v7, %v1025_v39 }
 0x260   : > { %v1027_v61 = vmul.f32 0.5, %v1026_v29 }
 0x262   : > { %v1028_v9 = vsub.f32 1.5, %v1027_v61 }
 0x264   : > { %v1029_v10 = vmul.f32 %v1717_v7, %v1028_v9 }
 0x266   : > { %v2587_v41 = vsel %vm1032_vm3, %v1717_v7, %v1029_v10 }
 0x267   : > { %v1034_v2 = vmul.f32 %v2587_v41, %v2228_v11  ;;  %v1035_v6 = vmul.f32 %v2587_v41, %v2232_v45  ;;  %v1036_v10 = vmul.f32 %v2587_v41, %v2236_v32  ;;  %v1037_v15 = vmul.f32 %v2587_v41, %v2244_v4 }
 0x268   : > { %v1038_v29 = vmul.f32 %v2587_v41, %v2248_v18  ;;  %v1039_v11 = vmul.f32 %v2587_v41, %v2254_v19  ;;  %v1040_v44 = vmul.f32 %v2587_v41, %v2260_v22  ;;  %v1041_v45 = vmul.f32 %v2587_v41, %v2266_v51 }
 0x269   : > { %vm1106_vm4 = vcmp.ge.f32.partialorder %v1034_v2, 0.0  ;;  %v1178_v62 = vmul.f32 0.2, %v1034_v2  ;;  %v1179_v57 = vmul.f32 0.2, %v1035_v6  ;;  %vm1107_vm5 = vcmp.ge.f32.partialorder %v1035_v6, 0.0 }
 0x26a   : > { %v1180_v26 = vmul.f32 0.2, %v1036_v10  ;;  %vm1108_vm6 = vcmp.ge.f32.partialorder %v1036_v10, 0.0  ;;  %v1181_v32 = vmul.f32 0.2, %v1037_v15  ;;  %v1042_v4 = vmul.f32 %v2587_v41, %v2272_v34 }
 0x26b   : > { %v1250_v17 = vsel %vm1106_vm4, %v1034_v2, %v1178_v62  ;;  %vm1109_vm7 = vcmp.ge.f32.partialorder %v1037_v15, 0.0  ;;  %v1182_v60 = vmul.f32 0.2, %v1038_v29  ;;  %v1043_v18 = vmul.f32 %v2587_v41, %v2278_v50 }
 0x26c   : > { %1322 = vst [vmem:[%s2595_s14] sm:$0xff] %v1250_v17  ;;  %vm1110_vm8 = vcmp.ge.f32.partialorder %v1038_v29, 0.0  ;;  %v1183_v19 = vmul.f32 0.2, %v1039_v11  ;;  %v1251_v52 = vsel %vm1107_vm5, %v1035_v6, %v1179_v57  ;;  %v1044_v22 = vmul.f32 %v2587_v41, %v2284_v63 }
 0x26d   : > { %vm1111_vm9 = vcmp.ge.f32.partialorder %v1039_v11, 0.0  ;;  %v1184_v51 = vmul.f32 0.2, %v1040_v44  ;;  %v1252_v37 = vsel %vm1108_vm6, %v1036_v10, %v1180_v26  ;;  %v1045_v58 = vmul.f32 %v2587_v41, %v2290_v53  ;;  %1323 = vst [vmem:[%s2595_s14 + $0x8] sm:$0xff] %v1251_v52 }
 0x26e   : > { %vm1112_vm10 = vcmp.ge.f32.partialorder %v1040_v44, 0.0  ;;  %v1185_v34 = vmul.f32 0.2, %v1041_v45  ;;  %v1253_v5 = vsel %vm1109_vm7, %v1037_v15, %v1181_v32  ;;  %v1046_v50 = vmul.f32 %v2587_v41, %v2296_v8  ;;  %1324 = vst [vmem:[%s2595_s14 + $0x10] sm:$0xff] %v1252_v37 }
 0x26f   : > { %vm1113_vm11 = vcmp.ge.f32.partialorder %v1041_v45, 0.0  ;;  %v1186_v7 = vmul.f32 0.2, %v1042_v4  ;;  %v1254_v39 = vsel %vm1110_vm8, %v1038_v29, %v1182_v60  ;;  %v1047_v63 = vmul.f32 %v2587_v41, %v2302_v54  ;;  %1325 = vst [vmem:[%s2595_s14 + $0x18] sm:$0xff] %v1253_v5 }
 0x270   : > { %vm1114_vm12 = vcmp.ge.f32.partialorder %v1042_v4, 0.0  ;;  %v1187_v61 = vmul.f32 0.2, %v1043_v18  ;;  %v1255_v9 = vsel %vm1111_vm9, %v1039_v11, %v1183_v19  ;;  %v1048_v53 = vmul.f32 %v2587_v41, %v2308_v30  ;;  %1326 = vst [vmem:[%s2595_s14 + $0x20] sm:$0xff] %v1254_v39 }
 0x271   : > { %vm1115_vm13 = vcmp.ge.f32.partialorder %v1043_v18, 0.0  ;;  %v1188_v2 = vmul.f32 0.2, %v1044_v22  ;;  %v1256_v8 = vsel %vm1112_vm10, %v1040_v44, %v1184_v51  ;;  %v1049_v62 = vmul.f32 %v2587_v41, %v2314_v56  ;;  %1327 = vst [vmem:[%s2595_s14 + $0x28] sm:$0xff] %v1255_v9 }
 0x272   : > { %vm1116_vm14 = vcmp.ge.f32.partialorder %v1044_v22, 0.0  ;;  %v1189_v17 = vmul.f32 0.2, %v1045_v58  ;;  %v1257_v54 = vsel %vm1113_vm11, %v1041_v45, %v1185_v34  ;;  %v1050_v6 = vmul.f32 %v2587_v41, %v2320_v12  ;;  %1328 = vst [vmem:[%s2595_s14 + $0x30] sm:$0xff] %v1256_v8 }
 0x273   : > { %vm1117_vm15 = vcmp.ge.f32.partialorder %v1045_v58, 0.0  ;;  %v1190_v30 = vmul.f32 0.2, %v1046_v50  ;;  %v1258_v10 = vsel %vm1114_vm12, %v1042_v4, %v1186_v7  ;;  %v1051_v15 = vmul.f32 %v2587_v41, %v2326_v55  ;;  %1329 = vst [vmem:[%s2595_s14 + $0x38] sm:$0xff] %v1257_v54 }
 0x274   : > { %vm1118_vm0 = vcmp.ge.f32.partialorder %v1046_v50, 0.0  ;;  %v1191_v56 = vmul.f32 0.2, %v1047_v63  ;;  %v1259_v29 = vsel %vm1115_vm13, %v1043_v18, %v1187_v61  ;;  %v1052_v11 = vmul.f32 %v2587_v41, %v2332_v43  ;;  %1330 = vst [vmem:[%s2595_s14 + $0x40] sm:$0xff] %v1258_v10 }
 0x275   : > { %vm1119_vm1 = vcmp.ge.f32.partialorder %v1047_v63, 0.0  ;;  %v1192_v12 = vmul.f32 0.2, %v1048_v53  ;;  %v1260_v57 = vsel %vm1116_vm14, %v1044_v22, %v1188_v2  ;;  %v1053_v44 = vmul.f32 %v2587_v41, %v2338_v16  ;;  %1331 = vst [vmem:[%s2595_s14 + $0x48] sm:$0xff] %v1259_v29  ;;  %v3018_v29 = vld [vmem:[#allocation6_spill] sm:$0xff] }
 0x276   : > { %vm1120_vm2 = vcmp.ge.f32.partialorder %v1048_v53, 0.0  ;;  %v1193_v55 = vmul.f32 0.2, %v1049_v62  ;;  %v1261_v26 = vsel %vm1117_vm15, %v1045_v58, %v1189_v17  ;;  %v1054_v45 = vmul.f32 %v2587_v41, %v2344_v20  ;;  %1332 = vst [vmem:[%s2595_s14 + $0x50] sm:$0xff] %v1260_v57 }
 0x277   : > { %vm1121_vm3 = vcmp.ge.f32.partialorder %v1049_v62, 0.0  ;;  %v1194_v43 = vmul.f32 0.2, %v1050_v6  ;;  %v1262_v32 = vsel %vm1118_vm0, %v1046_v50, %v1190_v30  ;;  %v1055_v4 = vmul.f32 %v2587_v41, %v2350_v24  ;;  %1333 = vst [vmem:[%s2595_s14 + $0x58] sm:$0xff] %v1261_v26  ;;  %v3017_v30 = vld [vmem:[#allocation5_spill] sm:$0xff] }
 0x278   : > { %vm1122_vm4 = vcmp.ge.f32.partialorder %v1050_v6, 0.0  ;;  %v1195_v16 = vmul.f32 0.2, %v1051_v15  ;;  %v1263_v60 = vsel %vm1119_vm1, %v1047_v63, %v1191_v56  ;;  %v1056_v18 = vmul.f32 %v2587_v41, %v2356_v27  ;;  %1334 = vst [vmem:[%s2595_s14 + $0x60] sm:$0xff] %v1262_v32  ;;  %v3014_v63 = vld [vmem:[#allocation2_spill] sm:$0xff] }
 0x279   : > { %vm1123_vm5 = vcmp.ge.f32.partialorder %v1051_v15, 0.0  ;;  %v1196_v20 = vmul.f32 0.2, %v1052_v11  ;;  %v1264_v19 = vsel %vm1120_vm2, %v1048_v53, %v1192_v12  ;;  %v1057_v52 = vmul.f32 %v2587_v41, %v2362_v1  ;;  %1335 = vst [vmem:[%s2595_s14 + $0x68] sm:$0xff] %v1263_v60  ;;  %v3015_v53 = vld [vmem:[#allocation3_spill] sm:$0xff]  ;;  %v3021_v60 = vld [vmem:[#allocation9_spill] sm:$0xff] }
 0x27a   : > { %vm1124_vm6 = vcmp.ge.f32.partialorder %v1052_v11, 0.0  ;;  %v1197_v24 = vmul.f32 0.2, %v1053_v44  ;;  %v1265_v22 = vsel %vm1121_vm3, %v1049_v62, %v1193_v55  ;;  %v1058_v51 = vmul.f32 %v2587_v41, %v2368_v36  ;;  %1336 = vst [vmem:[%s2595_s14 + $0x70] sm:$0xff] %v1264_v19  ;;  %v3016_v62 = vld [vmem:[#allocation4_spill] sm:$0xff] }
 0x27b   : > { %vm1125_vm7 = vcmp.ge.f32.partialorder %v1053_v44, 0.0  ;;  %v1198_v27 = vmul.f32 0.2, %v1054_v45  ;;  %v1266_v37 = vsel %vm1122_vm4, %v1050_v6, %v1194_v43  ;;  %v1059_v58 = vmul.f32 %v2587_v41, %v2374_v35  ;;  %1337 = vst [vmem:[%s2595_s14 + $0x78] sm:$0xff] %v1265_v22  ;;  %v3020_v43 = vld [vmem:[#allocation8_spill] sm:$0xff] }
 0x27c   : > { %vm1126_vm8 = vcmp.ge.f32.partialorder %v1054_v45, 0.0  ;;  %v1199_v1 = vmul.f32 0.2, %v1055_v4  ;;  %v1267_v34 = vsel %vm1123_vm5, %v1051_v15, %v1195_v16  ;;  %v1060_v5 = vmul.f32 %v2587_v41, %v2380_v47  ;;  %1338 = vst [vmem:[%s2595_s14 + $0x80] sm:$0xff] %v1266_v37 }
 0x27d   : > { %vm1127_vm9 = vcmp.ge.f32.partialorder %v1055_v4, 0.0  ;;  %v1200_v36 = vmul.f32 0.2, %v1056_v18  ;;  %v1268_v50 = vsel %vm1124_vm6, %v1052_v11, %v1196_v20  ;;  %v1061_v7 = vmul.f32 %v2587_v41, %v2386_v31  ;;  %1339 = vst [vmem:[%s2595_s14 + $0x88] sm:$0xff] %v1267_v34  ;;  %v3024_v34 = vld [vmem:[#allocation12_spill] sm:$0xff] }
 0x27e   : > { %vm1128_vm10 = vcmp.ge.f32.partialorder %v1056_v18, 0.0  ;;  %v1201_v35 = vmul.f32 0.2, %v1057_v52  ;;  %v1269_v39 = vsel %vm1125_vm7, %v1053_v44, %v1197_v24  ;;  %v1062_v61 = vmul.f32 %v2587_v41, %v3014_v63  ;;  %1340 = vst [vmem:[%s2595_s14 + $0x90] sm:$0xff] %v1268_v50  ;;  %v3019_v44 = vld [vmem:[#allocation7_spill] sm:$0xff] }
 0x27f   : > { %vm1129_vm11 = vcmp.ge.f32.partialorder %v1057_v52, 0.0  ;;  %v1202_v47 = vmul.f32 0.2, %v1058_v51  ;;  %v1270_v9 = vsel %vm1126_vm8, %v1054_v45, %v1198_v27  ;;  %v1063_v2 = vmul.f32 %v2587_v41, %v3015_v53  ;;  %1341 = vst [vmem:[%s2595_s14 + $0x98] sm:$0xff] %v1269_v39  ;;  %v3023_v27 = vld [vmem:[#allocation11_spill] sm:$0xff] }
 0x280   : > { %vm1130_vm12 = vcmp.ge.f32.partialorder %v1058_v51, 0.0  ;;  %v1203_v31 = vmul.f32 0.2, %v1059_v58  ;;  %v1271_v8 = vsel %vm1127_vm9, %v1055_v4, %v1199_v1  ;;  %v1064_v17 = vmul.f32 %v2587_v41, %v3016_v62  ;;  %1342 = vst [vmem:[%s2595_s14 + $0xa0] sm:$0xff] %v1270_v9 }
 0x281   : > { %vm1131_vm13 = vcmp.ge.f32.partialorder %v1059_v58, 0.0  ;;  %v1204_v54 = vmul.f32 0.2, %v1060_v5  ;;  %v1272_v6 = vsel %vm1128_vm10, %v1056_v18, %v1200_v36  ;;  %v1065_v10 = vmul.f32 %v2587_v41, %v3017_v30  ;;  %1343 = vst [vmem:[%s2595_s14 + $0xa8] sm:$0xff] %v1271_v8 }
 0x282   : > { %vm1132_vm14 = vcmp.ge.f32.partialorder %v1060_v5, 0.0  ;;  %v1205_v15 = vmul.f32 0.2, %v1061_v7  ;;  %v1273_v56 = vsel %vm1129_vm11, %v1057_v52, %v1201_v35  ;;  %v1066_v11 = vmul.f32 %v2587_v41, %v3018_v29  ;;  %1344 = vst [vmem:[%s2595_s14 + $0xb0] sm:$0xff] %v1272_v6  ;;  %v3022_v52 = vld [vmem:[#allocation10_spill] sm:$0xff] }
 0x283   : > { %vm1133_vm15 = vcmp.ge.f32.partialorder %v1061_v7, 0.0  ;;  %v1206_v12 = vmul.f32 0.2, %v1062_v61  ;;  %v1274_v57 = vsel %vm1130_vm12, %v1058_v51, %v1202_v47  ;;  %v1067_v55 = vmul.f32 %v2587_v41, %v3019_v44  ;;  %1345 = vst [vmem:[%s2595_s14 + $0xb8] sm:$0xff] %v1273_v56 }
 0x284   : > { %vm1134_vm0 = vcmp.ge.f32.partialorder %v1062_v61, 0.0  ;;  %v1207_v26 = vmul.f32 0.2, %v1063_v2  ;;  %v1275_v45 = vsel %vm1131_vm13, %v1059_v58, %v1203_v31  ;;  %v1068_v32 = vmul.f32 %v2587_v41, %v3020_v43  ;;  %1346 = vst [vmem:[%s2595_s14 + $0xc0] sm:$0xff] %v1274_v57 }
 0x285   : > { %vm1135_vm1 = vcmp.ge.f32.partialorder %v1063_v2, 0.0  ;;  %v1208_v4 = vmul.f32 0.2, %v1064_v17  ;;  %v1276_v16 = vsel %vm1132_vm14, %v1060_v5, %v1204_v54  ;;  %v1069_v18 = vmul.f32 %v2587_v41, %v3021_v60  ;;  %1347 = vst [vmem:[%s2595_s14 + $0xc8] sm:$0xff] %v1275_v45 }
 0x286   : > { %vm1136_vm2 = vcmp.ge.f32.partialorder %v1064_v17, 0.0  ;;  %v1209_v20 = vmul.f32 0.2, %v1065_v10  ;;  %v1277_v19 = vsel %vm1133_vm15, %v1061_v7, %v1205_v15  ;;  %v1070_v24 = vmul.f32 %v2587_v41, %v3022_v52  ;;  %1348 = vst [vmem:[%s2595_s14 + $0xd0] sm:$0xff] %v1276_v16  ;;  %v3025_v7 = vld [vmem:[#allocation13_spill] sm:$0xff] }
 0x287   : > { %vm1137_vm3 = vcmp.ge.f32.partialorder %v1065_v10, 0.0  ;;  %v1210_v22 = vmul.f32 0.2, %v1066_v11  ;;  %v1278_v51 = vsel %vm1134_vm0, %v1062_v61, %v1206_v12  ;;  %v1071_v37 = vmul.f32 %v2587_v41, %v3023_v27  ;;  %1349 = vst [vmem:[%s2595_s14 + $0xd8] sm:$0xff] %v1277_v19  ;;  %v3026_v61 = vld [vmem:[#allocation14_spill] sm:$0xff] }
 0x288   : > { %vm1138_vm4 = vcmp.ge.f32.partialorder %v1066_v11, 0.0  ;;  %v1211_v58 = vmul.f32 0.2, %v1067_v55  ;;  %v1279_v1 = vsel %vm1135_vm1, %v1063_v2, %v1207_v26  ;;  %v1072_v5 = vmul.f32 %v2587_v41, %v3024_v34  ;;  %1350 = vst [vmem:[%s2595_s14 + $0xe0] sm:$0xff] %v1278_v51  ;;  %v3027_v2 = vld [vmem:[#allocation15_spill] sm:$0xff] }
 0x289   : > { %vm1139_vm5 = vcmp.ge.f32.partialorder %v1067_v55, 0.0  ;;  %v1212_v36 = vmul.f32 0.2, %v1068_v32  ;;  %v1280_v50 = vsel %vm1136_vm2, %v1064_v17, %v1208_v4  ;;  %v1073_v35 = vmul.f32 %v2587_v41, %v3025_v7  ;;  %1351 = vst [vmem:[%s2595_s14 + $0xe8] sm:$0xff] %v1279_v1  ;;  %v3028_v17 = vld [vmem:[#allocation16_spill] sm:$0xff]  ;;  %v3035_v34 = vld [vmem:[#allocation23_spill] sm:$0xff] }
 0x28a   : > { %vm1140_vm6 = vcmp.ge.f32.partialorder %v1068_v32, 0.0  ;;  %v1213_v39 = vmul.f32 0.2, %v1069_v18  ;;  %v1281_v63 = vsel %vm1137_vm3, %v1065_v10, %v1209_v20  ;;  %v1074_v47 = vmul.f32 %v2587_v41, %v3026_v61  ;;  %1352 = vst [vmem:[%s2595_s14 + $0xf0] sm:$0xff] %v1280_v50  ;;  %v3029_v10 = vld [vmem:[#allocation17_spill] sm:$0xff] }
 0x28b   : > { %vm1141_vm7 = vcmp.ge.f32.partialorder %v1069_v18, 0.0  ;;  %v1214_v9 = vmul.f32 0.2, %v1070_v24  ;;  %v1282_v53 = vsel %vm1138_vm4, %v1066_v11, %v1210_v22  ;;  %v1075_v31 = vmul.f32 %v2587_v41, %v3027_v2  ;;  %1353 = vst [vmem:[%s2595_s14 + $0xf8] sm:$0xff] %v1281_v63  ;;  %v3030_v11 = vld [vmem:[#allocation18_spill] sm:$0xff] }
 0x28c   : > { %vm1142_vm8 = vcmp.ge.f32.partialorder %v1070_v24, 0.0  ;;  %v1215_v8 = vmul.f32 0.2, %v1071_v37  ;;  %v1283_v62 = vsel %vm1139_vm5, %v1067_v55, %v1211_v58  ;;  %v1076_v54 = vmul.f32 %v2587_v41, %v3028_v17  ;;  %1354 = vst [vmem:[%s2595_s14 + $0x100] sm:$0xff] %v1282_v53  ;;  %v3031_v55 = vld [vmem:[#allocation19_spill] sm:$0xff] }
 0x28d   : > { %vm1143_vm9 = vcmp.ge.f32.partialorder %v1071_v37, 0.0  ;;  %v1216_v6 = vmul.f32 0.2, %v1072_v5  ;;  %v1284_v30 = vsel %vm1140_vm6, %v1068_v32, %v1212_v36  ;;  %v1077_v15 = vmul.f32 %v2587_v41, %v3029_v10  ;;  %1355 = vst [vmem:[%s2595_s14 + $0x108] sm:$0xff] %v1283_v62  ;;  %v3032_v32 = vld [vmem:[#allocation20_spill] sm:$0xff] }
 0x28e   : > { %vm1144_vm10 = vcmp.ge.f32.partialorder %v1072_v5, 0.0  ;;  %v1217_v56 = vmul.f32 0.2, %v1073_v35  ;;  %v1285_v29 = vsel %vm1141_vm7, %v1069_v18, %v1213_v39  ;;  %v1078_v12 = vmul.f32 %v2587_v41, %v3030_v11  ;;  %1356 = vst [vmem:[%s2595_s14 + $0x110] sm:$0xff] %v1284_v30  ;;  %v3033_v18 = vld [vmem:[#allocation21_spill] sm:$0xff] }
 0x28f   : > { %vm1145_vm11 = vcmp.ge.f32.partialorder %v1073_v35, 0.0  ;;  %v1218_v57 = vmul.f32 0.2, %v1074_v47  ;;  %v1286_v44 = vsel %vm1142_vm8, %v1070_v24, %v1214_v9  ;;  %v1079_v26 = vmul.f32 %v2587_v41, %v3031_v55  ;;  %1357 = vst [vmem:[%s2595_s14 + $0x118] sm:$0xff] %v1285_v29  ;;  %v3034_v24 = vld [vmem:[#allocation22_spill] sm:$0xff] }
 0x290   : > { %vm1146_vm12 = vcmp.ge.f32.partialorder %v1074_v47, 0.0  ;;  %v1219_v45 = vmul.f32 0.2, %v1075_v31  ;;  %v1287_v43 = vsel %vm1143_vm9, %v1071_v37, %v1215_v8  ;;  %v1080_v4 = vmul.f32 %v2587_v41, %v3032_v32  ;;  %1358 = vst [vmem:[%s2595_s14 + $0x120] sm:$0xff] %v1286_v44 }
 0x291   : > { %vm1147_vm13 = vcmp.ge.f32.partialorder %v1075_v31, 0.0  ;;  %v1220_v16 = vmul.f32 0.2, %v1076_v54  ;;  %v1288_v60 = vsel %vm1144_vm10, %v1072_v5, %v1216_v6  ;;  %v1081_v20 = vmul.f32 %v2587_v41, %v3033_v18  ;;  %1359 = vst [vmem:[%s2595_s14 + $0x128] sm:$0xff] %v1287_v43  ;;  %v3037_v18 = vld [vmem:[#allocation30_spill] sm:$0xff] }
 0x292   : > { %vm1148_vm14 = vcmp.ge.f32.partialorder %v1076_v54, 0.0  ;;  %v1221_v19 = vmul.f32 0.2, %v1077_v15  ;;  %v1289_v52 = vsel %vm1145_vm11, %v1073_v35, %v1217_v56  ;;  %v1082_v22 = vmul.f32 %v2587_v41, %v3034_v24  ;;  %1360 = vst [vmem:[%s2595_s14 + $0x130] sm:$0xff] %v1288_v60 }
 0x293   : > { %vm1149_vm15 = vcmp.ge.f32.partialorder %v1077_v15, 0.0  ;;  %v1222_v51 = vmul.f32 0.2, %v1078_v12  ;;  %v1290_v27 = vsel %vm1146_vm12, %v1074_v47, %v1218_v57  ;;  %v1083_v37 = vmul.f32 %v2587_v41, %v2518_v49  ;;  %1361 = vst [vmem:[%s2595_s14 + $0x138] sm:$0xff] %v1289_v52  ;;  %v3038_v52 = vld [vmem:[#allocation31_spill] sm:$0xff] }
 0x294   : > { %vm1150_vm0 = vcmp.ge.f32.partialorder %v1078_v12, 0.0  ;;  %v1223_v58 = vmul.f32 0.2, %v1079_v26  ;;  %v1291_v1 = vsel %vm1147_vm13, %v1075_v31, %v1219_v45  ;;  %v1084_v5 = vmul.f32 %v2587_v41, %v3035_v34  ;;  %1362 = vst [vmem:[%s2595_s14 + $0x140] sm:$0xff] %v1290_v27  ;;  %v3039_v27 = vld [vmem:[#allocation32_spill] sm:$0xff]  ;;  %v3040_v34 = vld [vmem:[#allocation33_spill] sm:$0xff] }
 0x295   : > { %vm1151_vm1 = vcmp.ge.f32.partialorder %v1079_v26, 0.0  ;;  %v1224_v36 = vmul.f32 0.2, %v1080_v4  ;;  %v1292_v50 = vsel %vm1148_vm14, %v1076_v54, %v1220_v16  ;;  %v1085_v7 = vmul.f32 %v2587_v41, %v2530_v21  ;;  %1363 = vst [vmem:[%s2595_s14 + $0x148] sm:$0xff] %v1291_v1 }
 0x296   : > { %vm1152_vm2 = vcmp.ge.f32.partialorder %v1080_v4, 0.0  ;;  %v1225_v49 = vmul.f32 0.2, %v1081_v20  ;;  %v1293_v35 = vsel %vm1149_vm15, %v1077_v15, %v1221_v19  ;;  %v1086_v39 = vmul.f32 %v2587_v41, %v2536_v33  ;;  %1364 = vst [vmem:[%s2595_s14 + $0x150] sm:$0xff] %v1292_v50 }
 0x297   : > { %vm1153_vm3 = vcmp.ge.f32.partialorder %v1081_v20, 0.0  ;;  %v1226_v63 = vmul.f32 0.2, %v1082_v22  ;;  %v1294_v61 = vsel %vm1150_vm0, %v1078_v12, %v1222_v51  ;;  %v1087_v47 = vmul.f32 %v2587_v41, %v2542_v38  ;;  %1365 = vst [vmem:[%s2595_s14 + $0x158] sm:$0xff] %v1293_v35 }
 0x298   : > { %vm1154_vm4 = vcmp.ge.f32.partialorder %v1082_v22, 0.0  ;;  %v1227_v21 = vmul.f32 0.2, %v1083_v37  ;;  %v1295_v9 = vsel %vm1151_vm1, %v1079_v26, %v1223_v58  ;;  %v1088_v53 = vmul.f32 %v2587_v41, %v2173_v14  ;;  %1366 = vst [vmem:[%s2595_s14 + $0x160] sm:$0xff] %v1294_v61 }
 0x299   : > { %vm1155_vm5 = vcmp.ge.f32.partialorder %v1083_v37, 0.0  ;;  %v1228_v33 = vmul.f32 0.2, %v1084_v5  ;;  %v1296_v2 = vsel %vm1152_vm2, %v1080_v4, %v1224_v36  ;;  %v1089_v31 = vmul.f32 %v2587_v41, %v2176_v28  ;;  %1367 = vst [vmem:[%s2595_s14 + $0x168] sm:$0xff] %v1295_v9  ;;  %v3036_v4 = vld [vmem:[#allocation29_spill] sm:$0xff] }
 0x29a   : > { %vm1156_vm6 = vcmp.ge.f32.partialorder %v1084_v5, 0.0  ;;  %v1229_v38 = vmul.f32 0.2, %v1085_v7  ;;  %v1297_v8 = vsel %vm1153_vm3, %v1081_v20, %v1225_v49  ;;  %v1090_v62 = vmul.f32 %v2587_v41, %v2179_v48  ;;  %1368 = vst [vmem:[%s2595_s14 + $0x170] sm:$0xff] %v1296_v2 }
 0x29b   : > { %vm1157_vm7 = vcmp.ge.f32.partialorder %v1085_v7, 0.0  ;;  %v1230_v14 = vmul.f32 0.2, %v1086_v39  ;;  %v1298_v17 = vsel %vm1154_vm4, %v1082_v22, %v1226_v63  ;;  %v1091_v54 = vmul.f32 %v2587_v41, %v2182_v0  ;;  %1369 = vst [vmem:[%s2595_s14 + $0x178] sm:$0xff] %v1297_v8 }
 0x29c   : > { %vm1158_vm8 = vcmp.ge.f32.partialorder %v1086_v39, 0.0  ;;  %v1231_v28 = vmul.f32 0.2, %v1087_v47  ;;  %v1299_v6 = vsel %vm1155_vm5, %v1083_v37, %v1227_v21  ;;  %v1092_v30 = vmul.f32 %v2587_v41, %v2185_v3  ;;  %1370 = vst [vmem:[%s2595_s14 + $0x180] sm:$0xff] %v1298_v17 }
 0x29d   : > { %vm1159_vm9 = vcmp.ge.f32.partialorder %v1087_v47, 0.0  ;;  %v1232_v48 = vmul.f32 0.2, %v1088_v53  ;;  %v1300_v10 = vsel %vm1156_vm6, %v1084_v5, %v1228_v33  ;;  %v1093_v15 = vmul.f32 %v2587_v41, %v2188_v13  ;;  %1371 = vst [vmem:[%s2595_s14 + $0x188] sm:$0xff] %v1299_v6 }
 0x29e   : > { %vm1160_vm10 = vcmp.ge.f32.partialorder %v1088_v53, 0.0  ;;  %v1233_v0 = vmul.f32 0.2, %v1089_v31  ;;  %v1301_v56 = vsel %vm1157_vm7, %v1085_v7, %v1229_v38  ;;  %v1094_v29 = vmul.f32 %v2587_v41, %v2191_v42  ;;  %1372 = vst [vmem:[%s2595_s14 + $0x190] sm:$0xff] %v1300_v10  ;;  %v3041_v7 = vld [vmem:[#allocation34_spill] sm:$0xff] }
 0x29f   : > { %vm1161_vm11 = vcmp.ge.f32.partialorder %v1089_v31, 0.0  ;;  %v1234_v3 = vmul.f32 0.2, %v1090_v62  ;;  %v1302_v11 = vsel %vm1158_vm8, %v1086_v39, %v1230_v14  ;;  %v1095_v12 = vmul.f32 %v2587_v41, %v2194_v25  ;;  %1373 = vst [vmem:[%s2595_s14 + $0x198] sm:$0xff] %v1301_v56 }
 0x2a0   : > { %vm1162_vm12 = vcmp.ge.f32.partialorder %v1090_v62, 0.0  ;;  %v1235_v13 = vmul.f32 0.2, %v1091_v54  ;;  %v1303_v57 = vsel %vm1159_vm9, %v1087_v47, %v1231_v28  ;;  %v1096_v44 = vmul.f32 %v2587_v41, %v2197_v40  ;;  %1374 = vst [vmem:[%s2595_s14 + $0x1a0] sm:$0xff] %v1302_v11 }
 0x2a1   : > { %vm1163_vm13 = vcmp.ge.f32.partialorder %v1091_v54, 0.0  ;;  %v1236_v42 = vmul.f32 0.2, %v1092_v30  ;;  %v1304_v55 = vsel %vm1160_vm10, %v1088_v53, %v1232_v48  ;;  %v1097_v26 = vmul.f32 %v2587_v41, %v2200_v23  ;;  %1375 = vst [vmem:[%s2595_s14 + $0x1a8] sm:$0xff] %v1303_v57 }
 0x2a2   : > { %vm1164_vm14 = vcmp.ge.f32.partialorder %v1092_v30, 0.0  ;;  %v1237_v25 = vmul.f32 0.2, %v1093_v15  ;;  %v1305_v45 = vsel %vm1161_vm11, %v1089_v31, %v1233_v0  ;;  %v1098_v43 = vmul.f32 %v2587_v41, %v2203_v59  ;;  %1376 = vst [vmem:[%s2595_s14 + $0x1b0] sm:$0xff] %v1304_v55 }
 0x2a3   : > { %vm1165_vm15 = vcmp.ge.f32.partialorder %v1093_v15, 0.0  ;;  %v1238_v40 = vmul.f32 0.2, %v1094_v29  ;;  %v1306_v32 = vsel %vm1162_vm12, %v1090_v62, %v1234_v3  ;;  %v1099_v16 = vmul.f32 %v2587_v41, %v3036_v4  ;;  %1377 = vst [vmem:[%s2595_s14 + $0x1b8] sm:$0xff] %v1305_v45 }
 0x2a4   : > { %vm1166_vm0 = vcmp.ge.f32.partialorder %v1094_v29, 0.0  ;;  %v1239_v23 = vmul.f32 0.2, %v1095_v12  ;;  %v1307_v60 = vsel %vm1163_vm13, %v1091_v54, %v1235_v13  ;;  %v1100_v20 = vmul.f32 %v2587_v41, %v3037_v18  ;;  %1378 = vst [vmem:[%s2595_s14 + $0x1c0] sm:$0xff] %v1306_v32 }
 0x2a5   : > { %vm1167_vm1 = vcmp.ge.f32.partialorder %v1095_v12, 0.0  ;;  %v1240_v59 = vmul.f32 0.2, %v1096_v44  ;;  %v1308_v19 = vsel %vm1164_vm14, %v1092_v30, %v1236_v42  ;;  %v1101_v24 = vmul.f32 %v2587_v41, %v3038_v52  ;;  %1379 = vst [vmem:[%s2595_s14 + $0x1c8] sm:$0xff] %v1307_v60 }
 0x2a6   : > { %vm1168_vm2 = vcmp.ge.f32.partialorder %v1096_v44, 0.0  ;;  %v1241_v22 = vmul.f32 0.2, %v1097_v26  ;;  %v1309_v51 = vsel %vm1165_vm15, %v1093_v15, %v1237_v25  ;;  %v1102_v37 = vmul.f32 %v2587_v41, %v3039_v27  ;;  %1380 = vst [vmem:[%s2595_s14 + $0x1d0] sm:$0xff] %v1308_v19 }
 0x2a7   : > { %vm1169_vm3 = vcmp.ge.f32.partialorder %v1097_v26, 0.0  ;;  %v1242_v58 = vmul.f32 0.2, %v1098_v43  ;;  %v1310_v1 = vsel %vm1166_vm0, %v1094_v29, %v1238_v40  ;;  %v1103_v5 = vmul.f32 %v2587_v41, %v3040_v34  ;;  %1381 = vst [vmem:[%s2595_s14 + $0x1d8] sm:$0xff] %v1309_v51 }
 0x2a8   : > { %vm1170_vm4 = vcmp.ge.f32.partialorder %v1098_v43, 0.0  ;;  %v1243_v36 = vmul.f32 0.2, %v1099_v16  ;;  %v1311_v50 = vsel %vm1167_vm1, %v1095_v12, %v1239_v23  ;;  %v1104_v49 = vmul.f32 %v2587_v41, %v3041_v7  ;;  %1382 = vst [vmem:[%s2595_s14 + $0x1e0] sm:$0xff] %v1310_v1 }
 0x2a9   : > { %vm1171_vm5 = vcmp.ge.f32.partialorder %v1099_v16, 0.0  ;;  %v1244_v35 = vmul.f32 0.2, %v1100_v20  ;;  %v1312_v39 = vsel %vm1168_vm2, %v1096_v44, %v1240_v59  ;;  %v1105_v63 = vmul.f32 %v2587_v41, %v2224_v46  ;;  %1383 = vst [vmem:[%s2595_s14 + $0x1e8] sm:$0xff] %v1311_v50 }
 0x2aa   : > { %vm1172_vm6 = vcmp.ge.f32.partialorder %v1100_v20, 0.0  ;;  %v1245_v61 = vmul.f32 0.2, %v1101_v24  ;;  %v1313_v47 = vsel %vm1169_vm3, %v1097_v26, %v1241_v22  ;;  %vm1173_vm7 = vcmp.ge.f32.partialorder %v1101_v24, 0.0  ;;  %1384 = vst [vmem:[%s2595_s14 + $0x1f0] sm:$0xff] %v1312_v39 }
 0x2ab   : > { %v1246_v21 = vmul.f32 0.2, %v1102_v37  ;;  %v1314_v9 = vsel %vm1170_vm4, %v1098_v43, %v1242_v58  ;;  %vm1174_vm8 = vcmp.ge.f32.partialorder %v1102_v37, 0.0  ;;  %v1247_v53 = vmul.f32 0.2, %v1103_v5  ;;  %1385 = vst [vmem:[%s2595_s14 + $0x1f8] sm:$0xff] %v1313_v47 }
 0x2ac   : > { %v1315_v33 = vsel %vm1171_vm5, %v1099_v16, %v1243_v36  ;;  %vm1175_vm9 = vcmp.ge.f32.partialorder %v1103_v5, 0.0  ;;  %v1248_v46 = vmul.f32 0.2, %v1104_v49  ;;  %v1316_v41 = vsel %vm1172_vm6, %v1100_v20, %v1244_v35  ;;  %1386 = vst [vmem:[%s2595_s14 + $0x200] sm:$0xff] %v1314_v9 }
 0x2ad   : > { %vm1176_vm10 = vcmp.ge.f32.partialorder %v1104_v49, 0.0  ;;  %v1249_v2 = vmul.f32 0.2, %v1105_v63  ;;  %v1317_v31 = vsel %vm1173_vm7, %v1101_v24, %v1245_v61  ;;  %vm1177_vm11 = vcmp.ge.f32.partialorder %v1105_v63, 0.0  ;;  %1387 = vst [vmem:[%s2595_s14 + $0x208] sm:$0xff] %v1315_v33 }
 0x2ae   : > { %v1318_v38 = vsel %vm1174_vm8, %v1102_v37, %v1246_v21  ;;  %v1319_v8 = vsel %vm1175_vm9, %v1103_v5, %v1247_v53  ;;  %1388 = vst [vmem:[%s2595_s14 + $0x210] sm:$0xff] %v1316_v41  ;;  %v1320_v62 = vsel %vm1176_vm10, %v1104_v49, %v1248_v46 }
 0x2af   : > { %1389 = vst [vmem:[%s2595_s14 + $0x218] sm:$0xff] %v1317_v31  ;;  %v1321_v14 = vsel %vm1177_vm11, %v1105_v63, %v1249_v2 }
 0x2b0   : > { %1390 = vst [vmem:[%s2595_s14 + $0x220] sm:$0xff] %v1318_v38 }
 0x2b1   : > { %1391 = vst [vmem:[%s2595_s14 + $0x228] sm:$0xff] %v1319_v8 }
 0x2b2   : > { %1392 = vst [vmem:[%s2595_s14 + $0x230] sm:$0xff] %v1320_v62 }
 0x2b3   : > { %1393 = vst [vmem:[%s2595_s14 + $0x238] sm:$0xff] %v1321_v14 }
 0x2b4 PF: > { %s13_s12 = sadd.s32 1, %s1724_s12  }
 0x2b5   : > { %p10_p4 = scmp.ge.s32.totalorder %s13_s12, 4  }
 0x2b7   :  { %12 = sbr.rel (!%p10_p4) target bundleno = 1 (0x1), region = 62 }

// kernel: discriminator_forward.9
= control target key start
LH: loop header
LB: loop body
LE: loop exit
PB: predicated region body
PF: predicated region fallthrough
CT: control target
= control target key end

     0   :  { %s1005_s12 = smov 0   ;;  %s1310_s0 = inlined_call_operand.vmem [shape: bf16[2,144,256], index: 0, kind: input, shape index: {}]   ;;  %s1311_s1 = inlined_call_operand.vmem [shape: bf16[256,128], index: 1, kind: input, shape index: {}]   ;;  %s1312_s2 = inlined_call_operand.vmem [shape: f32[1,128], index: 2, kind: input, shape index: {}]   ;;  %s1313_s3 = inlined_call_operand.vmem [shape: f32[2,144,128], index: 3, kind: output, shape index: {}]  }
   0x1 LB: > { %s766_s13 = sadd.s32 4294967295, %s982_s12   ;;  %p770_p0 = scmp.ge.s32.totalorder %s982_s12, 1  ;;  %s982_s12 = sphi %s1005_s12, %s13_s12  }
   0x2   : > { %p137_p1 = scmp.lt.s32.totalorder %s982_s12, 3 }
   0x4   : > { %p138_p2 = pnand %p770_p0, %p137_p1 }
   0x5   : > { %p161_p3 = scmp.lt.s32.totalorder (!%p138_p2), %s766_s13, 1 }
   0x6   : > { %141 = sbr.rel (%p138_p2) target bundleno = 371 (0x173), region = 32 }
   0xb   : > { %v936_v0 = vld [vmem:[%s1311_s1 + $0x38] sm:$0xff]  ;;  %v935_v2 = vld [vmem:[%s1311_s1 + $0x30] sm:$0xff]  ;;  %v934_v4 = vld [vmem:[%s1311_s1 + $0x28] sm:$0xff]  ;;  %s1315_s13 = smov (!%p161_p3, %s766_s13), 1 }
   0xc   : > { %v944_v1 = vld [vmem:[%s1311_s1 + $0x78] sm:$0xff]  ;;  %411 = vmatpush.bf16.msra.mxu0 %v936_v0  ;;  %945 = vmatpush.bf16.msra.mxu2 %v936_v0  ;;  %v943_v3 = vld [vmem:[%s1311_s1 + $0x70] sm:$0xff]  ;;  %v942_v5 = vld [vmem:[%s1311_s1 + $0x68] sm:$0xff]  ;;  %s961_s9 = smul.u32 144, %s1315_s13 }
   0xd   : > { %465 = vmatpush.bf16.msra.mxu1 %v944_v1  ;;  %953 = vmatpush.bf16.msra.mxu3 %v944_v1  ;;  %v933_v6 = vld [vmem:[%s1311_s1 + $0x20] sm:$0xff]  ;;  %v932_v8 = vld [vmem:[%s1311_s1 + $0x18] sm:$0xff]  ;;  %v931_v10 = vld [vmem:[%s1311_s1 + $0x10] sm:$0xff] }
   0xe   : > { %v941_v7 = vld [vmem:[%s1311_s1 + $0x60] sm:$0xff]  ;;  %v940_v9 = vld [vmem:[%s1311_s1 + $0x58] sm:$0xff]  ;;  %v939_v11 = vld [vmem:[%s1311_s1 + $0x50] sm:$0xff]  ;;  %s1060_s18 = scalar_lea.vmem %s1310_s0, %s961_s9  ;;  %s1269_s29 = scalar_lea.vmem %s1313_s3, %s961_s9 }
   0xf   : > { %v930_v12 = vld [vmem:[%s1311_s1 + $0x8] sm:$0xff]  ;;  %v929_v14 = vld [vmem:[%s1311_s1] sm:$0xff]  ;;  %v921_v22 = vld [vmem:[%s1060_s18 + $0x54] sm:$0xf] }
  0x10   : > { %412 = vmatpush.bf16.msra.mxu0 %v935_v2  ;;  %946 = vmatpush.bf16.msra.mxu2 %v935_v2  ;;  %v938_v13 = vld [vmem:[%s1311_s1 + $0x48] sm:$0xff]  ;;  %v937_v15 = vld [vmem:[%s1311_s1 + $0x40] sm:$0xff]  ;;  %v817_v23 = vld [vmem:[%s1060_s18 + $0x58] sm:$0xf0] }
  0x11   : > { %466 = vmatpush.bf16.msra.mxu1 %v943_v3  ;;  %954 = vmatpush.bf16.msra.mxu3 %v943_v3  ;;  %v775_v16 = vld [vmem:[%s1060_s18] sm:$0xf]  ;;  %v912_v17 = vld [vmem:[%s1060_s18 + $0x4] sm:$0xf0]  ;;  %v911_v20 = vld [vmem:[%s1060_s18 + $0x4] sm:$0xf]  ;;  %v820_v27 = vor.u32 %v921_v22, %v817_v23 }
  0x12   : > { %v807_v18 = vld [vmem:[%s1060_s18 + $0x40] sm:$0xf]  ;;  %v920_v19 = vld [vmem:[%s1060_s18 + $0x44] sm:$0xf0]  ;;  %v777_v21 = vld [vmem:[%s1060_s18 + $0x8] sm:$0xf0]  ;;  %v776_v24 = vor.u32 %v912_v17, %v775_v16 }
  0x13   : > { %v808_v25 = vor.u32 %v920_v19, %v807_v18  ;;  %v780_v26 = vor.u32 %v911_v20, %v777_v21  ;;  %v783_v28 = vld [vmem:[%s1060_s18 + $0x10] sm:$0xf]  ;;  %v914_v29 = vld [vmem:[%s1060_s18 + $0x14] sm:$0xf0]  ;;  %v913_v32 = vld [vmem:[%s1060_s18 + $0x14] sm:$0xf] }
  0x14   : > { %413 = vmatpush.bf16.msra.mxu0 %v934_v4  ;;  %947 = vmatpush.bf16.msra.mxu2 %v934_v4  ;;  %v815_v30 = vld [vmem:[%s1060_s18 + $0x50] sm:$0xf]  ;;  %v922_v31 = vld [vmem:[%s1060_s18 + $0x54] sm:$0xf0]  ;;  %v785_v33 = vld [vmem:[%s1060_s18 + $0x18] sm:$0xf0]  ;;  %v784_v36 = vor.u32 %v914_v29, %v783_v28 }
  0x15   : > { %467 = vmatpush.bf16.msra.mxu1 %v942_v5  ;;  %955 = vmatpush.bf16.msra.mxu3 %v942_v5  ;;  %v923_v34 = vld [vmem:[%s1060_s18 + $0x64] sm:$0xf]  ;;  %v825_v35 = vld [vmem:[%s1060_s18 + $0x68] sm:$0xf0]  ;;  %v816_v37 = vor.u32 %v922_v31, %v815_v30  ;;  %v788_v38 = vor.u32 %v913_v32, %v785_v33  ;;  %v791_v40 = vld [vmem:[%s1060_s18 + $0x20] sm:$0xf] }
  0x16   : > { %v828_v39 = vor.u32 %v923_v34, %v825_v35  ;;  %v916_v41 = vld [vmem:[%s1060_s18 + $0x24] sm:$0xf0]  ;;  %v823_v42 = vld [vmem:[%s1060_s18 + $0x60] sm:$0xf]  ;;  %v915_v44 = vld [vmem:[%s1060_s18 + $0x24] sm:$0xf] }
  0x17   : > { %v924_v43 = vld [vmem:[%s1060_s18 + $0x64] sm:$0xf0]  ;;  %v793_v45 = vld [vmem:[%s1060_s18 + $0x28] sm:$0xf0]  ;;  %v925_v46 = vld [vmem:[%s1060_s18 + $0x74] sm:$0xf]  ;;  %v792_v48 = vor.u32 %v916_v41, %v791_v40 }
  0x18   : > { %414 = vmatpush.bf16.msra.mxu0 %v933_v6  ;;  %948 = vmatpush.bf16.msra.mxu2 %v933_v6  ;;  %v833_v47 = vld [vmem:[%s1060_s18 + $0x78] sm:$0xf0]  ;;  %v824_v49 = vor.u32 %v924_v43, %v823_v42  ;;  %v796_v50 = vor.u32 %v915_v44, %v793_v45  ;;  %v799_v52 = vld [vmem:[%s1060_s18 + $0x30] sm:$0xf]  ;;  %v918_v53 = vld [vmem:[%s1060_s18 + $0x34] sm:$0xf0] }
  0x19   : > { %468 = vmatpush.bf16.msra.mxu1 %v941_v7  ;;  %956 = vmatpush.bf16.msra.mxu3 %v941_v7  ;;  %v836_v51 = vor.u32 %v925_v46, %v833_v47  ;;  %v831_v54 = vld [vmem:[%s1060_s18 + $0x70] sm:$0xf]  ;;  %v926_v55 = vld [vmem:[%s1060_s18 + $0x74] sm:$0xf0]  ;;  %v917_v56 = vld [vmem:[%s1060_s18 + $0x34] sm:$0xf]  ;;  %v800_v60 = vor.u32 %v918_v53, %v799_v52 }
  0x1a   : > { %v801_v57 = vld [vmem:[%s1060_s18 + $0x38] sm:$0xf0]  ;;  %v927_v58 = vld [vmem:[%s1060_s18 + $0x84] sm:$0xf]  ;;  %v841_v59 = vld [vmem:[%s1060_s18 + $0x88] sm:$0xf0]  ;;  %v832_v61 = vor.u32 %v926_v55, %v831_v54 }
  0x1b   : > { %v804_v62 = vor.u32 %v917_v56, %v801_v57  ;;  %v844_v63 = vor.u32 %v927_v58, %v841_v59  ;;  %v839_v0 = vld [vmem:[%s1060_s18 + $0x80] sm:$0xf]  ;;  %v928_v1 = vld [vmem:[%s1060_s18 + $0x84] sm:$0xf0]  ;;  %v919_v2 = vld [vmem:[%s1060_s18 + $0x44] sm:$0xf] }
  0x1c   : > { %415 = vmatpush.bf16.msra.mxu0 %v932_v8  ;;  %949 = vmatpush.bf16.msra.mxu2 %v932_v8  ;;  %v809_v3 = vld [vmem:[%s1060_s18 + $0x48] sm:$0xf0]  ;;  %v840_v4 = vor.u32 %v928_v1, %v839_v0  ;;  %v1110_v29 = vld [vmem:[%s1312_s2] ss:$0 sm:$0xff] }
  0x1d   : > { %469 = vmatpush.bf16.msra.mxu1 %v940_v9  ;;  %957 = vmatpush.bf16.msra.mxu3 %v940_v9  ;;  %v812_v5 = vor.u32 %v919_v2, %v809_v3 }
  0x20   : > { %416 = vmatpush.bf16.msra.mxu0 %v931_v10  ;;  %950 = vmatpush.bf16.msra.mxu2 %v931_v10 }
  0x21   : > { %470 = vmatpush.bf16.msra.mxu1 %v939_v11  ;;  %958 = vmatpush.bf16.msra.mxu3 %v939_v11 }
  0x24   : > { %417 = vmatpush.bf16.msra.mxu0 %v930_v12  ;;  %951 = vmatpush.bf16.msra.mxu2 %v930_v12 }
  0x25   : > { %471 = vmatpush.bf16.msra.mxu1 %v938_v13  ;;  %959 = vmatpush.bf16.msra.mxu3 %v938_v13 }
  0x28   : > { %418 = vmatpush.bf16.msra.mxu0 %v929_v14  ;;  %952 = vmatpush.bf16.msra.mxu2 %v929_v14 }
  0x29   : > { %472 = vmatpush.bf16.msra.mxu1 %v937_v15  ;;  %960 = vmatpush.bf16.msra.mxu3 %v937_v15 }
  0x2b   : > { %419 = vmatmul.bf16.vlgmr.msra.gmra.mxu0 %v776_v24  ;;  %439 = vmatmul.bf16.vlgmr.msra.gmra.mxu2 %v808_v25 }
  0x2c   : > { %473 = vmatmul.bf16.vlgmr.msra.gmra.mxu1 %v780_v26  ;;  %498 = vmatmul.bf16.vlgmr.msra.gmra.mxu3 %v820_v27 }
  0x3b   : > { %424 = vmatmul.bf16.gmra.mxu0 %v784_v36  ;;  %444 = vmatmul.bf16.gmra.mxu2 %v816_v37 }
  0x3c   : > { %478 = vmatmul.bf16.gmra.mxu1 %v788_v38  ;;  %503 = vmatmul.bf16.gmra.mxu3 %v828_v39 }
  0x4b   : > { %429 = vmatmul.bf16.gmra.mxu0 %v792_v48  ;;  %449 = vmatmul.bf16.gmra.mxu2 %v824_v49 }
  0x4c   : > { %483 = vmatmul.bf16.gmra.mxu1 %v796_v50  ;;  %508 = vmatmul.bf16.gmra.mxu3 %v836_v51 }
  0x5b   : > { %434 = vmatmul.bf16.gmra.mxu0 %v800_v60  ;;  %454 = vmatmul.bf16.gmra.mxu2 %v832_v61 }
  0x5c   : > { %488 = vmatmul.bf16.gmra.mxu1 %v804_v62  ;;  %513 = vmatmul.bf16.gmra.mxu3 %v844_v63 }
  0x6b   : > { %459 = vmatmul.bf16.gmra.mxu2 %v840_v4 }
  0x6c   : > { %493 = vmatmul.bf16.gmra.mxu1 %v812_v5 }
  0xa8   : > { %v420_v6 = vpop.f32.mrf.mxu0 }
  0xa9   : > { %v474_v7 = vpop.f32.mrf.mxu1  ;;  %v421_v32 = vadd.f32 %v1110_v29, %v420_v6 }
  0xab   : > { %v1118_v39 = vadd.f32 %v474_v7, %v421_v32 }
  0xae   : > { %v440_v8 = vpop.f32.mrf.mxu2 }
  0xaf   : > { %v499_v14 = vpop.f32.mrf.mxu3  ;;  %v441_v57 = vadd.f32 %v1110_v29, %v440_v8 }
  0xb0   : > { %v422_v9 = vpop.f32.mrf.mxu0 }
  0xb1   : > { %v476_v10 = vpop.f32.mrf.mxu1  ;;  %v423_v31 = vadd.f32 %v1110_v29, %v422_v9 }
  0xb3   : > { %v1115_v35 = vadd.f32 %v476_v10, %v423_v31 }
  0xb5   : > { %v519_v42 = vadd.f32 %v1115_v35, %v1118_v39 }
  0xb6   : > { %v442_v11 = vpop.f32.mrf.mxu2 }
  0xb7   : > { %v501_v18 = vpop.f32.mrf.mxu3  ;;  %v443_v62 = vadd.f32 %v1110_v29, %v442_v11 }
  0xb8   : > { %v425_v12 = vpop.f32.mrf.mxu0 }
  0xb9   : > { %v479_v13 = vpop.f32.mrf.mxu1  ;;  %v426_v33 = vadd.f32 %v1110_v29, %v425_v12 }
  0xbb   : > { %v1120_v40 = vadd.f32 %v479_v13, %v426_v33  ;;  %v984_v13 = vmov 144.0  }
  0xbc   : > { %972 = vrcp.f32 %v984_v13 }
  0xbd   : > { %v520_v46 = vadd.f32 %v519_v42, %v1120_v40 }
  0xbe   : > { %v445_v15 = vpop.f32.mrf.mxu2 }
  0xbf   : > { %v504_v22 = vpop.f32.mrf.mxu3  ;;  %v446_v63 = vadd.f32 %v1110_v29, %v445_v15 }
  0xc0   : > { %v427_v16 = vpop.f32.mrf.mxu0 }
  0xc1   : > { %v481_v17 = vpop.f32.mrf.mxu1  ;;  %v428_v36 = vadd.f32 %v1110_v29, %v427_v16  ;;  %v1153_v6 = vadd.f32 %v499_v14, %v446_v63 }
  0xc3   : > { %v1125_v43 = vadd.f32 %v481_v17, %v428_v36 }
  0xc5   : > { %v521_v50 = vadd.f32 %v520_v46, %v1125_v43 }
  0xc6   : > { %v447_v19 = vpop.f32.mrf.mxu2 }
  0xc7   : > { %v506_v27 = vpop.f32.mrf.mxu3  ;;  %v448_v3 = vadd.f32 %v1110_v29, %v447_v19 }
  0xc8   : > { %v430_v20 = vpop.f32.mrf.mxu0 }
  0xc9   : > { %v484_v21 = vpop.f32.mrf.mxu1  ;;  %v431_v41 = vadd.f32 %v1110_v29, %v430_v20  ;;  %v1157_v10 = vadd.f32 %v501_v18, %v448_v3 }
  0xcb   : > { %v1129_v47 = vadd.f32 %v484_v21, %v431_v41  ;;  %v973_v21 = vpop.eup %972 }
  0xcc   : > { %v543_v31 = vmul.f32 144.0, %v973_v21  ;;  %vm547_vm0 = vweird.f32 %v973_v21 }
  0xcd   : > { %v522_v54 = vadd.f32 %v521_v50, %v1129_v47 }
  0xce   : > { %v450_v23 = vpop.f32.mrf.mxu2  ;;  %v544_v36 = vsub.f32 1.0, %v543_v31 }
  0xcf   : > { %v509_v38 = vpop.f32.mrf.mxu3  ;;  %v451_v7 = vadd.f32 %v1110_v29, %v450_v23 }
  0xd0   : > { %v432_v24 = vpop.f32.mrf.mxu0  ;;  %v545_v42 = vmul.f32 %v973_v21, %v544_v36 }
  0xd1   : > { %v486_v25 = vpop.f32.mrf.mxu1  ;;  %v433_v44 = vadd.f32 %v1110_v29, %v432_v24  ;;  %v1161_v15 = vadd.f32 %v504_v22, %v451_v7 }
  0xd3   : > { %v1133_v51 = vadd.f32 %v486_v25, %v433_v44 }
  0xd5   : > { %v523_v58 = vadd.f32 %v522_v54, %v1133_v51 }
  0xd6   : > { %v452_v26 = vpop.f32.mrf.mxu2 }
  0xd7   : > { %v511_v56 = vpop.f32.mrf.mxu3  ;;  %v453_v11 = vadd.f32 %v1110_v29, %v452_v26 }
  0xd8   : > { %v435_v30 = vpop.f32.mrf.mxu0 }
  0xd9   : > { %v489_v28 = vpop.f32.mrf.mxu1  ;;  %v436_v48 = vadd.f32 %v1110_v29, %v435_v30  ;;  %v1165_v17 = vadd.f32 %v506_v27, %v453_v11 }
  0xdb   : > { %v1137_v55 = vadd.f32 %v489_v28, %v436_v48 }
  0xdd   : > { %v524_v60 = vadd.f32 %v523_v58, %v1137_v55 }
  0xde   : > { %v455_v34 = vpop.f32.mrf.mxu2 }
  0xdf   : > { %v514_v9 = vpop.f32.mrf.mxu3  ;;  %v456_v16 = vadd.f32 %v1110_v29, %v455_v34 }
  0xe0   : > { %v437_v45 = vpop.f32.mrf.mxu0 }
  0xe1   : > { %v491_v37 = vpop.f32.mrf.mxu1  ;;  %v438_v52 = vadd.f32 %v1110_v29, %v437_v45  ;;  %v510_v23 = vadd.f32 %v509_v38, %v456_v16  ;;  %v546_v45 = vadd.f32 %v973_v21, %v545_v42 }
  0xe3   : > { %v1141_v59 = vadd.f32 %v491_v37, %v438_v52 }
  0xe5   : > { %v525_v0 = vadd.f32 %v524_v60, %v1141_v59 }
  0xe6   : > { %v457_v49 = vpop.f32.mrf.mxu2 }
  0xe7   : > { %v458_v19 = vadd.f32 %v1110_v29, %v457_v49  ;;  %v516_v30 = vpop.f32.mrf.mxu3  ;;  %v548_v49 = vsel %vm547_vm0, %v973_v21, %v546_v45 }
  0xe9   : > { %v494_v53 = vpop.f32.mrf.mxu1  ;;  %v512_v26 = vadd.f32 %v511_v56, %v458_v19 }
  0xea   : > { %v1144_v61 = vadd.f32 %v494_v53, %v441_v57 }
  0xec   : > { %v526_v4 = vadd.f32 %v525_v0, %v1144_v61 }
  0xee   : > { %v460_v1 = vpop.f32.mrf.mxu2 }
  0xef   : > { %v461_v24 = vadd.f32 %v1110_v29, %v460_v1 }
  0xf1   : > { %v496_v2 = vpop.f32.mrf.mxu1  ;;  %v515_v32 = vadd.f32 %v514_v9, %v461_v24 }
  0xf2   : > { %v1151_v5 = vadd.f32 %v496_v2, %v443_v62 }
  0xf4   : > { %v527_v8 = vadd.f32 %v526_v4, %v1151_v5 }
  0xf6   : > { %v528_v12 = vadd.f32 %v527_v8, %v1153_v6  ;;  %v462_v18 = vpop.f32.mrf.mxu2 }
  0xf7   : > { %v463_v28 = vadd.f32 %v1110_v29, %v462_v18 }
  0xf8   : > { %v529_v14 = vadd.f32 %v528_v12, %v1157_v10 }
  0xf9   : > { %v517_v34 = vadd.f32 %v516_v30, %v463_v28 }
  0xfa   : > { %v530_v20 = vadd.f32 %v529_v14, %v1161_v15 }
  0xfc   : > { %v531_v25 = vadd.f32 %v530_v20, %v1165_v17 }
  0xfe   : > { %v532_v22 = vadd.f32 %v531_v25, %v510_v23 }
 0x100   : > { %v533_v27 = vadd.f32 %v532_v22, %v512_v26 }
 0x102   : > { %v534_v33 = vadd.f32 %v533_v27, %v515_v32 }
 0x104   : > { %v535_v37 = vadd.f32 %v534_v33, %v517_v34 }
 0x106   : > { %v536_v41 = vrot.slane %v535_v37, 4 }
 0x108   : > { %v537_v44 = vadd.f32 %v536_v41, %v535_v37 }
 0x10a   : > { %v538_v38 = vrot.slane %v537_v44, 2 }
 0x10c   : > { %v539_v46 = vadd.f32 %v538_v38, %v537_v44 }
 0x10e   : > { %v540_v48 = vrot.slane %v539_v46, 1 }
 0x110   : > { %v541_v50 = vadd.f32 %v540_v48, %v539_v46 }
 0x112   : > { %v549_v52 = vmul.f32 %v548_v49, %v541_v50 }
 0x114   : > { %v1173_v29 = vsub.f32 %v1118_v39, %v549_v52  ;;  %v1176_v53 = vsub.f32 %v1115_v35, %v549_v52  ;;  %v1179_v54 = vsub.f32 %v1120_v40, %v549_v52  ;;  %v1186_v58 = vsub.f32 %v1125_v43, %v549_v52 }
 0x115   : > { %v1189_v60 = vsub.f32 %v1129_v47, %v549_v52  ;;  %v1194_v62 = vsub.f32 %v1133_v51, %v549_v52  ;;  %v1199_v0 = vsub.f32 %v1137_v55, %v549_v52  ;;  %v1204_v47 = vsub.f32 %v1141_v59, %v549_v52 }
 0x116   : > { %v568_v56 = vmul.f32 %v1173_v29, %v1173_v29  ;;  %v569_v57 = vmul.f32 %v1176_v53, %v1176_v53  ;;  %v570_v39 = vmul.f32 %v1179_v54, %v1179_v54  ;;  %v571_v40 = vmul.f32 %v1186_v58, %v1186_v58 }
 0x117   : > { %v572_v43 = vmul.f32 %v1189_v60, %v1189_v60  ;;  %v573_v2 = vmul.f32 %v1194_v62, %v1194_v62  ;;  %v1209_v51 = vsub.f32 %v1144_v61, %v549_v52  ;;  %v574_v4 = vmul.f32 %v1199_v0, %v1199_v0 }
 0x118   : > { %v586_v35 = vadd.f32 %v569_v57, %v568_v56  ;;  %v1214_v55 = vsub.f32 %v1151_v5, %v549_v52  ;;  %v575_v8 = vmul.f32 %v1204_v47, %v1204_v47  ;;  %v1219_v59 = vsub.f32 %v1153_v6, %v549_v52 }
 0x119   : > { %v576_v11 = vmul.f32 %v1209_v51, %v1209_v51  ;;  %v1224_v61 = vsub.f32 %v1157_v10, %v549_v52  ;;  %v1229_v5 = vsub.f32 %v1161_v15, %v549_v52  ;;  %v1234_v6 = vsub.f32 %v1165_v17, %v549_v52 }
 0x11a   : > { %v587_v63 = vadd.f32 %v586_v35, %v570_v39  ;;  %v577_v13 = vmul.f32 %v1214_v55, %v1214_v55  ;;  %v578_v14 = vmul.f32 %v1219_v59, %v1219_v59  ;;  %v1238_v10 = vsub.f32 %v510_v23, %v549_v52 }
 0x11b   : > { %v579_v20 = vmul.f32 %v1224_v61, %v1224_v61  ;;  %v580_v21 = vmul.f32 %v1229_v5, %v1229_v5  ;;  %v1242_v25 = vsub.f32 %v512_v26, %v549_v52  ;;  %v581_v15 = vmul.f32 %v1234_v6, %v1234_v6 }
 0x11c   : > { %v588_v1 = vadd.f32 %v587_v63, %v571_v40  ;;  %v1246_v28 = vsub.f32 %v515_v32, %v549_v52  ;;  %v582_v17 = vmul.f32 %v1238_v10, %v1238_v10  ;;  %v1250_v31 = vsub.f32 %v517_v34, %v549_v52 }
 0x11d   : > { %v583_v23 = vmul.f32 %v1242_v25, %v1242_v25 }
 0x11e   : > { %v589_v3 = vadd.f32 %v588_v1, %v572_v43  ;;  %v584_v26 = vmul.f32 %v1246_v28, %v1246_v28  ;;  %v585_v36 = vmul.f32 %v1250_v31, %v1250_v31 }
 0x120   : > { %v590_v7 = vadd.f32 %v589_v3, %v573_v2 }
 0x122   : > { %v591_v9 = vadd.f32 %v590_v7, %v574_v4 }
 0x124   : > { %v592_v12 = vadd.f32 %v591_v9, %v575_v8 }
 0x126   : > { %v593_v16 = vadd.f32 %v592_v12, %v576_v11 }
 0x128   : > { %v594_v19 = vadd.f32 %v593_v16, %v577_v13 }
 0x12a   : > { %v595_v18 = vadd.f32 %v594_v19, %v578_v14 }
 0x12c   : > { %v596_v24 = vadd.f32 %v595_v18, %v579_v20 }
 0x12e   : > { %v597_v22 = vadd.f32 %v596_v24, %v580_v21 }
 0x130   : > { %v598_v30 = vadd.f32 %v597_v22, %v581_v15 }
 0x132   : > { %v599_v27 = vadd.f32 %v598_v30, %v582_v17 }
 0x134   : > { %v600_v33 = vadd.f32 %v599_v27, %v583_v23 }
 0x136   : > { %v601_v37 = vadd.f32 %v600_v33, %v584_v26 }
 0x138   : > { %v602_v32 = vadd.f32 %v601_v37, %v585_v36 }
 0x13a   : > { %v603_v41 = vrot.slane %v602_v32, 4 }
 0x13c   : > { %v604_v42 = vadd.f32 %v603_v41, %v602_v32 }
 0x13e   : > { %v605_v44 = vrot.slane %v604_v42, 2 }
 0x140   : > { %v606_v38 = vadd.f32 %v605_v44, %v604_v42 }
 0x142   : > { %v607_v45 = vrot.slane %v606_v38, 1 }
 0x144   : > { %v608_v34 = vadd.f32 %v607_v45, %v606_v38 }
 0x146   : > { %v609_v46 = vmul.f32 %v608_v34, %v548_v49 }
 0x148   : > { %v610_v48 = vadd.f32 1e-05, %v609_v46 }
 0x14a   : > { %974 = vrsqrt.f32 %v610_v48  ;;  %vm617_vm2 = vweird.f32 %v610_v48 }
 0x150   : > { %v975_v50 = vpop.eup %974 }
 0x151   : > { %v612_v52 = vmul.f32 %v975_v50, %v610_v48  ;;  %vm618_vm1 = vweird.f32 %v975_v50 }
 0x152   : > { %vm619_vm3 = vmor %vm617_vm2, %vm618_vm1 }
 0x153   : > { %v613_v56 = vmul.f32 %v975_v50, %v612_v52 }
 0x155   : > { %v614_v57 = vmul.f32 0.5, %v613_v56 }
 0x157   : > { %v615_v39 = vsub.f32 1.5, %v614_v57 }
 0x159   : > { %v616_v35 = vmul.f32 %v975_v50, %v615_v39 }
 0x15b   : > { %v620_v40 = vsel %vm619_vm3, %v975_v50, %v616_v35 }
 0x15c   : > { %v621_v63 = vmul.f32 %v620_v40, %v1173_v29  ;;  %v622_v43 = vmul.f32 %v620_v40, %v1176_v53  ;;  %v623_v1 = vmul.f32 %v620_v40, %v1179_v54  ;;  %v624_v49 = vmul.f32 %v620_v40, %v1186_v58 }
 0x15d   : > { %v625_v2 = vmul.f32 %v620_v40, %v1189_v60  ;;  %v626_v3 = vmul.f32 %v620_v40, %v1194_v62  ;;  %v627_v29 = vmul.f32 %v620_v40, %v1199_v0  ;;  %v628_v58 = vmul.f32 %v620_v40, %v1204_v47 }
 0x15e   : > { %vm639_vm4 = vcmp.ge.f32.partialorder %v621_v63, 0.0  ;;  %vm640_vm5 = vcmp.ge.f32.partialorder %v622_v43, 0.0  ;;  %v657_v53 = vmul.f32 0.2, %v621_v63  ;;  %v658_v4 = vmul.f32 0.2, %v622_v43 }
 0x15f   : > { %v659_v54 = vmul.f32 0.2, %v623_v1  ;;  %vm641_vm6 = vcmp.ge.f32.partialorder %v623_v1, 0.0  ;;  %v660_v60 = vmul.f32 0.2, %v624_v49  ;;  %v629_v62 = vmul.f32 %v620_v40, %v1209_v51 }
 0x160   : > { %vm642_vm7 = vcmp.ge.f32.partialorder %v624_v49, 0.0  ;;  %v661_v7 = vmul.f32 0.2, %v625_v2  ;;  %v675_v8 = vsel %vm639_vm4, %v621_v63, %v657_v53  ;;  %v630_v9 = vmul.f32 %v620_v40, %v1214_v55 }
 0x161   : > { %vm643_vm8 = vcmp.ge.f32.partialorder %v625_v2, 0.0  ;;  %v662_v11 = vmul.f32 0.2, %v626_v3  ;;  %v676_v12 = vsel %vm640_vm5, %v622_v43, %v658_v4  ;;  %693 = vst [vmem:[%s1269_s29] sm:$0xff] %v675_v8  ;;  %v631_v0 = vmul.f32 %v620_v40, %v1219_v59 }
 0x162   : > { %vm644_vm9 = vcmp.ge.f32.partialorder %v626_v3, 0.0  ;;  %v663_v47 = vmul.f32 0.2, %v627_v29  ;;  %v677_v13 = vsel %vm641_vm6, %v623_v1, %v659_v54  ;;  %v632_v16 = vmul.f32 %v620_v40, %v1224_v61  ;;  %694 = vst [vmem:[%s1269_s29 + $0x8] sm:$0xff] %v676_v12 }
 0x163   : > { %vm645_vm10 = vcmp.ge.f32.partialorder %v627_v29, 0.0  ;;  %v664_v51 = vmul.f32 0.2, %v628_v58  ;;  %v678_v14 = vsel %vm642_vm7, %v624_v49, %v660_v60  ;;  %v633_v55 = vmul.f32 %v620_v40, %v1229_v5  ;;  %695 = vst [vmem:[%s1269_s29 + $0x10] sm:$0xff] %v677_v13 }
 0x164   : > { %vm646_vm11 = vcmp.ge.f32.partialorder %v628_v58, 0.0  ;;  %v665_v19 = vmul.f32 0.2, %v629_v62  ;;  %v679_v20 = vsel %vm643_vm8, %v625_v2, %v661_v7  ;;  %v634_v18 = vmul.f32 %v620_v40, %v1234_v6  ;;  %696 = vst [vmem:[%s1269_s29 + $0x18] sm:$0xff] %v678_v14 }
 0x165   : > { %vm647_vm12 = vcmp.ge.f32.partialorder %v629_v62, 0.0  ;;  %v666_v59 = vmul.f32 0.2, %v630_v9  ;;  %v680_v21 = vsel %vm644_vm9, %v626_v3, %v662_v11  ;;  %v635_v61 = vmul.f32 %v620_v40, %v1238_v10  ;;  %697 = vst [vmem:[%s1269_s29 + $0x20] sm:$0xff] %v679_v20 }
 0x166   : > { %vm648_vm13 = vcmp.ge.f32.partialorder %v630_v9, 0.0  ;;  %v667_v24 = vmul.f32 0.2, %v631_v0  ;;  %v681_v15 = vsel %vm645_vm10, %v627_v29, %v663_v47  ;;  %v636_v5 = vmul.f32 %v620_v40, %v1242_v25  ;;  %698 = vst [vmem:[%s1269_s29 + $0x28] sm:$0xff] %v680_v21 }
 0x167   : > { %vm649_vm14 = vcmp.ge.f32.partialorder %v631_v0, 0.0  ;;  %v668_v22 = vmul.f32 0.2, %v632_v16  ;;  %v682_v6 = vsel %vm646_vm11, %v628_v58, %v664_v51  ;;  %v637_v17 = vmul.f32 %v620_v40, %v1246_v28  ;;  %699 = vst [vmem:[%s1269_s29 + $0x30] sm:$0xff] %v681_v15 }
 0x168   : > { %vm650_vm15 = vcmp.ge.f32.partialorder %v632_v16, 0.0  ;;  %v669_v30 = vmul.f32 0.2, %v633_v55  ;;  %v683_v10 = vsel %vm647_vm12, %v629_v62, %v665_v19  ;;  %v638_v23 = vmul.f32 %v620_v40, %v1250_v31  ;;  %700 = vst [vmem:[%s1269_s29 + $0x38] sm:$0xff] %v682_v6 }
 0x169   : > { %vm651_vm0 = vcmp.ge.f32.partialorder %v633_v55, 0.0  ;;  %v670_v27 = vmul.f32 0.2, %v634_v18  ;;  %v684_v25 = vsel %vm648_vm13, %v630_v9, %v666_v59  ;;  %vm652_vm1 = vcmp.ge.f32.partialorder %v634_v18, 0.0  ;;  %701 = vst [vmem:[%s1269_s29 + $0x40] sm:$0xff] %v683_v10 }
 0x16a   : > { %v671_v26 = vmul.f32 0.2, %v635_v61  ;;  %v685_v33 = vsel %vm649_vm14, %v631_v0, %v667_v24  ;;  %vm653_vm2 = vcmp.ge.f32.partialorder %v635_v61, 0.0  ;;  %v672_v28 = vmul.f32 0.2, %v636_v5  ;;  %702 = vst [vmem:[%s1269_s29 + $0x48] sm:$0xff] %v684_v25 }
 0x16b   : > { %v686_v36 = vsel %vm650_vm15, %v632_v16, %v668_v22  ;;  %vm654_vm3 = vcmp.ge.f32.partialorder %v636_v5, 0.0  ;;  %v673_v31 = vmul.f32 0.2, %v637_v17  ;;  %v687_v37 = vsel %vm651_vm0, %v633_v55, %v669_v30  ;;  %703 = vst [vmem:[%s1269_s29 + $0x50] sm:$0xff] %v685_v33 }
 0x16c   : > { %vm655_vm4 = vcmp.ge.f32.partialorder %v637_v17, 0.0  ;;  %v674_v32 = vmul.f32 0.2, %v638_v23  ;;  %v688_v41 = vsel %vm652_vm1, %v634_v18, %v670_v27  ;;  %vm656_vm5 = vcmp.ge.f32.partialorder %v638_v23, 0.0  ;;  %704 = vst [vmem:[%s1269_s29 + $0x58] sm:$0xff] %v686_v36 }
 0x16d   : > { %v689_v42 = vsel %vm653_vm2, %v635_v61, %v671_v26  ;;  %v690_v44 = vsel %vm654_vm3, %v636_v5, %v672_v28  ;;  %705 = vst [vmem:[%s1269_s29 + $0x60] sm:$0xff] %v687_v37  ;;  %v691_v38 = vsel %vm655_vm4, %v637_v17, %v673_v31 }
 0x16e   : > { %706 = vst [vmem:[%s1269_s29 + $0x68] sm:$0xff] %v688_v41  ;;  %v692_v45 = vsel %vm656_vm5, %v638_v23, %v674_v32 }
 0x16f   : > { %707 = vst [vmem:[%s1269_s29 + $0x70] sm:$0xff] %v689_v42 }
 0x170   : > { %708 = vst [vmem:[%s1269_s29 + $0x78] sm:$0xff] %v690_v44 }
 0x171   : > { %709 = vst [vmem:[%s1269_s29 + $0x80] sm:$0xff] %v691_v38 }
 0x172   : > { %710 = vst [vmem:[%s1269_s29 + $0x88] sm:$0xff] %v692_v45 }
 0x173 PF: > { %s13_s12 = sadd.s32 1, %s982_s12  }
 0x174   : > { %p10_p4 = scmp.ge.s32.totalorder %s13_s12, 4  }
 0x176   :  { %12 = sbr.rel (!%p10_p4) target bundleno = 1 (0x1), region = 62 }

// kernel: discriminator_forward.10
= control target key start
LH: loop header
LB: loop body
LE: loop exit
PB: predicated region body
PF: predicated region fallthrough
CT: control target
= control target key end

     0   :  { %s974_s12 = smov 0   ;;  %s1120_s0 = inlined_call_operand.vmem [shape: bf16[2,36,512], index: 0, kind: input, shape index: {}]   ;;  %s1121_s1 = inlined_call_operand.vmem [shape: bf16[512,128], index: 1, kind: input, shape index: {}]   ;;  %s1122_s2 = inlined_call_operand.vmem [shape: f32[1,128], index: 2, kind: input, shape index: {}]   ;;  %s1123_s3 = inlined_call_operand.vmem [shape: f32[2,36,128], index: 3, kind: output, shape index: {}]  }
   0x1 LB: > { %s720_s13 = sadd.s32 4294967295, %s951_s12   ;;  %p724_p0 = scmp.ge.s32.totalorder %s951_s12, 1  ;;  %s951_s12 = sphi %s974_s12, %s13_s12  }
   0x2   : > { %p137_p1 = scmp.lt.s32.totalorder %s951_s12, 3 }
   0x4   : > { %p138_p2 = pnand %p724_p0, %p137_p1 }
   0x5   : > { %p161_p3 = scmp.lt.s32.totalorder (!%p138_p2), %s720_s13, 1 }
   0x6   : > { %141 = sbr.rel (%p138_p2) target bundleno = 287 (0x11f), region = 32 }
   0xb   : > { %v904_v0 = vld [vmem:[%s1121_s1 + $0x38] sm:$0xff]  ;;  %v903_v4 = vld [vmem:[%s1121_s1 + $0x30] sm:$0xff]  ;;  %v902_v8 = vld [vmem:[%s1121_s1 + $0x28] sm:$0xff]  ;;  %s1125_s13 = smov (!%p161_p3, %s720_s13), 1  ;;  %vm590_vm0 = vcmask 1043456  }
   0xc   : > { %v912_v1 = vld [vmem:[%s1121_s1 + $0x78] sm:$0xff]  ;;  %495 = vmatpush.bf16.msra.mxu0 %v904_v0  ;;  %v911_v5 = vld [vmem:[%s1121_s1 + $0x70] sm:$0xff]  ;;  %v910_v9 = vld [vmem:[%s1121_s1 + $0x68] sm:$0xff]  ;;  %s929_s6 = smul.u32 80, %s1125_s13 }
   0xd   : > { %v920_v2 = vld [vmem:[%s1121_s1 + $0xb8] sm:$0xff]  ;;  %518 = vmatpush.bf16.msra.mxu1 %v912_v1  ;;  %v919_v6 = vld [vmem:[%s1121_s1 + $0xb0] sm:$0xff]  ;;  %v918_v10 = vld [vmem:[%s1121_s1 + $0xa8] sm:$0xff]  ;;  %s930_s7 = smul.u32 40, %s1125_s13 }
   0xe   : > { %v928_v3 = vld [vmem:[%s1121_s1 + $0xf8] sm:$0xff]  ;;  %541 = vmatpush.bf16.msra.mxu2 %v920_v2  ;;  %v927_v7 = vld [vmem:[%s1121_s1 + $0xf0] sm:$0xff]  ;;  %v926_v11 = vld [vmem:[%s1121_s1 + $0xe8] sm:$0xff]  ;;  %s1070_s19 = scalar_lea.vmem %s1120_s0, %s929_s6 }
   0xf   : > { %564 = vmatpush.bf16.msra.mxu3 %v928_v3  ;;  %v901_v12 = vld [vmem:[%s1121_s1 + $0x20] sm:$0xff]  ;;  %v900_v16 = vld [vmem:[%s1121_s1 + $0x18] sm:$0xff]  ;;  %v899_v20 = vld [vmem:[%s1121_s1 + $0x10] sm:$0xff]  ;;  %s170_s10 = scalar_lea.vmem %s1123_s3, %s930_s7 }
  0x10   : > { %496 = vmatpush.bf16.msra.mxu0 %v903_v4  ;;  %v909_v13 = vld [vmem:[%s1121_s1 + $0x60] sm:$0xff]  ;;  %v908_v17 = vld [vmem:[%s1121_s1 + $0x58] sm:$0xff]  ;;  %v907_v21 = vld [vmem:[%s1121_s1 + $0x50] sm:$0xff] }
  0x11   : > { %519 = vmatpush.bf16.msra.mxu1 %v911_v5  ;;  %v917_v14 = vld [vmem:[%s1121_s1 + $0xa0] sm:$0xff]  ;;  %v916_v18 = vld [vmem:[%s1121_s1 + $0x98] sm:$0xff]  ;;  %v915_v22 = vld [vmem:[%s1121_s1 + $0x90] sm:$0xff] }
  0x12   : > { %542 = vmatpush.bf16.msra.mxu2 %v919_v6  ;;  %v925_v15 = vld [vmem:[%s1121_s1 + $0xe0] sm:$0xff]  ;;  %v924_v19 = vld [vmem:[%s1121_s1 + $0xd8] sm:$0xff]  ;;  %v923_v23 = vld [vmem:[%s1121_s1 + $0xd0] sm:$0xff] }
  0x13   : > { %565 = vmatpush.bf16.msra.mxu3 %v927_v7  ;;  %v898_v24 = vld [vmem:[%s1121_s1 + $0x8] sm:$0xff]  ;;  %v897_v28 = vld [vmem:[%s1121_s1] sm:$0xff]  ;;  %v891_v33 = vld [vmem:[%s1070_s19 + $0xc] sm:$0xf0] }
  0x14   : > { %497 = vmatpush.bf16.msra.mxu0 %v902_v8  ;;  %v906_v25 = vld [vmem:[%s1121_s1 + $0x48] sm:$0xff]  ;;  %v905_v29 = vld [vmem:[%s1121_s1 + $0x40] sm:$0xff]  ;;  %v731_v35 = vld [vmem:[%s1070_s19 + $0x10] sm:$0xf0] }
  0x15   : > { %520 = vmatpush.bf16.msra.mxu1 %v910_v9  ;;  %v914_v26 = vld [vmem:[%s1121_s1 + $0x88] sm:$0xff]  ;;  %v913_v30 = vld [vmem:[%s1121_s1 + $0x80] sm:$0xff]  ;;  %v892_v37 = vld [vmem:[%s1070_s19 + $0x14] sm:$0xf0] }
  0x16   : > { %543 = vmatpush.bf16.msra.mxu2 %v918_v10  ;;  %v922_v27 = vld [vmem:[%s1121_s1 + $0xc8] sm:$0xff]  ;;  %v921_v31 = vld [vmem:[%s1121_s1 + $0xc0] sm:$0xff]  ;;  %v739_v39 = vld [vmem:[%s1070_s19 + $0x18] sm:$0xf0] }
  0x17   : > { %566 = vmatpush.bf16.msra.mxu3 %v926_v11  ;;  %v729_v32 = vld [vmem:[%s1070_s19] sm:$0xf]  ;;  %v889_v34 = vld [vmem:[%s1070_s19 + $0x4] sm:$0xf]  ;;  %v737_v36 = vld [vmem:[%s1070_s19 + $0x8] sm:$0xf] }
  0x18   : > { %498 = vmatpush.bf16.msra.mxu0 %v901_v12  ;;  %v890_v38 = vld [vmem:[%s1070_s19 + $0xc] sm:$0xf]  ;;  %v730_v40 = vor.u32 %v891_v33, %v729_v32  ;;  %v734_v41 = vor.u32 %v889_v34, %v731_v35  ;;  %v738_v42 = vor.u32 %v892_v37, %v737_v36  ;;  %v745_v44 = vld [vmem:[%s1070_s19 + $0x20] sm:$0xf]  ;;  %v895_v45 = vld [vmem:[%s1070_s19 + $0x2c] sm:$0xf0] }
  0x19   : > { %521 = vmatpush.bf16.msra.mxu1 %v909_v13  ;;  %v742_v43 = vor.u32 %v890_v38, %v739_v39  ;;  %v893_v46 = vld [vmem:[%s1070_s19 + $0x24] sm:$0xf]  ;;  %v747_v47 = vld [vmem:[%s1070_s19 + $0x30] sm:$0xf0]  ;;  %v753_v48 = vld [vmem:[%s1070_s19 + $0x28] sm:$0xf]  ;;  %v746_v52 = vor.u32 %v895_v45, %v745_v44 }
  0x1a   : > { %544 = vmatpush.bf16.msra.mxu2 %v917_v14  ;;  %v896_v49 = vld [vmem:[%s1070_s19 + $0x34] sm:$0xf0]  ;;  %v894_v50 = vld [vmem:[%s1070_s19 + $0x2c] sm:$0xf]  ;;  %v755_v51 = vld [vmem:[%s1070_s19 + $0x38] sm:$0xf0]  ;;  %v750_v53 = vor.u32 %v893_v46, %v747_v47 }
  0x1b   : > { %567 = vmatpush.bf16.msra.mxu3 %v925_v15  ;;  %v754_v54 = vor.u32 %v896_v49, %v753_v48  ;;  %v758_v55 = vor.u32 %v894_v50, %v755_v51  ;;  %v179_v56 = vld [vmem:[%s1070_s19 + $0x40] sm:$0x33]  ;;  %v180_v57 = vld [vmem:[%s1070_s19 + $0x48] sm:$0x33] }
  0x1c   : > { %499 = vmatpush.bf16.msra.mxu0 %v900_v16  ;;  %v275_v58 = vunpack.c.l.b16 %v179_v56  ;;  %v276_v59 = vunpack.c.h.b16 %v179_v56  ;;  %v277_v60 = vunpack.c.l.b16 %v180_v57  ;;  %v278_v61 = vunpack.c.h.b16 %v180_v57  ;;  %v940_v12 = vld [vmem:[%s1122_s2] ss:$0 sm:$0xff] }
  0x1d   : > { %522 = vmatpush.bf16.msra.mxu1 %v908_v17 }
  0x1e   : > { %545 = vmatpush.bf16.msra.mxu2 %v916_v18  ;;  %v287_v62 = vpack.c.b16 %v275_v58, %v275_v58  ;;  %v288_v63 = vpack.c.b16 %v276_v59, %v276_v59  ;;  %v289_v0 = vpack.c.b16 %v277_v60, %v277_v60  ;;  %v290_v1 = vpack.c.b16 %v278_v61, %v278_v61 }
  0x1f   : > { %568 = vmatpush.bf16.msra.mxu3 %v924_v19 }
  0x20   : > { %500 = vmatpush.bf16.msra.mxu0 %v899_v20 }
  0x21   : > { %523 = vmatpush.bf16.msra.mxu1 %v907_v21 }
  0x22   : > { %546 = vmatpush.bf16.msra.mxu2 %v915_v22 }
  0x23   : > { %569 = vmatpush.bf16.msra.mxu3 %v923_v23 }
  0x24   : > { %501 = vmatpush.bf16.msra.mxu0 %v898_v24 }
  0x25   : > { %524 = vmatpush.bf16.msra.mxu1 %v906_v25 }
  0x26   : > { %547 = vmatpush.bf16.msra.mxu2 %v914_v26 }
  0x27   : > { %570 = vmatpush.bf16.msra.mxu3 %v922_v27  ;;  %v953_v27 = vmov 36.0  }
  0x28   : > { %502 = vmatpush.bf16.msra.mxu0 %v897_v28  ;;  %941 = vrcp.f32 %v953_v27 }
  0x29   : > { %525 = vmatpush.bf16.msra.mxu1 %v905_v29 }
  0x2a   : > { %548 = vmatpush.bf16.msra.mxu2 %v913_v30 }
  0x2b   : > { %571 = vmatpush.bf16.msra.mxu3 %v921_v31  ;;  %503 = vmatmul.bf16.vlgmr.msra.gmra.mxu0 %v730_v40 }
  0x2c   : > { %526 = vmatmul.bf16.vlgmr.msra.gmra.mxu1 %v734_v41 }
  0x2d   : > { %549 = vmatmul.bf16.vlgmr.msra.gmra.mxu2 %v738_v42 }
  0x2e   : > { %572 = vmatmul.bf16.vlgmr.msra.gmra.mxu3 %v742_v43  ;;  %v942_v37 = vpop.eup %941 }
  0x2f   : > { %v600_v45 = vmul.f32 36.0, %v942_v37  ;;  %vm604_vm1 = vweird.f32 %v942_v37 }
  0x3b   : > { %508 = vmatmul.bf16.gmra.mxu0 %v746_v52  ;;  %v601_v52 = vsub.f32 1.0, %v600_v45 }
  0x3c   : > { %531 = vmatmul.bf16.gmra.mxu1 %v750_v53 }
  0x3d   : > { %554 = vmatmul.bf16.gmra.mxu2 %v754_v54  ;;  %v602_v57 = vmul.f32 %v942_v37, %v601_v52 }
  0x3e   : > { %577 = vmatmul.bf16.gmra.mxu3 %v758_v55 }
  0x3f   : > { %v603_v60 = vadd.f32 %v942_v37, %v602_v57 }
  0x4b   : > { %513 = vmatmul.bf16.gmra.mxu0 %v287_v62 }
  0x4c   : > { %536 = vmatmul.bf16.gmra.mxu1 %v288_v63  ;;  %v605_v63 = vsel %vm604_vm1, %v942_v37, %v603_v60 }
  0x4d   : > { %559 = vmatmul.bf16.gmra.mxu2 %v289_v0 }
  0x4e   : > { %582 = vmatmul.bf16.gmra.mxu3 %v290_v1 }
  0xa8   : > { %v504_v2 = vpop.f32.mrf.mxu0 }
  0xa9   : > { %v527_v3 = vpop.f32.mrf.mxu1  ;;  %v505_v17 = vadd.f32 %v940_v12, %v504_v2 }
  0xab   : > { %v528_v20 = vadd.f32 %v527_v3, %v505_v17 }
  0xb0   : > { %v550_v4 = vpop.f32.mrf.mxu2  ;;  %v506_v6 = vpop.f32.mrf.mxu0 }
  0xb1   : > { %v573_v5 = vpop.f32.mrf.mxu3  ;;  %v529_v7 = vpop.f32.mrf.mxu1  ;;  %v507_v18 = vadd.f32 %v940_v12, %v506_v6  ;;  %v551_v30 = vadd.f32 %v550_v4, %v528_v20 }
  0xb3   : > { %v530_v21 = vadd.f32 %v529_v7, %v507_v18  ;;  %v574_v38 = vadd.f32 %v573_v5, %v551_v30 }
  0xb8   : > { %v552_v8 = vpop.f32.mrf.mxu2  ;;  %v509_v10 = vpop.f32.mrf.mxu0 }
  0xb9   : > { %v575_v9 = vpop.f32.mrf.mxu3  ;;  %v532_v11 = vpop.f32.mrf.mxu1  ;;  %v510_v19 = vadd.f32 %v940_v12, %v509_v10  ;;  %v553_v24 = vadd.f32 %v552_v8, %v530_v21 }
  0xbb   : > { %v533_v22 = vadd.f32 %v532_v11, %v510_v19  ;;  %v576_v34 = vadd.f32 %v575_v9, %v553_v24 }
  0xbd   : > { %v587_v40 = vadd.f32 %v576_v34, %v574_v38 }
  0xc0   : > { %v555_v13 = vpop.f32.mrf.mxu2  ;;  %v511_v15 = vpop.f32.mrf.mxu0 }
  0xc1   : > { %v578_v14 = vpop.f32.mrf.mxu3  ;;  %v534_v16 = vpop.f32.mrf.mxu1  ;;  %v512_v23 = vadd.f32 %v940_v12, %v511_v15  ;;  %v556_v31 = vadd.f32 %v555_v13, %v533_v22 }
  0xc3   : > { %v535_v32 = vadd.f32 %v534_v16, %v512_v23  ;;  %v579_v39 = vadd.f32 %v578_v14, %v556_v31 }
  0xc5   : > { %v588_v48 = vadd.f32 %v587_v40, %v579_v39 }
  0xc8   : > { %v557_v25 = vpop.f32.mrf.mxu2  ;;  %v514_v28 = vpop.f32.mrf.mxu0 }
  0xc9   : > { %v580_v26 = vpop.f32.mrf.mxu3  ;;  %v537_v29 = vpop.f32.mrf.mxu1  ;;  %v515_v33 = vadd.f32 %v940_v12, %v514_v28  ;;  %v558_v35 = vadd.f32 %v557_v25, %v535_v32 }
  0xcb   : > { %v538_v36 = vadd.f32 %v537_v29, %v515_v33  ;;  %v581_v41 = vadd.f32 %v580_v26, %v558_v35 }
  0xcd   : > { %v589_v50 = vadd.f32 %v588_v48, %v581_v41 }
  0xd0   : > { %v560_v42 = vpop.f32.mrf.mxu2  ;;  %v516_v46 = vpop.f32.mrf.mxu0 }
  0xd1   : > { %v583_v43 = vpop.f32.mrf.mxu3  ;;  %v561_v44 = vadd.f32 %v560_v42, %v538_v36  ;;  %v539_v47 = vpop.f32.mrf.mxu1 }
  0xd3   : > { %v584_v49 = vadd.f32 %v583_v43, %v561_v44 }
  0xd5   : > { %v591_v51 = vsel %vm590_vm0, %v584_v49, 0.0 }
  0xd6   : > { %v592_v53 = vadd.f32 %v591_v51, %v589_v50 }
  0xd8   : > { %v593_v54 = vrot.slane %v592_v53, 4  ;;  %v562_v55 = vpop.f32.mrf.mxu2 }
  0xd9   : > { %v585_v56 = vpop.f32.mrf.mxu3 }
  0xda   : > { %v594_v58 = vadd.f32 %v593_v54, %v592_v53 }
  0xdc   : > { %v595_v59 = vrot.slane %v594_v58, 2 }
  0xde   : > { %v596_v61 = vadd.f32 %v595_v59, %v594_v58 }
  0xe0   : > { %v597_v62 = vrot.slane %v596_v61, 1 }
  0xe2   : > { %v598_v0 = vadd.f32 %v597_v62, %v596_v61 }
  0xe4   : > { %v606_v1 = vmul.f32 %v605_v63, %v598_v0 }
  0xe6   : > { %v607_v2 = vsub.f32 %v574_v38, %v606_v1  ;;  %v608_v3 = vsub.f32 %v576_v34, %v606_v1  ;;  %v609_v4 = vsub.f32 %v579_v39, %v606_v1  ;;  %v611_v5 = vsub.f32 %v584_v49, %v606_v1 }
  0xe7   : > { %v610_v6 = vsub.f32 %v581_v41, %v606_v1 }
  0xe8   : > { %v612_v7 = vmul.f32 %v607_v2, %v607_v2  ;;  %v613_v8 = vmul.f32 %v608_v3, %v608_v3  ;;  %v614_v9 = vmul.f32 %v609_v4, %v609_v4  ;;  %v616_v11 = vmul.f32 %v611_v5, %v611_v5 }
  0xe9   : > { %v615_v12 = vmul.f32 %v610_v6, %v610_v6 }
  0xea   : > { %v617_v10 = vadd.f32 %v613_v8, %v612_v7  ;;  %v620_v15 = vsel %vm590_vm0, %v616_v11, 0.0 }
  0xec   : > { %v618_v13 = vadd.f32 %v617_v10, %v614_v9 }
  0xee   : > { %v619_v14 = vadd.f32 %v618_v13, %v615_v12 }
  0xf0   : > { %v621_v16 = vadd.f32 %v620_v15, %v619_v14 }
  0xf2   : > { %v622_v17 = vrot.slane %v621_v16, 4 }
  0xf4   : > { %v623_v18 = vadd.f32 %v622_v17, %v621_v16 }
  0xf6   : > { %v624_v19 = vrot.slane %v623_v18, 2 }
  0xf8   : > { %v625_v20 = vadd.f32 %v624_v19, %v623_v18 }
  0xfa   : > { %v626_v21 = vrot.slane %v625_v20, 1 }
  0xfc   : > { %v627_v22 = vadd.f32 %v626_v21, %v625_v20 }
  0xfe   : > { %v628_v23 = vmul.f32 %v627_v22, %v605_v63 }
 0x100   : > { %v629_v24 = vadd.f32 1e-05, %v628_v23 }
 0x102   : > { %943 = vrsqrt.f32 %v629_v24  ;;  %vm636_vm3 = vweird.f32 %v629_v24 }
 0x108   : > { %v944_v25 = vpop.eup %943 }
 0x109   : > { %v631_v26 = vmul.f32 %v944_v25, %v629_v24  ;;  %vm637_vm2 = vweird.f32 %v944_v25 }
 0x10a   : > { %vm638_vm4 = vmor %vm636_vm3, %vm637_vm2 }
 0x10b   : > { %v632_v27 = vmul.f32 %v944_v25, %v631_v26 }
 0x10d   : > { %v633_v28 = vmul.f32 0.5, %v632_v27 }
 0x10f   : > { %v634_v29 = vsub.f32 1.5, %v633_v28 }
 0x111   : > { %v635_v30 = vmul.f32 %v944_v25, %v634_v29 }
 0x113   : > { %v639_v31 = vsel %vm638_vm4, %v944_v25, %v635_v30 }
 0x114   : > { %v640_v32 = vmul.f32 %v639_v31, %v607_v2  ;;  %v641_v33 = vmul.f32 %v639_v31, %v608_v3  ;;  %v642_v34 = vmul.f32 %v639_v31, %v609_v4  ;;  %v643_v35 = vmul.f32 %v639_v31, %v610_v6 }
 0x115   : > { %v644_v36 = vmul.f32 %v639_v31, %v611_v5 }
 0x116   : > { %vm645_vm5 = vcmp.ge.f32.partialorder %v640_v32, 0.0  ;;  %vm646_vm6 = vcmp.ge.f32.partialorder %v641_v33, 0.0  ;;  %vm647_vm7 = vcmp.ge.f32.partialorder %v642_v34, 0.0  ;;  %vm648_vm8 = vcmp.ge.f32.partialorder %v643_v35, 0.0 }
 0x117   : > { %vm649_vm9 = vcmp.ge.f32.partialorder %v644_v36, 0.0  ;;  %v650_v37 = vmul.f32 0.2, %v640_v32  ;;  %v651_v38 = vmul.f32 0.2, %v641_v33 }
 0x118   : > { %v652_v39 = vmul.f32 0.2, %v642_v34  ;;  %v653_v40 = vmul.f32 0.2, %v643_v35  ;;  %v654_v41 = vmul.f32 0.2, %v644_v36 }
 0x119   : > { %v655_v42 = vsel %vm645_vm5, %v640_v32, %v650_v37  ;;  %v656_v43 = vsel %vm646_vm6, %v641_v33, %v651_v38 }
 0x11a   : > { %v657_v44 = vsel %vm647_vm7, %v642_v34, %v652_v39  ;;  %v658_v45 = vsel %vm648_vm8, %v643_v35, %v653_v40  ;;  %660 = vst [vmem:[%s170_s10] sm:$0xff] %v655_v42  ;;  %v659_v46 = vsel %vm649_vm9, %v644_v36, %v654_v41 }
 0x11b   : > { %661 = vst [vmem:[%s170_s10 + $0x8] sm:$0xff] %v656_v43 }
 0x11c   : > { %662 = vst [vmem:[%s170_s10 + $0x10] sm:$0xff] %v657_v44 }
 0x11d   : > { %663 = vst [vmem:[%s170_s10 + $0x18] sm:$0xff] %v658_v45 }
 0x11e   : > { %664 = vst [vmem:[%s170_s10 + $0x20] sm:$0xf] %v659_v46 }
 0x11f PF: > { %s13_s12 = sadd.s32 1, %s951_s12  }
 0x120   : > { %p10_p4 = scmp.ge.s32.totalorder %s13_s12, 4  }
 0x122   :  { %12 = sbr.rel (!%p10_p4) target bundleno = 1 (0x1), region = 62 }

// kernel: discriminator_forward.11
= control target key start
LH: loop header
LB: loop body
LE: loop exit
PB: predicated region body
PF: predicated region fallthrough
CT: control target
= control target key end

     0   :  { %s1369_s12 = smov 0   ;;  %s1609_s0 = inlined_call_operand.vmem [shape: bf16[2,9,1024], index: 0, kind: input, shape index: {}]   ;;  %s1610_s1 = inlined_call_operand.vmem [shape: bf16[1024,128], index: 1, kind: input, shape index: {}]   ;;  %s1611_s2 = inlined_call_operand.vmem [shape: f32[1,128], index: 2, kind: input, shape index: {}]   ;;  %s1612_s3 = inlined_call_operand.vmem [shape: f32[2,9,128], index: 3, kind: output, shape index: {}]  }
   0x1 LB: > { %s953_s13 = sadd.s32 4294967295, %s1346_s12   ;;  %p957_p0 = scmp.ge.s32.totalorder %s1346_s12, 1  ;;  %s1346_s12 = sphi %s1369_s12, %s13_s12  }
   0x2   : > { %p137_p1 = scmp.lt.s32.totalorder %s1346_s12, 3 }
   0x4   : > { %p138_p2 = pnand %p957_p0, %p137_p1 }
   0x5   : > { %p161_p3 = scmp.lt.s32.totalorder (!%p138_p2), %s953_s13, 1 }
   0x6   : > { %141 = sbr.rel (%p138_p2) target bundleno = 286 (0x11e), region = 32 }
   0xb   : > { %v1269_v0 = vld [vmem:[%s1610_s1 + $0x38] sm:$0xff]  ;;  %v1268_v4 = vld [vmem:[%s1610_s1 + $0x30] sm:$0xff]  ;;  %v1267_v8 = vld [vmem:[%s1610_s1 + $0x28] sm:$0xff]  ;;  %s1614_s13 = smov (!%p161_p3, %s953_s13), 1  ;;  %vm847_vm0 = vcmask 1040384  }
   0xc   : > { %v1277_v1 = vld [vmem:[%s1610_s1 + $0x78] sm:$0xff]  ;;  %735 = vmatpush.bf16.msra.mxu0 %v1269_v0  ;;  %v1276_v5 = vld [vmem:[%s1610_s1 + $0x70] sm:$0xff]  ;;  %v1275_v9 = vld [vmem:[%s1610_s1 + $0x68] sm:$0xff]  ;;  %s1252_s10 = sshll.u32 %s1614_s13, 6 }
   0xd   : > { %v1285_v2 = vld [vmem:[%s1610_s1 + $0xb8] sm:$0xff]  ;;  %749 = vmatpush.bf16.msra.mxu1 %v1277_v1  ;;  %v1284_v6 = vld [vmem:[%s1610_s1 + $0xb0] sm:$0xff]  ;;  %v1283_v10 = vld [vmem:[%s1610_s1 + $0xa8] sm:$0xff]  ;;  %s1471_s23 = scalar_lea.vmem %s1609_s0, %s1252_s10 }
   0xe   : > { %v1293_v3 = vld [vmem:[%s1610_s1 + $0xf8] sm:$0xff]  ;;  %763 = vmatpush.bf16.msra.mxu2 %v1285_v2  ;;  %v1292_v7 = vld [vmem:[%s1610_s1 + $0xf0] sm:$0xff]  ;;  %v1291_v11 = vld [vmem:[%s1610_s1 + $0xe8] sm:$0xff] }
   0xf   : > { %777 = vmatpush.bf16.msra.mxu3 %v1293_v3  ;;  %v1266_v12 = vld [vmem:[%s1610_s1 + $0x20] sm:$0xff]  ;;  %v1265_v16 = vld [vmem:[%s1610_s1 + $0x18] sm:$0xff]  ;;  %v1264_v20 = vld [vmem:[%s1610_s1 + $0x10] sm:$0xff] }
  0x10   : > { %736 = vmatpush.bf16.msra.mxu0 %v1268_v4  ;;  %v1274_v13 = vld [vmem:[%s1610_s1 + $0x60] sm:$0xff]  ;;  %v1273_v17 = vld [vmem:[%s1610_s1 + $0x58] sm:$0xff]  ;;  %v1272_v21 = vld [vmem:[%s1610_s1 + $0x50] sm:$0xff] }
  0x11   : > { %750 = vmatpush.bf16.msra.mxu1 %v1276_v5  ;;  %v1282_v14 = vld [vmem:[%s1610_s1 + $0xa0] sm:$0xff]  ;;  %v1281_v18 = vld [vmem:[%s1610_s1 + $0x98] sm:$0xff]  ;;  %v1280_v22 = vld [vmem:[%s1610_s1 + $0x90] sm:$0xff] }
  0x12   : > { %764 = vmatpush.bf16.msra.mxu2 %v1284_v6  ;;  %v1290_v15 = vld [vmem:[%s1610_s1 + $0xe0] sm:$0xff]  ;;  %v1289_v19 = vld [vmem:[%s1610_s1 + $0xd8] sm:$0xff]  ;;  %v1288_v23 = vld [vmem:[%s1610_s1 + $0xd0] sm:$0xff] }
  0x13   : > { %778 = vmatpush.bf16.msra.mxu3 %v1292_v7  ;;  %v1263_v24 = vld [vmem:[%s1610_s1 + $0x8] sm:$0xff]  ;;  %v1262_v28 = vld [vmem:[%s1610_s1] sm:$0xff]  ;;  %v1301_v32 = vld [vmem:[%s1610_s1 + $0x138] sm:$0xff] }
  0x14   : > { %737 = vmatpush.bf16.msra.mxu0 %v1267_v8  ;;  %v1271_v25 = vld [vmem:[%s1610_s1 + $0x48] sm:$0xff]  ;;  %v1270_v29 = vld [vmem:[%s1610_s1 + $0x40] sm:$0xff]  ;;  %v1309_v33 = vld [vmem:[%s1610_s1 + $0x178] sm:$0xff] }
  0x15   : > { %751 = vmatpush.bf16.msra.mxu1 %v1275_v9  ;;  %v1279_v26 = vld [vmem:[%s1610_s1 + $0x88] sm:$0xff]  ;;  %v1278_v30 = vld [vmem:[%s1610_s1 + $0x80] sm:$0xff]  ;;  %v1317_v42 = vld [vmem:[%s1610_s1 + $0x1b8] sm:$0xff] }
  0x16   : > { %765 = vmatpush.bf16.msra.mxu2 %v1283_v10  ;;  %v1287_v27 = vld [vmem:[%s1610_s1 + $0xc8] sm:$0xff]  ;;  %v1286_v31 = vld [vmem:[%s1610_s1 + $0xc0] sm:$0xff]  ;;  %v1325_v43 = vld [vmem:[%s1610_s1 + $0x1f8] sm:$0xff] }
  0x17   : > { %779 = vmatpush.bf16.msra.mxu3 %v1291_v11  ;;  %v972_v34 = vld [vmem:[%s1471_s23 + $0x8] sm:$0xf]  ;;  %v964_v36 = vld [vmem:[%s1471_s23] sm:$0xf]  ;;  %v1255_v38 = vld [vmem:[%s1471_s23 + $0xc] sm:$0xf] }
  0x18   : > { %738 = vmatpush.bf16.msra.mxu0 %v1266_v12  ;;  %v1259_v35 = vld [vmem:[%s1471_s23 + $0x24] sm:$0x10]  ;;  %v1258_v37 = vld [vmem:[%s1471_s23 + $0x1c] sm:$0x10]  ;;  %v974_v39 = vld [vmem:[%s1471_s23 + $0x28] sm:$0x10] }
  0x19   : > { %752 = vmatpush.bf16.msra.mxu1 %v1274_v13  ;;  %v1254_v40 = vld [vmem:[%s1471_s23 + $0x4] sm:$0xf]  ;;  %v973_v44 = vor.u32 %v1259_v35, %v972_v34  ;;  %v965_v45 = vor.u32 %v1258_v37, %v964_v36  ;;  %v977_v46 = vor.u32 %v1255_v38, %v974_v39  ;;  %v1300_v48 = vld [vmem:[%s1610_s1 + $0x130] sm:$0xff]  ;;  %v1299_v52 = vld [vmem:[%s1610_s1 + $0x128] sm:$0xff] }
  0x1a   : > { %766 = vmatpush.bf16.msra.mxu2 %v1282_v14  ;;  %v966_v41 = vld [vmem:[%s1471_s23 + $0x20] sm:$0x10]  ;;  %v1308_v49 = vld [vmem:[%s1610_s1 + $0x170] sm:$0xff]  ;;  %v1307_v53 = vld [vmem:[%s1610_s1 + $0x168] sm:$0xff] }
  0x1b   : > { %780 = vmatpush.bf16.msra.mxu3 %v1290_v15  ;;  %v969_v47 = vor.u32 %v1254_v40, %v966_v41  ;;  %v1316_v50 = vld [vmem:[%s1610_s1 + $0x1b0] sm:$0xff]  ;;  %v1315_v54 = vld [vmem:[%s1610_s1 + $0x1a8] sm:$0xff]  ;;  %v1298_v56 = vld [vmem:[%s1610_s1 + $0x120] sm:$0xff] }
  0x1c   : > { %739 = vmatpush.bf16.msra.mxu0 %v1265_v16  ;;  %v1324_v51 = vld [vmem:[%s1610_s1 + $0x1f0] sm:$0xff]  ;;  %v1323_v55 = vld [vmem:[%s1610_s1 + $0x1e8] sm:$0xff]  ;;  %v1306_v57 = vld [vmem:[%s1610_s1 + $0x160] sm:$0xff] }
  0x1d   : > { %753 = vmatpush.bf16.msra.mxu1 %v1273_v17  ;;  %v1314_v58 = vld [vmem:[%s1610_s1 + $0x1a0] sm:$0xff]  ;;  %v1297_v60 = vld [vmem:[%s1610_s1 + $0x118] sm:$0xff]  ;;  %v1296_v0 = vld [vmem:[%s1610_s1 + $0x110] sm:$0xff] }
  0x1e   : > { %767 = vmatpush.bf16.msra.mxu2 %v1281_v18  ;;  %v1322_v59 = vld [vmem:[%s1610_s1 + $0x1e0] sm:$0xff]  ;;  %v1305_v61 = vld [vmem:[%s1610_s1 + $0x158] sm:$0xff]  ;;  %v1304_v1 = vld [vmem:[%s1610_s1 + $0x150] sm:$0xff] }
  0x1f   : > { %781 = vmatpush.bf16.msra.mxu3 %v1289_v19  ;;  %v1313_v62 = vld [vmem:[%s1610_s1 + $0x198] sm:$0xff]  ;;  %v1312_v2 = vld [vmem:[%s1610_s1 + $0x190] sm:$0xff]  ;;  %v1295_v4 = vld [vmem:[%s1610_s1 + $0x108] sm:$0xff] }
  0x20   : > { %740 = vmatpush.bf16.msra.mxu0 %v1264_v20  ;;  %v1321_v63 = vld [vmem:[%s1610_s1 + $0x1d8] sm:$0xff]  ;;  %v1320_v3 = vld [vmem:[%s1610_s1 + $0x1d0] sm:$0xff]  ;;  %v1303_v5 = vld [vmem:[%s1610_s1 + $0x148] sm:$0xff] }
  0x21   : > { %754 = vmatpush.bf16.msra.mxu1 %v1272_v21  ;;  %v1311_v6 = vld [vmem:[%s1610_s1 + $0x188] sm:$0xff]  ;;  %v1294_v8 = vld [vmem:[%s1610_s1 + $0x100] sm:$0xff]  ;;  %v980_v12 = vld [vmem:[%s1471_s23 + $0x10] sm:$0xf] }
  0x22   : > { %768 = vmatpush.bf16.msra.mxu2 %v1280_v22  ;;  %v1319_v7 = vld [vmem:[%s1610_s1 + $0x1c8] sm:$0xff]  ;;  %v1302_v9 = vld [vmem:[%s1610_s1 + $0x140] sm:$0xff]  ;;  %v1260_v13 = vld [vmem:[%s1471_s23 + $0x2c] sm:$0x10] }
  0x23   : > { %782 = vmatpush.bf16.msra.mxu3 %v1288_v23  ;;  %v1310_v10 = vld [vmem:[%s1610_s1 + $0x180] sm:$0xff]  ;;  %v1256_v14 = vld [vmem:[%s1471_s23 + $0x14] sm:$0xf]  ;;  %v988_v16 = vld [vmem:[%s1471_s23 + $0x18] sm:$0xf]  ;;  %v981_v20 = vor.u32 %v1260_v13, %v980_v12 }
  0x24   : > { %741 = vmatpush.bf16.msra.mxu0 %v1263_v24  ;;  %v1318_v11 = vld [vmem:[%s1610_s1 + $0x1c0] sm:$0xff]  ;;  %v982_v15 = vld [vmem:[%s1471_s23 + $0x30] sm:$0x10]  ;;  %v1261_v17 = vld [vmem:[%s1471_s23 + $0x34] sm:$0x10] }
  0x25   : > { %755 = vmatpush.bf16.msra.mxu1 %v1271_v25  ;;  %v1257_v18 = vld [vmem:[%s1471_s23 + $0x1c] sm:$0xf]  ;;  %v985_v21 = vor.u32 %v1256_v14, %v982_v15  ;;  %v989_v22 = vor.u32 %v1261_v17, %v988_v16 }
  0x26   : > { %769 = vmatpush.bf16.msra.mxu2 %v1279_v26  ;;  %v990_v19 = vld [vmem:[%s1471_s23 + $0x38] sm:$0x10]  ;;  %s1253_s23 = sshll.u32 %s1614_s13, 4 }
  0x27   : > { %783 = vmatpush.bf16.msra.mxu3 %v1287_v27  ;;  %v993_v23 = vor.u32 %v1257_v18, %v990_v19  ;;  %s170_s28 = scalar_lea.vmem %s1612_s3, %s1253_s23 }
  0x28   : > { %742 = vmatpush.bf16.msra.mxu0 %v1262_v28  ;;  %v1335_v28 = vld [vmem:[%s1611_s2] ss:$0 sm:$0xff] }
  0x29   : > { %756 = vmatpush.bf16.msra.mxu1 %v1270_v29 }
  0x2a   : > { %770 = vmatpush.bf16.msra.mxu2 %v1278_v30 }
  0x2b   : > { %784 = vmatpush.bf16.msra.mxu3 %v1286_v31  ;;  %743 = vmatmul.bf16.vlgmr.msra.gmra.mxu0 %v965_v45 }
  0x2c   : > { %791 = vmatpush.bf16.msrb.mxu0 %v1301_v32  ;;  %757 = vmatmul.bf16.vlgmr.msra.gmra.mxu1 %v969_v47 }
  0x2d   : > { %805 = vmatpush.bf16.msrb.mxu1 %v1309_v33  ;;  %771 = vmatmul.bf16.vlgmr.msra.gmra.mxu2 %v973_v44  ;;  %v1348_v44 = vmov 9.0  }
  0x2e   : > { %819 = vmatpush.bf16.msrb.mxu2 %v1317_v42  ;;  %785 = vmatmul.bf16.vlgmr.msra.gmra.mxu3 %v977_v46  ;;  %1336 = vrcp.f32 %v1348_v44 }
  0x2f   : > { %833 = vmatpush.bf16.msrb.mxu3 %v1325_v43 }
  0x30   : > { %792 = vmatpush.bf16.msrb.mxu0 %v1300_v48 }
  0x31   : > { %806 = vmatpush.bf16.msrb.mxu1 %v1308_v49 }
  0x32   : > { %820 = vmatpush.bf16.msrb.mxu2 %v1316_v50 }
  0x33   : > { %834 = vmatpush.bf16.msrb.mxu3 %v1324_v51 }
  0x34   : > { %793 = vmatpush.bf16.msrb.mxu0 %v1299_v52  ;;  %v1337_v49 = vpop.eup %1336 }
  0x35   : > { %807 = vmatpush.bf16.msrb.mxu1 %v1307_v53  ;;  %vm861_vm1 = vweird.f32 %v1337_v49 }
  0x36   : > { %821 = vmatpush.bf16.msrb.mxu2 %v1315_v54 }
  0x37   : > { %835 = vmatpush.bf16.msrb.mxu3 %v1323_v55 }
  0x38   : > { %794 = vmatpush.bf16.msrb.mxu0 %v1298_v56  ;;  %v857_v56 = vmul.f32 9.0, %v1337_v49 }
  0x39   : > { %808 = vmatpush.bf16.msrb.mxu1 %v1306_v57 }
  0x3a   : > { %822 = vmatpush.bf16.msrb.mxu2 %v1314_v58 }
  0x3b   : > { %836 = vmatpush.bf16.msrb.mxu3 %v1322_v59 }
  0x3c   : > { %795 = vmatpush.bf16.msrb.mxu0 %v1297_v60 }
  0x3d   : > { %809 = vmatpush.bf16.msrb.mxu1 %v1305_v61  ;;  %v858_v61 = vsub.f32 1.0, %v857_v56 }
  0x3e   : > { %823 = vmatpush.bf16.msrb.mxu2 %v1313_v62 }
  0x3f   : > { %837 = vmatpush.bf16.msrb.mxu3 %v1321_v63 }
  0x40   : > { %796 = vmatpush.bf16.msrb.mxu0 %v1296_v0  ;;  %v859_v0 = vmul.f32 %v1337_v49, %v858_v61 }
  0x41   : > { %810 = vmatpush.bf16.msrb.mxu1 %v1304_v1 }
  0x42   : > { %824 = vmatpush.bf16.msrb.mxu2 %v1312_v2 }
  0x43   : > { %838 = vmatpush.bf16.msrb.mxu3 %v1320_v3  ;;  %v860_v3 = vadd.f32 %v1337_v49, %v859_v0 }
  0x44   : > { %797 = vmatpush.bf16.msrb.mxu0 %v1295_v4 }
  0x45   : > { %811 = vmatpush.bf16.msrb.mxu1 %v1303_v5 }
  0x46   : > { %825 = vmatpush.bf16.msrb.mxu2 %v1311_v6  ;;  %v862_v6 = vsel %vm861_vm1, %v1337_v49, %v860_v3 }
  0x47   : > { %839 = vmatpush.bf16.msrb.mxu3 %v1319_v7 }
  0x48   : > { %798 = vmatpush.bf16.msrb.mxu0 %v1294_v8 }
  0x49   : > { %812 = vmatpush.bf16.msrb.mxu1 %v1302_v9 }
  0x4a   : > { %826 = vmatpush.bf16.msrb.mxu2 %v1310_v10 }
  0x4b   : > { %840 = vmatpush.bf16.msrb.mxu3 %v1318_v11  ;;  %799 = vmatmul.bf16.vlgmr.msrb.gmra.mxu0 %v981_v20 }
  0x4c   : > { %813 = vmatmul.bf16.vlgmr.msrb.gmra.mxu1 %v985_v21 }
  0x4d   : > { %827 = vmatmul.bf16.vlgmr.msrb.gmra.mxu2 %v989_v22 }
  0x4e   : > { %841 = vmatmul.bf16.vlgmr.msrb.gmra.mxu3 %v993_v23 }
  0xa8   : > { %v744_v24 = vpop.f32.mrf.mxu0 }
  0xa9   : > { %v758_v25 = vpop.f32.mrf.mxu1  ;;  %v745_v30 = vadd.f32 %v1335_v28, %v744_v24 }
  0xab   : > { %v759_v33 = vadd.f32 %v758_v25, %v745_v30 }
  0xb0   : > { %v772_v26 = vpop.f32.mrf.mxu2  ;;  %v746_v29 = vpop.f32.mrf.mxu0 }
  0xb1   : > { %v786_v27 = vpop.f32.mrf.mxu3  ;;  %v760_v31 = vpop.f32.mrf.mxu1  ;;  %v747_v32 = vadd.f32 %v1335_v28, %v746_v29  ;;  %v773_v38 = vadd.f32 %v772_v26, %v759_v33 }
  0xb3   : > { %v761_v36 = vadd.f32 %v760_v31, %v747_v32  ;;  %v787_v41 = vadd.f32 %v786_v27, %v773_v38 }
  0xb8   : > { %v774_v34 = vpop.f32.mrf.mxu2 }
  0xb9   : > { %v788_v35 = vpop.f32.mrf.mxu3  ;;  %v775_v40 = vadd.f32 %v774_v34, %v761_v36 }
  0xbb   : > { %v789_v45 = vadd.f32 %v788_v35, %v775_v40 }
  0xc8   : > { %v800_v37 = vpop.f32.mrf.mxu0 }
  0xc9   : > { %v814_v39 = vpop.f32.mrf.mxu1  ;;  %v801_v47 = vadd.f32 %v800_v37, %v787_v41 }
  0xcb   : > { %v815_v50 = vadd.f32 %v814_v39, %v801_v47 }
  0xd0   : > { %v828_v42 = vpop.f32.mrf.mxu2  ;;  %v802_v46 = vpop.f32.mrf.mxu0 }
  0xd1   : > { %v842_v43 = vpop.f32.mrf.mxu3  ;;  %v803_v48 = vadd.f32 %v802_v46, %v789_v45  ;;  %v816_v51 = vpop.f32.mrf.mxu1  ;;  %v829_v53 = vadd.f32 %v828_v42, %v815_v50 }
  0xd3   : > { %v817_v52 = vadd.f32 %v816_v51, %v803_v48  ;;  %v843_v59 = vadd.f32 %v842_v43, %v829_v53 }
  0xd8   : > { %v830_v54 = vpop.f32.mrf.mxu2 }
  0xd9   : > { %v831_v55 = vadd.f32 %v830_v54, %v817_v52  ;;  %v844_v57 = vpop.f32.mrf.mxu3 }
  0xdb   : > { %v845_v58 = vadd.f32 %v844_v57, %v831_v55 }
  0xdd   : > { %v848_v60 = vsel %vm847_vm0, %v845_v58, 0.0 }
  0xde   : > { %v849_v62 = vadd.f32 %v848_v60, %v843_v59 }
  0xe0   : > { %v850_v63 = vrot.slane %v849_v62, 4 }
  0xe2   : > { %v851_v1 = vadd.f32 %v850_v63, %v849_v62 }
  0xe4   : > { %v852_v2 = vrot.slane %v851_v1, 2 }
  0xe6   : > { %v853_v4 = vadd.f32 %v852_v2, %v851_v1 }
  0xe8   : > { %v854_v5 = vrot.slane %v853_v4, 1 }
  0xea   : > { %v855_v7 = vadd.f32 %v854_v5, %v853_v4 }
  0xec   : > { %v863_v8 = vmul.f32 %v862_v6, %v855_v7 }
  0xee   : > { %v864_v9 = vsub.f32 %v843_v59, %v863_v8  ;;  %v865_v10 = vsub.f32 %v845_v58, %v863_v8 }
  0xf0   : > { %v866_v11 = vmul.f32 %v864_v9, %v864_v9  ;;  %v867_v12 = vmul.f32 %v865_v10, %v865_v10 }
  0xf2   : > { %v868_v13 = vsel %vm847_vm0, %v867_v12, 0.0 }
  0xf3   : > { %v869_v14 = vadd.f32 %v868_v13, %v866_v11 }
  0xf5   : > { %v870_v15 = vrot.slane %v869_v14, 4 }
  0xf7   : > { %v871_v16 = vadd.f32 %v870_v15, %v869_v14 }
  0xf9   : > { %v872_v17 = vrot.slane %v871_v16, 2 }
  0xfb   : > { %v873_v18 = vadd.f32 %v872_v17, %v871_v16 }
  0xfd   : > { %v874_v19 = vrot.slane %v873_v18, 1 }
  0xff   : > { %v875_v20 = vadd.f32 %v874_v19, %v873_v18 }
 0x101   : > { %v876_v21 = vmul.f32 %v875_v20, %v862_v6 }
 0x103   : > { %v877_v22 = vadd.f32 1e-05, %v876_v21 }
 0x105   : > { %1338 = vrsqrt.f32 %v877_v22  ;;  %vm884_vm3 = vweird.f32 %v877_v22 }
 0x10b   : > { %v1339_v23 = vpop.eup %1338 }
 0x10c   : > { %v879_v24 = vmul.f32 %v1339_v23, %v877_v22  ;;  %vm885_vm2 = vweird.f32 %v1339_v23 }
 0x10d   : > { %vm886_vm4 = vmor %vm884_vm3, %vm885_vm2 }
 0x10e   : > { %v880_v25 = vmul.f32 %v1339_v23, %v879_v24 }
 0x110   : > { %v881_v26 = vmul.f32 0.5, %v880_v25 }
 0x112   : > { %v882_v27 = vsub.f32 1.5, %v881_v26 }
 0x114   : > { %v883_v28 = vmul.f32 %v1339_v23, %v882_v27 }
 0x116   : > { %v887_v29 = vsel %vm886_vm4, %v1339_v23, %v883_v28 }
 0x117   : > { %v888_v30 = vmul.f32 %v887_v29, %v864_v9  ;;  %v889_v31 = vmul.f32 %v887_v29, %v865_v10 }
 0x119   : > { %vm890_vm5 = vcmp.ge.f32.partialorder %v888_v30, 0.0  ;;  %vm891_vm6 = vcmp.ge.f32.partialorder %v889_v31, 0.0  ;;  %v892_v32 = vmul.f32 0.2, %v888_v30  ;;  %v893_v33 = vmul.f32 0.2, %v889_v31 }
 0x11b   : > { %v894_v34 = vsel %vm890_vm5, %v888_v30, %v892_v32  ;;  %v895_v35 = vsel %vm891_vm6, %v889_v31, %v893_v33 }
 0x11c   : > { %896 = vst [vmem:[%s170_s28] sm:$0xff] %v894_v34 }
 0x11d   : > { %897 = vst [vmem:[%s170_s28 + $0x8] sm:$0x1] %v895_v35 }
 0x11e PF: > { %s13_s12 = sadd.s32 1, %s1346_s12  }
 0x11f   : > { %p10_p4 = scmp.ge.s32.totalorder %s13_s12, 4  }
 0x121   :  { %12 = sbr.rel (!%p10_p4) target bundleno = 1 (0x1), region = 62 }

// kernel: discriminator_forward.12
= control target key start
LH: loop header
LB: loop body
LE: loop exit
PB: predicated region body
PF: predicated region fallthrough
CT: control target
= control target key end

     0   :  { %s1281_s12 = smov 0   ;;  %s1503_s0 = inlined_call_operand.vmem [shape: bf16[2,4,1024], index: 0, kind: input, shape index: {}]   ;;  %s1504_s1 = inlined_call_operand.vmem [shape: bf16[1024,128], index: 1, kind: input, shape index: {}]   ;;  %s1505_s2 = inlined_call_operand.vmem [shape: f32[1,128], index: 2, kind: input, shape index: {}]   ;;  %s1506_s3 = inlined_call_operand.vmem [shape: f32[2,4,128], index: 3, kind: output, shape index: {}]  }
   0x1 LB: > { %s907_s13 = sadd.s32 4294967295, %s1258_s12   ;;  %p911_p0 = scmp.ge.s32.totalorder %s1258_s12, 1  ;;  %s1258_s12 = sphi %s1281_s12, %s13_s12  }
   0x2   : > { %p137_p1 = scmp.lt.s32.totalorder %s1258_s12, 3 }
   0x4   : > { %p138_p2 = pnand %p911_p0, %p137_p1 }
   0x5   : > { %p160_p3 = scmp.lt.s32.totalorder (!%p138_p2), %s907_s13, 1 }
   0x6   : > { %141 = sbr.rel (%p138_p2) target bundleno = 273 (0x111), region = 32 }
   0xb   : > { %v1181_v0 = vld [vmem:[%s1504_s1 + $0x38] sm:$0xff]  ;;  %v1180_v4 = vld [vmem:[%s1504_s1 + $0x30] sm:$0xff]  ;;  %s1508_s13 = smov (!%p160_p3, %s907_s13), 1  ;;  %v1179_v8 = vld [vmem:[%s1504_s1 + $0x28] sm:$0xff]  ;;  %vm812_vm0 = vcmask 1043456  }
   0xc   : > { %v1189_v1 = vld [vmem:[%s1504_s1 + $0x78] sm:$0xff]  ;;  %708 = vmatpush.bf16.msra.mxu0 %v1181_v0  ;;  %v1188_v5 = vld [vmem:[%s1504_s1 + $0x70] sm:$0xff]  ;;  %v1187_v9 = vld [vmem:[%s1504_s1 + $0x68] sm:$0xff]  ;;  %s1173_s11 = sshll.u32 %s1508_s13, 4  ;;  %s914_s24 = sshll.u32 %s1508_s13, 2 }
   0xd   : > { %v1197_v2 = vld [vmem:[%s1504_s1 + $0xb8] sm:$0xff]  ;;  %721 = vmatpush.bf16.msra.mxu1 %v1189_v1  ;;  %v1196_v6 = vld [vmem:[%s1504_s1 + $0xb0] sm:$0xff]  ;;  %v1195_v10 = vld [vmem:[%s1504_s1 + $0xa8] sm:$0xff]  ;;  %s1337_s20 = scalar_lea.vmem %s1503_s0, %s1173_s11  ;;  %s168_s27 = scalar_lea.vmem %s1506_s3, %s914_s24 }
   0xe   : > { %v1205_v3 = vld [vmem:[%s1504_s1 + $0xf8] sm:$0xff]  ;;  %734 = vmatpush.bf16.msra.mxu2 %v1197_v2  ;;  %v1204_v7 = vld [vmem:[%s1504_s1 + $0xf0] sm:$0xff]  ;;  %v1203_v11 = vld [vmem:[%s1504_s1 + $0xe8] sm:$0xff] }
   0xf   : > { %747 = vmatpush.bf16.msra.mxu3 %v1205_v3  ;;  %v1178_v12 = vld [vmem:[%s1504_s1 + $0x20] sm:$0xff]  ;;  %v1177_v17 = vld [vmem:[%s1504_s1 + $0x18] sm:$0xff]  ;;  %v1176_v21 = vld [vmem:[%s1504_s1 + $0x10] sm:$0xff] }
  0x10   : > { %709 = vmatpush.bf16.msra.mxu0 %v1180_v4  ;;  %v1186_v13 = vld [vmem:[%s1504_s1 + $0x60] sm:$0xff]  ;;  %v1185_v18 = vld [vmem:[%s1504_s1 + $0x58] sm:$0xff]  ;;  %v1184_v22 = vld [vmem:[%s1504_s1 + $0x50] sm:$0xff] }
  0x11   : > { %722 = vmatpush.bf16.msra.mxu1 %v1188_v5  ;;  %v1194_v14 = vld [vmem:[%s1504_s1 + $0xa0] sm:$0xff]  ;;  %v1193_v19 = vld [vmem:[%s1504_s1 + $0x98] sm:$0xff]  ;;  %v1192_v23 = vld [vmem:[%s1504_s1 + $0x90] sm:$0xff] }
  0x12   : > { %735 = vmatpush.bf16.msra.mxu2 %v1196_v6  ;;  %v1202_v15 = vld [vmem:[%s1504_s1 + $0xe0] sm:$0xff]  ;;  %v1201_v20 = vld [vmem:[%s1504_s1 + $0xd8] sm:$0xff]  ;;  %v1200_v24 = vld [vmem:[%s1504_s1 + $0xd0] sm:$0xff] }
  0x13   : > { %748 = vmatpush.bf16.msra.mxu3 %v1204_v7  ;;  %v169_v16 = vld [vmem:[%s1337_s20] sm:$0xff]  ;;  %v1175_v25 = vld [vmem:[%s1504_s1 + $0x8] sm:$0xff]  ;;  %v1213_v34 = vld [vmem:[%s1504_s1 + $0x138] sm:$0xff] }
  0x14   : > { %710 = vmatpush.bf16.msra.mxu0 %v1179_v8  ;;  %304 = vst [vmem:[#allocation1] ss:$4 sm:$0xff] %v169_v16  ;;  %v1183_v26 = vld [vmem:[%s1504_s1 + $0x48] sm:$0xff]  ;;  %v1174_v30 = vld [vmem:[%s1504_s1] sm:$0xff]  ;;  %v1221_v35 = vld [vmem:[%s1504_s1 + $0x178] sm:$0xff] }
  0x15   : > { %723 = vmatpush.bf16.msra.mxu1 %v1187_v9  ;;  %v1191_v27 = vld [vmem:[%s1504_s1 + $0x88] sm:$0xff]  ;;  %v1182_v31 = vld [vmem:[%s1504_s1 + $0x40] sm:$0xff]  ;;  %v1229_v36 = vld [vmem:[%s1504_s1 + $0x1b8] sm:$0xff] }
  0x16   : > { %736 = vmatpush.bf16.msra.mxu2 %v1195_v10  ;;  %v1199_v28 = vld [vmem:[%s1504_s1 + $0xc8] sm:$0xff]  ;;  %v1190_v32 = vld [vmem:[%s1504_s1 + $0x80] sm:$0xff]  ;;  %v1237_v37 = vld [vmem:[%s1504_s1 + $0x1f8] sm:$0xff] }
  0x17   : > { %749 = vmatpush.bf16.msra.mxu3 %v1203_v11  ;;  %v170_v29 = vld [vmem:[%s1337_s20 + $0x8] sm:$0xff]  ;;  %v1198_v33 = vld [vmem:[%s1504_s1 + $0xc0] sm:$0xff]  ;;  %v1212_v38 = vld [vmem:[%s1504_s1 + $0x130] sm:$0xff] }
  0x18   : > { %711 = vmatpush.bf16.msra.mxu0 %v1178_v12  ;;  %307 = vst [vmem:[#allocation1 + $0x20] ss:$4 sm:$0xff] %v170_v29  ;;  %v1220_v39 = vld [vmem:[%s1504_s1 + $0x170] sm:$0xff]  ;;  %v1211_v46 = vld [vmem:[%s1504_s1 + $0x128] sm:$0xff]  ;;  %v1210_v50 = vld [vmem:[%s1504_s1 + $0x120] sm:$0xff] }
  0x19   : > { %724 = vmatpush.bf16.msra.mxu1 %v1186_v13  ;;  %v1228_v44 = vld [vmem:[%s1504_s1 + $0x1b0] sm:$0xff]  ;;  %v1219_v47 = vld [vmem:[%s1504_s1 + $0x168] sm:$0xff]  ;;  %v1218_v51 = vld [vmem:[%s1504_s1 + $0x160] sm:$0xff] }
  0x1a   : > { %737 = vmatpush.bf16.msra.mxu2 %v1194_v14  ;;  %v1236_v45 = vld [vmem:[%s1504_s1 + $0x1f0] sm:$0xff]  ;;  %v1227_v48 = vld [vmem:[%s1504_s1 + $0x1a8] sm:$0xff]  ;;  %v1226_v52 = vld [vmem:[%s1504_s1 + $0x1a0] sm:$0xff] }
  0x1b   : > { %750 = vmatpush.bf16.msra.mxu3 %v1202_v15  ;;  %v310_v40 = vld.sshfl [vmem:[#allocation1 + $0x10] sm:$0xff pattern:$0x73625140]  ;;  %v308_v41 = vld.sshfl [vmem:[#allocation1] sm:$0xff pattern:$0x73625140] }
  0x1c   : > { %712 = vmatpush.bf16.msra.mxu0 %v1177_v17  ;;  %v311_v42 = vld.sshfl [vmem:[#allocation1 + $0x18] sm:$0xff pattern:$0x73625140]  ;;  %v309_v43 = vld.sshfl [vmem:[#allocation1 + $0x8] sm:$0xff pattern:$0x73625140] }
  0x1d   : > { %725 = vmatpush.bf16.msra.mxu1 %v1185_v18  ;;  %v1235_v49 = vld [vmem:[%s1504_s1 + $0x1e8] sm:$0xff]  ;;  %v1234_v53 = vld [vmem:[%s1504_s1 + $0x1e0] sm:$0xff]  ;;  %v1209_v54 = vld [vmem:[%s1504_s1 + $0x118] sm:$0xff] }
  0x1e   : > { %738 = vmatpush.bf16.msra.mxu2 %v1193_v19  ;;  %v1217_v55 = vld [vmem:[%s1504_s1 + $0x158] sm:$0xff]  ;;  %v1208_v58 = vld [vmem:[%s1504_s1 + $0x110] sm:$0xff]  ;;  %v1207_v62 = vld [vmem:[%s1504_s1 + $0x108] sm:$0xff] }
  0x1f   : > { %751 = vmatpush.bf16.msra.mxu3 %v1201_v20  ;;  %v1225_v56 = vld [vmem:[%s1504_s1 + $0x198] sm:$0xff]  ;;  %v1216_v59 = vld [vmem:[%s1504_s1 + $0x150] sm:$0xff]  ;;  %v1215_v63 = vld [vmem:[%s1504_s1 + $0x148] sm:$0xff] }
  0x20   : > { %713 = vmatpush.bf16.msra.mxu0 %v1176_v21  ;;  %v1233_v57 = vld [vmem:[%s1504_s1 + $0x1d8] sm:$0xff]  ;;  %v1224_v60 = vld [vmem:[%s1504_s1 + $0x190] sm:$0xff]  ;;  %v1223_v0 = vld [vmem:[%s1504_s1 + $0x188] sm:$0xff] }
  0x21   : > { %726 = vmatpush.bf16.msra.mxu1 %v1184_v22  ;;  %v1232_v61 = vld [vmem:[%s1504_s1 + $0x1d0] sm:$0xff]  ;;  %v1231_v1 = vld [vmem:[%s1504_s1 + $0x1c8] sm:$0xff]  ;;  %v1206_v2 = vld [vmem:[%s1504_s1 + $0x100] sm:$0xff]  ;;  %v1260_v22 = vmov 4.0  }
  0x22   : > { %739 = vmatpush.bf16.msra.mxu2 %v1192_v23  ;;  %v1214_v3 = vld [vmem:[%s1504_s1 + $0x140] sm:$0xff]  ;;  %v313_v7 = vld.sshfl [vmem:[#allocation1 + $0x28] sm:$0xff pattern:$0x73625140]  ;;  %1248 = vrcp.f32 %v1260_v22 }
  0x23   : > { %752 = vmatpush.bf16.msra.mxu3 %v1200_v24  ;;  %v1222_v4 = vld [vmem:[%s1504_s1 + $0x180] sm:$0xff]  ;;  %v314_v8 = vld.sshfl [vmem:[#allocation1 + $0x30] sm:$0xff pattern:$0x73625140] }
  0x24   : > { %714 = vmatpush.bf16.msra.mxu0 %v1175_v25  ;;  %v1230_v5 = vld [vmem:[%s1504_s1 + $0x1c0] sm:$0xff]  ;;  %v315_v9 = vld.sshfl [vmem:[#allocation1 + $0x38] sm:$0xff pattern:$0x73625140] }
  0x25   : > { %727 = vmatpush.bf16.msra.mxu1 %v1183_v26  ;;  %v312_v6 = vld.sshfl [vmem:[#allocation1 + $0x20] sm:$0xff pattern:$0x73625140] }
  0x26   : > { %740 = vmatpush.bf16.msra.mxu2 %v1191_v27  ;;  %v1247_v16 = vld [vmem:[%s1505_s2] ss:$0 sm:$0xff] }
  0x27   : > { %753 = vmatpush.bf16.msra.mxu3 %v1199_v28 }
  0x28   : > { %715 = vmatpush.bf16.msra.mxu0 %v1174_v30  ;;  %v1249_v27 = vpop.eup %1248 }
  0x29   : > { %728 = vmatpush.bf16.msra.mxu1 %v1182_v31  ;;  %v821_v29 = vmul.f32 4.0, %v1249_v27  ;;  %vm825_vm1 = vweird.f32 %v1249_v27 }
  0x2a   : > { %741 = vmatpush.bf16.msra.mxu2 %v1190_v32 }
  0x2b   : > { %754 = vmatpush.bf16.msra.mxu3 %v1198_v33  ;;  %716 = vmatmul.bf16.vlgmr.msra.gmra.mxu0 %v308_v41 }
  0x2c   : > { %760 = vmatpush.bf16.msrb.mxu0 %v1213_v34  ;;  %729 = vmatmul.bf16.vlgmr.msra.gmra.mxu1 %v309_v43 }
  0x2d   : > { %773 = vmatpush.bf16.msrb.mxu1 %v1221_v35  ;;  %742 = vmatmul.bf16.vlgmr.msra.gmra.mxu2 %v310_v40 }
  0x2e   : > { %786 = vmatpush.bf16.msrb.mxu2 %v1229_v36  ;;  %755 = vmatmul.bf16.vlgmr.msra.gmra.mxu3 %v311_v42  ;;  %v822_v36 = vsub.f32 1.0, %v821_v29 }
  0x2f   : > { %799 = vmatpush.bf16.msrb.mxu3 %v1237_v37 }
  0x30   : > { %761 = vmatpush.bf16.msrb.mxu0 %v1212_v38 }
  0x31   : > { %774 = vmatpush.bf16.msrb.mxu1 %v1220_v39  ;;  %v823_v39 = vmul.f32 %v1249_v27, %v822_v36 }
  0x32   : > { %787 = vmatpush.bf16.msrb.mxu2 %v1228_v44 }
  0x33   : > { %800 = vmatpush.bf16.msrb.mxu3 %v1236_v45  ;;  %v824_v44 = vadd.f32 %v1249_v27, %v823_v39 }
  0x34   : > { %762 = vmatpush.bf16.msrb.mxu0 %v1211_v46 }
  0x35   : > { %775 = vmatpush.bf16.msrb.mxu1 %v1219_v47  ;;  %v826_v47 = vsel %vm825_vm1, %v1249_v27, %v824_v44 }
  0x36   : > { %788 = vmatpush.bf16.msrb.mxu2 %v1227_v48 }
  0x37   : > { %801 = vmatpush.bf16.msrb.mxu3 %v1235_v49 }
  0x38   : > { %763 = vmatpush.bf16.msrb.mxu0 %v1210_v50 }
  0x39   : > { %776 = vmatpush.bf16.msrb.mxu1 %v1218_v51 }
  0x3a   : > { %789 = vmatpush.bf16.msrb.mxu2 %v1226_v52 }
  0x3b   : > { %802 = vmatpush.bf16.msrb.mxu3 %v1234_v53 }
  0x3c   : > { %764 = vmatpush.bf16.msrb.mxu0 %v1209_v54 }
  0x3d   : > { %777 = vmatpush.bf16.msrb.mxu1 %v1217_v55 }
  0x3e   : > { %790 = vmatpush.bf16.msrb.mxu2 %v1225_v56 }
  0x3f   : > { %803 = vmatpush.bf16.msrb.mxu3 %v1233_v57 }
  0x40   : > { %765 = vmatpush.bf16.msrb.mxu0 %v1208_v58 }
  0x41   : > { %778 = vmatpush.bf16.msrb.mxu1 %v1216_v59 }
  0x42   : > { %791 = vmatpush.bf16.msrb.mxu2 %v1224_v60 }
  0x43   : > { %804 = vmatpush.bf16.msrb.mxu3 %v1232_v61 }
  0x44   : > { %766 = vmatpush.bf16.msrb.mxu0 %v1207_v62 }
  0x45   : > { %779 = vmatpush.bf16.msrb.mxu1 %v1215_v63 }
  0x46   : > { %792 = vmatpush.bf16.msrb.mxu2 %v1223_v0 }
  0x47   : > { %805 = vmatpush.bf16.msrb.mxu3 %v1231_v1 }
  0x48   : > { %767 = vmatpush.bf16.msrb.mxu0 %v1206_v2 }
  0x49   : > { %780 = vmatpush.bf16.msrb.mxu1 %v1214_v3 }
  0x4a   : > { %793 = vmatpush.bf16.msrb.mxu2 %v1222_v4 }
  0x4b   : > { %806 = vmatpush.bf16.msrb.mxu3 %v1230_v5  ;;  %768 = vmatmul.bf16.vlgmr.msrb.gmra.mxu0 %v312_v6 }
  0x4c   : > { %781 = vmatmul.bf16.vlgmr.msrb.gmra.mxu1 %v313_v7 }
  0x4d   : > { %794 = vmatmul.bf16.vlgmr.msrb.gmra.mxu2 %v314_v8 }
  0x4e   : > { %807 = vmatmul.bf16.vlgmr.msrb.gmra.mxu3 %v315_v9 }
  0xa8   : > { %v717_v10 = vpop.f32.mrf.mxu0 }
  0xa9   : > { %v730_v11 = vpop.f32.mrf.mxu1  ;;  %v718_v19 = vadd.f32 %v1247_v16, %v717_v10 }
  0xab   : > { %v731_v20 = vadd.f32 %v730_v11, %v718_v19 }
  0xb0   : > { %v743_v12 = vpop.f32.mrf.mxu2  ;;  %v719_v14 = vpop.f32.mrf.mxu0 }
  0xb1   : > { %v756_v13 = vpop.f32.mrf.mxu3  ;;  %v732_v15 = vpop.f32.mrf.mxu1  ;;  %v744_v21 = vadd.f32 %v743_v12, %v731_v20 }
  0xb3   : > { %v757_v23 = vadd.f32 %v756_v13, %v744_v21 }
  0xb8   : > { %v745_v17 = vpop.f32.mrf.mxu2 }
  0xb9   : > { %v758_v18 = vpop.f32.mrf.mxu3 }
  0xc8   : > { %v769_v24 = vpop.f32.mrf.mxu0 }
  0xc9   : > { %v782_v25 = vpop.f32.mrf.mxu1  ;;  %v770_v26 = vadd.f32 %v769_v24, %v757_v23 }
  0xcb   : > { %v783_v28 = vadd.f32 %v782_v25, %v770_v26 }
  0xd0   : > { %v795_v30 = vpop.f32.mrf.mxu2  ;;  %v771_v33 = vpop.f32.mrf.mxu0 }
  0xd1   : > { %v808_v31 = vpop.f32.mrf.mxu3  ;;  %v796_v32 = vadd.f32 %v795_v30, %v783_v28  ;;  %v784_v34 = vpop.f32.mrf.mxu1 }
  0xd3   : > { %v809_v35 = vadd.f32 %v808_v31, %v796_v32 }
  0xd5   : > { %v813_v37 = vsel %vm812_vm0, %v809_v35, 0.0 }
  0xd6   : > { %v814_v38 = vrot.slane %v813_v37, 4 }
  0xd8   : > { %v815_v40 = vadd.f32 %v814_v38, %v813_v37  ;;  %v797_v41 = vpop.f32.mrf.mxu2 }
  0xd9   : > { %v810_v42 = vpop.f32.mrf.mxu3 }
  0xda   : > { %v816_v43 = vrot.slane %v815_v40, 2 }
  0xdc   : > { %v817_v45 = vadd.f32 %v816_v43, %v815_v40 }
  0xde   : > { %v818_v46 = vrot.slane %v817_v45, 1 }
  0xe0   : > { %v819_v48 = vadd.f32 %v818_v46, %v817_v45 }
  0xe2   : > { %v827_v49 = vmul.f32 %v826_v47, %v819_v48 }
  0xe4   : > { %v828_v50 = vsub.f32 %v809_v35, %v827_v49 }
  0xe6   : > { %v829_v51 = vmul.f32 %v828_v50, %v828_v50 }
  0xe8   : > { %v830_v52 = vsel %vm812_vm0, %v829_v51, 0.0 }
  0xe9   : > { %v831_v53 = vrot.slane %v830_v52, 4 }
  0xeb   : > { %v832_v54 = vadd.f32 %v831_v53, %v830_v52 }
  0xed   : > { %v833_v55 = vrot.slane %v832_v54, 2 }
  0xef   : > { %v834_v56 = vadd.f32 %v833_v55, %v832_v54 }
  0xf1   : > { %v835_v57 = vrot.slane %v834_v56, 1 }
  0xf3   : > { %v836_v58 = vadd.f32 %v835_v57, %v834_v56 }
  0xf5   : > { %v837_v59 = vmul.f32 %v836_v58, %v826_v47 }
  0xf7   : > { %v838_v60 = vadd.f32 1e-05, %v837_v59 }
  0xf9   : > { %1250 = vrsqrt.f32 %v838_v60  ;;  %vm845_vm3 = vweird.f32 %v838_v60 }
  0xff   : > { %v1251_v61 = vpop.eup %1250 }
 0x100   : > { %v840_v62 = vmul.f32 %v1251_v61, %v838_v60  ;;  %vm846_vm2 = vweird.f32 %v1251_v61 }
 0x101   : > { %vm847_vm4 = vmor %vm845_vm3, %vm846_vm2 }
 0x102   : > { %v841_v63 = vmul.f32 %v1251_v61, %v840_v62 }
 0x104   : > { %v842_v0 = vmul.f32 0.5, %v841_v63 }
 0x106   : > { %v843_v1 = vsub.f32 1.5, %v842_v0 }
 0x108   : > { %v844_v2 = vmul.f32 %v1251_v61, %v843_v1 }
 0x10a   : > { %v848_v3 = vsel %vm847_vm4, %v1251_v61, %v844_v2 }
 0x10b   : > { %v849_v4 = vmul.f32 %v848_v3, %v828_v50 }
 0x10d   : > { %vm850_vm5 = vcmp.ge.f32.partialorder %v849_v4, 0.0  ;;  %v851_v5 = vmul.f32 0.2, %v849_v4 }
 0x10f   : > { %v852_v6 = vsel %vm850_vm5, %v849_v4, %v851_v5 }
 0x110   : > { %853 = vst [vmem:[%s168_s27] sm:$0xf] %v852_v6 }
 0x111 PF: > { %s13_s12 = sadd.s32 1, %s1258_s12  }
 0x112   : > { %p10_p4 = scmp.ge.s32.totalorder %s13_s12, 4  }
 0x114   :  { %12 = sbr.rel (!%p10_p4) target bundleno = 1 (0x1), region = 63 }

// kernel: discriminator_forward.13
= control target key start
LH: loop header
LB: loop body
LE: loop exit
PB: predicated region body
PF: predicated region fallthrough
CT: control target
= control target key end

     0   :  { %s1236_s12 = smov 0   ;;  %s1452_s0 = inlined_call_operand.vmem [shape: bf16[2,1,1024], index: 0, kind: input, shape index: {}]   ;;  %s1453_s1 = inlined_call_operand.vmem [shape: bf16[1024,128], index: 1, kind: input, shape index: {}]   ;;  %s1454_s2 = inlined_call_operand.vmem [shape: f32[1,128], index: 2, kind: input, shape index: {}]   ;;  %s1455_s3 = inlined_call_operand.vmem [shape: f32[2,1,128], index: 3, kind: output, shape index: {}]  }
   0x1 LB: > { %s867_s13 = sadd.s32 4294967295, %s1214_s12   ;;  %p871_p0 = scmp.ge.s32.totalorder %s1214_s12, 1  ;;  %s1214_s12 = sphi %s1236_s12, %s13_s12  }
   0x2   : > { %p136_p1 = scmp.lt.s32.totalorder %s1214_s12, 3 }
   0x4   : > { %p137_p2 = pnand %p871_p0, %p136_p1 }
   0x5   : > { %p157_p3 = scmp.lt.s32.totalorder (!%p137_p2), %s867_s13, 1 }
   0x6   : > { %140 = sbr.rel (%p137_p2) target bundleno = 242 (0xf2), region = 32 }
   0xb   : > { %v1139_v0 = vld [vmem:[%s1453_s1 + $0x38] sm:$0xff]  ;;  %v1138_v4 = vld [vmem:[%s1453_s1 + $0x30] sm:$0xff]  ;;  %s1457_s13 = smov (!%p157_p3, %s867_s13), 1  ;;  %v1137_v8 = vld [vmem:[%s1453_s1 + $0x28] sm:$0xff] }
   0xc   : > { %v1147_v1 = vld [vmem:[%s1453_s1 + $0x78] sm:$0xff]  ;;  %696 = vmatpush.bf16.msra.mxu0 %v1139_v0  ;;  %v1146_v5 = vld [vmem:[%s1453_s1 + $0x70] sm:$0xff]  ;;  %v1145_v9 = vld [vmem:[%s1453_s1 + $0x68] sm:$0xff]  ;;  %s872_s11 = sshll.u32 %s1457_s13, 3  ;;  %s163_s25 = scalar_lea.vmem %s1455_s3, %s1457_s13 }
   0xd   : > { %v1155_v2 = vld [vmem:[%s1453_s1 + $0xb8] sm:$0xff]  ;;  %709 = vmatpush.bf16.msra.mxu1 %v1147_v1  ;;  %v1154_v6 = vld [vmem:[%s1453_s1 + $0xb0] sm:$0xff]  ;;  %v1153_v10 = vld [vmem:[%s1453_s1 + $0xa8] sm:$0xff]  ;;  %s160_s20 = scalar_lea.vmem %s1452_s0, %s872_s11 }
   0xe   : > { %v1163_v3 = vld [vmem:[%s1453_s1 + $0xf8] sm:$0xff]  ;;  %722 = vmatpush.bf16.msra.mxu2 %v1155_v2  ;;  %v1162_v7 = vld [vmem:[%s1453_s1 + $0xf0] sm:$0xff]  ;;  %v1161_v11 = vld [vmem:[%s1453_s1 + $0xe8] sm:$0xff] }
   0xf   : > { %735 = vmatpush.bf16.msra.mxu3 %v1163_v3  ;;  %v1136_v12 = vld [vmem:[%s1453_s1 + $0x20] sm:$0xff]  ;;  %v1135_v17 = vld [vmem:[%s1453_s1 + $0x18] sm:$0xff]  ;;  %v1134_v21 = vld [vmem:[%s1453_s1 + $0x10] sm:$0xff] }
  0x10   : > { %697 = vmatpush.bf16.msra.mxu0 %v1138_v4  ;;  %v1144_v13 = vld [vmem:[%s1453_s1 + $0x60] sm:$0xff]  ;;  %v1143_v18 = vld [vmem:[%s1453_s1 + $0x58] sm:$0xff]  ;;  %v1142_v22 = vld [vmem:[%s1453_s1 + $0x50] sm:$0xff] }
  0x11   : > { %710 = vmatpush.bf16.msra.mxu1 %v1146_v5  ;;  %v1152_v14 = vld [vmem:[%s1453_s1 + $0xa0] sm:$0xff]  ;;  %v1151_v19 = vld [vmem:[%s1453_s1 + $0x98] sm:$0xff]  ;;  %v1150_v23 = vld [vmem:[%s1453_s1 + $0x90] sm:$0xff] }
  0x12   : > { %723 = vmatpush.bf16.msra.mxu2 %v1154_v6  ;;  %v1160_v15 = vld [vmem:[%s1453_s1 + $0xe0] sm:$0xff]  ;;  %v1159_v20 = vld [vmem:[%s1453_s1 + $0xd8] sm:$0xff]  ;;  %v1158_v24 = vld [vmem:[%s1453_s1 + $0xd0] sm:$0xff] }
  0x13   : > { %736 = vmatpush.bf16.msra.mxu3 %v1162_v7  ;;  %v164_v16 = vld [vmem:[%s160_s20] sm:$0xff]  ;;  %v1133_v25 = vld [vmem:[%s1453_s1 + $0x8] sm:$0xff]  ;;  %v1171_v33 = vld [vmem:[%s1453_s1 + $0x138] sm:$0xff] }
  0x14   : > { %698 = vmatpush.bf16.msra.mxu0 %v1137_v8  ;;  %295 = vst [vmem:[#allocation1] ss:$9 sm:$0xff] %v164_v16  ;;  %v1141_v26 = vld [vmem:[%s1453_s1 + $0x48] sm:$0xff]  ;;  %v1132_v29 = vld [vmem:[%s1453_s1] sm:$0xff]  ;;  %v1179_v34 = vld [vmem:[%s1453_s1 + $0x178] sm:$0xff] }
  0x15   : > { %711 = vmatpush.bf16.msra.mxu1 %v1145_v9  ;;  %v1149_v27 = vld [vmem:[%s1453_s1 + $0x88] sm:$0xff]  ;;  %v1140_v30 = vld [vmem:[%s1453_s1 + $0x40] sm:$0xff]  ;;  %v1187_v35 = vld [vmem:[%s1453_s1 + $0x1b8] sm:$0xff] }
  0x16   : > { %724 = vmatpush.bf16.msra.mxu2 %v1153_v10  ;;  %v1157_v28 = vld [vmem:[%s1453_s1 + $0xc8] sm:$0xff]  ;;  %v1148_v31 = vld [vmem:[%s1453_s1 + $0x80] sm:$0xff]  ;;  %v1195_v36 = vld [vmem:[%s1453_s1 + $0x1f8] sm:$0xff] }
  0x17   : > { %737 = vmatpush.bf16.msra.mxu3 %v1161_v11  ;;  %v1156_v32 = vld [vmem:[%s1453_s1 + $0xc0] sm:$0xff]  ;;  %v1170_v37 = vld [vmem:[%s1453_s1 + $0x130] sm:$0xff]  ;;  %v1169_v45 = vld [vmem:[%s1453_s1 + $0x128] sm:$0xff] }
  0x18   : > { %699 = vmatpush.bf16.msra.mxu0 %v1136_v12  ;;  %v1178_v40 = vld [vmem:[%s1453_s1 + $0x170] sm:$0xff]  ;;  %v1177_v46 = vld [vmem:[%s1453_s1 + $0x168] sm:$0xff]  ;;  %v1168_v49 = vld [vmem:[%s1453_s1 + $0x120] sm:$0xff] }
  0x19   : > { %712 = vmatpush.bf16.msra.mxu1 %v1144_v13  ;;  %v1186_v43 = vld [vmem:[%s1453_s1 + $0x1b0] sm:$0xff]  ;;  %v1185_v47 = vld [vmem:[%s1453_s1 + $0x1a8] sm:$0xff]  ;;  %v1176_v50 = vld [vmem:[%s1453_s1 + $0x160] sm:$0xff] }
  0x1a   : > { %725 = vmatpush.bf16.msra.mxu2 %v1152_v14  ;;  %v1194_v44 = vld [vmem:[%s1453_s1 + $0x1f0] sm:$0xff]  ;;  %v1193_v48 = vld [vmem:[%s1453_s1 + $0x1e8] sm:$0xff]  ;;  %v1184_v51 = vld [vmem:[%s1453_s1 + $0x1a0] sm:$0xff] }
  0x1b   : > { %738 = vmatpush.bf16.msra.mxu3 %v1160_v15  ;;  %v298_v38 = vld [vmem:[#allocation1 + $0x12] sm:$0xff]  ;;  %v296_v39 = vld [vmem:[#allocation1] sm:$0xff]  ;;  %v297_v42 = vld [vmem:[#allocation1 + $0x9] sm:$0xff] }
  0x1c   : > { %700 = vmatpush.bf16.msra.mxu0 %v1135_v17  ;;  %v299_v41 = vld [vmem:[#allocation1 + $0x1b] sm:$0xff]  ;;  %v1166_v57 = vld [vmem:[%s1453_s1 + $0x110] sm:$0xff]  ;;  %v1165_v61 = vld [vmem:[%s1453_s1 + $0x108] sm:$0xff] }
  0x1d   : > { %713 = vmatpush.bf16.msra.mxu1 %v1143_v18  ;;  %v1192_v52 = vld [vmem:[%s1453_s1 + $0x1e0] sm:$0xff]  ;;  %v1167_v53 = vld [vmem:[%s1453_s1 + $0x118] sm:$0xff]  ;;  %v1174_v58 = vld [vmem:[%s1453_s1 + $0x150] sm:$0xff] }
  0x1e   : > { %726 = vmatpush.bf16.msra.mxu2 %v1151_v19  ;;  %v1175_v54 = vld [vmem:[%s1453_s1 + $0x158] sm:$0xff]  ;;  %v1182_v59 = vld [vmem:[%s1453_s1 + $0x190] sm:$0xff]  ;;  %v1173_v62 = vld [vmem:[%s1453_s1 + $0x148] sm:$0xff] }
  0x1f   : > { %739 = vmatpush.bf16.msra.mxu3 %v1159_v20  ;;  %v1183_v55 = vld [vmem:[%s1453_s1 + $0x198] sm:$0xff]  ;;  %v1190_v60 = vld [vmem:[%s1453_s1 + $0x1d0] sm:$0xff]  ;;  %v1181_v63 = vld [vmem:[%s1453_s1 + $0x188] sm:$0xff] }
  0x20   : > { %701 = vmatpush.bf16.msra.mxu0 %v1134_v21  ;;  %v1191_v56 = vld [vmem:[%s1453_s1 + $0x1d8] sm:$0xff]  ;;  %v1189_v0 = vld [vmem:[%s1453_s1 + $0x1c8] sm:$0xff]  ;;  %v1164_v1 = vld [vmem:[%s1453_s1 + $0x100] sm:$0xff] }
  0x21   : > { %714 = vmatpush.bf16.msra.mxu1 %v1142_v22  ;;  %v1172_v2 = vld [vmem:[%s1453_s1 + $0x140] sm:$0xff]  ;;  %v301_v6 = vld [vmem:[#allocation1 + $0x2d] sm:$0xff]  ;;  %v302_v7 = vld [vmem:[#allocation1 + $0x36] sm:$0xff] }
  0x22   : > { %727 = vmatpush.bf16.msra.mxu2 %v1150_v23  ;;  %v1180_v3 = vld [vmem:[%s1453_s1 + $0x180] sm:$0xff] }
  0x23   : > { %740 = vmatpush.bf16.msra.mxu3 %v1158_v24  ;;  %v1188_v4 = vld [vmem:[%s1453_s1 + $0x1c0] sm:$0xff] }
  0x24   : > { %702 = vmatpush.bf16.msra.mxu0 %v1133_v25  ;;  %v300_v5 = vld [vmem:[#allocation1 + $0x24] sm:$0xff]  ;;  %v293_v15 = vld [vmem:[%s1454_s2] sm:$0x1] }
  0x25   : > { %715 = vmatpush.bf16.msra.mxu1 %v1141_v26  ;;  %v303_v8 = vld [vmem:[#allocation1 + $0x3f] sm:$0xff] }
  0x26   : > { %728 = vmatpush.bf16.msra.mxu2 %v1149_v27 }
  0x27   : > { %741 = vmatpush.bf16.msra.mxu3 %v1157_v28 }
  0x28   : > { %703 = vmatpush.bf16.msra.mxu0 %v1132_v29 }
  0x29   : > { %716 = vmatpush.bf16.msra.mxu1 %v1140_v30 }
  0x2a   : > { %729 = vmatpush.bf16.msra.mxu2 %v1148_v31 }
  0x2b   : > { %742 = vmatpush.bf16.msra.mxu3 %v1156_v32  ;;  %704 = vmatmul.bf16.vlgmr.msra.gmra.mxu0 %v296_v39 }
  0x2c   : > { %748 = vmatpush.bf16.msrb.mxu0 %v1171_v33  ;;  %717 = vmatmul.bf16.vlgmr.msra.gmra.mxu1 %v297_v42 }
  0x2d   : > { %761 = vmatpush.bf16.msrb.mxu1 %v1179_v34  ;;  %730 = vmatmul.bf16.vlgmr.msra.gmra.mxu2 %v298_v38 }
  0x2e   : > { %774 = vmatpush.bf16.msrb.mxu2 %v1187_v35  ;;  %743 = vmatmul.bf16.vlgmr.msra.gmra.mxu3 %v299_v41 }
  0x2f   : > { %787 = vmatpush.bf16.msrb.mxu3 %v1195_v36 }
  0x30   : > { %749 = vmatpush.bf16.msrb.mxu0 %v1170_v37 }
  0x31   : > { %762 = vmatpush.bf16.msrb.mxu1 %v1178_v40 }
  0x32   : > { %775 = vmatpush.bf16.msrb.mxu2 %v1186_v43 }
  0x33   : > { %788 = vmatpush.bf16.msrb.mxu3 %v1194_v44 }
  0x34   : > { %750 = vmatpush.bf16.msrb.mxu0 %v1169_v45 }
  0x35   : > { %763 = vmatpush.bf16.msrb.mxu1 %v1177_v46 }
  0x36   : > { %776 = vmatpush.bf16.msrb.mxu2 %v1185_v47 }
  0x37   : > { %789 = vmatpush.bf16.msrb.mxu3 %v1193_v48 }
  0x38   : > { %751 = vmatpush.bf16.msrb.mxu0 %v1168_v49 }
  0x39   : > { %764 = vmatpush.bf16.msrb.mxu1 %v1176_v50 }
  0x3a   : > { %777 = vmatpush.bf16.msrb.mxu2 %v1184_v51 }
  0x3b   : > { %790 = vmatpush.bf16.msrb.mxu3 %v1192_v52 }
  0x3c   : > { %752 = vmatpush.bf16.msrb.mxu0 %v1167_v53 }
  0x3d   : > { %765 = vmatpush.bf16.msrb.mxu1 %v1175_v54 }
  0x3e   : > { %778 = vmatpush.bf16.msrb.mxu2 %v1183_v55 }
  0x3f   : > { %791 = vmatpush.bf16.msrb.mxu3 %v1191_v56 }
  0x40   : > { %753 = vmatpush.bf16.msrb.mxu0 %v1166_v57 }
  0x41   : > { %766 = vmatpush.bf16.msrb.mxu1 %v1174_v58 }
  0x42   : > { %779 = vmatpush.bf16.msrb.mxu2 %v1182_v59 }
  0x43   : > { %792 = vmatpush.bf16.msrb.mxu3 %v1190_v60 }
  0x44   : > { %754 = vmatpush.bf16.msrb.mxu0 %v1165_v61 }
  0x45   : > { %767 = vmatpush.bf16.msrb.mxu1 %v1173_v62 }
  0x46   : > { %780 = vmatpush.bf16.msrb.mxu2 %v1181_v63 }
  0x47   : > { %793 = vmatpush.bf16.msrb.mxu3 %v1189_v0 }
  0x48   : > { %755 = vmatpush.bf16.msrb.mxu0 %v1164_v1 }
  0x49   : > { %768 = vmatpush.bf16.msrb.mxu1 %v1172_v2 }
  0x4a   : > { %781 = vmatpush.bf16.msrb.mxu2 %v1180_v3 }
  0x4b   : > { %794 = vmatpush.bf16.msrb.mxu3 %v1188_v4  ;;  %756 = vmatmul.bf16.vlgmr.msrb.gmra.mxu0 %v300_v5 }
  0x4c   : > { %769 = vmatmul.bf16.vlgmr.msrb.gmra.mxu1 %v301_v6 }
  0x4d   : > { %782 = vmatmul.bf16.vlgmr.msrb.gmra.mxu2 %v302_v7 }
  0x4e   : > { %795 = vmatmul.bf16.vlgmr.msrb.gmra.mxu3 %v303_v8 }
  0xa8   : > { %v705_v9 = vpop.f32.mrf.mxu0 }
  0xa9   : > { %v718_v10 = vpop.f32.mrf.mxu1  ;;  %v706_v18 = vadd.f32 %v705_v9, %v293_v15 }
  0xab   : > { %v719_v19 = vadd.f32 %v718_v10, %v706_v18 }
  0xb0   : > { %v731_v11 = vpop.f32.mrf.mxu2  ;;  %v707_v13 = vpop.f32.mrf.mxu0 }
  0xb1   : > { %v744_v12 = vpop.f32.mrf.mxu3  ;;  %v720_v14 = vpop.f32.mrf.mxu1  ;;  %v732_v20 = vadd.f32 %v731_v11, %v719_v19 }
  0xb3   : > { %v745_v21 = vadd.f32 %v744_v12, %v732_v20 }
  0xb8   : > { %v733_v16 = vpop.f32.mrf.mxu2 }
  0xb9   : > { %v746_v17 = vpop.f32.mrf.mxu3 }
  0xc8   : > { %v757_v22 = vpop.f32.mrf.mxu0 }
  0xc9   : > { %v770_v23 = vpop.f32.mrf.mxu1  ;;  %v758_v24 = vadd.f32 %v757_v22, %v745_v21 }
  0xcb   : > { %v771_v25 = vadd.f32 %v770_v23, %v758_v24 }
  0xd0   : > { %v783_v26 = vpop.f32.mrf.mxu2  ;;  %v759_v29 = vpop.f32.mrf.mxu0 }
  0xd1   : > { %v796_v27 = vpop.f32.mrf.mxu3  ;;  %v784_v28 = vadd.f32 %v783_v26, %v771_v25  ;;  %v772_v30 = vpop.f32.mrf.mxu1 }
  0xd3   : > { %v797_v31 = vadd.f32 %v796_v27, %v784_v28 }
  0xd5   : > { %v1129_v32 = vmul.f32 -1.442695, %v797_v31 }
  0xd7   : > { %1204 = vpow2.f32 %v1129_v32 }
  0xd8   : > { %v785_v33 = vpop.f32.mrf.mxu2 }
  0xd9   : > { %v798_v34 = vpop.f32.mrf.mxu3 }
  0xdd   : > { %v1205_v35 = vpop.eup %1204 }
  0xde   : > { %v803_v36 = vadd.f32 1.0, %v1205_v35 }
  0xe0   : > { %1206 = vrcp.f32 %v803_v36  ;;  %v815_v40 = vand.u32 2147483648, %v803_v36  ;;  %v813_v42 = vand.u32 2147483647, %v803_v36  ;;  %vm809_vm1 = vweird.f32 %v803_v36 }
  0xe2   : > { %v816_v44 = vor.u32 1.1754944e-38, %v815_v40  ;;  %vm814_vm3 = vcmp.eq.f32.partialorder %v813_v42, 8.507059e+37 }
  0xe6   : > { %v1207_v37 = vpop.eup %1206 }
  0xe7   : > { %v805_v38 = vmul.f32 %v1207_v37, %v803_v36  ;;  %vm810_vm0 = vweird.f32 %v1207_v37 }
  0xe8   : > { %vm811_vm2 = vmor %vm809_vm1, %vm810_vm0 }
  0xe9   : > { %v806_v39 = vsub.f32 1.0, %v805_v38 }
  0xeb   : > { %v807_v41 = vmul.f32 %v1207_v37, %v806_v39 }
  0xed   : > { %v808_v43 = vadd.f32 %v1207_v37, %v807_v41 }
  0xef   : > { %v812_v45 = vsel %vm811_vm2, %v1207_v37, %v808_v43 }
  0xf0   : > { %v817_v46 = vsel %vm814_vm3, %v816_v44, %v812_v45 }
  0xf1   : > { %819 = vst [vmem:[%s163_s25] sm:$0x1] %v817_v46 }
  0xf2 PF: > { %s13_s12 = sadd.s32 1, %s1214_s12  }
  0xf3   : > { %p10_p4 = scmp.ge.s32.totalorder %s13_s12, 4  }
  0xf5   :  { %12 = sbr.rel (!%p10_p4) target bundleno = 1 (0x1), region = 62 }

</bundles_post_ra>
